<compile_context>
chip_gen: v6e
topology: v6e:2x2x1
jax: 0.10.0
libtpu: 0.0.40
codegen_flags: <defaults>
</compile_context>

<pallas_src>
import functools

import jax
import jax.numpy as jnp
from jax import lax
from jax.experimental import pallas as pl
from jax.experimental.pallas import tpu as pltpu

LANE = 128


def _round_up(x, m):
    return (x + m - 1) // m * m


def _residual_block_kernel(x_ref, w1_ref, s1_ref, b1_ref, w2_ref, s2_ref, b2_ref,
                           o_ref, pad_ref, *, H, W, Wp, C):
    """One batch element per grid step.

    x_ref : (1, H, W, C)   f32 input tile (NHWC, C padded to a 128 multiple)
    w1/w2 : (9*C, C)       bf16 conv weights, im2col-packed (tap-major, HWIO)
    s*/b* : (1, C)         f32 folded BN scale / shift
    o_ref : (1, H, W, C)   f32 output tile
    pad_ref: (H+2, Wp, C)  f32 zero-halo padded activation scratch (Wp = 8-aligned)
    """
    # ---- halo-only zero init (interior is always overwritten below) --------
    pad_ref[0:1, :, :] = jnp.zeros((1, Wp, C), jnp.float32)
    pad_ref[H + 1:H + 2, :, :] = jnp.zeros((1, Wp, C), jnp.float32)
    pad_ref[:, 0:1, :] = jnp.zeros((H + 2, 1, C), jnp.float32)
    pad_ref[:, W + 1:Wp, :] = jnp.zeros((H + 2, Wp - W - 1, C), jnp.float32)

    def conv3x3(w_ref):
        # 3 accumulating dots, one per kernel row ky.  LHS is a per-ky
        # mini-col (H*W, 3*C) in bf16 (value-level concat of the 3 tap
        # slices), so K = 3*C >= 256 for full MXU depth on v6e/v7x.
        out = None
        for ky in range(3):
            taps = []
            for kx in range(3):
                t = pad_ref[ky:ky + H, kx:kx + W, :]            # (H, W, C) f32
                # leading-dim merge (W % 8 == 0, C % 128 == 0) is layout-trivial
                taps.append(t.reshape(H * W, C).astype(jnp.bfloat16))
            cols = jnp.concatenate(taps, axis=1)                # (H*W, 3*C) bf16
            wk = w_ref[ky * 3 * C:(ky + 1) * 3 * C, :]          # (3*C, C) bf16
            d = jnp.dot(cols, wk, preferred_element_type=jnp.float32)
            out = d if out is None else out + d
        return out                                              # (H*W, C) f32

    # ---- conv1 -> bn1 -> relu ----------------------------------------------
    pad_ref[1:H + 1, 1:W + 1, :] = x_ref[0]
    h = conv3x3(w1_ref)
    h = jnp.maximum(h * s1_ref[...] + b1_ref[...], 0.0)

    # ---- conv2 -> bn2 (reuse pad scratch) -----------------------------------
    pad_ref[1:H + 1, 1:W + 1, :] = h.reshape(H, W, C)
    out = conv3x3(w2_ref)
    out = out * s2_ref[...] + b2_ref[...]

    # ---- residual add + relu (f32) ------------------------------------------
    out = out.reshape(H, W, C) + x_ref[0]
    o_ref[0] = jnp.maximum(out, 0.0).astype(o_ref.dtype)


def residual_block_pallas(x_nchw, w1, s1, b1, w2, s2, b2):
    """x_nchw: (N, Cin, H, W) f32.  w1/w2: HWIO (3,3,Cin,Cout).  s/b: (C,).

    Returns (N, Cout, H, W) f32.
    """
    N, Cin, H, W = x_nchw.shape
    Cout = w1.shape[-1]
    assert Cin == Cout, "stride=1 / no downsample requires inplanes == planes"
    assert W % 8 == 0, "W must be a sublane multiple for layout-trivial reshapes"

    Cp = _round_up(Cin, LANE)          # lane-dense channel count
    Wp = _round_up(W + 2, 8)           # sublane-aligned padded row pitch

    # NCHW -> NHWC at the boundary (PyTorch layout), pad channels to 128, keep f32
    # (identity branch + BN math stay f32; matmul operands go bf16 in-kernel).
    x_nhwc = jnp.transpose(x_nchw, (0, 2, 3, 1)).astype(jnp.float32)
    x_p = jnp.pad(x_nhwc, ((0, 0), (0, 0), (0, 0), (0, Cp - Cin)))

    def pack_w(w):   # HWIO -> zero-pad channels -> (9*Cp, Cp) bf16, tap-major
        w = jnp.pad(w, ((0, 0), (0, 0), (0, Cp - w.shape[2]), (0, Cp - w.shape[3])))
        return w.reshape(9 * Cp, Cp).astype(jnp.bfloat16)

    def pack_v(v):   # per-channel vector -> (1, Cp) f32, zeros in the pad
        return jnp.pad(v, (0, Cp - v.shape[0])).reshape(1, Cp).astype(jnp.float32)

    w1m, w2m = pack_w(w1), pack_w(w2)
    s1m, b1m = pack_v(s1), pack_v(b1)
    s2m, b2m = pack_v(s2), pack_v(b2)

    kernel = functools.partial(_residual_block_kernel, H=H, W=W, Wp=Wp, C=Cp)

    def build_and_call(single_buffer_consts):
        if single_buffer_consts:
            # Constant-index inputs: no need for double buffering.
            const = lambda shape: pl.BlockSpec(shape, lambda n: (0, 0),
                                               pipeline_mode=pl.Buffered(1))
        else:
            const = lambda shape: pl.BlockSpec(shape, lambda n: (0, 0))

        return pl.pallas_call(
            kernel,
            out_shape=jax.ShapeDtypeStruct((N, H, W, Cp), jnp.float32),
            grid_spec=pltpu.PrefetchScalarGridSpec(
                num_scalar_prefetch=0,
                grid=(N,),
                in_specs=[
                    pl.BlockSpec((1, H, W, Cp), lambda n: (n, 0, 0, 0)),
                    const((9 * Cp, Cp)),   # w1 (im2col-packed, bf16)
                    const((1, Cp)),        # s1
                    const((1, Cp)),        # b1
                    const((9 * Cp, Cp)),   # w2
                    const((1, Cp)),        # s2
                    const((1, Cp)),        # b2
                ],
                out_specs=pl.BlockSpec((1, H, W, Cp), lambda n: (n, 0, 0, 0)),
                scratch_shapes=[
                    pltpu.VMEM((H + 2, Wp, Cp), jnp.float32),   # padded activation
                ],
            ),
            compiler_params=pltpu.CompilerParams(
                dimension_semantics=("parallel",),
                vmem_limit_bytes=32 * 1024 * 1024,
            ),
        )(x_p, w1m, s1m, b1m, w2m, s2m, b2m)

    try:
        out_p = build_and_call(True)
    except Exception:
        # Older/newer Pallas versions may reject Buffered(1) on pipelined
        # inputs; fall back to default (double-buffered) constant specs.
        out_p = build_and_call(False)

    out = out_p[..., :Cout]                       # drop channel padding
    return jnp.transpose(out, (0, 3, 1, 2))       # back to NCHW


# ------------------------- pure-JAX reference ------------------------------
def residual_block_ref(x_nchw, w1, s1, b1, w2, s2, b2):
    # Mirrors the kernel's numerics: bf16 conv operands, f32 accumulation,
    # f32 BN / residual / ReLU.
    def conv(x, w_hwio):
        w_oihw = jnp.transpose(w_hwio, (3, 2, 0, 1)).astype(jnp.bfloat16)
        return lax.conv_general_dilated(
            x.astype(jnp.bfloat16), w_oihw, window_strides=(1, 1),
            padding=((1, 1), (1, 1)),
            dimension_numbers=("NCHW", "OIHW", "NCHW"),
            preferred_element_type=jnp.float32)

    h = conv(x_nchw, w1) * s1[None, :, None, None] + b1[None, :, None, None]
    h = jnp.maximum(h, 0.0)
    o = conv(h, w2) * s2[None, :, None, None] + b2[None, :, None, None]
    o = o + x_nchw
    return jnp.maximum(o, 0.0)


if __name__ == "__main__":
    N, C, H, W = 2, 4, 16, 16          # inplanes == planes == 4, stride 1
    eps = 1e-5

    key = jax.random.PRNGKey(0)
    kx, kw1, kw2, kg1, kb1, km1, kv1, kg2, kb2, km2, kv2 = jax.random.split(key, 11)

    x = jax.random.normal(kx, (N, C, H, W), jnp.float32)

    # conv weights, HWIO layout
    w1 = jax.random.normal(kw1, (3, 3, C, C), jnp.float32) * 0.1
    w2 = jax.random.normal(kw2, (3, 3, C, C), jnp.float32) * 0.1

    # BatchNorm params (eval mode) folded into per-channel scale/shift.
    def fold_bn(kg, kb, km, kv):
        gamma = 1.0 + 0.1 * jax.random.normal(kg, (C,), jnp.float32)
        beta = 0.1 * jax.random.normal(kb, (C,), jnp.float32)
        mean = 0.1 * jax.random.normal(km, (C,), jnp.float32)
        var = jnp.abs(jax.random.normal(kv, (C,), jnp.float32)) + 0.5
        scale = gamma / jnp.sqrt(var + eps)
        shift = beta - mean * scale
        return scale, shift

    s1, b1 = fold_bn(kg1, kb1, km1, kv1)
    s2, b2 = fold_bn(kg2, kb2, km2, kv2)

    out = residual_block_pallas(x, w1, s1, b1, w2, s2, b2)
    out = jax.block_until_ready(out)

    ref = residual_block_ref(x, w1, s1, b1, w2, s2, b2)
    assert out.shape == (N, C, H, W)
    # bf16 matmul operands (f32 accumulation) on both sides -> tight tolerance.
    assert jnp.allclose(out, ref, atol=2e-3, rtol=2e-3), "mismatch vs reference"

    print("KERNEL_OK")
</pallas_src>

<mosaic_0001>
module attributes {stable_mosaic.version = 11 : i64} {
  func.func @_residual_block_kernel(%arg0: i32, %arg1: memref<1x16x16x128xf32, #tpu.memory_space<vmem>>, %arg2: memref<1152x128xbf16, #tpu.memory_space<vmem>>, %arg3: memref<1x128xf32, #tpu.memory_space<vmem>>, %arg4: memref<1x128xf32, #tpu.memory_space<vmem>>, %arg5: memref<1152x128xbf16, #tpu.memory_space<vmem>>, %arg6: memref<1x128xf32, #tpu.memory_space<vmem>>, %arg7: memref<1x128xf32, #tpu.memory_space<vmem>>, %arg8: memref<1x16x16x128xf32, #tpu.memory_space<vmem>>, %arg9: memref<18x24x128xf32, #tpu.memory_space<vmem>>) attributes {dimension_semantics = [#tpu.dimension_semantics<parallel>], iteration_bounds = array<i64: 2>, scalar_prefetch = 0 : i64, scratch_operands = 1 : i64, tpu.core_type = #tpu.core_type<tc>, window_params = [{transform_indices = @transform_0, window_bounds = array<i64: 1, 16, 16, 128>}, {pipeline_mode = #tpu.pipeline_mode<synchronous>, transform_indices = @transform_1, window_bounds = array<i64: 1152, 128>}, {pipeline_mode = #tpu.pipeline_mode<synchronous>, transform_indices = @transform_2, window_bounds = array<i64: 1, 128>}, {pipeline_mode = #tpu.pipeline_mode<synchronous>, transform_indices = @transform_3, window_bounds = array<i64: 1, 128>}, {pipeline_mode = #tpu.pipeline_mode<synchronous>, transform_indices = @transform_4, window_bounds = array<i64: 1152, 128>}, {pipeline_mode = #tpu.pipeline_mode<synchronous>, transform_indices = @transform_5, window_bounds = array<i64: 1, 128>}, {pipeline_mode = #tpu.pipeline_mode<synchronous>, transform_indices = @transform_6, window_bounds = array<i64: 1, 128>}, {transform_indices = @transform_7, window_bounds = array<i64: 1, 16, 16, 128>}]} {
    %cst = arith.constant 0.000000e+00 : f32
    %0 = vector.broadcast %cst : f32 to vector<1x24x128xf32>
    %c0 = arith.constant 0 : index
    %c0_0 = arith.constant 0 : index
    %c0_1 = arith.constant 0 : index
    %1 = vector.load %arg9[%c0, %c0_0, %c0_1] : memref<18x24x128xf32, #tpu.memory_space<vmem>>, vector<1x24x128xf32>
    tpu.vector_store %arg9[%c0, %c0_0, %c0_1], %0 {strides = array<i32>} : memref<18x24x128xf32, #tpu.memory_space<vmem>>, vector<1x24x128xf32>,
    %cst_2 = arith.constant 0.000000e+00 : f32
    %2 = vector.broadcast %cst_2 : f32 to vector<1x24x128xf32>
    %c17 = arith.constant 17 : index
    %c0_3 = arith.constant 0 : index
    %c0_4 = arith.constant 0 : index
    %3 = vector.load %arg9[%c17, %c0_3, %c0_4] : memref<18x24x128xf32, #tpu.memory_space<vmem>>, vector<1x24x128xf32>
    tpu.vector_store %arg9[%c17, %c0_3, %c0_4], %2 {strides = array<i32>} : memref<18x24x128xf32, #tpu.memory_space<vmem>>, vector<1x24x128xf32>,
    %cst_5 = arith.constant 0.000000e+00 : f32
    %4 = vector.broadcast %cst_5 : f32 to vector<18x1x128xf32>
    %c0_6 = arith.constant 0 : index
    %c0_7 = arith.constant 0 : index
    %c0_8 = arith.constant 0 : index
    %5 = vector.load %arg9[%c0_6, %c0_7, %c0_8] : memref<18x24x128xf32, #tpu.memory_space<vmem>>, vector<18x1x128xf32>
    tpu.vector_store %arg9[%c0_6, %c0_7, %c0_8], %4 {strides = array<i32>} : memref<18x24x128xf32, #tpu.memory_space<vmem>>, vector<18x1x128xf32>,
    %cst_9 = arith.constant 0.000000e+00 : f32
    %6 = vector.broadcast %cst_9 : f32 to vector<18x7x128xf32>
    %c0_10 = arith.constant 0 : index
    %c17_11 = arith.constant 17 : index
    %c0_12 = arith.constant 0 : index
    %7 = vector.load %arg9[%c0_10, %c17_11, %c0_12] : memref<18x24x128xf32, #tpu.memory_space<vmem>>, vector<18x7x128xf32>
    tpu.vector_store %arg9[%c0_10, %c17_11, %c0_12], %6 {strides = array<i32>} : memref<18x24x128xf32, #tpu.memory_space<vmem>>, vector<18x7x128xf32>,
    %c0_13 = arith.constant 0 : index
    %c0_14 = arith.constant 0 : index
    %c0_15 = arith.constant 0 : index
    %c0_16 = arith.constant 0 : index
    %8 = vector.load %arg1[%c0_13, %c0_14, %c0_15, %c0_16] : memref<1x16x16x128xf32, #tpu.memory_space<vmem>>, vector<1x16x16x128xf32>
    %9 = vector.shape_cast %8 : vector<1x16x16x128xf32> to vector<16x16x128xf32>
    %c1 = arith.constant 1 : index
    %c1_17 = arith.constant 1 : index
    %c0_18 = arith.constant 0 : index
    %10 = vector.load %arg9[%c1, %c1_17, %c0_18] : memref<18x24x128xf32, #tpu.memory_space<vmem>>, vector<16x16x128xf32>
    tpu.vector_store %arg9[%c1, %c1_17, %c0_18], %9 {strides = array<i32>} : memref<18x24x128xf32, #tpu.memory_space<vmem>>, vector<16x16x128xf32>,
    %c0_19 = arith.constant 0 : index
    %c0_20 = arith.constant 0 : index
    %c0_21 = arith.constant 0 : index
    %11 = vector.load %arg9[%c0_19, %c0_20, %c0_21] : memref<18x24x128xf32, #tpu.memory_space<vmem>>, vector<16x16x128xf32>
    %12 = vector.shape_cast %11 : vector<16x16x128xf32> to vector<256x128xf32>
    %13 = arith.truncf %12 : vector<256x128xf32> to vector<256x128xbf16>
    %c0_22 = arith.constant 0 : index
    %c1_23 = arith.constant 1 : index
    %c0_24 = arith.constant 0 : index
    %14 = vector.load %arg9[%c0_22, %c1_23, %c0_24] : memref<18x24x128xf32, #tpu.memory_space<vmem>>, vector<16x16x128xf32>
    %15 = vector.shape_cast %14 : vector<16x16x128xf32> to vector<256x128xf32>
    %16 = arith.truncf %15 : vector<256x128xf32> to vector<256x128xbf16>
    %c0_25 = arith.constant 0 : index
    %c2 = arith.constant 2 : index
    %c0_26 = arith.constant 0 : index
    %17 = vector.load %arg9[%c0_25, %c2, %c0_26] : memref<18x24x128xf32, #tpu.memory_space<vmem>>, vector<16x16x128xf32>
    %18 = vector.shape_cast %17 : vector<16x16x128xf32> to vector<256x128xf32>
    %19 = arith.truncf %18 : vector<256x128xf32> to vector<256x128xbf16>
    %20 = tpu.concatenate %13, %16, %19 in 1 : vector<256x128xbf16>, vector<256x128xbf16>, vector<256x128xbf16> -> vector<256x384xbf16>
    %c0_27 = arith.constant 0 : index
    %c0_28 = arith.constant 0 : index
    %21 = vector.load %arg2[%c0_27, %c0_28] : memref<1152x128xbf16, #tpu.memory_space<vmem>>, vector<384x128xbf16>
    %cst_29 = arith.constant dense<0.000000e+00> : vector<256x128xf32>
    %22 = tpu.matmul %20, %21, %cst_29 {dimension_numbers = #tpu.dot_dimension_numbers<[1], [0], [0], [1], [0, 0, 1, 1], [], []>} : vector<256x384xbf16>, vector<384x128xbf16>, vector<256x128xf32> -> vector<256x128xf32>
    %c1_30 = arith.constant 1 : index
    %c0_31 = arith.constant 0 : index
    %c0_32 = arith.constant 0 : index
    %23 = vector.load %arg9[%c1_30, %c0_31, %c0_32] : memref<18x24x128xf32, #tpu.memory_space<vmem>>, vector<16x16x128xf32>
    %24 = vector.shape_cast %23 : vector<16x16x128xf32> to vector<256x128xf32>
    %25 = arith.truncf %24 : vector<256x128xf32> to vector<256x128xbf16>
    %c1_33 = arith.constant 1 : index
    %c1_34 = arith.constant 1 : index
    %c0_35 = arith.constant 0 : index
    %26 = vector.load %arg9[%c1_33, %c1_34, %c0_35] : memref<18x24x128xf32, #tpu.memory_space<vmem>>, vector<16x16x128xf32>
    %27 = vector.shape_cast %26 : vector<16x16x128xf32> to vector<256x128xf32>
    %28 = arith.truncf %27 : vector<256x128xf32> to vector<256x128xbf16>
    %c1_36 = arith.constant 1 : index
    %c2_37 = arith.constant 2 : index
    %c0_38 = arith.constant 0 : index
    %29 = vector.load %arg9[%c1_36, %c2_37, %c0_38] : memref<18x24x128xf32, #tpu.memory_space<vmem>>, vector<16x16x128xf32>
    %30 = vector.shape_cast %29 : vector<16x16x128xf32> to vector<256x128xf32>
    %31 = arith.truncf %30 : vector<256x128xf32> to vector<256x128xbf16>
    %32 = tpu.concatenate %25, %28, %31 in 1 : vector<256x128xbf16>, vector<256x128xbf16>, vector<256x128xbf16> -> vector<256x384xbf16>
    %c384 = arith.constant 384 : index
    %c0_39 = arith.constant 0 : index
    %33 = vector.load %arg2[%c384, %c0_39] : memref<1152x128xbf16, #tpu.memory_space<vmem>>, vector<384x128xbf16>
    %cst_40 = arith.constant dense<0.000000e+00> : vector<256x128xf32>
    %34 = tpu.matmul %32, %33, %cst_40 {dimension_numbers = #tpu.dot_dimension_numbers<[1], [0], [0], [1], [0, 0, 1, 1], [], []>} : vector<256x384xbf16>, vector<384x128xbf16>, vector<256x128xf32> -> vector<256x128xf32>
    %35 = arith.addf %22, %34 : vector<256x128xf32>
    %c2_41 = arith.constant 2 : index
    %c0_42 = arith.constant 0 : index
    %c0_43 = arith.constant 0 : index
    %36 = vector.load %arg9[%c2_41, %c0_42, %c0_43] : memref<18x24x128xf32, #tpu.memory_space<vmem>>, vector<16x16x128xf32>
    %37 = vector.shape_cast %36 : vector<16x16x128xf32> to vector<256x128xf32>
    %38 = arith.truncf %37 : vector<256x128xf32> to vector<256x128xbf16>
    %c2_44 = arith.constant 2 : index
    %c1_45 = arith.constant 1 : index
    %c0_46 = arith.constant 0 : index
    %39 = vector.load %arg9[%c2_44, %c1_45, %c0_46] : memref<18x24x128xf32, #tpu.memory_space<vmem>>, vector<16x16x128xf32>
    %40 = vector.shape_cast %39 : vector<16x16x128xf32> to vector<256x128xf32>
    %41 = arith.truncf %40 : vector<256x128xf32> to vector<256x128xbf16>
    %c2_47 = arith.constant 2 : index
    %c2_48 = arith.constant 2 : index
    %c0_49 = arith.constant 0 : index
    %42 = vector.load %arg9[%c2_47, %c2_48, %c0_49] : memref<18x24x128xf32, #tpu.memory_space<vmem>>, vector<16x16x128xf32>
    %43 = vector.shape_cast %42 : vector<16x16x128xf32> to vector<256x128xf32>
    %44 = arith.truncf %43 : vector<256x128xf32> to vector<256x128xbf16>
    %45 = tpu.concatenate %38, %41, %44 in 1 : vector<256x128xbf16>, vector<256x128xbf16>, vector<256x128xbf16> -> vector<256x384xbf16>
    %c768 = arith.constant 768 : index
    %c0_50 = arith.constant 0 : index
    %46 = vector.load %arg2[%c768, %c0_50] : memref<1152x128xbf16, #tpu.memory_space<vmem>>, vector<384x128xbf16>
    %cst_51 = arith.constant dense<0.000000e+00> : vector<256x128xf32>
    %47 = tpu.matmul %45, %46, %cst_51 {dimension_numbers = #tpu.dot_dimension_numbers<[1], [0], [0], [1], [0, 0, 1, 1], [], []>} : vector<256x384xbf16>, vector<384x128xbf16>, vector<256x128xf32> -> vector<256x128xf32>
    %48 = arith.addf %35, %47 : vector<256x128xf32>
    %c0_52 = arith.constant 0 : index
    %c0_53 = arith.constant 0 : index
    %49 = vector.load %arg3[%c0_52, %c0_53] : memref<1x128xf32, #tpu.memory_space<vmem>>, vector<1x128xf32>
    %50 = vector.broadcast %49 : vector<1x128xf32> to vector<256x128xf32>
    %51 = arith.mulf %48, %50 : vector<256x128xf32>
    %c0_54 = arith.constant 0 : index
    %c0_55 = arith.constant 0 : index
    %52 = vector.load %arg4[%c0_54, %c0_55] : memref<1x128xf32, #tpu.memory_space<vmem>>, vector<1x128xf32>
    %53 = vector.broadcast %52 : vector<1x128xf32> to vector<256x128xf32>
    %54 = arith.addf %51, %53 : vector<256x128xf32>
    %cst_56 = arith.constant 0.000000e+00 : f32
    %55 = vector.broadcast %cst_56 : f32 to vector<256x128xf32>
    %56 = arith.maximumf %54, %55 : vector<256x128xf32>
    %57 = vector.shape_cast %56 : vector<256x128xf32> to vector<16x16x128xf32>
    %c1_57 = arith.constant 1 : index
    %c1_58 = arith.constant 1 : index
    %c0_59 = arith.constant 0 : index
    %58 = vector.load %arg9[%c1_57, %c1_58, %c0_59] : memref<18x24x128xf32, #tpu.memory_space<vmem>>, vector<16x16x128xf32>
    tpu.vector_store %arg9[%c1_57, %c1_58, %c0_59], %57 {strides = array<i32>} : memref<18x24x128xf32, #tpu.memory_space<vmem>>, vector<16x16x128xf32>,
    %c0_60 = arith.constant 0 : index
    %c0_61 = arith.constant 0 : index
    %c0_62 = arith.constant 0 : index
    %59 = vector.load %arg9[%c0_60, %c0_61, %c0_62] : memref<18x24x128xf32, #tpu.memory_space<vmem>>, vector<16x16x128xf32>
    %60 = vector.shape_cast %59 : vector<16x16x128xf32> to vector<256x128xf32>
    %61 = arith.truncf %60 : vector<256x128xf32> to vector<256x128xbf16>
    %c0_63 = arith.constant 0 : index
    %c1_64 = arith.constant 1 : index
    %c0_65 = arith.constant 0 : index
    %62 = vector.load %arg9[%c0_63, %c1_64, %c0_65] : memref<18x24x128xf32, #tpu.memory_space<vmem>>, vector<16x16x128xf32>
    %63 = vector.shape_cast %62 : vector<16x16x128xf32> to vector<256x128xf32>
    %64 = arith.truncf %63 : vector<256x128xf32> to vector<256x128xbf16>
    %c0_66 = arith.constant 0 : index
    %c2_67 = arith.constant 2 : index
    %c0_68 = arith.constant 0 : index
    %65 = vector.load %arg9[%c0_66, %c2_67, %c0_68] : memref<18x24x128xf32, #tpu.memory_space<vmem>>, vector<16x16x128xf32>
    %66 = vector.shape_cast %65 : vector<16x16x128xf32> to vector<256x128xf32>
    %67 = arith.truncf %66 : vector<256x128xf32> to vector<256x128xbf16>
    %68 = tpu.concatenate %61, %64, %67 in 1 : vector<256x128xbf16>, vector<256x128xbf16>, vector<256x128xbf16> -> vector<256x384xbf16>
    %c0_69 = arith.constant 0 : index
    %c0_70 = arith.constant 0 : index
    %69 = vector.load %arg5[%c0_69, %c0_70] : memref<1152x128xbf16, #tpu.memory_space<vmem>>, vector<384x128xbf16>
    %cst_71 = arith.constant dense<0.000000e+00> : vector<256x128xf32>
    %70 = tpu.matmul %68, %69, %cst_71 {dimension_numbers = #tpu.dot_dimension_numbers<[1], [0], [0], [1], [0, 0, 1, 1], [], []>} : vector<256x384xbf16>, vector<384x128xbf16>, vector<256x128xf32> -> vector<256x128xf32>
    %c1_72 = arith.constant 1 : index
    %c0_73 = arith.constant 0 : index
    %c0_74 = arith.constant 0 : index
    %71 = vector.load %arg9[%c1_72, %c0_73, %c0_74] : memref<18x24x128xf32, #tpu.memory_space<vmem>>, vector<16x16x128xf32>
    %72 = vector.shape_cast %71 : vector<16x16x128xf32> to vector<256x128xf32>
    %73 = arith.truncf %72 : vector<256x128xf32> to vector<256x128xbf16>
    %c1_75 = arith.constant 1 : index
    %c1_76 = arith.constant 1 : index
    %c0_77 = arith.constant 0 : index
    %74 = vector.load %arg9[%c1_75, %c1_76, %c0_77] : memref<18x24x128xf32, #tpu.memory_space<vmem>>, vector<16x16x128xf32>
    %75 = vector.shape_cast %74 : vector<16x16x128xf32> to vector<256x128xf32>
    %76 = arith.truncf %75 : vector<256x128xf32> to vector<256x128xbf16>
    %c1_78 = arith.constant 1 : index
    %c2_79 = arith.constant 2 : index
    %c0_80 = arith.constant 0 : index
    %77 = vector.load %arg9[%c1_78, %c2_79, %c0_80] : memref<18x24x128xf32, #tpu.memory_space<vmem>>, vector<16x16x128xf32>
    %78 = vector.shape_cast %77 : vector<16x16x128xf32> to vector<256x128xf32>
    %79 = arith.truncf %78 : vector<256x128xf32> to vector<256x128xbf16>
    %80 = tpu.concatenate %73, %76, %79 in 1 : vector<256x128xbf16>, vector<256x128xbf16>, vector<256x128xbf16> -> vector<256x384xbf16>
    %c384_81 = arith.constant 384 : index
    %c0_82 = arith.constant 0 : index
    %81 = vector.load %arg5[%c384_81, %c0_82] : memref<1152x128xbf16, #tpu.memory_space<vmem>>, vector<384x128xbf16>
    %cst_83 = arith.constant dense<0.000000e+00> : vector<256x128xf32>
    %82 = tpu.matmul %80, %81, %cst_83 {dimension_numbers = #tpu.dot_dimension_numbers<[1], [0], [0], [1], [0, 0, 1, 1], [], []>} : vector<256x384xbf16>, vector<384x128xbf16>, vector<256x128xf32> -> vector<256x128xf32>
    %83 = arith.addf %70, %82 : vector<256x128xf32>
    %c2_84 = arith.constant 2 : index
    %c0_85 = arith.constant 0 : index
    %c0_86 = arith.constant 0 : index
    %84 = vector.load %arg9[%c2_84, %c0_85, %c0_86] : memref<18x24x128xf32, #tpu.memory_space<vmem>>, vector<16x16x128xf32>
    %85 = vector.shape_cast %84 : vector<16x16x128xf32> to vector<256x128xf32>
    %86 = arith.truncf %85 : vector<256x128xf32> to vector<256x128xbf16>
    %c2_87 = arith.constant 2 : index
    %c1_88 = arith.constant 1 : index
    %c0_89 = arith.constant 0 : index
    %87 = vector.load %arg9[%c2_87, %c1_88, %c0_89] : memref<18x24x128xf32, #tpu.memory_space<vmem>>, vector<16x16x128xf32>
    %88 = vector.shape_cast %87 : vector<16x16x128xf32> to vector<256x128xf32>
    %89 = arith.truncf %88 : vector<256x128xf32> to vector<256x128xbf16>
    %c2_90 = arith.constant 2 : index
    %c2_91 = arith.constant 2 : index
    %c0_92 = arith.constant 0 : index
    %90 = vector.load %arg9[%c2_90, %c2_91, %c0_92] : memref<18x24x128xf32, #tpu.memory_space<vmem>>, vector<16x16x128xf32>
    %91 = vector.shape_cast %90 : vector<16x16x128xf32> to vector<256x128xf32>
    %92 = arith.truncf %91 : vector<256x128xf32> to vector<256x128xbf16>
    %93 = tpu.concatenate %86, %89, %92 in 1 : vector<256x128xbf16>, vector<256x128xbf16>, vector<256x128xbf16> -> vector<256x384xbf16>
    %c768_93 = arith.constant 768 : index
    %c0_94 = arith.constant 0 : index
    %94 = vector.load %arg5[%c768_93, %c0_94] : memref<1152x128xbf16, #tpu.memory_space<vmem>>, vector<384x128xbf16>
    %cst_95 = arith.constant dense<0.000000e+00> : vector<256x128xf32>
    %95 = tpu.matmul %93, %94, %cst_95 {dimension_numbers = #tpu.dot_dimension_numbers<[1], [0], [0], [1], [0, 0, 1, 1], [], []>} : vector<256x384xbf16>, vector<384x128xbf16>, vector<256x128xf32> -> vector<256x128xf32>
    %96 = arith.addf %83, %95 : vector<256x128xf32>
    %c0_96 = arith.constant 0 : index
    %c0_97 = arith.constant 0 : index
    %97 = vector.load %arg6[%c0_96, %c0_97] : memref<1x128xf32, #tpu.memory_space<vmem>>, vector<1x128xf32>
    %98 = vector.broadcast %97 : vector<1x128xf32> to vector<256x128xf32>
    %99 = arith.mulf %96, %98 : vector<256x128xf32>
    %c0_98 = arith.constant 0 : index
    %c0_99 = arith.constant 0 : index
    %100 = vector.load %arg7[%c0_98, %c0_99] : memref<1x128xf32, #tpu.memory_space<vmem>>, vector<1x128xf32>
    %101 = vector.broadcast %100 : vector<1x128xf32> to vector<256x128xf32>
    %102 = arith.addf %99, %101 : vector<256x128xf32>
    %103 = vector.shape_cast %102 : vector<256x128xf32> to vector<16x16x128xf32>
    %c0_100 = arith.constant 0 : index
    %c0_101 = arith.constant 0 : index
    %c0_102 = arith.constant 0 : index
    %c0_103 = arith.constant 0 : index
    %104 = vector.load %arg1[%c0_100, %c0_101, %c0_102, %c0_103] : memref<1x16x16x128xf32, #tpu.memory_space<vmem>>, vector<1x16x16x128xf32>
    %105 = vector.shape_cast %104 : vector<1x16x16x128xf32> to vector<16x16x128xf32>
    %106 = arith.addf %103, %105 : vector<16x16x128xf32>
    %cst_104 = arith.constant 0.000000e+00 : f32
    %107 = vector.broadcast %cst_104 : f32 to vector<16x16x128xf32>
    %108 = arith.maximumf %106, %107 : vector<16x16x128xf32>
    %c0_105 = arith.constant 0 : index
    %c0_106 = arith.constant 0 : index
    %c0_107 = arith.constant 0 : index
    %c0_108 = arith.constant 0 : index
    %109 = vector.load %arg8[%c0_105, %c0_106, %c0_107, %c0_108] : memref<1x16x16x128xf32, #tpu.memory_space<vmem>>, vector<1x16x16x128xf32>
    %110 = vector.shape_cast %109 : vector<1x16x16x128xf32> to vector<16x16x128xf32>
    %111 = vector.shape_cast %108 : vector<16x16x128xf32> to vector<1x16x16x128xf32>
    tpu.vector_store %arg8[%c0_105, %c0_106, %c0_107, %c0_108], %111 {strides = array<i32>} : memref<1x16x16x128xf32, #tpu.memory_space<vmem>>, vector<1x16x16x128xf32>,
    return
  }
  func.func @transform_0(%arg0: i32) -> (i32, i32, i32, i32) {
    %c0_i32 = arith.constant 0 : i32
    %c0_i32_0 = arith.constant 0 : i32
    %c0_i32_1 = arith.constant 0 : i32
    %c0_i32_2 = arith.constant 0 : i32
    return %arg0, %c0_i32, %c0_i32_0, %c0_i32_1 : i32, i32, i32, i32
  }
  func.func @transform_1(%arg0: i32) -> (i32, i32) {
    %c0_i32 = arith.constant 0 : i32
    %c0_i32_0 = arith.constant 0 : i32
    %c0_i32_1 = arith.constant 0 : i32
    return %c0_i32, %c0_i32_0 : i32, i32
  }
  func.func @transform_2(%arg0: i32) -> (i32, i32) {
    %c0_i32 = arith.constant 0 : i32
    %c0_i32_0 = arith.constant 0 : i32
    %c0_i32_1 = arith.constant 0 : i32
    return %c0_i32, %c0_i32_0 : i32, i32
  }
  func.func @transform_3(%arg0: i32) -> (i32, i32) {
    %c0_i32 = arith.constant 0 : i32
    %c0_i32_0 = arith.constant 0 : i32
    %c0_i32_1 = arith.constant 0 : i32
    return %c0_i32, %c0_i32_0 : i32, i32
  }
  func.func @transform_4(%arg0: i32) -> (i32, i32) {
    %c0_i32 = arith.constant 0 : i32
    %c0_i32_0 = arith.constant 0 : i32
    %c0_i32_1 = arith.constant 0 : i32
    return %c0_i32, %c0_i32_0 : i32, i32
  }
  func.func @transform_5(%arg0: i32) -> (i32, i32) {
    %c0_i32 = arith.constant 0 : i32
    %c0_i32_0 = arith.constant 0 : i32
    %c0_i32_1 = arith.constant 0 : i32
    return %c0_i32, %c0_i32_0 : i32, i32
  }
  func.func @transform_6(%arg0: i32) -> (i32, i32) {
    %c0_i32 = arith.constant 0 : i32
    %c0_i32_0 = arith.constant 0 : i32
    %c0_i32_1 = arith.constant 0 : i32
    return %c0_i32, %c0_i32_0 : i32, i32
  }
  func.func @transform_7(%arg0: i32) -> (i32, i32, i32, i32) {
    %c0_i32 = arith.constant 0 : i32
    %c0_i32_0 = arith.constant 0 : i32
    %c0_i32_1 = arith.constant 0 : i32
    %c0_i32_2 = arith.constant 0 : i32
    return %arg0, %c0_i32, %c0_i32_0, %c0_i32_1 : i32, i32, i32, i32
  }
}

module attributes {stable_mosaic.version = 11 : i64} {
  func.func @_residual_block_kernel(%arg0: i32, %arg1: memref<1x16x16x128xf32, #tpu.memory_space<vmem>>, %arg2: memref<1152x128xbf16, #tpu.memory_space<vmem>>, %arg3: memref<1x128xf32, #tpu.memory_space<vmem>>, %arg4: memref<1x128xf32, #tpu.memory_space<vmem>>, %arg5: memref<1152x128xbf16, #tpu.memory_space<vmem>>, %arg6: memref<1x128xf32, #tpu.memory_space<vmem>>, %arg7: memref<1x128xf32, #tpu.memory_space<vmem>>, %arg8: memref<1x16x16x128xf32, #tpu.memory_space<vmem>>, %arg9: memref<18x24x128xf32, #tpu.memory_space<vmem>>) attributes {dimension_semantics = [#tpu.dimension_semantics<parallel>], iteration_bounds = array<i64: 2>, scalar_prefetch = 0 : i64, scratch_operands = 1 : i64, tpu.core_type = #tpu.core_type<tc>, window_params = [{transform_indices = @transform_0, window_bounds = array<i64: 1, 16, 16, 128>}, {pipeline_mode = #tpu.pipeline_mode<synchronous>, transform_indices = @transform_1, window_bounds = array<i64: 1152, 128>}, {pipeline_mode = #tpu.pipeline_mode<synchronous>, transform_indices = @transform_2, window_bounds = array<i64: 1, 128>}, {pipeline_mode = #tpu.pipeline_mode<synchronous>, transform_indices = @transform_3, window_bounds = array<i64: 1, 128>}, {pipeline_mode = #tpu.pipeline_mode<synchronous>, transform_indices = @transform_4, window_bounds = array<i64: 1152, 128>}, {pipeline_mode = #tpu.pipeline_mode<synchronous>, transform_indices = @transform_5, window_bounds = array<i64: 1, 128>}, {pipeline_mode = #tpu.pipeline_mode<synchronous>, transform_indices = @transform_6, window_bounds = array<i64: 1, 128>}, {transform_indices = @transform_7, window_bounds = array<i64: 1, 16, 16, 128>}]} {
    %cst = arith.constant 0.000000e+00 : f32
    %0 = vector.broadcast %cst : f32 to vector<1x24x128xf32>
    %c0 = arith.constant 0 : index
    %c0_0 = arith.constant 0 : index
    %c0_1 = arith.constant 0 : index
    %1 = vector.load %arg9[%c0, %c0_0, %c0_1] : memref<18x24x128xf32, #tpu.memory_space<vmem>>, vector<1x24x128xf32>
    tpu.vector_store %arg9[%c0, %c0_0, %c0_1], %0 {strides = array<i32>} : memref<18x24x128xf32, #tpu.memory_space<vmem>>, vector<1x24x128xf32>,
    %cst_2 = arith.constant 0.000000e+00 : f32
    %2 = vector.broadcast %cst_2 : f32 to vector<1x24x128xf32>
    %c17 = arith.constant 17 : index
    %c0_3 = arith.constant 0 : index
    %c0_4 = arith.constant 0 : index
    %3 = vector.load %arg9[%c17, %c0_3, %c0_4] : memref<18x24x128xf32, #tpu.memory_space<vmem>>, vector<1x24x128xf32>
    tpu.vector_store %arg9[%c17, %c0_3, %c0_4], %2 {strides = array<i32>} : memref<18x24x128xf32, #tpu.memory_space<vmem>>, vector<1x24x128xf32>,
    %cst_5 = arith.constant 0.000000e+00 : f32
    %4 = vector.broadcast %cst_5 : f32 to vector<18x1x128xf32>
    %c0_6 = arith.constant 0 : index
    %c0_7 = arith.constant 0 : index
    %c0_8 = arith.constant 0 : index
    %5 = vector.load %arg9[%c0_6, %c0_7, %c0_8] : memref<18x24x128xf32, #tpu.memory_space<vmem>>, vector<18x1x128xf32>
    tpu.vector_store %arg9[%c0_6, %c0_7, %c0_8], %4 {strides = array<i32>} : memref<18x24x128xf32, #tpu.memory_space<vmem>>, vector<18x1x128xf32>,
    %cst_9 = arith.constant 0.000000e+00 : f32
    %6 = vector.broadcast %cst_9 : f32 to vector<18x7x128xf32>
    %c0_10 = arith.constant 0 : index
    %c17_11 = arith.constant 17 : index
    %c0_12 = arith.constant 0 : index
    %7 = vector.load %arg9[%c0_10, %c17_11, %c0_12] : memref<18x24x128xf32, #tpu.memory_space<vmem>>, vector<18x7x128xf32>
    tpu.vector_store %arg9[%c0_10, %c17_11, %c0_12], %6 {strides = array<i32>} : memref<18x24x128xf32, #tpu.memory_space<vmem>>, vector<18x7x128xf32>,
    %c0_13 = arith.constant 0 : index
    %c0_14 = arith.constant 0 : index
    %c0_15 = arith.constant 0 : index
    %c0_16 = arith.constant 0 : index
    %8 = vector.load %arg1[%c0_13, %c0_14, %c0_15, %c0_16] : memref<1x16x16x128xf32, #tpu.memory_space<vmem>>, vector<1x16x16x128xf32>
    %9 = vector.shape_cast %8 : vector<1x16x16x128xf32> to vector<16x16x128xf32>
    %c1 = arith.constant 1 : index
    %c1_17 = arith.constant 1 : index
    %c0_18 = arith.constant 0 : index
    %10 = vector.load %arg9[%c1, %c1_17, %c0_18] : memref<18x24x128xf32, #tpu.memory_space<vmem>>, vector<16x16x128xf32>
    tpu.vector_store %arg9[%c1, %c1_17, %c0_18], %9 {strides = array<i32>} : memref<18x24x128xf32, #tpu.memory_space<vmem>>, vector<16x16x128xf32>,
    %c0_19 = arith.constant 0 : index
    %c0_20 = arith.constant 0 : index
    %c0_21 = arith.constant 0 : index
    %11 = vector.load %arg9[%c0_19, %c0_20, %c0_21] : memref<18x24x128xf32, #tpu.memory_space<vmem>>, vector<16x16x128xf32>
    %12 = vector.shape_cast %11 : vector<16x16x128xf32> to vector<256x128xf32>
    %13 = arith.truncf %12 : vector<256x128xf32> to vector<256x128xbf16>
    %c0_22 = arith.constant 0 : index
    %c1_23 = arith.constant 1 : index
    %c0_24 = arith.constant 0 : index
    %14 = vector.load %arg9[%c0_22, %c1_23, %c0_24] : memref<18x24x128xf32, #tpu.memory_space<vmem>>, vector<16x16x128xf32>
    %15 = vector.shape_cast %14 : vector<16x16x128xf32> to vector<256x128xf32>
    %16 = arith.truncf %15 : vector<256x128xf32> to vector<256x128xbf16>
    %c0_25 = arith.constant 0 : index
    %c2 = arith.constant 2 : index
    %c0_26 = arith.constant 0 : index
    %17 = vector.load %arg9[%c0_25, %c2, %c0_26] : memref<18x24x128xf32, #tpu.memory_space<vmem>>, vector<16x16x128xf32>
    %18 = vector.shape_cast %17 : vector<16x16x128xf32> to vector<256x128xf32>
    %19 = arith.truncf %18 : vector<256x128xf32> to vector<256x128xbf16>
    %20 = tpu.concatenate %13, %16, %19 in 1 : vector<256x128xbf16>, vector<256x128xbf16>, vector<256x128xbf16> -> vector<256x384xbf16>
    %c0_27 = arith.constant 0 : index
    %c0_28 = arith.constant 0 : index
    %21 = vector.load %arg2[%c0_27, %c0_28] : memref<1152x128xbf16, #tpu.memory_space<vmem>>, vector<384x128xbf16>
    %cst_29 = arith.constant dense<0.000000e+00> : vector<256x128xf32>
    %22 = tpu.matmul %20, %21, %cst_29 {dimension_numbers = #tpu.dot_dimension_numbers<[1], [0], [0], [1], [0, 0, 1, 1], [], []>} : vector<256x384xbf16>, vector<384x128xbf16>, vector<256x128xf32> -> vector<256x128xf32>
    %c1_30 = arith.constant 1 : index
    %c0_31 = arith.constant 0 : index
    %c0_32 = arith.constant 0 : index
    %23 = vector.load %arg9[%c1_30, %c0_31, %c0_32] : memref<18x24x128xf32, #tpu.memory_space<vmem>>, vector<16x16x128xf32>
    %24 = vector.shape_cast %23 : vector<16x16x128xf32> to vector<256x128xf32>
    %25 = arith.truncf %24 : vector<256x128xf32> to vector<256x128xbf16>
    %c1_33 = arith.constant 1 : index
    %c1_34 = arith.constant 1 : index
    %c0_35 = arith.constant 0 : index
    %26 = vector.load %arg9[%c1_33, %c1_34, %c0_35] : memref<18x24x128xf32, #tpu.memory_space<vmem>>, vector<16x16x128xf32>
    %27 = vector.shape_cast %26 : vector<16x16x128xf32> to vector<256x128xf32>
    %28 = arith.truncf %27 : vector<256x128xf32> to vector<256x128xbf16>
    %c1_36 = arith.constant 1 : index
    %c2_37 = arith.constant 2 : index
    %c0_38 = arith.constant 0 : index
    %29 = vector.load %arg9[%c1_36, %c2_37, %c0_38] : memref<18x24x128xf32, #tpu.memory_space<vmem>>, vector<16x16x128xf32>
    %30 = vector.shape_cast %29 : vector<16x16x128xf32> to vector<256x128xf32>
    %31 = arith.truncf %30 : vector<256x128xf32> to vector<256x128xbf16>
    %32 = tpu.concatenate %25, %28, %31 in 1 : vector<256x128xbf16>, vector<256x128xbf16>, vector<256x128xbf16> -> vector<256x384xbf16>
    %c384 = arith.constant 384 : index
    %c0_39 = arith.constant 0 : index
    %33 = vector.load %arg2[%c384, %c0_39] : memref<1152x128xbf16, #tpu.memory_space<vmem>>, vector<384x128xbf16>
    %cst_40 = arith.constant dense<0.000000e+00> : vector<256x128xf32>
    %34 = tpu.matmul %32, %33, %cst_40 {dimension_numbers = #tpu.dot_dimension_numbers<[1], [0], [0], [1], [0, 0, 1, 1], [], []>} : vector<256x384xbf16>, vector<384x128xbf16>, vector<256x128xf32> -> vector<256x128xf32>
    %35 = arith.addf %22, %34 : vector<256x128xf32>
    %c2_41 = arith.constant 2 : index
    %c0_42 = arith.constant 0 : index
    %c0_43 = arith.constant 0 : index
    %36 = vector.load %arg9[%c2_41, %c0_42, %c0_43] : memref<18x24x128xf32, #tpu.memory_space<vmem>>, vector<16x16x128xf32>
    %37 = vector.shape_cast %36 : vector<16x16x128xf32> to vector<256x128xf32>
    %38 = arith.truncf %37 : vector<256x128xf32> to vector<256x128xbf16>
    %c2_44 = arith.constant 2 : index
    %c1_45 = arith.constant 1 : index
    %c0_46 = arith.constant 0 : index
    %39 = vector.load %arg9[%c2_44, %c1_45, %c0_46] : memref<18x24x128xf32, #tpu.memory_space<vmem>>, vector<16x16x128xf32>
    %40 = vector.shape_cast %39 : vector<16x16x128xf32> to vector<256x128xf32>
    %41 = arith.truncf %40 : vector<256x128xf32> to vector<256x128xbf16>
    %c2_47 = arith.constant 2 : index
    %c2_48 = arith.constant 2 : index
    %c0_49 = arith.constant 0 : index
    %42 = vector.load %arg9[%c2_47, %c2_48, %c0_49] : memref<18x24x128xf32, #tpu.memory_space<vmem>>, vector<16x16x128xf32>
    %43 = vector.shape_cast %42 : vector<16x16x128xf32> to vector<256x128xf32>
    %44 = arith.truncf %43 : vector<256x128xf32> to vector<256x128xbf16>
    %45 = tpu.concatenate %38, %41, %44 in 1 : vector<256x128xbf16>, vector<256x128xbf16>, vector<256x128xbf16> -> vector<256x384xbf16>
    %c768 = arith.constant 768 : index
    %c0_50 = arith.constant 0 : index
    %46 = vector.load %arg2[%c768, %c0_50] : memref<1152x128xbf16, #tpu.memory_space<vmem>>, vector<384x128xbf16>
    %cst_51 = arith.constant dense<0.000000e+00> : vector<256x128xf32>
    %47 = tpu.matmul %45, %46, %cst_51 {dimension_numbers = #tpu.dot_dimension_numbers<[1], [0], [0], [1], [0, 0, 1, 1], [], []>} : vector<256x384xbf16>, vector<384x128xbf16>, vector<256x128xf32> -> vector<256x128xf32>
    %48 = arith.addf %35, %47 : vector<256x128xf32>
    %c0_52 = arith.constant 0 : index
    %c0_53 = arith.constant 0 : index
    %49 = vector.load %arg3[%c0_52, %c0_53] : memref<1x128xf32, #tpu.memory_space<vmem>>, vector<1x128xf32>
    %50 = vector.broadcast %49 : vector<1x128xf32> to vector<256x128xf32>
    %51 = arith.mulf %48, %50 : vector<256x128xf32>
    %c0_54 = arith.constant 0 : index
    %c0_55 = arith.constant 0 : index
    %52 = vector.load %arg4[%c0_54, %c0_55] : memref<1x128xf32, #tpu.memory_space<vmem>>, vector<1x128xf32>
    %53 = vector.broadcast %52 : vector<1x128xf32> to vector<256x128xf32>
    %54 = arith.addf %51, %53 : vector<256x128xf32>
    %cst_56 = arith.constant 0.000000e+00 : f32
    %55 = vector.broadcast %cst_56 : f32 to vector<256x128xf32>
    %56 = arith.maximumf %54, %55 : vector<256x128xf32>
    %57 = vector.shape_cast %56 : vector<256x128xf32> to vector<16x16x128xf32>
    %c1_57 = arith.constant 1 : index
    %c1_58 = arith.constant 1 : index
    %c0_59 = arith.constant 0 : index
    %58 = vector.load %arg9[%c1_57, %c1_58, %c0_59] : memref<18x24x128xf32, #tpu.memory_space<vmem>>, vector<16x16x128xf32>
    tpu.vector_store %arg9[%c1_57, %c1_58, %c0_59], %57 {strides = array<i32>} : memref<18x24x128xf32, #tpu.memory_space<vmem>>, vector<16x16x128xf32>,
    %c0_60 = arith.constant 0 : index
    %c0_61 = arith.constant 0 : index
    %c0_62 = arith.constant 0 : index
    %59 = vector.load %arg9[%c0_60, %c0_61, %c0_62] : memref<18x24x128xf32, #tpu.memory_space<vmem>>, vector<16x16x128xf32>
    %60 = vector.shape_cast %59 : vector<16x16x128xf32> to vector<256x128xf32>
    %61 = arith.truncf %60 : vector<256x128xf32> to vector<256x128xbf16>
    %c0_63 = arith.constant 0 : index
    %c1_64 = arith.constant 1 : index
    %c0_65 = arith.constant 0 : index
    %62 = vector.load %arg9[%c0_63, %c1_64, %c0_65] : memref<18x24x128xf32, #tpu.memory_space<vmem>>, vector<16x16x128xf32>
    %63 = vector.shape_cast %62 : vector<16x16x128xf32> to vector<256x128xf32>
    %64 = arith.truncf %63 : vector<256x128xf32> to vector<256x128xbf16>
    %c0_66 = arith.constant 0 : index
    %c2_67 = arith.constant 2 : index
    %c0_68 = arith.constant 0 : index
    %65 = vector.load %arg9[%c0_66, %c2_67, %c0_68] : memref<18x24x128xf32, #tpu.memory_space<vmem>>, vector<16x16x128xf32>
    %66 = vector.shape_cast %65 : vector<16x16x128xf32> to vector<256x128xf32>
    %67 = arith.truncf %66 : vector<256x128xf32> to vector<256x128xbf16>
    %68 = tpu.concatenate %61, %64, %67 in 1 : vector<256x128xbf16>, vector<256x128xbf16>, vector<256x128xbf16> -> vector<256x384xbf16>
    %c0_69 = arith.constant 0 : index
    %c0_70 = arith.constant 0 : index
    %69 = vector.load %arg5[%c0_69, %c0_70] : memref<1152x128xbf16, #tpu.memory_space<vmem>>, vector<384x128xbf16>
    %cst_71 = arith.constant dense<0.000000e+00> : vector<256x128xf32>
    %70 = tpu.matmul %68, %69, %cst_71 {dimension_numbers = #tpu.dot_dimension_numbers<[1], [0], [0], [1], [0, 0, 1, 1], [], []>} : vector<256x384xbf16>, vector<384x128xbf16>, vector<256x128xf32> -> vector<256x128xf32>
    %c1_72 = arith.constant 1 : index
    %c0_73 = arith.constant 0 : index
    %c0_74 = arith.constant 0 : index
    %71 = vector.load %arg9[%c1_72, %c0_73, %c0_74] : memref<18x24x128xf32, #tpu.memory_space<vmem>>, vector<16x16x128xf32>
    %72 = vector.shape_cast %71 : vector<16x16x128xf32> to vector<256x128xf32>
    %73 = arith.truncf %72 : vector<256x128xf32> to vector<256x128xbf16>
    %c1_75 = arith.constant 1 : index
    %c1_76 = arith.constant 1 : index
    %c0_77 = arith.constant 0 : index
    %74 = vector.load %arg9[%c1_75, %c1_76, %c0_77] : memref<18x24x128xf32, #tpu.memory_space<vmem>>, vector<16x16x128xf32>
    %75 = vector.shape_cast %74 : vector<16x16x128xf32> to vector<256x128xf32>
    %76 = arith.truncf %75 : vector<256x128xf32> to vector<256x128xbf16>
    %c1_78 = arith.constant 1 : index
    %c2_79 = arith.constant 2 : index
    %c0_80 = arith.constant 0 : index
    %77 = vector.load %arg9[%c1_78, %c2_79, %c0_80] : memref<18x24x128xf32, #tpu.memory_space<vmem>>, vector<16x16x128xf32>
    %78 = vector.shape_cast %77 : vector<16x16x128xf32> to vector<256x128xf32>
    %79 = arith.truncf %78 : vector<256x128xf32> to vector<256x128xbf16>
    %80 = tpu.concatenate %73, %76, %79 in 1 : vector<256x128xbf16>, vector<256x128xbf16>, vector<256x128xbf16> -> vector<256x384xbf16>
    %c384_81 = arith.constant 384 : index
    %c0_82 = arith.constant 0 : index
    %81 = vector.load %arg5[%c384_81, %c0_82] : memref<1152x128xbf16, #tpu.memory_space<vmem>>, vector<384x128xbf16>
    %cst_83 = arith.constant dense<0.000000e+00> : vector<256x128xf32>
    %82 = tpu.matmul %80, %81, %cst_83 {dimension_numbers = #tpu.dot_dimension_numbers<[1], [0], [0], [1], [0, 0, 1, 1], [], []>} : vector<256x384xbf16>, vector<384x128xbf16>, vector<256x128xf32> -> vector<256x128xf32>
    %83 = arith.addf %70, %82 : vector<256x128xf32>
    %c2_84 = arith.constant 2 : index
    %c0_85 = arith.constant 0 : index
    %c0_86 = arith.constant 0 : index
    %84 = vector.load %arg9[%c2_84, %c0_85, %c0_86] : memref<18x24x128xf32, #tpu.memory_space<vmem>>, vector<16x16x128xf32>
    %85 = vector.shape_cast %84 : vector<16x16x128xf32> to vector<256x128xf32>
    %86 = arith.truncf %85 : vector<256x128xf32> to vector<256x128xbf16>
    %c2_87 = arith.constant 2 : index
    %c1_88 = arith.constant 1 : index
    %c0_89 = arith.constant 0 : index
    %87 = vector.load %arg9[%c2_87, %c1_88, %c0_89] : memref<18x24x128xf32, #tpu.memory_space<vmem>>, vector<16x16x128xf32>
    %88 = vector.shape_cast %87 : vector<16x16x128xf32> to vector<256x128xf32>
    %89 = arith.truncf %88 : vector<256x128xf32> to vector<256x128xbf16>
    %c2_90 = arith.constant 2 : index
    %c2_91 = arith.constant 2 : index
    %c0_92 = arith.constant 0 : index
    %90 = vector.load %arg9[%c2_90, %c2_91, %c0_92] : memref<18x24x128xf32, #tpu.memory_space<vmem>>, vector<16x16x128xf32>
    %91 = vector.shape_cast %90 : vector<16x16x128xf32> to vector<256x128xf32>
    %92 = arith.truncf %91 : vector<256x128xf32> to vector<256x128xbf16>
    %93 = tpu.concatenate %86, %89, %92 in 1 : vector<256x128xbf16>, vector<256x128xbf16>, vector<256x128xbf16> -> vector<256x384xbf16>
    %c768_93 = arith.constant 768 : index
    %c0_94 = arith.constant 0 : index
    %94 = vector.load %arg5[%c768_93, %c0_94] : memref<1152x128xbf16, #tpu.memory_space<vmem>>, vector<384x128xbf16>
    %cst_95 = arith.constant dense<0.000000e+00> : vector<256x128xf32>
    %95 = tpu.matmul %93, %94, %cst_95 {dimension_numbers = #tpu.dot_dimension_numbers<[1], [0], [0], [1], [0, 0, 1, 1], [], []>} : vector<256x384xbf16>, vector<384x128xbf16>, vector<256x128xf32> -> vector<256x128xf32>
    %96 = arith.addf %83, %95 : vector<256x128xf32>
    %c0_96 = arith.constant 0 : index
    %c0_97 = arith.constant 0 : index
    %97 = vector.load %arg6[%c0_96, %c0_97] : memref<1x128xf32, #tpu.memory_space<vmem>>, vector<1x128xf32>
    %98 = vector.broadcast %97 : vector<1x128xf32> to vector<256x128xf32>
    %99 = arith.mulf %96, %98 : vector<256x128xf32>
    %c0_98 = arith.constant 0 : index
    %c0_99 = arith.constant 0 : index
    %100 = vector.load %arg7[%c0_98, %c0_99] : memref<1x128xf32, #tpu.memory_space<vmem>>, vector<1x128xf32>
    %101 = vector.broadcast %100 : vector<1x128xf32> to vector<256x128xf32>
    %102 = arith.addf %99, %101 : vector<256x128xf32>
    %103 = vector.shape_cast %102 : vector<256x128xf32> to vector<16x16x128xf32>
    %c0_100 = arith.constant 0 : index
    %c0_101 = arith.constant 0 : index
    %c0_102 = arith.constant 0 : index
    %c0_103 = arith.constant 0 : index
    %104 = vector.load %arg1[%c0_100, %c0_101, %c0_102, %c0_103] : memref<1x16x16x128xf32, #tpu.memory_space<vmem>>, vector<1x16x16x128xf32>
    %105 = vector.shape_cast %104 : vector<1x16x16x128xf32> to vector<16x16x128xf32>
    %106 = arith.addf %103, %105 : vector<16x16x128xf32>
    %cst_104 = arith.constant 0.000000e+00 : f32
    %107 = vector.broadcast %cst_104 : f32 to vector<16x16x128xf32>
    %108 = arith.maximumf %106, %107 : vector<16x16x128xf32>
    %c0_105 = arith.constant 0 : index
    %c0_106 = arith.constant 0 : index
    %c0_107 = arith.constant 0 : index
    %c0_108 = arith.constant 0 : index
    %109 = vector.load %arg8[%c0_105, %c0_106, %c0_107, %c0_108] : memref<1x16x16x128xf32, #tpu.memory_space<vmem>>, vector<1x16x16x128xf32>
    %110 = vector.shape_cast %109 : vector<1x16x16x128xf32> to vector<16x16x128xf32>
    %111 = vector.shape_cast %108 : vector<16x16x128xf32> to vector<1x16x16x128xf32>
    tpu.vector_store %arg8[%c0_105, %c0_106, %c0_107, %c0_108], %111 {strides = array<i32>} : memref<1x16x16x128xf32, #tpu.memory_space<vmem>>, vector<1x16x16x128xf32>,
    return
  }
  func.func @transform_0(%arg0: i32) -> (i32, i32, i32, i32) {
    %c0_i32 = arith.constant 0 : i32
    %c0_i32_0 = arith.constant 0 : i32
    %c0_i32_1 = arith.constant 0 : i32
    %c0_i32_2 = arith.constant 0 : i32
    return %arg0, %c0_i32, %c0_i32_0, %c0_i32_1 : i32, i32, i32, i32
  }
  func.func @transform_1(%arg0: i32) -> (i32, i32) {
    %c0_i32 = arith.constant 0 : i32
    %c0_i32_0 = arith.constant 0 : i32
    %c0_i32_1 = arith.constant 0 : i32
    return %c0_i32, %c0_i32_0 : i32, i32
  }
  func.func @transform_2(%arg0: i32) -> (i32, i32) {
    %c0_i32 = arith.constant 0 : i32
    %c0_i32_0 = arith.constant 0 : i32
    %c0_i32_1 = arith.constant 0 : i32
    return %c0_i32, %c0_i32_0 : i32, i32
  }
  func.func @transform_3(%arg0: i32) -> (i32, i32) {
    %c0_i32 = arith.constant 0 : i32
    %c0_i32_0 = arith.constant 0 : i32
    %c0_i32_1 = arith.constant 0 : i32
    return %c0_i32, %c0_i32_0 : i32, i32
  }
  func.func @transform_4(%arg0: i32) -> (i32, i32) {
    %c0_i32 = arith.constant 0 : i32
    %c0_i32_0 = arith.constant 0 : i32
    %c0_i32_1 = arith.constant 0 : i32
    return %c0_i32, %c0_i32_0 : i32, i32
  }
  func.func @transform_5(%arg0: i32) -> (i32, i32) {
    %c0_i32 = arith.constant 0 : i32
    %c0_i32_0 = arith.constant 0 : i32
    %c0_i32_1 = arith.constant 0 : i32
    return %c0_i32, %c0_i32_0 : i32, i32
  }
  func.func @transform_6(%arg0: i32) -> (i32, i32) {
    %c0_i32 = arith.constant 0 : i32
    %c0_i32_0 = arith.constant 0 : i32
    %c0_i32_1 = arith.constant 0 : i32
    return %c0_i32, %c0_i32_0 : i32, i32
  }
  func.func @transform_7(%arg0: i32) -> (i32, i32, i32, i32) {
    %c0_i32 = arith.constant 0 : i32
    %c0_i32_0 = arith.constant 0 : i32
    %c0_i32_1 = arith.constant 0 : i32
    %c0_i32_2 = arith.constant 0 : i32
    return %arg0, %c0_i32, %c0_i32_0, %c0_i32_1 : i32, i32, i32, i32
  }
}

</mosaic_0001>

<bundles_post_ra>
// kernel: tpu_custom_call.1
= control target key start
LH: loop header
LB: loop body
LE: loop exit
PB: predicated region body
PF: predicated region fallthrough
CT: control target
= control target key end

     0   :  { %s8293_s0 = inlined_call_operand.hbm [shape: f32[2,16,16,128], index: 0, kind: input, shape index: {}]   ;;  %s8294_s1 = inlined_call_operand.hbm [shape: bf16[1152,128], index: 1, kind: input, shape index: {}]   ;;  %s8295_s2 = inlined_call_operand.vmem [shape: f32[1,128], index: 2, kind: input, shape index: {}]   ;;  %s8296_s3 = inlined_call_operand.vmem [shape: f32[1,128], index: 3, kind: input, shape index: {}]   ;;  %s8297_s4 = inlined_call_operand.hbm [shape: bf16[1152,128], index: 4, kind: input, shape index: {}]   ;;  %s8298_s5 = inlined_call_operand.vmem [shape: f32[1,128], index: 5, kind: input, shape index: {}]   ;;  %s8299_s6 = inlined_call_operand.vmem [shape: f32[1,128], index: 6, kind: input, shape index: {}]   ;;  %s8300_s7 = inlined_call_operand.hbm [shape: f32[2,16,16,128], index: 7, kind: output, shape index: {}]  }
   0x1   :  { %8305 = sst [smem:[#allocation28_spill]] %s8294_s1 }
   0x2   :  { %12 = vsyncpa [#allocation4], 0 }
   0x3   :  { %14 = vsyncpa [#allocation4 + $0x1], 0 }
   0x4   :  { %15 = vsyncpa [#allocation7], 0 }
   0x5   :  { %16 = vsyncpa [#allocation5], 0 }
   0x6   :  { %18 = vsyncpa [#allocation5 + $0x1], 0  ;;  %s6597_s24 = smov 0   ;;  %s6599_s25 = smov 0  }
   0x7   :  { %s6601_s26 = smov 0   ;;  %s6603_s27 = smov 0  }
   0x8 LB: > { %s6618_s28 = sadd.s32 4294967295, %s6544_s27   ;;  %s4902_s29 = sadd.s32 4294967294, %s6544_s27   ;;  %s6544_s27 = sphi %s6603_s27, %s8354_s27   ;;  %s6540_s26 = sphi %s6601_s26, %s8353_s26   ;;  %s6536_s25 = sphi %s6599_s25, %s8352_s25   ;;  %s6532_s24 = sphi %s6597_s24, %s8351_s24  }
   0x9   : > { %p44_p0 = scmp.ne.s32.totalorder %s6536_s25, %s6532_s24  ;;  %p8301_p1 = scmp.eq.s32.totalorder %s6618_s28, 0 }
   0xa   : > { %p200_p3 = scmp.eq.s32.totalorder %s4902_s29, 1  ;;  %p4903_p5 = scmp.ge.s32.totalorder %s6544_s27, 1 }
   0xb   : > { %p6627_p4 = por %p8301_p1, %p44_p0  ;;  %p207_p7 = scmp.lt.s32.totalorder %s6544_s27, 3 }
   0xc   : > { %p6632_p6 = por %p200_p3, %p44_p0  ;;  %s6546_s10 = smov [#allocation6]  }
   0xd   : > { %s8306_s30 = scalar_select %p6627_p4, 1, 0 }
   0xe   : > { %s8307_s8 = scalar_select %p6632_p6, 1, 0 }
   0xf   : > { %p6637_p8 = pnand %p4903_p5, %p207_p7  ;;  %s219_s11 = sshll.u32 %s6546_s10, 4  ;;  %s220_s11 = int_to_ptr.vmem [resolvable:$true] %s219_s11 }
  0x10   : > { %s6547_s13 = smov [#allocation8]   ;;  %s6407_s15 = scalar_lea.vmem %s220_s11, 9216 }
  0x11   : > { %s8308_s9 = scalar_select %p6637_p8, 1, 0 }
  0x12   : > { %p6186_p9 = pneg %p6637_p8  ;;  %s238_s14 = sshll.u32 %s6547_s13, 4  ;;  %s239_s14 = int_to_ptr.vmem [resolvable:$true] %s238_s14 }
  0x13   : > { %p6408_p13 = scmp.ne.s32.totalorder %s220_s11, %s6407_s15  ;;  %p6415_p5 = scmp.lt.s32.totalorder %s220_s11, %s220_s11 }
  0x14   : > { %p6646_p11 = pnand %p6186_p9, %p8301_p1  ;;  %p6416_p7 = scmp.lt.s32.totalorder %s6407_s15, %s6407_s15 }
  0x16   : > { %p6398_p12 = pneg %p6646_p11  ;;  %p6417_p10 = por %p6416_p7, %p6415_p5 }
  0x18   : > { %p6410_p0 = pnand %p6408_p13, %p6398_p12 }
  0x1a   : > { %p6411_p3 = pneg %p6410_p0 }
  0x1c   : > { %p6418_p9 = pnand %p6417_p10, %p6411_p3 }
  0x1e   : > { %6421 = shalt.err (!%p6418_p9)
}
  0x1f   : > { %s6548_s16 = smov 64   ;;  %s6549_s17 = smov 4  }
  0x20   : > { %s8310_s1 = sld [smem:[#allocation28_spill]]  ;;  %s6433_s20 = scalar_lea.vmem %s239_s14, 9216 }
  0x21   : > { %p6434_p1 = scmp.ne.s32.totalorder %s239_s14, %s6433_s20  ;;  %p6441_p2 = scmp.lt.s32.totalorder %s239_s14, %s239_s14 }
  0x22   : > { %p6442_p6 = scmp.lt.s32.totalorder %s6433_s20, %s6433_s20 }
  0x23   : > { %p6436_p13 = pnand %p6434_p1, %p6398_p12 }
  0x24   : > { %p6443_p5 = por %p6442_p6, %p6441_p2 }
  0x25   : > { %p6437_p0 = pneg %p6436_p13 }
  0x26   : > { %6189 = dma.hbm_to_vmem [thread:$0]  (!%p6646_p11), %s8310_s1, 9216, %s220_s11, [#allocation7], %s6548_s16, %s6548_s16, %s6549_s17  }
  0x27   : > { %p6444_p10 = pnand %p6443_p5, %p6437_p0 }
  0x29   : > { %6447 = shalt.err (!%p6444_p10)
}
  0x2a   : > { %6192 = dma.hbm_to_vmem [thread:$0]  (!%p6646_p11), %s8297_s4, 9216, %s239_s14, [#allocation7], %s6548_s16, %s6548_s16, %s6549_s17  }
  0x2b   : > { %s6669_s23 = sadd.s32 1, %s6544_s27   ;;  %s31_s29 = sadd.s32 1, %s6540_s26 }
  0x2c   : > { %s28_s10 = ssub.s32 %s6544_s27, %s6669_s23  ;;  %p38_p1 = scmp.ne.s32.totalorder %s6540_s26, %s6536_s25 }
  0x2d   : > { %p29_p2 = scmp.eq.s32.totalorder %s28_s10, 0  ;;  %p39_p6 = scmp.eq.s32.totalorder %s6544_s27, 0 }
  0x2e   : > { %p8311_p12 = scmp.eq.s32.totalorder %s6618_s28, 1  ;;  %p6203_p7 = scmp.lt.s32.totalorder %s6544_s27, 2 }
  0x2f   : > { %s6685_s12 = scalar_select %p29_p2, %s6540_s26, %s31_s29  }
  0x30   : > { %p6679_p3 = por %p8311_p12, %p38_p1  ;;  %p40_p9 = por %p39_p6, %p38_p1 }
  0x31   : > { %s258_s13 = sand.u32 1, %s6540_s26   ;;  %s5068_s14 = sshll.u32 %s6544_s27, 12 }
  0x32   : > { %s8312_s11 = scalar_select %p6679_p3, 1, 0 }
  0x33   : > { %s4907_s15 = sshll.u32 %s258_s13, 8  ;;  %s6692_s18 = scalar_lea.hbm %s8293_s0, %s5068_s14 }
  0x34   : > { %s262_s19 = scalar_lea.vmem [#allocation3], %s4907_s15  ;;  %p6696_p11 = pnand %p6203_p7, %p40_p9 }
  0x35   : > { %s269_s20 = sshll.u32 %s262_s19, 4  ;;  %s6700_s22 = scalar_lea.sflag [#allocation4], %s258_s13  ;;  %s6694_s20 = int_to_ptr.vmem [resolvable:$true] %s269_s20 }
  0x36   : > { %s6448_s29 = scalar_lea.hbm %s6692_s18, 4096  ;;  %p6450_p0 = pneg %p6696_p11 }
  0x37   : > { %p6449_p13 = scmp.ne.s32.totalorder %s6692_s18, %s6448_s29  ;;  %s6453_s15 = scalar_lea.hbm %s8293_s0, 8192 }
  0x38   : > { %p6454_p1 = scmp.lt.s32.totalorder %s6692_s18, %s8293_s0  ;;  %p6455_p2 = scmp.lt.s32.totalorder %s6453_s15, %s6448_s29 }
  0x39   : > { %p6451_p5 = pnand %p6450_p0, %p6449_p13 }
  0x3a   : > { %p6456_p6 = por %p6455_p2, %p6454_p1 }
  0x3b   : > { %p6452_p10 = pneg %p6451_p5 }
  0x3d   : > { %p6457_p12 = pnand %p6456_p6, %p6452_p10 }
  0x3f   : > { %6460 = shalt.err (!%p6457_p12)
}
  0x40   : > { %s6461_s13 = scalar_lea.vmem %s6694_s20, 4096  ;;  %s6550_s19 = smov [#allocation3]  }
  0x41   : > { %p6462_p7 = scmp.ne.s32.totalorder %s6694_s20, %s6461_s13  ;;  %s6466_s1 = sshll.u32 %s6550_s19, 4  ;;  %s6467_s1 = int_to_ptr.vmem [resolvable:$false] %s6466_s1 }
  0x42   : > { %s6468_s10 = scalar_lea.vmem %s6467_s1, 8192  ;;  %p6469_p5 = scmp.lt.s32.totalorder %s6694_s20, %s6467_s1 }
  0x43   : > { %p6464_p9 = pnand %p6462_p7, %p6450_p0  ;;  %p6470_p3 = scmp.lt.s32.totalorder %s6468_s10, %s6461_s13 }
  0x45   : > { %p6465_p13 = pneg %p6464_p9  ;;  %p6471_p4 = por %p6470_p3, %p6469_p5 }
  0x47   : > { %p6472_p8 = pnand %p6471_p4, %p6465_p13 }
  0x49   : > { %6475 = shalt.err (!%p6472_p8)
}
  0x4a   : > { %s6551_s29 = smov 128   ;;  %s6552_s14 = smov 8  }
  0x4b   : > { %6196 = dma.hbm_to_vmem [thread:$0]  (!%p6696_p11), %s6692_s18, 4096, %s6694_s20, %s6700_s22, %s6551_s29, %s6551_s29, %s6552_s14  }
  0x4c   : > { %p8314_p0 = scmp.ne.s32.totalorder %s8308_s9, 0 }
  0x4e   : > { %281 = sbr.rel (%p8314_p0) target bundleno = 1077 (0x435), region = 48 }
  0x53   : > { %s6724_s15 = sand.u32 1, %s6536_s25   ;;  %p8315_p4 = scmp.ne.s32.totalorder %s8306_s30, 0 }
  0x54   : > { %s4911_s1 = sshll.u32 %s6724_s15, 8  ;;  %s284_s16 = scalar_lea.sflag [#allocation4], %s6724_s15 }
  0x55   : > { %s6730_s17 = scalar_lea.vmem [#allocation3], %s4911_s1 }
  0x56   : > { %6519 = dma.done.wait (%p8315_p4), %s284_s16, 4096  }
  0x57   : > { %6521 = vsyncadd (%p8315_p4), %s284_s16, 4294963200  ;;  %p8316_p8 = scmp.eq.s32.totalorder %s6618_s28, 0 }
  0x59   : > { %6523 = dma.done.wait (%p8316_p8), [#allocation7], 18432   ;;  %p8317_p3 = pmov %p8316_p8 }
  0x5a   : > { %v6553_v0 = vmov 0.0   ;;  %v6248_v1 = vld [vmem:[#allocation6 + $0x138] sm:$0xff]   ;;  %v6251_v4 = vld [vmem:[#allocation6 + $0x130] sm:$0xff]   ;;  %v6254_v7 = vld [vmem:[#allocation6 + $0x128] sm:$0xff]   ;;  %s8034_s30 = scalar_lea.vmem [#allocation9], %s4911_s1  ;;  %s5069_s1 = sshll.u32 %s6618_s28, 12 }
  0x5b   : > { %6525 = vsyncadd (%p8317_p3), [#allocation7], 4294948864  ;;  %353 = vst [vmem:[#allocation2 + $0x29] sm:$0x7f] %v6553_v0  ;;  %v6249_v2 = vld [vmem:[#allocation6 + $0x178] sm:$0xff]   ;;  %5070 = vmatprep.subr.bf16.mxu0 %v6248_v1  ;;  %v6252_v5 = vld [vmem:[#allocation6 + $0x170] sm:$0xff]   ;;  %s8247_s21 = scalar_lea.hbm %s8300_s7, %s5069_s1 }
  0x5c   : > { %327 = vst [vmem:[#allocation2] sm:$0xff] %v6553_v0  ;;  %328 = vst [vmem:[#allocation2 + $0x8] sm:$0xff] %v6553_v0  ;;  %v6250_v3 = vld [vmem:[#allocation6 + $0xf8] sm:$0xff]   ;;  %5886 = vmatprep.subr.bf16.mxu1 %v6249_v2  ;;  %v6253_v6 = vld [vmem:[#allocation6 + $0xf0] sm:$0xff]   ;;  %s4810_s9 = sshll.u32 %s8034_s30, 4  ;;  %p8348_p10 = scmp.ne.s32.totalorder %s8312_s11, 0  ;;  %s8249_s9 = int_to_ptr.vmem [resolvable:$true] %s4810_s9 }
  0x5d   : > { %329 = vst [vmem:[#allocation2 + $0x10] sm:$0xff] %v6553_v0  ;;  %331 = vst [vmem:[#allocation2 + $0x198] sm:$0xff] %v6553_v0  ;;  %5071 = vmatpush3.bf16.msra.mxu0 %v6250_v3  ;;  %5887 = vmatpush3.bf16.msra.mxu1 %v6249_v2  ;;  %v6255_v8 = vld [vmem:[#allocation6 + $0x168] sm:$0xff]   ;;  %v6257_v10 = vld [vmem:[#allocation6 + $0x120] sm:$0xff]   ;;  %s6476_s22 = scalar_lea.vmem %s8249_s9, 4096  ;;  %s6554_s28 = smov [#allocation9]  }
  0x5e   : > { %332 = vst [vmem:[#allocation2 + $0x1a0] sm:$0xff] %v6553_v0  ;;  %333 = vst [vmem:[#allocation2 + $0x1a8] sm:$0xff] %v6553_v0  ;;  %5072 = vmatprep.subr.bf16.mxu0 %v6251_v4  ;;  %5888 = vmatprep.subr.bf16.mxu1 %v6252_v5  ;;  %v6256_v9 = vld [vmem:[#allocation6 + $0xe8] sm:$0xff]   ;;  %v6258_v11 = vld [vmem:[#allocation6 + $0x160] sm:$0xff]   ;;  %p6477_p11 = scmp.ne.s32.totalorder %s8249_s9, %s6476_s22  ;;  %s6480_s13 = sshll.u32 %s6554_s28, 4  ;;  %s6481_s13 = int_to_ptr.vmem [resolvable:$false] %s6480_s13 }
  0x5f   : > { %335 = vst [vmem:[#allocation2 + $0x18] sm:$0x1] %v6553_v0  ;;  %336 = vst [vmem:[#allocation2 + $0x30] sm:$0x1] %v6553_v0  ;;  %v6259_v12 = vld [vmem:[#allocation6 + $0xe0] sm:$0xff]   ;;  %v6260_v13 = vld [vmem:[#allocation6 + $0x118] sm:$0xff]   ;;  %p6483_p6 = scmp.lt.s32.totalorder %s8249_s9, %s6481_s13 }
  0x60   : > { %337 = vst [vmem:[#allocation2 + $0x48] sm:$0x1] %v6553_v0  ;;  %338 = vst [vmem:[#allocation2 + $0x60] sm:$0x1] %v6553_v0  ;;  %v6261_v14 = vld [vmem:[#allocation6 + $0x158] sm:$0xff]   ;;  %v6263_v16 = vld [vmem:[#allocation6 + $0x110] sm:$0xff]   ;;  %p6478_p1 = pnand %p6477_p11, %p8348_p10 }
  0x61   : > { %339 = vst [vmem:[#allocation2 + $0x78] sm:$0x1] %v6553_v0  ;;  %340 = vst [vmem:[#allocation2 + $0x90] sm:$0x1] %v6553_v0  ;;  %5073 = vmatpush3.bf16.msra.mxu0 %v6253_v6  ;;  %5889 = vmatpush3.bf16.msra.mxu1 %v6252_v5  ;;  %v6262_v15 = vld [vmem:[#allocation6 + $0xd8] sm:$0xff]   ;;  %v6264_v17 = vld [vmem:[#allocation6 + $0x150] sm:$0xff]  }
  0x62   : > { %341 = vst [vmem:[#allocation2 + $0xa8] sm:$0x1] %v6553_v0  ;;  %342 = vst [vmem:[#allocation2 + $0xc0] sm:$0x1] %v6553_v0  ;;  %5074 = vmatprep.subr.bf16.mxu0 %v6254_v7  ;;  %5890 = vmatprep.subr.bf16.mxu1 %v6255_v8  ;;  %v6265_v18 = vld [vmem:[#allocation6 + $0xd0] sm:$0xff]   ;;  %v6266_v19 = vld [vmem:[#allocation6 + $0x108] sm:$0xff]   ;;  %p6479_p2 = pneg %p6478_p1 }
  0x63   : > { %343 = vst [vmem:[#allocation2 + $0xd8] sm:$0x1] %v6553_v0  ;;  %344 = vst [vmem:[#allocation2 + $0xf0] sm:$0x1] %v6553_v0  ;;  %v6267_v20 = vld [vmem:[#allocation6 + $0x148] sm:$0xff]   ;;  %v6269_v22 = vld [vmem:[#allocation6 + $0x100] sm:$0xff]  }
  0x64   : > { %345 = vst [vmem:[#allocation2 + $0x108] sm:$0x1] %v6553_v0  ;;  %346 = vst [vmem:[#allocation2 + $0x120] sm:$0x1] %v6553_v0  ;;  %v6268_v21 = vld [vmem:[#allocation6 + $0xc8] sm:$0xff]   ;;  %v6270_v23 = vld [vmem:[#allocation6 + $0x140] sm:$0xff]  }
  0x65   : > { %347 = vst [vmem:[#allocation2 + $0x138] sm:$0x1] %v6553_v0  ;;  %348 = vst [vmem:[#allocation2 + $0x150] sm:$0x1] %v6553_v0  ;;  %5075 = vmatpush3.bf16.msra.mxu0 %v6256_v9  ;;  %5891 = vmatpush3.bf16.msra.mxu1 %v6255_v8  ;;  %v370_v24 = vld [vmem:[%s6730_s17] sm:$0xff]  ;;  %v371_v25 = vld [vmem:[%s6730_s17 + $0x8] sm:$0xff] }
  0x66   : > { %349 = vst [vmem:[#allocation2 + $0x168] sm:$0x1] %v6553_v0  ;;  %350 = vst [vmem:[#allocation2 + $0x180] sm:$0x1] %v6553_v0  ;;  %5076 = vmatprep.subr.bf16.mxu0 %v6257_v10  ;;  %5892 = vmatprep.subr.bf16.mxu1 %v6258_v11  ;;  %v372_v26 = vld [vmem:[%s6730_s17 + $0x10] sm:$0xff]  ;;  %v6785_v27 = vpack.c.bf16 %v371_v25, %v370_v24  ;;  %v373_v28 = vld [vmem:[%s6730_s17 + $0x18] sm:$0xff] }
  0x67   : > { %354 = vst [vmem:[#allocation2 + $0x41] sm:$0x7f] %v6553_v0  ;;  %355 = vst [vmem:[#allocation2 + $0x59] sm:$0x7f] %v6553_v0  ;;  %v6271_v29 = vld [vmem:[#allocation6 + $0xc0] sm:$0xff]   ;;  %v6272_v30 = vld [vmem:[#allocation6 + $0xb8] sm:$0xff]   ;;  %v6809_v47 = vpack.c.bf16 %v373_v28, %v372_v26 }
  0x68   : > { %356 = vst [vmem:[#allocation2 + $0x71] sm:$0x7f] %v6553_v0  ;;  %357 = vst [vmem:[#allocation2 + $0x89] sm:$0x7f] %v6553_v0  ;;  %995 = vmatprep.mubr.bf16.mxu0 %v6785_v27  ;;  %v6273_v31 = vld [vmem:[#allocation6 + $0x78] sm:$0xff]   ;;  %v374_v32 = vld [vmem:[%s6730_s17 + $0x20] sm:$0xff] }
  0x69   : > { %358 = vst [vmem:[#allocation2 + $0xa1] sm:$0x7f] %v6553_v0  ;;  %359 = vst [vmem:[#allocation2 + $0xb9] sm:$0x7f] %v6553_v0  ;;  %5077 = vmatpush3.bf16.msra.mxu0 %v6259_v12  ;;  %5893 = vmatpush3.bf16.msra.mxu1 %v6258_v11  ;;  %v375_v33 = vld [vmem:[%s6730_s17 + $0x28] sm:$0xff]  ;;  %v6792_v34 = vld [vmem:[%s6730_s17 + $0x30] sm:$0xff] }
  0x6a   : > { %360 = vst [vmem:[#allocation2 + $0xd1] sm:$0x7f] %v6553_v0  ;;  %361 = vst [vmem:[#allocation2 + $0xe9] sm:$0x7f] %v6553_v0  ;;  %5078 = vmatprep.subr.bf16.mxu0 %v6260_v13  ;;  %5894 = vmatprep.subr.bf16.mxu1 %v6261_v14  ;;  %v6795_v35 = vld [vmem:[%s6730_s17 + $0x38] sm:$0xff]  ;;  %v6800_v37 = vld [vmem:[%s6730_s17 + $0x40] sm:$0xff]  ;;  %v6837_v2 = vpack.c.bf16 %v375_v33, %v374_v32 }
  0x6b   : > { %362 = vst [vmem:[#allocation2 + $0x101] sm:$0x7f] %v6553_v0  ;;  %363 = vst [vmem:[#allocation2 + $0x119] sm:$0x7f] %v6553_v0  ;;  %v6274_v36 = vld [vmem:[#allocation6 + $0x38] sm:$0xff]   ;;  %v6275_v48 = vld [vmem:[#allocation6 + $0x70] sm:$0xff]  }
  0x6c   : > { %364 = vst [vmem:[#allocation2 + $0x131] sm:$0x7f] %v6553_v0  ;;  %365 = vst [vmem:[#allocation2 + $0x149] sm:$0x7f] %v6553_v0  ;;  %v6812_v49 = vld [vmem:[%s6730_s17 + $0x48] sm:$0xff]  ;;  %v6276_v50 = vld [vmem:[#allocation6 + $0x30] sm:$0xff]  }
  0x6d   : > { %366 = vst [vmem:[#allocation2 + $0x161] sm:$0x7f] %v6553_v0  ;;  %367 = vst [vmem:[#allocation2 + $0x179] sm:$0x7f] %v6553_v0  ;;  %5079 = vmatpush3.bf16.msra.mxu0 %v6262_v15  ;;  %5895 = vmatpush3.bf16.msra.mxu1 %v6261_v14  ;;  %v6817_v51 = vld [vmem:[%s6730_s17 + $0x50] sm:$0xff]  ;;  %v6820_v52 = vld [vmem:[%s6730_s17 + $0x58] sm:$0xff] }
  0x6e   : > { %368 = vst [vmem:[#allocation2 + $0x191] sm:$0x7f] %v6553_v0  ;;  %334 = vst [vmem:[#allocation2] sm:$0x1] %v6553_v0  ;;  %5080 = vmatprep.subr.bf16.mxu0 %v6263_v16  ;;  %5896 = vmatprep.subr.bf16.mxu1 %v6264_v17  ;;  %v6277_v60 = vld [vmem:[#allocation6 + $0xb0] sm:$0xff]   ;;  %v6278_v61 = vld [vmem:[#allocation6 + $0x68] sm:$0xff]  }
  0x6f   : > { %351 = vst [vmem:[#allocation2 + $0x198] sm:$0x1] %v6553_v0  ;;  %352 = vst [vmem:[#allocation2 + $0x11] sm:$0x7f] %v6553_v0  ;;  %v6835_v1 = vld [vmem:[%s6730_s17 + $0x60] sm:$0xff]  ;;  %v6279_v3 = vld [vmem:[#allocation6 + $0x28] sm:$0xff]  }
  0x70   : > { %369 = vst [vmem:[#allocation2 + $0x1a9] sm:$0x7f] %v6553_v0  ;;  %403 = vst [vmem:[#allocation2 + $0x19] sm:$0xff] %v370_v24  ;;  %v6840_v4 = vld [vmem:[%s6730_s17 + $0x68] sm:$0xff]  ;;  %v6845_v7 = vld [vmem:[%s6730_s17 + $0x70] sm:$0xff]  ;;  %s6482_s19 = scalar_lea.vmem %s6481_s13, 8192 }
  0x71   : > { %5081 = vmatpush3.bf16.msra.mxu0 %v6265_v18  ;;  %5897 = vmatpush3.bf16.msra.mxu1 %v6264_v17  ;;  %404 = vst [vmem:[#allocation2 + $0x21] sm:$0xff] %v371_v25  ;;  %405 = vst [vmem:[#allocation2 + $0x31] sm:$0xff] %v372_v26  ;;  %v6850_v12 = vld [vmem:[%s6730_s17 + $0x78] sm:$0xff]  ;;  %v6280_v13 = vld [vmem:[#allocation6 + $0x60] sm:$0xff]   ;;  %p6484_p12 = scmp.lt.s32.totalorder %s6482_s19, %s6476_s22 }
  0x72   : > { %5082 = vmatprep.subr.bf16.mxu0 %v6266_v19  ;;  %5898 = vmatprep.subr.bf16.mxu1 %v6267_v20  ;;  %406 = vst [vmem:[#allocation2 + $0x39] sm:$0xff] %v373_v28  ;;  %407 = vst [vmem:[#allocation2 + $0x49] sm:$0xff] %v374_v32  ;;  %v6281_v15 = vld [vmem:[#allocation6 + $0x20] sm:$0xff]   ;;  %v6862_v17 = vld [vmem:[%s6730_s17 + $0x88] sm:$0xff] }
  0x73   : > { %408 = vst [vmem:[#allocation2 + $0x51] sm:$0xff] %v375_v33  ;;  %409 = vst [vmem:[#allocation2 + $0x61] sm:$0xff] %v6792_v34  ;;  %v6859_v16 = vld [vmem:[%s6730_s17 + $0x80] sm:$0xff]  ;;  %v6867_v18 = vld [vmem:[%s6730_s17 + $0x90] sm:$0xff]  ;;  %p6485_p7 = por %p6484_p12, %p6483_p6 }
  0x74   : > { %410 = vst [vmem:[#allocation2 + $0x69] sm:$0xff] %v6795_v35  ;;  %411 = vst [vmem:[#allocation2 + $0x79] sm:$0xff] %v6800_v37  ;;  %v6870_v19 = vld [vmem:[%s6730_s17 + $0x98] sm:$0xff]  ;;  %v6887_v32 = vld [vmem:[%s6730_s17 + $0xa0] sm:$0xff] }
  0x75   : > { %5083 = vmatpush3.bf16.msra.mxu0 %v6268_v21  ;;  %5899 = vmatpush3.bf16.msra.mxu1 %v6267_v20  ;;  %412 = vst [vmem:[#allocation2 + $0x81] sm:$0xff] %v6812_v49  ;;  %413 = vst [vmem:[#allocation2 + $0x91] sm:$0xff] %v6817_v51  ;;  %v6283_v28 = vld [vmem:[#allocation6 + $0x58] sm:$0xff]   ;;  %v6890_v33 = vld [vmem:[%s6730_s17 + $0xa8] sm:$0xff]  ;;  %p6486_p9 = pnand %p6485_p7, %p6479_p2 }
  0x76   : > { %5084 = vmatprep.subr.bf16.mxu0 %v6269_v22  ;;  %5900 = vmatprep.subr.bf16.mxu1 %v6270_v23  ;;  %414 = vst [vmem:[#allocation2 + $0x99] sm:$0xff] %v6820_v52  ;;  %415 = vst [vmem:[#allocation2 + $0xa9] sm:$0xff] %v6835_v1  ;;  %v6282_v22 = vld [vmem:[#allocation6 + $0xa8] sm:$0xff]  }
  0x77   : > { %v627_v40 = vld [vmem:[#allocation2 + $0x18] sm:$0xff]  ;;  %416 = vst [vmem:[#allocation2 + $0xb1] sm:$0xff] %v6840_v4  ;;  %417 = vst [vmem:[#allocation2 + $0xc1] sm:$0xff] %v6845_v7 }
  0x78   : > { %v723_v38 = vld [vmem:[#allocation2 + $0x1a] sm:$0xff]  ;;  %v724_v39 = vld [vmem:[#allocation2 + $0x22] sm:$0xff]  ;;  %v629_v55 = vld [vmem:[#allocation2 + $0x30] sm:$0xff]  ;;  %418 = vst [vmem:[#allocation2 + $0xc9] sm:$0xff] %v6850_v12 }
  0x79   : > { %5085 = vmatpush3.bf16.msra.mxu0 %v6271_v29  ;;  %5901 = vmatpush3.bf16.msra.mxu1 %v6270_v23  ;;  %v6803_v41 = vpack.c.bf16 %v724_v39, %v723_v38  ;;  %v628_v42 = vld [vmem:[#allocation2 + $0x20] sm:$0xff]  ;;  %v725_v43 = vld [vmem:[#allocation2 + $0x32] sm:$0xff]  ;;  %v631_v9 = vld [vmem:[#allocation2 + $0x48] sm:$0xff]  ;;  %419 = vst [vmem:[#allocation2 + $0xd9] sm:$0xff] %v6859_v16  ;;  %v6880_v23 = vpack.c.bf16 %v6795_v35, %v6792_v34 }
  0x7a   : > { %v726_v44 = vld [vmem:[#allocation2 + $0x3a] sm:$0xff]  ;;  %5934 = vmatprep.subr.bf16.mxu0 %v6272_v30  ;;  %5206 = vmatprep.subr.bf16.mxu1 %v6273_v31  ;;  %v6805_v45 = vpack.c.bf16 %v628_v42, %v627_v40  ;;  %v727_v53 = vld [vmem:[#allocation2 + $0x4a] sm:$0xff]  ;;  %v728_v54 = vld [vmem:[#allocation2 + $0x52] sm:$0xff]  ;;  %420 = vst [vmem:[#allocation2 + $0xe1] sm:$0xff] %v6862_v17 }
  0x7b   : > { %v6807_v46 = vpack.c.bf16 %v726_v44, %v725_v43  ;;  %5902 = vmatprep.mubr.bf16.mxu1 %v6803_v41  ;;  %v6826_v56 = vpack.c.bf16 %v728_v54, %v727_v53  ;;  %v630_v57 = vld [vmem:[#allocation2 + $0x38] sm:$0xff]  ;;  %v729_v58 = vld [vmem:[#allocation2 + $0x62] sm:$0xff]  ;;  %v730_v59 = vld [vmem:[#allocation2 + $0x6a] sm:$0xff]  ;;  %421 = vst [vmem:[#allocation2 + $0xf1] sm:$0xff] %v6867_v18 }
  0x7c   : > { %996 = vmatmul.mubr.bf16.vlgmr.msra.gmra.mxu0 %v6805_v45  ;;  %v6830_v62 = vpack.c.bf16 %v630_v57, %v629_v55  ;;  %v6832_v63 = vpack.c.bf16 %v730_v59, %v729_v58  ;;  %v731_v5 = vld [vmem:[#allocation2 + $0x7a] sm:$0xff]  ;;  %v732_v6 = vld [vmem:[#allocation2 + $0x82] sm:$0xff]  ;;  %v632_v10 = vld [vmem:[#allocation2 + $0x50] sm:$0xff]  ;;  %422 = vst [vmem:[#allocation2 + $0xf9] sm:$0xff] %v6870_v19 }
  0x7d   : > { %5903 = vmatmul.mubr.bf16.vlgmr.msra.gmra.mxu1 %v6807_v46  ;;  %5935 = vmatpush3.bf16.msra.mxu0 %v6272_v30  ;;  %v6847_v8 = vpack.c.bf16 %v732_v6, %v731_v5  ;;  %v733_v11 = vld [vmem:[#allocation2 + $0x92] sm:$0xff]  ;;  %v734_v14 = vld [vmem:[#allocation2 + $0x9a] sm:$0xff]  ;;  %v6872_v20 = vpack.c.bf16 %v632_v10, %v631_v9  ;;  %v634_v30 = vld [vmem:[#allocation2 + $0x68] sm:$0xff]  ;;  %423 = vst [vmem:[#allocation2 + $0x109] sm:$0xff] %v6887_v32 }
  0x7e   : > { %5207 = vmatpush3.bf16.msra.mxu1 %v6274_v36  ;;  %1003 = vmatprep.mubr.bf16.mxu0 %v6809_v47  ;;  %v6874_v21 = vpack.c.bf16 %v734_v14, %v733_v11  ;;  %v735_v24 = vld [vmem:[#allocation2 + $0xaa] sm:$0xff]  ;;  %v736_v25 = vld [vmem:[#allocation2 + $0xb2] sm:$0xff]  ;;  %v633_v29 = vld [vmem:[#allocation2 + $0x60] sm:$0xff]  ;;  %424 = vst [vmem:[#allocation2 + $0x111] sm:$0xff] %v6890_v33 }
  0x7f   : > { %5208 = vmatprep.subr.bf16.mxu1 %v6275_v48  ;;  %5906 = vmatprep.mubr.bf16.mxu1 %v6826_v56  ;;  %v6882_v26 = vpack.c.bf16 %v736_v25, %v735_v24  ;;  %v6284_v31 = vld [vmem:[#allocation6 + $0x18] sm:$0xff]   ;;  %v6897_v36 = vld [vmem:[%s6730_s17 + $0xb0] sm:$0xff]  ;;  %v6904_v42 = vpack.c.bf16 %v634_v30, %v633_v29  ;;  %v6910_v48 = vpack.c.bf16 %v6812_v49, %v6800_v37  ;;  %v394_v54 = vld [vmem:[%s6730_s17 + $0xc0] sm:$0xff] }
  0x80   : > { %5936 = vmatprep.subr.bf16.mxu0 %v6277_v60  ;;  %v737_v34 = vld [vmem:[#allocation2 + $0xc2] sm:$0xff]  ;;  %v738_v35 = vld [vmem:[#allocation2 + $0xca] sm:$0xff]  ;;  %425 = vst [vmem:[#allocation2 + $0x121] sm:$0xff] %v6897_v36  ;;  %v395_v55 = vld [vmem:[%s6730_s17 + $0xc8] sm:$0xff]  ;;  %v6934_v24 = vpack.c.bf16 %v6820_v52, %v6817_v51 }
  0x81   : > { %5937 = vmatpush3.bf16.msra.mxu0 %v6277_v60  ;;  %v739_v38 = vld [vmem:[#allocation2 + $0xda] sm:$0xff]  ;;  %v740_v39 = vld [vmem:[#allocation2 + $0xe2] sm:$0xff]  ;;  %v6906_v43 = vpack.c.bf16 %v738_v35, %v737_v34  ;;  %427 = vst [vmem:[#allocation2 + $0x139] sm:$0xff] %v394_v54  ;;  %428 = vst [vmem:[#allocation2 + $0x141] sm:$0xff] %v395_v55 }
  0x82   : > { %5209 = vmatpush3.bf16.msra.mxu1 %v6276_v50  ;;  %5938 = vmatprep.subr.bf16.mxu0 %v6282_v22  ;;  %v6900_v40 = vld [vmem:[%s6730_s17 + $0xb8] sm:$0xff]  ;;  %v6285_v44 = vld [vmem:[#allocation6 + $0x50] sm:$0xff]   ;;  %v6912_v50 = vpack.c.bf16 %v740_v39, %v739_v38  ;;  %v635_v57 = vld [vmem:[#allocation2 + $0x78] sm:$0xff] }
  0x83   : > { %5210 = vmatprep.subr.bf16.mxu1 %v6278_v61  ;;  %426 = vst [vmem:[#allocation2 + $0x129] sm:$0xff] %v6900_v40  ;;  %v6286_v53 = vld [vmem:[#allocation6 + $0x10] sm:$0xff]   ;;  %v397_v60 = vld [vmem:[%s6730_s17 + $0xd8] sm:$0xff]  ;;  %v6918_v61 = vpack.c.bf16 %v395_v55, %v394_v54  ;;  %v741_v37 = vld [vmem:[#allocation2 + $0xf2] sm:$0xff] }
  0x84   : > { %1004 = vmatmul.mubr.bf16.gmra.mxu0 %v6830_v62  ;;  %v636_v58 = vld [vmem:[#allocation2 + $0x80] sm:$0xff]  ;;  %430 = vst [vmem:[#allocation2 + $0x159] sm:$0xff] %v397_v60  ;;  %v6287_v5 = vld [vmem:[#allocation6 + $0xa0] sm:$0xff]   ;;  %v6288_v10 = vld [vmem:[#allocation6 + $0x48] sm:$0xff]  }
  0x85   : > { %5907 = vmatmul.mubr.bf16.gmra.mxu1 %v6832_v63  ;;  %1011 = vmatprep.mubr.bf16.mxu0 %v6837_v2  ;;  %v396_v59 = vld [vmem:[%s6730_s17 + $0xd0] sm:$0xff]  ;;  %v743_v6 = vld [vmem:[#allocation2 + $0x10a] sm:$0xff]  ;;  %v744_v9 = vld [vmem:[#allocation2 + $0x112] sm:$0xff] }
  0x86   : > { %5910 = vmatprep.mubr.bf16.mxu1 %v6847_v8  ;;  %5211 = vmatpush3.bf16.msra.mxu1 %v6279_v3  ;;  %v742_v49 = vld [vmem:[#allocation2 + $0xfa] sm:$0xff]  ;;  %429 = vst [vmem:[#allocation2 + $0x151] sm:$0xff] %v396_v59  ;;  %v6922_v3 = vpack.c.bf16 %v397_v60, %v396_v59  ;;  %v6936_v25 = vpack.c.bf16 %v744_v9, %v743_v6  ;;  %v6942_v29 = vld [vmem:[%s6730_s17 + $0xf8] sm:$0xff]  ;;  %v637_v51 = vld [vmem:[#allocation2 + $0x90] sm:$0xff] }
  0x87   : > { %5212 = vmatprep.subr.bf16.mxu1 %v6280_v13  ;;  %5939 = vmatpush3.bf16.msra.mxu0 %v6282_v22  ;;  %v6289_v11 = vld [vmem:[#allocation6 + $0x8] sm:$0xff]   ;;  %v6926_v13 = vpack.c.bf16 %v636_v58, %v635_v57  ;;  %v6928_v14 = vpack.c.bf16 %v742_v49, %v741_v37  ;;  %434 = vst [vmem:[#allocation2 + $0x189] sm:$0xff] %v6942_v29  ;;  %v6290_v34 = vld [vmem:[#allocation6 + $0x40] sm:$0xff]   ;;  %v6292_v54 = vld [vmem:[#allocation6 + $0x98] sm:$0xff]  }
  0x88   : > { %5940 = vmatprep.subr.bf16.mxu0 %v6287_v5  ;;  %v399_v22 = vld [vmem:[%s6730_s17 + $0xe8] sm:$0xff]  ;;  %v6291_v39 = vld [vmem:[#allocation6] sm:$0xff]   ;;  %v6960_v58 = vpack.c.bf16 %v6840_v4, %v6835_v1  ;;  %v6293_v60 = vld [vmem:[#allocation6 + $0x238] sm:$0xff]  }
  0x89   : > { %432 = vst [vmem:[#allocation2 + $0x171] sm:$0xff] %v399_v22  ;;  %v638_v52 = vld [vmem:[#allocation2 + $0x98] sm:$0xff]  ;;  %v639_v37 = vld [vmem:[#allocation2 + $0xa8] sm:$0xff]  ;;  %v640_v49 = vld [vmem:[#allocation2 + $0xb0] sm:$0xff] }
  0x8a   : > { %5213 = vmatpush3.bf16.msra.mxu1 %v6281_v15  ;;  %v398_v15 = vld [vmem:[%s6730_s17 + $0xe0] sm:$0xff]  ;;  %v745_v35 = vld [vmem:[#allocation2 + $0x122] sm:$0xff]  ;;  %v6954_v55 = vpack.c.bf16 %v638_v52, %v637_v51 }
  0x8b   : > { %5214 = vmatprep.subr.bf16.mxu1 %v6283_v28  ;;  %5941 = vmatpush3.bf16.msra.mxu0 %v6287_v5  ;;  %431 = vst [vmem:[#allocation2 + $0x169] sm:$0xff] %v398_v15  ;;  %v6939_v28 = vld [vmem:[%s6730_s17 + $0xf0] sm:$0xff]  ;;  %v6944_v30 = vpack.c.bf16 %v399_v22, %v398_v15  ;;  %v746_v38 = vld [vmem:[#allocation2 + $0x12a] sm:$0xff]  ;;  %v6974_v22 = vpack.c.bf16 %v6850_v12, %v6845_v7 }
  0x8c   : > { %1012 = vmatmul.mubr.bf16.gmra.mxu0 %v6872_v20  ;;  %433 = vst [vmem:[#allocation2 + $0x181] sm:$0xff] %v6939_v28  ;;  %v6956_v57 = vpack.c.bf16 %v746_v38, %v745_v35  ;;  %5942 = vmatprep.subr.bf16.mxu0 %v6292_v54  ;;  %v6294_v5 = vld [vmem:[#allocation6 + $0x90] sm:$0xff]   ;;  %v642_v35 = vld [vmem:[#allocation2 + $0xc8] sm:$0xff] }
  0x8d   : > { %5911 = vmatmul.mubr.bf16.gmra.mxu1 %v6874_v21  ;;  %1019 = vmatprep.mubr.bf16.mxu0 %v6880_v23  ;;  %v749_v6 = vld [vmem:[#allocation2 + $0x152] sm:$0xff]  ;;  %v750_v9 = vld [vmem:[#allocation2 + $0x15a] sm:$0xff]  ;;  %v6300_v12 = vld [vmem:[#allocation6 + $0x1f8] sm:$0xff]  }
  0x8e   : > { %5914 = vmatprep.mubr.bf16.mxu1 %v6882_v26  ;;  %5215 = vmatpush3.bf16.msra.mxu1 %v6284_v31  ;;  %v722_v31 = vpack.c.bf16 %v6942_v29, %v6939_v28  ;;  %v6970_v15 = vpack.c.bf16 %v750_v9, %v749_v6  ;;  %v641_v52 = vld [vmem:[#allocation2 + $0xc0] sm:$0xff]  ;;  %v754_v7 = vld [vmem:[#allocation2 + $0x18a] sm:$0xff]  ;;  %v6306_v28 = vld [vmem:[#allocation6 + $0x1a8] sm:$0xff]  }
  0x8f   : > { %5216 = vmatprep.subr.bf16.mxu1 %v6285_v44  ;;  %v747_v44 = vld [vmem:[#allocation2 + $0x13a] sm:$0xff]  ;;  %5943 = vmatpush3.bf16.msra.mxu0 %v6292_v54  ;;  %v6308_v29 = vld [vmem:[#allocation6 + $0x1e0] sm:$0xff]  }
  0x90   : > { %v752_v4 = vld [vmem:[#allocation2 + $0x172] sm:$0xff]  ;;  %5944 = vmatprep.subr.bf16.mxu0 %v6294_v5  ;;  %v483_v38 = vld [vmem:[#allocation2 + $0x1] sm:$0xff] }
  0x91   : > { %v644_v6 = vld [vmem:[#allocation2 + $0xe0] sm:$0xff] }
  0x92   : > { %5217 = vmatpush3.bf16.msra.mxu1 %v6286_v53  ;;  %v748_v53 = vld [vmem:[#allocation2 + $0x142] sm:$0xff]  ;;  %v751_v1 = vld [vmem:[#allocation2 + $0x16a] sm:$0xff] }
  0x93   : > { %5218 = vmatprep.subr.bf16.mxu1 %v6288_v10  ;;  %v6962_v59 = vpack.c.bf16 %v748_v53, %v747_v44  ;;  %5945 = vmatpush3.bf16.msra.mxu0 %v6294_v5  ;;  %v6296_v10 = vld [vmem:[#allocation6 + $0x88] sm:$0xff]   ;;  %v6976_v51 = vpack.c.bf16 %v752_v4, %v751_v1  ;;  %v753_v44 = vld [vmem:[#allocation2 + $0x182] sm:$0xff]  ;;  %v6982_v53 = vpack.c.bf16 %v642_v35, %v641_v52 }
  0x94   : > { %1020 = vmatmul.mubr.bf16.gmra.mxu0 %v6904_v42  ;;  %5946 = vmatprep.subr.bf16.mxu0 %v6296_v10  ;;  %v770_v54 = vpack.c.bf16 %v754_v7, %v753_v44  ;;  %v643_v5 = vld [vmem:[#allocation2 + $0xd8] sm:$0xff]  ;;  %v435_v9 = vld [vmem:[#allocation2] sm:$0xff]  ;;  %v650_v44 = vld [vmem:[#allocation2 + $0x128] sm:$0xff] }
  0x95   : > { %5915 = vmatmul.mubr.bf16.gmra.mxu1 %v6906_v43  ;;  %1027 = vmatprep.mubr.bf16.mxu0 %v6910_v48  ;;  %v6990_v1 = vpack.c.bf16 %v644_v6, %v643_v5  ;;  %v467_v4 = vpack.c.bf16 %v6553_v0, %v435_v9  ;;  %v646_v52 = vld [vmem:[#allocation2 + $0xf8] sm:$0xff]  ;;  %v7004_v0 = vpack.c.bf16 %v6890_v33, %v6887_v32  ;;  %v6307_v33 = vld [vmem:[#allocation6 + $0x210] sm:$0xff]   ;;  %v653_v7 = vld [vmem:[#allocation2 + $0x150] sm:$0xff] }
  0x96   : > { %5918 = vmatprep.mubr.bf16.mxu1 %v6912_v50  ;;  %5219 = vmatpush3.bf16.msra.mxu1 %v6289_v11  ;;  %v6968_v11 = vpack.c.bf16 %v640_v49, %v639_v37  ;;  %v6986_v37 = vpack.c.bf16 %v6862_v17, %v6859_v16  ;;  %v6295_v16 = vld [vmem:[#allocation6 + $0x230] sm:$0xff]   ;;  %v645_v17 = vld [vmem:[#allocation2 + $0xf0] sm:$0xff]  ;;  %v7014_v32 = vpack.c.bf16 %v6900_v40, %v6897_v36  ;;  %v6301_v9 = vld [vmem:[#allocation6 + $0x1b8] sm:$0xff]  }
  0x97   : > { %5220 = vmatprep.subr.bf16.mxu1 %v6290_v34  ;;  %5947 = vmatpush3.bf16.msra.mxu0 %v6296_v10  ;;  %v6298_v34 = vld [vmem:[#allocation6 + $0x80] sm:$0xff]   ;;  %v6995_v10 = vpack.c.bf16 %v6870_v19, %v6867_v18  ;;  %v7000_v35 = vpack.c.bf16 %v646_v52, %v645_v17  ;;  %v652_v40 = vld [vmem:[#allocation2 + $0x140] sm:$0xff] }
  0x98   : > { %5948 = vmatprep.subr.bf16.mxu0 %v6298_v34  ;;  %v6299_v18 = vld [vmem:[#allocation6 + $0x220] sm:$0xff]   ;;  %v657_v5 = vld [vmem:[#allocation2 + $0x180] sm:$0xff] }
  0x99   : > { %v648_v19 = vld [vmem:[#allocation2 + $0x110] sm:$0xff] }
  0x9a   : > { %5221 = vmatpush3.bf16.msra.mxu1 %v6291_v39  ;;  %v484_v39 = vld [vmem:[#allocation2 + $0x9] sm:$0xff] }
  0x9b   : > { %5982 = vmatprep.subr.bf16.mxu1 %v6293_v60  ;;  %5949 = vmatpush3.bf16.msra.mxu0 %v6298_v34  ;;  %v515_v49 = vpack.c.bf16 %v484_v39, %v483_v38  ;;  %v6297_v34 = vld [vmem:[#allocation6 + $0x228] sm:$0xff]   ;;  %v649_v39 = vld [vmem:[#allocation2 + $0x120] sm:$0xff]  ;;  %v6317_v36 = vld [vmem:[#allocation6 + $0x200] sm:$0xff]  }
  0x9c   : > { %1028 = vmatmul.mubr.bf16.gmra.mxu0 %v6926_v13  ;;  %5342 = vmatprep.subr.bf16.mxu0 %v6300_v12  ;;  %v654_v12 = vld [vmem:[#allocation2 + $0x158] sm:$0xff]  ;;  %v532_v6 = vld [vmem:[#allocation2 + $0xa] sm:$0xff] }
  0x9d   : > { %5919 = vmatmul.mubr.bf16.gmra.mxu1 %v6928_v14  ;;  %1035 = vmatprep.mubr.bf16.mxu0 %v6934_v24 }
  0x9e   : > { %5922 = vmatprep.mubr.bf16.mxu1 %v6936_v25 }
  0xa4   : > { %1036 = vmatmul.mubr.bf16.gmra.mxu0 %v6954_v55 }
  0xa5   : > { %5923 = vmatmul.mubr.bf16.gmra.mxu1 %v6956_v57  ;;  %1043 = vmatprep.mubr.bf16.mxu0 %v6960_v58 }
  0xa6   : > { %5926 = vmatprep.mubr.bf16.mxu1 %v6962_v59 }
  0xac   : > { %1044 = vmatmul.mubr.bf16.gmra.mxu0 %v6968_v11 }
  0xad   : > { %5927 = vmatmul.mubr.bf16.gmra.mxu1 %v6970_v15  ;;  %1051 = vmatprep.mubr.bf16.mxu0 %v6974_v22 }
  0xae   : > { %5930 = vmatprep.mubr.bf16.mxu1 %v6976_v51 }
  0xb4   : > { %1052 = vmatmul.mubr.bf16.gmra.mxu0 %v6982_v53 }
  0xb5   : > { %5931 = vmatmul.mubr.bf16.gmra.mxu1 %v770_v54  ;;  %1059 = vmatprep.mubr.bf16.mxu0 %v6986_v37  ;;  %v656_v54 = vld [vmem:[#allocation2 + $0x170] sm:$0xff] }
  0xb6   : > { %1461 = vmatprep.mubr.bf16.mxu1 %v515_v49 }
  0xbc   : > { %1060 = vmatmul.mubr.bf16.gmra.mxu0 %v6990_v1 }
  0xbd   : > { %1462 = vmatmul.mubr.bf16.vlgmr.msra.gmra.mxu1 %v467_v4  ;;  %1067 = vmatprep.mubr.bf16.mxu0 %v6995_v10  ;;  %v6303_v4 = vld [vmem:[#allocation6 + $0x1f0] sm:$0xff]  }
  0xbe   : > { %5983 = vmatpush3.bf16.msra.mxu1 %v6293_v60  ;;  %1469 = vmatprep.mubr.bf16.mxu1 %v6785_v27  ;;  %v647_v27 = vld [vmem:[#allocation2 + $0x108] sm:$0xff] }
  0xbf   : > { %5984 = vmatprep.subr.bf16.mxu1 %v6295_v16  ;;  %v6302_v60 = vld [vmem:[#allocation6 + $0x218] sm:$0xff]   ;;  %v7010_v38 = vpack.c.bf16 %v648_v19, %v647_v27 }
  0xc0   : > { %v1855_v27 = vld [vmem:[#allocation2 + $0x82] sm:$0xff] }
  0xc1   : > { %v1804_v19 = vld [vmem:[#allocation2 + $0x61] sm:$0xff] }
  0xc2   : > { %5985 = vmatpush3.bf16.msra.mxu1 %v6295_v16  ;;  %v6304_v16 = vld [vmem:[#allocation6 + $0x1b0] sm:$0xff]  }
  0xc3   : > { %5986 = vmatprep.subr.bf16.mxu1 %v6297_v34 }
  0xc4   : > { %1068 = vmatmul.mubr.bf16.gmra.mxu0 %v7000_v35 }
  0xc5   : > { %1470 = vmatmul.mubr.bf16.gmra.mxu1 %v6805_v45  ;;  %1075 = vmatprep.mubr.bf16.mxu0 %v7004_v0  ;;  %v6312_v45 = vld [vmem:[#allocation6 + $0x208] sm:$0xff]  }
  0xc6   : > { %1477 = vmatprep.mubr.bf16.mxu1 %v6809_v47  ;;  %5987 = vmatpush3.bf16.msra.mxu1 %v6297_v34  ;;  %v7020_v47 = vpack.c.bf16 %v650_v44, %v649_v39  ;;  %v1857_v39 = vld [vmem:[#allocation2 + $0x9a] sm:$0xff] }
  0xc7   : > { %5988 = vmatprep.subr.bf16.mxu1 %v6299_v18 }
  0xca   : > { %5989 = vmatpush3.bf16.msra.mxu1 %v6299_v18  ;;  %v1854_v18 = vld [vmem:[#allocation2 + $0x7a] sm:$0xff] }
  0xcb   : > { %5990 = vmatprep.subr.bf16.mxu1 %v6302_v60 }
  0xcc   : > { %1076 = vmatmul.mubr.bf16.gmra.mxu0 %v7010_v38 }
  0xcd   : > { %1478 = vmatmul.mubr.bf16.gmra.mxu1 %v6830_v62  ;;  %1083 = vmatprep.mubr.bf16.mxu0 %v7014_v32  ;;  %v651_v62 = vld [vmem:[#allocation2 + $0x138] sm:$0xff] }
  0xce   : > { %1485 = vmatprep.mubr.bf16.mxu1 %v6837_v2  ;;  %5991 = vmatpush3.bf16.msra.mxu1 %v6302_v60  ;;  %v7026_v2 = vpack.c.bf16 %v652_v40, %v651_v62  ;;  %v1883_v62 = vpack.c.bf16 %v1855_v27, %v1854_v18 }
  0xcf   : > { %5992 = vmatprep.subr.bf16.mxu1 %v6307_v33 }
  0xd2   : > { %5993 = vmatpush3.bf16.msra.mxu1 %v6307_v33  ;;  %v1856_v33 = vld [vmem:[#allocation2 + $0x92] sm:$0xff] }
  0xd3   : > { %5994 = vmatprep.subr.bf16.mxu1 %v6312_v45 }
  0xd4   : > { %1084 = vmatmul.mubr.bf16.gmra.mxu0 %v7020_v47 }
  0xd5   : > { %1486 = vmatmul.mubr.bf16.gmra.mxu1 %v6872_v20  ;;  %1091 = vmatprep.mubr.bf16.mxu0 %v6918_v61  ;;  %v7032_v20 = vpack.c.bf16 %v654_v12, %v653_v7  ;;  %v1884_v7 = vpack.c.bf16 %v1857_v39, %v1856_v33  ;;  %v1761_v33 = vld [vmem:[#allocation2 + $0x98] sm:$0xff] }
  0xd6   : > { %1493 = vmatprep.mubr.bf16.mxu1 %v6880_v23  ;;  %5995 = vmatpush3.bf16.msra.mxu1 %v6312_v45  ;;  %v655_v23 = vld [vmem:[#allocation2 + $0x168] sm:$0xff] }
  0xd7   : > { %5996 = vmatprep.subr.bf16.mxu1 %v6317_v36  ;;  %v7038_v49 = vpack.c.bf16 %v656_v54, %v655_v23 }
  0xda   : > { %5997 = vmatpush3.bf16.msra.mxu1 %v6317_v36 }
  0xdc   : > { %1092 = vmatmul.mubr.bf16.gmra.mxu0 %v7026_v2 }
  0xdd   : > { %1494 = vmatmul.mubr.bf16.gmra.mxu1 %v6904_v42  ;;  %1099 = vmatprep.mubr.bf16.mxu0 %v6922_v3  ;;  %v658_v42 = vld [vmem:[#allocation2 + $0x188] sm:$0xff] }
  0xde   : > { %1501 = vmatprep.mubr.bf16.mxu1 %v6910_v48  ;;  %v531_v48 = vld [vmem:[#allocation2 + $0x2] sm:$0xff] }
  0xe4   : > { %1100 = vmatmul.mubr.bf16.gmra.mxu0 %v7032_v20 }
  0xe5   : > { %1502 = vmatmul.mubr.bf16.gmra.mxu1 %v6926_v13  ;;  %1107 = vmatprep.mubr.bf16.mxu0 %v6944_v30  ;;  %v674_v13 = vpack.c.bf16 %v658_v42, %v657_v5  ;;  %v1756_v5 = vld [vmem:[#allocation2 + $0x60] sm:$0xff]  ;;  %v1757_v42 = vld [vmem:[#allocation2 + $0x68] sm:$0xff] }
  0xe6   : > { %1509 = vmatprep.mubr.bf16.mxu1 %v6934_v24  ;;  %v563_v24 = vpack.c.bf16 %v532_v6, %v531_v48  ;;  %v1806_v6 = vld [vmem:[#allocation2 + $0x79] sm:$0xff] }
  0xec   : > { %1108 = vmatmul.mubr.bf16.gmra.mxu0 %v7038_v49 }
  0xed   : > { %1510 = vmatmul.mubr.bf16.gmra.mxu1 %v6954_v55  ;;  %1115 = vmatprep.mubr.bf16.mxu0 %v722_v31  ;;  %v6305_v55 = vld [vmem:[#allocation6 + $0x1e8] sm:$0xff]   ;;  %v6310_v31 = vld [vmem:[#allocation6 + $0x1d8] sm:$0xff]  }
  0xee   : > { %1517 = vmatprep.mubr.bf16.mxu1 %v6960_v58  ;;  %v6311_v58 = vld [vmem:[#allocation6 + $0x198] sm:$0xff]  }
  0xf4   : > { %1116 = vmatmul.mubr.bf16.gmra.mxu0 %v674_v13  ;;  %v1858_v13 = vld [vmem:[#allocation2 + $0xaa] sm:$0xff] }
  0xf5   : > { %1518 = vmatmul.mubr.bf16.gmra.mxu1 %v6968_v11  ;;  %5950 = vmatprep.mubr.bf16.mxu0 %v563_v24  ;;  %v6316_v11 = vld [vmem:[#allocation6 + $0x188] sm:$0xff]  }
  0xf6   : > { %1525 = vmatprep.mubr.bf16.mxu1 %v6974_v22  ;;  %v6318_v22 = vld [vmem:[#allocation6 + $0x1c0] sm:$0xff]  }
  0xf7   : > { %v1859_v24 = vld [vmem:[#allocation2 + $0xb2] sm:$0xff] }
  0xfc   : > { %5951 = vmatmul.mubr.bf16.vlgmr.msra.gmra.mxu0 %v6803_v41  ;;  %v6309_v41 = vld [vmem:[#allocation6 + $0x1a0] sm:$0xff]  }
  0xfd   : > { %1526 = vmatmul.mubr.bf16.gmra.mxu1 %v6982_v53  ;;  %5343 = vmatpush3.bf16.msra.mxu0 %v6301_v9  ;;  %v1802_v53 = vld [vmem:[#allocation2 + $0x49] sm:$0xff] }
  0xfe   : > { %1533 = vmatprep.mubr.bf16.mxu1 %v6986_v37  ;;  %5954 = vmatprep.mubr.bf16.mxu0 %v6807_v46  ;;  %v6313_v46 = vld [vmem:[#allocation6 + $0x1d0] sm:$0xff]  }
  0xff   : > { %5344 = vmatprep.subr.bf16.mxu0 %v6303_v4  ;;  %v1852_v37 = vld [vmem:[#allocation2 + $0x62] sm:$0xff] }
 0x101   : > { %5345 = vmatpush3.bf16.msra.mxu0 %v6304_v16  ;;  %v1807_v16 = vld [vmem:[#allocation2 + $0x81] sm:$0xff] }
 0x102   : > { %5346 = vmatprep.subr.bf16.mxu0 %v6305_v55  ;;  %v1860_v55 = vld [vmem:[#allocation2 + $0xc2] sm:$0xff] }
 0x104   : > { %5955 = vmatmul.mubr.bf16.gmra.mxu0 %v6826_v56  ;;  %v6314_v56 = vld [vmem:[#allocation6 + $0x190] sm:$0xff]  }
 0x105   : > { %1534 = vmatmul.mubr.bf16.gmra.mxu1 %v6990_v1  ;;  %5958 = vmatprep.mubr.bf16.mxu0 %v6832_v63  ;;  %v6315_v63 = vld [vmem:[#allocation6 + $0x1c8] sm:$0xff]  }
 0x106   : > { %1541 = vmatprep.mubr.bf16.mxu1 %v6995_v10  ;;  %5347 = vmatpush3.bf16.msra.mxu0 %v6306_v28  ;;  %v1861_v28 = vld [vmem:[#allocation2 + $0xca] sm:$0xff] }
 0x107   : > { %5348 = vmatprep.subr.bf16.mxu0 %v6308_v29 }
 0x10a   : > { %5349 = vmatpush3.bf16.msra.mxu0 %v6309_v41 }
 0x10b   : > { %5350 = vmatprep.subr.bf16.mxu0 %v6310_v31 }
 0x10c   : > { %5959 = vmatmul.mubr.bf16.gmra.mxu0 %v6847_v8  ;;  %v6319_v8 = vld [vmem:[#allocation6 + $0x180] sm:$0xff]  }
 0x10d   : > { %1542 = vmatmul.mubr.bf16.gmra.mxu1 %v7000_v35  ;;  %5962 = vmatprep.mubr.bf16.mxu0 %v6874_v21  ;;  %v1800_v21 = vld [vmem:[#allocation2 + $0x31] sm:$0xff] }
 0x10e   : > { %1549 = vmatprep.mubr.bf16.mxu1 %v7004_v0  ;;  %5351 = vmatpush3.bf16.msra.mxu0 %v6311_v58  ;;  %v1754_v0 = vld [vmem:[#allocation2 + $0x48] sm:$0xff]  ;;  %v1786_v58 = vpack.c.bf16 %v1757_v42, %v1756_v5 }
 0x10f   : > { %5352 = vmatprep.subr.bf16.mxu0 %v6313_v46  ;;  %v1885_v46 = vpack.c.bf16 %v1859_v24, %v1858_v13 }
 0x112   : > { %5353 = vmatpush3.bf16.msra.mxu0 %v6314_v56 }
 0x113   : > { %5354 = vmatprep.subr.bf16.mxu0 %v6315_v63  ;;  %v1835_v63 = vpack.c.bf16 %v1807_v16, %v1806_v6 }
 0x114   : > { %5963 = vmatmul.mubr.bf16.gmra.mxu0 %v6882_v26  ;;  %v1801_v26 = vld [vmem:[#allocation2 + $0x39] sm:$0xff] }
 0x115   : > { %1550 = vmatmul.mubr.bf16.gmra.mxu1 %v7010_v38  ;;  %5966 = vmatprep.mubr.bf16.mxu0 %v6906_v43  ;;  %v1848_v43 = vld [vmem:[#allocation2 + $0x32] sm:$0xff] }
 0x116   : > { %1557 = vmatprep.mubr.bf16.mxu1 %v7014_v32  ;;  %5355 = vmatpush3.bf16.msra.mxu0 %v6316_v11  ;;  %v1805_v32 = vld [vmem:[#allocation2 + $0x69] sm:$0xff]  ;;  %v1886_v11 = vpack.c.bf16 %v1861_v28, %v1860_v55 }
 0x117   : > { %5356 = vmatprep.subr.bf16.mxu0 %v6318_v22  ;;  %v6320_v55 = vld [vmem:[#allocation8 + $0x138] sm:$0xff]  }
 0x118   : > { %v6321_v28 = vld [vmem:[#allocation8 + $0xf8] sm:$0xff]   ;;  %5478 = vmatprep.subr.bf16.mxu1 %v6320_v55 }
 0x11a   : > { %5357 = vmatpush3.bf16.msra.mxu0 %v6319_v8 }
 0x11c   : > { %5967 = vmatmul.mubr.bf16.gmra.mxu0 %v6912_v50  ;;  %v1849_v50 = vld [vmem:[#allocation2 + $0x3a] sm:$0xff] }
 0x11d   : > { %1558 = vmatmul.mubr.bf16.gmra.mxu1 %v7020_v47  ;;  %5970 = vmatprep.mubr.bf16.mxu0 %v6928_v14  ;;  %v1880_v14 = vpack.c.bf16 %v1849_v50, %v1848_v43  ;;  %v1758_v50 = vld [vmem:[#allocation2 + $0x78] sm:$0xff] }
 0x11e   : > { %1565 = vmatprep.mubr.bf16.mxu1 %v6918_v61  ;;  %v1832_v61 = vpack.c.bf16 %v1801_v26, %v1800_v21 }
 0x124   : > { %5971 = vmatmul.mubr.bf16.gmra.mxu0 %v6936_v25  ;;  %v1753_v25 = vld [vmem:[#allocation2 + $0x38] sm:$0xff] }
 0x125   : > { %1566 = vmatmul.mubr.bf16.gmra.mxu1 %v7026_v2  ;;  %5974 = vmatprep.mubr.bf16.mxu0 %v6956_v57  ;;  %v1850_v57 = vld [vmem:[#allocation2 + $0x4a] sm:$0xff]  ;;  %v1834_v2 = vpack.c.bf16 %v1805_v32, %v1804_v19 }
 0x126   : > { %1573 = vmatprep.mubr.bf16.mxu1 %v6922_v3  ;;  %v1752_v3 = vld [vmem:[#allocation2 + $0x30] sm:$0xff] }
 0x127   : > { %v1784_v1 = vpack.c.bf16 %v1753_v25, %v1752_v3  ;;  %v1808_v3 = vld [vmem:[#allocation2 + $0x91] sm:$0xff]  ;;  %v1862_v25 = vld [vmem:[#allocation2 + $0xda] sm:$0xff] }
 0x128   : > { %v1760_v32 = vld [vmem:[#allocation2 + $0x90] sm:$0xff] }
 0x129   : > { %v1788_v5 = vpack.c.bf16 %v1761_v33, %v1760_v32  ;;  %v1765_v32 = vld [vmem:[#allocation2 + $0xc8] sm:$0xff] }
 0x12c   : > { %5975 = vmatmul.mubr.bf16.gmra.mxu0 %v6962_v59  ;;  %v1851_v59 = vld [vmem:[#allocation2 + $0x52] sm:$0xff] }
 0x12d   : > { %1574 = vmatmul.mubr.bf16.gmra.mxu1 %v7032_v20  ;;  %5978 = vmatprep.mubr.bf16.mxu0 %v6970_v15  ;;  %v1853_v15 = vld [vmem:[#allocation2 + $0x6a] sm:$0xff]  ;;  %v1881_v10 = vpack.c.bf16 %v1851_v59, %v1850_v57  ;;  %v1863_v57 = vld [vmem:[#allocation2 + $0xe2] sm:$0xff] }
 0x12e   : > { %1581 = vmatprep.mubr.bf16.mxu1 %v6944_v30  ;;  %v1803_v30 = vld [vmem:[#allocation2 + $0x51] sm:$0xff]  ;;  %v1882_v52 = vpack.c.bf16 %v1853_v15, %v1852_v37  ;;  %v1865_v15 = vld [vmem:[#allocation2 + $0xfa] sm:$0xff] }
 0x12f   : > { %v1833_v17 = vpack.c.bf16 %v1803_v30, %v1802_v53  ;;  %v1809_v30 = vld [vmem:[#allocation2 + $0x99] sm:$0xff] }
 0x130   : > { %v1864_v37 = vld [vmem:[#allocation2 + $0xf2] sm:$0xff] }
 0x134   : > { %5979 = vmatmul.mubr.bf16.gmra.mxu0 %v6976_v51  ;;  %v1755_v51 = vld [vmem:[#allocation2 + $0x50] sm:$0xff] }
 0x135   : > { %1582 = vmatmul.mubr.bf16.gmra.mxu1 %v7038_v49  ;;  %2120 = vmatprep.mubr.bf16.mxu0 %v1832_v61  ;;  %v1785_v36 = vpack.c.bf16 %v1755_v51, %v1754_v0  ;;  %v1759_v61 = vld [vmem:[#allocation2 + $0x80] sm:$0xff]  ;;  %v1836_v0 = vpack.c.bf16 %v1809_v30, %v1808_v3  ;;  %v1888_v51 = vpack.c.bf16 %v1865_v15, %v1864_v37 }
 0x136   : > { %5998 = vmatprep.mubr.bf16.mxu1 %v1880_v14  ;;  %v1873_v3 = vld [vmem:[#allocation2 + $0x15a] sm:$0xff] }
 0x13c   : > { %v5086_v34 = vpop.f32.mrf.mxu0  ;;  %2121 = vmatmul.mubr.bf16.vlgmr.msra.gmra.mxu0 %v1784_v1 }
 0x13d   : > { %v5904_v35 = vpop.f32.mrf.mxu1  ;;  %5999 = vmatmul.mubr.bf16.vlgmr.msra.gmra.mxu1 %v1881_v10  ;;  %2128 = vmatprep.mubr.bf16.mxu0 %v1833_v17 }
 0x13e   : > { %6002 = vmatprep.mubr.bf16.mxu1 %v1882_v52  ;;  %v5087_v60 = vpop.f32.mrf.mxu0  ;;  %v1787_v52 = vpack.c.bf16 %v1759_v61, %v1758_v50  ;;  %v1813_v50 = vld [vmem:[#allocation2 + $0xc9] sm:$0xff]  ;;  %v1872_v61 = vld [vmem:[#allocation2 + $0x152] sm:$0xff]  ;;  %5479 = vmatpush3.bf16.msra.mxu1 %v6321_v28 }
 0x13f   : > { %v1158_v38 = vpop.f32.mrf.mxu1  ;;  %v5088_v44 = vadd.f32 %v5087_v60, %v5086_v34  ;;  %v1887_v34 = vpack.c.bf16 %v1863_v57, %v1862_v25 }
 0x140   : > { %v5089_v45 = vpop.f32.mrf.mxu0 }
 0x141   : > { %v5905_v47 = vpop.f32.mrf.mxu1  ;;  %v7078_v40 = vadd.f32 %v5088_v44, %v1158_v38  ;;  %v1810_v44 = vld [vmem:[#allocation2 + $0xa9] sm:$0xff] }
 0x142   : > { %v5090_v12 = vpop.f32.mrf.mxu0 }
 0x143   : > { %v1161_v20 = vpop.f32.mrf.mxu1  ;;  %v5091_v23 = vadd.f32 %v5090_v12, %v5089_v45  ;;  %v1866_v45 = vld [vmem:[#allocation2 + $0x10a] sm:$0xff] }
 0x144   : > { %v5092_v54 = vpop.f32.mrf.mxu0  ;;  %2129 = vmatmul.mubr.bf16.gmra.mxu0 %v1785_v36  ;;  %v1869_v12 = vld [vmem:[#allocation2 + $0x12a] sm:$0xff] }
 0x145   : > { %v7080_v49 = vpop.f32.mrf.mxu1  ;;  %6003 = vmatmul.mubr.bf16.gmra.mxu1 %v1883_v62  ;;  %v7082_v48 = vadd.f32 %v5091_v23, %v1161_v20  ;;  %2136 = vmatprep.mubr.bf16.mxu0 %v1834_v2  ;;  %v1811_v2 = vld [vmem:[#allocation2 + $0xb1] sm:$0xff] }
 0x146   : > { %6006 = vmatprep.mubr.bf16.mxu1 %v1884_v7  ;;  %v5093_v9 = vpop.f32.mrf.mxu0  ;;  %v1868_v7 = vld [vmem:[#allocation2 + $0x122] sm:$0xff]  ;;  %v1837_v13 = vpack.c.bf16 %v1811_v2, %v1810_v44  ;;  %v1874_v44 = vld [vmem:[#allocation2 + $0x16a] sm:$0xff] }
 0x147   : > { %v1174_v4 = vpop.f32.mrf.mxu1  ;;  %v5094_v29 = vadd.f32 %v5093_v9, %v5092_v54  ;;  %v1890_v24 = vpack.c.bf16 %v1869_v12, %v1868_v7  ;;  %v1815_v2 = vld [vmem:[#allocation2 + $0xe1] sm:$0xff]  ;;  %v1877_v12 = vld [vmem:[#allocation2 + $0x18a] sm:$0xff] }
 0x148   : > { %v5095_v41 = vpop.f32.mrf.mxu0  ;;  %v1876_v7 = vld [vmem:[#allocation2 + $0x182] sm:$0xff] }
 0x149   : > { %v7084_v31 = vpop.f32.mrf.mxu1  ;;  %v7086_v56 = vadd.f32 %v5904_v35, %v5094_v29 }
 0x14a   : > { %v5096_v22 = vpop.f32.mrf.mxu0 }
 0x14b   : > { %v1177_v8 = vpop.f32.mrf.mxu1  ;;  %v5097_v21 = vadd.f32 %v5096_v22, %v5095_v41  ;;  %v1871_v22 = vld [vmem:[#allocation2 + $0x142] sm:$0xff] }
 0x14c   : > { %v5098_v26 = vpop.f32.mrf.mxu0  ;;  %2137 = vmatmul.mubr.bf16.gmra.mxu0 %v1786_v58  ;;  %v1762_v58 = vld [vmem:[#allocation2 + $0xa8] sm:$0xff] }
 0x14d   : > { %v7088_v43 = vpop.f32.mrf.mxu1  ;;  %6007 = vmatmul.mubr.bf16.gmra.mxu1 %v1885_v46  ;;  %v7090_v14 = vadd.f32 %v5905_v47, %v5097_v21  ;;  %2144 = vmatprep.mubr.bf16.mxu0 %v1835_v63  ;;  %v1867_v47 = vld [vmem:[#allocation2 + $0x112] sm:$0xff]  ;;  %v1812_v63 = vld [vmem:[#allocation2 + $0xc1] sm:$0xff] }
 0x14e   : > { %6010 = vmatprep.mubr.bf16.mxu1 %v1886_v11  ;;  %v5099_v59 = vpop.f32.mrf.mxu0  ;;  %v1889_v42 = vpack.c.bf16 %v1867_v47, %v1866_v45  ;;  %v1763_v46 = vld [vmem:[#allocation2 + $0xb0] sm:$0xff]  ;;  %v1838_v15 = vpack.c.bf16 %v1813_v50, %v1812_v63  ;;  %v6327_v50 = vld [vmem:[#allocation8 + $0x170] sm:$0xff]  }
 0x14f   : > { %v7092_v53 = vpop.f32.mrf.mxu1  ;;  %v5100_v1 = vadd.f32 %v5099_v59, %v5098_v26  ;;  %v1875_v45 = vld [vmem:[#allocation2 + $0x172] sm:$0xff] }
 0x150   : > { %v5101_v10 = vpop.f32.mrf.mxu0 }
 0x151   : > { %v7094_v17 = vpop.f32.mrf.mxu1  ;;  %v7096_v35 = vadd.f32 %v5100_v1, %v1174_v4  ;;  %v1892_v1 = vpack.c.bf16 %v1873_v3, %v1872_v61 }
 0x152   : > { %v5102_v18 = vpop.f32.mrf.mxu0 }
 0x153   : > { %v7098_v27 = vpop.f32.mrf.mxu1  ;;  %v5103_v19 = vadd.f32 %v5102_v18, %v5101_v10 }
 0x154   : > { %v5104_v60 = vpop.f32.mrf.mxu0  ;;  %2145 = vmatmul.mubr.bf16.gmra.mxu0 %v1787_v52 }
 0x155   : > { %v7100_v38 = vpop.f32.mrf.mxu1  ;;  %6011 = vmatmul.mubr.bf16.gmra.mxu1 %v1887_v34  ;;  %v7102_v39 = vadd.f32 %v5103_v19, %v1177_v8  ;;  %2152 = vmatprep.mubr.bf16.mxu0 %v1836_v0  ;;  %v6322_v8 = vld [vmem:[#allocation8 + $0x178] sm:$0xff]   ;;  %v6323_v0 = vld [vmem:[#allocation8 + $0x130] sm:$0xff]  }
 0x156   : > { %6014 = vmatprep.mubr.bf16.mxu1 %v1888_v51  ;;  %v5105_v36 = vpop.f32.mrf.mxu0  ;;  %6030 = vmatprep.subr.bf16.mxu0 %v6322_v8  ;;  %v6324_v51 = vld [vmem:[#allocation8 + $0xf0] sm:$0xff]  }
 0x157   : > { %v7104_v62 = vpop.f32.mrf.mxu1  ;;  %v5106_v20 = vadd.f32 %v5105_v36, %v5104_v60  ;;  %6031 = vmatpush3.bf16.msra.mxu0 %v6322_v8  ;;  %v1764_v60 = vld [vmem:[#allocation2 + $0xc0] sm:$0xff]  ;;  %5480 = vmatprep.subr.bf16.mxu1 %v6323_v0 }
 0x158   : > { %v5107_v23 = vpop.f32.mrf.mxu0  ;;  %5481 = vmatpush3.bf16.msra.mxu1 %v6324_v51  ;;  %6032 = vmatprep.subr.bf16.mxu0 %v6327_v50 }
 0x159   : > { %v7106_v54 = vpop.f32.mrf.mxu1  ;;  %v7109_v6 = vadd.f32 %v7080_v49, %v5106_v20  ;;  %v1870_v49 = vld [vmem:[#allocation2 + $0x13a] sm:$0xff] }
 0x15a   : > { %v5108_v9 = vpop.f32.mrf.mxu0  ;;  %v1891_v30 = vpack.c.bf16 %v1871_v22, %v1870_v49  ;;  %v1766_v49 = vld [vmem:[#allocation2 + $0xd8] sm:$0xff]  ;;  %v1767_v22 = vld [vmem:[#allocation2 + $0xe0] sm:$0xff] }
 0x15b   : > { %v7111_v4 = vpop.f32.mrf.mxu1  ;;  %v5109_v16 = vadd.f32 %v5108_v9, %v5107_v23  ;;  %v1894_v9 = vpack.c.bf16 %v1877_v12, %v1876_v7  ;;  %6033 = vmatpush3.bf16.msra.mxu0 %v6327_v50  ;;  %v1818_v12 = vld [vmem:[#allocation2 + $0x109] sm:$0xff] }
 0x15c   : > { %v5110_v29 = vpop.f32.mrf.mxu0  ;;  %2153 = vmatmul.mubr.bf16.gmra.mxu0 %v1788_v5 }
 0x15d   : > { %v7113_v41 = vpop.f32.mrf.mxu1  ;;  %6015 = vmatmul.mubr.bf16.gmra.mxu1 %v1889_v42  ;;  %v7116_v11 = vadd.f32 %v7084_v31, %v5109_v16  ;;  %2160 = vmatprep.mubr.bf16.mxu0 %v1837_v13  ;;  %v1789_v31 = vpack.c.bf16 %v1763_v46, %v1762_v58  ;;  %v1790_v42 = vpack.c.bf16 %v1765_v32, %v1764_v60  ;;  %v6326_v58 = vld [vmem:[#allocation8 + $0xe8] sm:$0xff]   ;;  %v6328_v60 = vld [vmem:[#allocation8 + $0x120] sm:$0xff]  }
 0x15e   : > { %6018 = vmatprep.mubr.bf16.mxu1 %v1890_v24  ;;  %v5111_v21 = vpop.f32.mrf.mxu0  ;;  %v6329_v32 = vld [vmem:[#allocation8 + $0xe0] sm:$0xff]  }
 0x15f   : > { %v7118_v26 = vpop.f32.mrf.mxu1  ;;  %v5112_v25 = vadd.f32 %v5111_v21, %v5110_v29  ;;  %v6325_v29 = vld [vmem:[#allocation8 + $0x128] sm:$0xff]   ;;  %v1879_v21 = vld [vmem:[#allocation2 + $0x1a2] sm:$0xff] }
 0x160   : > { %v5113_v57 = vpop.f32.mrf.mxu0  ;;  %5482 = vmatprep.subr.bf16.mxu1 %v6325_v29 }
 0x161   : > { %v7120_v59 = vpop.f32.mrf.mxu1  ;;  %v7123_v37 = vadd.f32 %v5112_v25, %v7092_v53  ;;  %v1814_v53 = vld [vmem:[#allocation2 + $0xd9] sm:$0xff]  ;;  %v1816_v25 = vld [vmem:[#allocation2 + $0xf1] sm:$0xff]  ;;  %5483 = vmatpush3.bf16.msra.mxu1 %v6326_v58 }
 0x162   : > { %v5114_v10 = vpop.f32.mrf.mxu0  ;;  %v1839_v24 = vpack.c.bf16 %v1815_v2, %v1814_v53  ;;  %v1769_v2 = vld [vmem:[#allocation2 + $0xf8] sm:$0xff]  ;;  %5484 = vmatprep.subr.bf16.mxu1 %v6328_v60 }
 0x163   : > { %v7125_v52 = vpop.f32.mrf.mxu1  ;;  %v5115_v34 = vadd.f32 %v5114_v10, %v5113_v57  ;;  %v1817_v57 = vld [vmem:[#allocation2 + $0xf9] sm:$0xff] }
 0x164   : > { %v5116_v18 = vpop.f32.mrf.mxu0  ;;  %2161 = vmatmul.mubr.bf16.gmra.mxu0 %v1789_v31 }
 0x165   : > { %v7127_v19 = vpop.f32.mrf.mxu1  ;;  %6019 = vmatmul.mubr.bf16.gmra.mxu1 %v1891_v30  ;;  %v7130_v33 = vadd.f32 %v5115_v34, %v7098_v27  ;;  %2168 = vmatprep.mubr.bf16.mxu0 %v1838_v15  ;;  %v1893_v27 = vpack.c.bf16 %v1875_v45, %v1874_v44  ;;  %v1840_v34 = vpack.c.bf16 %v1817_v57, %v1816_v25  ;;  %v1821_v25 = vld [vmem:[#allocation2 + $0x129] sm:$0xff] }
 0x166   : > { %6022 = vmatprep.mubr.bf16.mxu1 %v1892_v1  ;;  %v5117_v47 = vpop.f32.mrf.mxu0  ;;  %v1791_v1 = vpack.c.bf16 %v1767_v22, %v1766_v49  ;;  %5485 = vmatpush3.bf16.msra.mxu1 %v6329_v32  ;;  %v1770_v22 = vld [vmem:[#allocation2 + $0x108] sm:$0xff] }
 0x167   : > { %v7132_v36 = vpop.f32.mrf.mxu1  ;;  %v5118_v20 = vadd.f32 %v5117_v47, %v5116_v18  ;;  %v1768_v47 = vld [vmem:[#allocation2 + $0xf0] sm:$0xff] }
 0x168   : > { %v5119_v23 = vpop.f32.mrf.mxu0 }
 0x169   : > { %v7134_v5 = vpop.f32.mrf.mxu1  ;;  %v7137_v13 = vadd.f32 %v7088_v43, %v5118_v20  ;;  %v1878_v43 = vld [vmem:[#allocation2 + $0x19a] sm:$0xff]  ;;  %v1819_v20 = vld [vmem:[#allocation2 + $0x111] sm:$0xff] }
 0x16a   : > { %v5120_v16 = vpop.f32.mrf.mxu0 }
 0x16b   : > { %v7139_v55 = vpop.f32.mrf.mxu1  ;;  %v5121_v28 = vadd.f32 %v5120_v16, %v5119_v23 }
 0x16c   : > { %v5122_v46 = vpop.f32.mrf.mxu0  ;;  %2169 = vmatmul.mubr.bf16.gmra.mxu0 %v1790_v42 }
 0x16d   : > { %v7141_v63 = vpop.f32.mrf.mxu1  ;;  %6023 = vmatmul.mubr.bf16.gmra.mxu1 %v1893_v27  ;;  %v7144_v8 = vadd.f32 %v7094_v17, %v5121_v28  ;;  %2176 = vmatprep.mubr.bf16.mxu0 %v1839_v24  ;;  %v1895_v17 = vpack.c.bf16 %v1879_v21, %v1878_v43  ;;  %v1792_v24 = vpack.c.bf16 %v1769_v2, %v1768_v47  ;;  %v1771_v43 = vld [vmem:[#allocation2 + $0x110] sm:$0xff] }
 0x16e   : > { %6026 = vmatprep.mubr.bf16.mxu1 %v1894_v9  ;;  %v5123_v61 = vpop.f32.mrf.mxu0 }
 0x16f   : > { %v7146_v3 = vpop.f32.mrf.mxu1  ;;  %v5124_v31 = vadd.f32 %v5123_v61, %v5122_v46  ;;  %v1820_v61 = vld [vmem:[#allocation2 + $0x121] sm:$0xff] }
 0x170   : > { %v5125_v30 = vpop.f32.mrf.mxu0 }
 0x171   : > { %v7148_v15 = vpop.f32.mrf.mxu1  ;;  %v7151_v10 = vadd.f32 %v5124_v31, %v7104_v62  ;;  %v6330_v31 = vld [vmem:[#allocation8 + $0x118] sm:$0xff]  }
 0x172   : > { %v5126_v0 = vpop.f32.mrf.mxu0  ;;  %5486 = vmatprep.subr.bf16.mxu1 %v6330_v31  ;;  %v6337_v31 = vld [vmem:[#allocation8 + $0x160] sm:$0xff]  }
 0x173   : > { %v7153_v51 = vpop.f32.mrf.mxu1  ;;  %v5127_v18 = vadd.f32 %v5126_v0, %v5125_v30  ;;  %v6331_v30 = vld [vmem:[#allocation8 + $0xd8] sm:$0xff]   ;;  %v1793_v0 = vpack.c.bf16 %v1771_v43, %v1770_v22 }
 0x174   : > { %v5128_v53 = vpop.f32.mrf.mxu0  ;;  %2177 = vmatmul.mubr.bf16.gmra.mxu0 %v1791_v1  ;;  %v6332_v1 = vld [vmem:[#allocation8 + $0x168] sm:$0xff]   ;;  %5487 = vmatpush3.bf16.msra.mxu1 %v6331_v30 }
 0x175   : > { %v7155_v44 = vpop.f32.mrf.mxu1  ;;  %6027 = vmatmul.mubr.bf16.gmra.mxu1 %v1895_v17  ;;  %v7158_v45 = vadd.f32 %v5127_v18, %v7111_v4  ;;  %2184 = vmatprep.mubr.bf16.mxu0 %v1840_v34  ;;  %v1841_v4 = vpack.c.bf16 %v1819_v20, %v1818_v12  ;;  %v1772_v20 = vld [vmem:[#allocation2 + $0x120] sm:$0xff] }
 0x176   : > { %v5129_v62 = vpop.f32.mrf.mxu0  ;;  %6034 = vmatprep.subr.bf16.mxu0 %v6332_v1 }
 0x177   : > { %v7160_v7 = vpop.f32.mrf.mxu1  ;;  %v5130_v23 = vadd.f32 %v5129_v62, %v5128_v53  ;;  %6035 = vmatpush3.bf16.msra.mxu0 %v6332_v1 }
 0x178   : > { %v5131_v42 = vpop.f32.mrf.mxu0  ;;  %6036 = vmatprep.subr.bf16.mxu0 %v6337_v31 }
 0x179   : > { %v7162_v27 = vpop.f32.mrf.mxu1  ;;  %v7165_v9 = vadd.f32 %v7100_v38, %v5130_v23 }
 0x17a   : > { %v5132_v16 = vpop.f32.mrf.mxu0 }
 0x17b   : > { %v7167_v28 = vpop.f32.mrf.mxu1  ;;  %v5133_v29 = vadd.f32 %v5132_v16, %v5131_v42  ;;  %6037 = vmatpush3.bf16.msra.mxu0 %v6337_v31 }
 0x17c   : > { %v5134_v58 = vpop.f32.mrf.mxu0  ;;  %2185 = vmatmul.mubr.bf16.gmra.mxu0 %v1792_v24  ;;  %v1822_v24 = vld [vmem:[#allocation2 + $0x139] sm:$0xff] }
 0x17d   : > { %v5222_v46 = vpop.f32.mrf.mxu1  ;;  %v7170_v49 = vadd.f32 %v7106_v54, %v5133_v29  ;;  %2192 = vmatprep.mubr.bf16.mxu0 %v1841_v4  ;;  %v1842_v54 = vpack.c.bf16 %v1821_v25, %v1820_v61  ;;  %v1823_v4 = vld [vmem:[#allocation2 + $0x141] sm:$0xff] }
 0x17e   : > { %v5135_v21 = vpop.f32.mrf.mxu0 }
 0x17f   : > { %v5223_v50 = vpop.f32.mrf.mxu1  ;;  %v5136_v38 = vadd.f32 %v5135_v21, %v5134_v58  ;;  %v1843_v21 = vpack.c.bf16 %v1823_v4, %v1822_v24  ;;  %v6336_v24 = vld [vmem:[#allocation8 + $0xc8] sm:$0xff]  }
 0x180   : > { %v5224_v57 = vadd.f32 %v5223_v50, %v5222_v46  ;;  %v5137_v17 = vpop.f32.mrf.mxu0 }
 0x181   : > { %v5225_v34 = vpop.f32.mrf.mxu1  ;;  %v7173_v18 = vadd.f32 %v5136_v38, %v7118_v26  ;;  %v1773_v26 = vld [vmem:[#allocation2 + $0x128] sm:$0xff] }
 0x182   : > { %v7176_v60 = vadd.f32 %v5224_v57, %v7078_v40  ;;  %v5138_v32 = vpop.f32.mrf.mxu0  ;;  %v1794_v22 = vpack.c.bf16 %v1773_v26, %v1772_v20  ;;  %v6333_v57 = vld [vmem:[#allocation8 + $0x110] sm:$0xff]   ;;  %v6335_v20 = vld [vmem:[#allocation8 + $0x108] sm:$0xff]   ;;  %v6338_v26 = vld [vmem:[#allocation8 + $0x158] sm:$0xff]  }
 0x183   : > { %v5226_v53 = vpop.f32.mrf.mxu1  ;;  %v7178_v47 = vadd.f32 %v5138_v32, %v5137_v17  ;;  %v6334_v17 = vld [vmem:[#allocation8 + $0xd0] sm:$0xff]   ;;  %5488 = vmatprep.subr.bf16.mxu1 %v6333_v57  ;;  %6038 = vmatprep.subr.bf16.mxu0 %v6338_v26  ;;  %v1777_v57 = vld [vmem:[#allocation2 + $0x158] sm:$0xff] }
 0x184   : > { %v5227_v2 = vadd.f32 %v5226_v53, %v5225_v34  ;;  %v5140_v62 = vpop.f32.mrf.mxu0  ;;  %2193 = vmatmul.mubr.bf16.gmra.mxu0 %v1793_v0  ;;  %v1775_v0 = vld [vmem:[#allocation2 + $0x140] sm:$0xff]  ;;  %v1824_v53 = vld [vmem:[#allocation2 + $0x151] sm:$0xff]  ;;  %5489 = vmatpush3.bf16.msra.mxu1 %v6334_v17 }
 0x185   : > { %v5228_v12 = vpop.f32.mrf.mxu1  ;;  %2200 = vmatprep.mubr.bf16.mxu0 %v1842_v54  ;;  %5490 = vmatprep.subr.bf16.mxu1 %v6335_v20  ;;  %v1827_v17 = vld [vmem:[#allocation2 + $0x171] sm:$0xff] }
 0x186   : > { %v7181_v23 = vadd.f32 %v5227_v2, %v7082_v48  ;;  %v5141_v40 = vpop.f32.mrf.mxu0  ;;  %v1825_v2 = vld [vmem:[#allocation2 + $0x159] sm:$0xff]  ;;  %6039 = vmatpush3.bf16.msra.mxu0 %v6338_v26 }
 0x187   : > { %v5229_v42 = vpop.f32.mrf.mxu1  ;;  %v5142_v16 = vadd.f32 %v5141_v40, %v5140_v62 }
 0x188   : > { %v5230_v29 = vadd.f32 %v5229_v42, %v5228_v12  ;;  %v5143_v58 = vpop.f32.mrf.mxu0  ;;  %5491 = vmatpush3.bf16.msra.mxu1 %v6336_v24 }
 0x189   : > { %v5231_v46 = vpop.f32.mrf.mxu1  ;;  %v7184_v43 = vadd.f32 %v7113_v41, %v5142_v16  ;;  %v1774_v41 = vld [vmem:[#allocation2 + $0x138] sm:$0xff] }
 0x18a   : > { %v7187_v50 = vadd.f32 %v5230_v29, %v7086_v56  ;;  %v5144_v61 = vpop.f32.mrf.mxu0  ;;  %v1795_v42 = vpack.c.bf16 %v1775_v0, %v1774_v41 }
 0x18b   : > { %v5232_v25 = vpop.f32.mrf.mxu1  ;;  %v5145_v48 = vadd.f32 %v5144_v61, %v5143_v58  ;;  %v6341_v61 = vld [vmem:[#allocation8 + $0x150] sm:$0xff]  }
 0x18c   : > { %v5233_v38 = vadd.f32 %v5232_v25, %v5231_v46  ;;  %v5146_v30 = vpop.f32.mrf.mxu0  ;;  %2201 = vmatmul.mubr.bf16.gmra.mxu0 %v1794_v22  ;;  %6040 = vmatprep.subr.bf16.mxu0 %v6341_v61 }
 0x18d   : > { %v5234_v1 = vpop.f32.mrf.mxu1  ;;  %v7190_v34 = vadd.f32 %v7120_v59, %v5145_v48  ;;  %2208 = vmatprep.mubr.bf16.mxu0 %v1843_v21  ;;  %v6339_v21 = vld [vmem:[#allocation8 + $0x100] sm:$0xff]   ;;  %6041 = vmatpush3.bf16.msra.mxu0 %v6341_v61  ;;  %v1828_v61 = vld [vmem:[#allocation2 + $0x181] sm:$0xff] }
 0x18e   : > { %v7193_v54 = vadd.f32 %v5233_v38, %v7090_v14  ;;  %v5147_v56 = vpop.f32.mrf.mxu0  ;;  %v1844_v14 = vpack.c.bf16 %v1825_v2, %v1824_v53  ;;  %v1776_v38 = vld [vmem:[#allocation2 + $0x150] sm:$0xff]  ;;  %5492 = vmatprep.subr.bf16.mxu1 %v6339_v21 }
 0x18f   : > { %v5235_v32 = vpop.f32.mrf.mxu1  ;;  %v5148_v62 = vadd.f32 %v5147_v56, %v5146_v30  ;;  %v6342_v56 = vld [vmem:[#allocation8 + $0x148] sm:$0xff]   ;;  %v1796_v2 = vpack.c.bf16 %v1777_v57, %v1776_v38 }
 0x190   : > { %v5236_v12 = vadd.f32 %v5235_v32, %v5234_v1  ;;  %v5149_v59 = vpop.f32.mrf.mxu0  ;;  %v1826_v1 = vld [vmem:[#allocation2 + $0x169] sm:$0xff]  ;;  %6042 = vmatprep.subr.bf16.mxu0 %v6342_v56 }
 0x191   : > { %v5237_v40 = vpop.f32.mrf.mxu1  ;;  %v7196_v4 = vadd.f32 %v5148_v62, %v7132_v36  ;;  %v6340_v36 = vld [vmem:[#allocation8 + $0xc0] sm:$0xff]   ;;  %6043 = vmatpush3.bf16.msra.mxu0 %v6342_v56 }
 0x192   : > { %v7199_v16 = vadd.f32 %v5236_v12, %v7096_v35  ;;  %v5150_v29 = vpop.f32.mrf.mxu0  ;;  %5493 = vmatpush3.bf16.msra.mxu1 %v6340_v36  ;;  %v1845_v12 = vpack.c.bf16 %v1827_v17, %v1826_v1 }
 0x193   : > { %v5238_v58 = vpop.f32.mrf.mxu1  ;;  %v7201_v46 = vadd.f32 %v5150_v29, %v5149_v59 }
 0x194   : > { %v5239_v22 = vadd.f32 %v5238_v58, %v5237_v40  ;;  %v5152_v25 = vpop.f32.mrf.mxu0  ;;  %2209 = vmatmul.mubr.bf16.gmra.mxu0 %v1795_v42  ;;  %v1779_v58 = vld [vmem:[#allocation2 + $0x170] sm:$0xff] }
 0x195   : > { %v5240_v48 = vpop.f32.mrf.mxu1  ;;  %2216 = vmatprep.mubr.bf16.mxu0 %v1844_v14  ;;  %v6344_v14 = vld [vmem:[#allocation8 + $0x140] sm:$0xff]  }
 0x196   : > { %v7204_v35 = vadd.f32 %v5239_v22, %v7102_v39  ;;  %v5153_v31 = vpop.f32.mrf.mxu0  ;;  %6044 = vmatprep.subr.bf16.mxu0 %v6344_v14 }
 0x197   : > { %v5241_v30 = vpop.f32.mrf.mxu1  ;;  %v5154_v41 = vadd.f32 %v5153_v31, %v5152_v25  ;;  %v1829_v25 = vld [vmem:[#allocation2 + $0x189] sm:$0xff]  ;;  %6045 = vmatpush3.bf16.msra.mxu0 %v6344_v14 }
 0x198   : > { %v5242_v0 = vadd.f32 %v5241_v30, %v5240_v48  ;;  %v5155_v32 = vpop.f32.mrf.mxu0  ;;  %v1846_v30 = vpack.c.bf16 %v1829_v25, %v1828_v61 }
 0x199   : > { %v5243_v53 = vpop.f32.mrf.mxu1  ;;  %v7207_v62 = vadd.f32 %v7127_v19, %v5154_v41  ;;  %v1778_v19 = vld [vmem:[#allocation2 + $0x168] sm:$0xff] }
 0x19a   : > { %v7210_v39 = vadd.f32 %v5242_v0, %v7109_v6  ;;  %v5156_v20 = vpop.f32.mrf.mxu0  ;;  %v1797_v31 = vpack.c.bf16 %v1779_v58, %v1778_v19 }
 0x19b   : > { %v5244_v26 = vpop.f32.mrf.mxu1  ;;  %v5157_v59 = vadd.f32 %v5156_v20, %v5155_v32  ;;  %v1780_v32 = vld [vmem:[#allocation2 + $0x180] sm:$0xff] }
 0x19c   : > { %v5245_v40 = vadd.f32 %v5244_v26, %v5243_v53  ;;  %v5158_v42 = vpop.f32.mrf.mxu0  ;;  %2217 = vmatmul.mubr.bf16.gmra.mxu0 %v1796_v2  ;;  %v1781_v53 = vld [vmem:[#allocation2 + $0x188] sm:$0xff]  ;;  %v1830_v20 = vld [vmem:[#allocation2 + $0x199] sm:$0xff] }
 0x19d   : > { %v5246_v24 = vpop.f32.mrf.mxu1  ;;  %v7213_v29 = vadd.f32 %v7134_v5, %v5157_v59  ;;  %2224 = vmatprep.mubr.bf16.mxu0 %v1845_v12  ;;  %v1831_v26 = vld [vmem:[#allocation2 + $0x1a1] sm:$0xff]  ;;  %v1798_v14 = vpack.c.bf16 %v1781_v53, %v1780_v32 }
 0x19e   : > { %v7216_v22 = vadd.f32 %v5245_v40, %v7116_v11  ;;  %v5159_v6 = vpop.f32.mrf.mxu0  ;;  %v7231_v40 = vld [vmem:[#allocation8 + $0xb8] sm:$0xff]   ;;  %v1847_v58 = vpack.c.bf16 %v1831_v26, %v1830_v20 }
 0x19f   : > { %v5247_v21 = vpop.f32.mrf.mxu1  ;;  %v5160_v48 = vadd.f32 %v5159_v6, %v5158_v42  ;;  %6078 = vmatprep.subr.bf16.mxu1 %v7231_v40  ;;  %v6392_v32 = vld [vmem:[#allocation2 + $0x8] sm:$0xff] }
 0x1a0   : > { %v5248_v36 = vadd.f32 %v5247_v21, %v5246_v24  ;;  %v7218_v38 = vpop.f32.mrf.mxu0 }
 0x1a1   : > { %v5249_v57 = vpop.f32.mrf.mxu1  ;;  %v7221_v5 = vadd.f32 %v5160_v48, %v7146_v3 }
 0x1a2   : > { %v7224_v1 = vadd.f32 %v5248_v36, %v7123_v37  ;;  %v7226_v11 = vpop.f32.mrf.mxu0 }
 0x1a3   : > { %v5250_v17 = vpop.f32.mrf.mxu1 }
 0x1a4   : > { %v5251_v41 = vadd.f32 %v5250_v17, %v5249_v57  ;;  %v5164_v0 = vpop.f32.mrf.mxu0  ;;  %2225 = vmatmul.mubr.bf16.gmra.mxu0 %v1797_v31  ;;  %v1782_v31 = vld [vmem:[#allocation2 + $0x198] sm:$0xff] }
 0x1a5   : > { %v5252_v56 = vpop.f32.mrf.mxu1  ;;  %2232 = vmatprep.mubr.bf16.mxu0 %v1846_v30  ;;  %v1799_v53 = vpack.c.bf16 %v6392_v32, %v1782_v31 }
 0x1a6   : > { %v7229_v2 = vadd.f32 %v5251_v41, %v7130_v33  ;;  %v5165_v12 = vpop.f32.mrf.mxu0 }
 0x1a7   : > { %v5253_v3 = vpop.f32.mrf.mxu1  ;;  %v5166_v59 = vadd.f32 %v5165_v12, %v5164_v0 }
 0x1a8   : > { %v5254_v37 = vadd.f32 %v5253_v3, %v5252_v56  ;;  %v5167_v42 = vpop.f32.mrf.mxu0 }
 0x1a9   : > { %v5255_v24 = vpop.f32.mrf.mxu1  ;;  %v7234_v19 = vadd.f32 %v7141_v63, %v5166_v59 }
 0x1aa   : > { %v7237_v6 = vadd.f32 %v5254_v37, %v7137_v13  ;;  %v5168_v33 = vpop.f32.mrf.mxu0 }
 0x1ab   : > { %v5256_v21 = vpop.f32.mrf.mxu1  ;;  %v5169_v61 = vadd.f32 %v5168_v33, %v5167_v42 }
 0x1ac   : > { %v5257_v25 = vadd.f32 %v5256_v21, %v5255_v24  ;;  %v5170_v48 = vpop.f32.mrf.mxu0  ;;  %2233 = vmatmul.mubr.bf16.gmra.mxu0 %v1798_v14 }
 0x1ad   : > { %v5258_v36 = vpop.f32.mrf.mxu1  ;;  %v7241_v57 = vadd.f32 %v7148_v15, %v5169_v61  ;;  %2240 = vmatprep.mubr.bf16.mxu0 %v1847_v58 }
 0x1ae   : > { %v7244_v63 = vadd.f32 %v5257_v25, %v7144_v8  ;;  %v5171_v30 = vpop.f32.mrf.mxu0 }
 0x1af   : > { %v5259_v13 = vpop.f32.mrf.mxu1  ;;  %v5172_v17 = vadd.f32 %v5171_v30, %v5170_v48 }
 0x1b0   : > { %v5260_v41 = vadd.f32 %v5259_v13, %v5258_v36  ;;  %v7246_v0 = vpop.f32.mrf.mxu0 }
 0x1b1   : > { %v5261_v56 = vpop.f32.mrf.mxu1  ;;  %v7249_v12 = vadd.f32 %v5172_v17, %v7160_v7 }
 0x1b2   : > { %v7252_v15 = vadd.f32 %v5260_v41, %v7151_v10  ;;  %v7254_v3 = vpop.f32.mrf.mxu0 }
 0x1b3   : > { %v5262_v20 = vpop.f32.mrf.mxu1 }
 0x1b4   : > { %v5263_v8 = vadd.f32 %v5262_v20, %v5261_v56  ;;  %v5176_v26 = vpop.f32.mrf.mxu0  ;;  %2241 = vmatmul.mubr.bf16.gmra.mxu0 %v1799_v53 }
 0x1b5   : > { %v5264_v59 = vpop.f32.mrf.mxu1 }
 0x1b6   : > { %v7257_v37 = vadd.f32 %v5263_v8, %v7158_v45  ;;  %v5177_v42 = vpop.f32.mrf.mxu0 }
 0x1b7   : > { %v5265_v24 = vpop.f32.mrf.mxu1  ;;  %v7259_v14 = vadd.f32 %v5177_v42, %v5176_v26 }
 0x1b8   : > { %v5266_v58 = vadd.f32 %v5265_v24, %v5264_v59  ;;  %v7261_v7 = vpop.f32.mrf.mxu0 }
 0x1b9   : > { %v5267_v33 = vpop.f32.mrf.mxu1 }
 0x1ba   : > { %v1520_v10 = vadd.f32 %v5266_v58, %v7165_v9  ;;  %v7264_v21 = vpop.f32.mrf.mxu0 }
 0x1bb   : > { %v5268_v61 = vpop.f32.mrf.mxu1 }
 0x1bc   : > { %v5269_v25 = vadd.f32 %v5268_v61, %v5267_v33  ;;  %v5952_v36 = vpop.f32.mrf.mxu0 }
 0x1bd   : > { %v5270_v48 = vpop.f32.mrf.mxu1  ;;  %v7267_v31 = vadd.f32 %v5952_v36, %v7187_v50  ;;  %v1226_v50 = vadd.f32 %v7178_v47, %v7125_v52 }
 0x1be   : > { %v1523_v45 = vadd.f32 %v5269_v25, %v7170_v49  ;;  %v1624_v13 = vpop.f32.mrf.mxu0 }
 0x1bf   : > { %v5271_v30 = vpop.f32.mrf.mxu1  ;;  %v7271_v41 = vadd.f32 %v1624_v13, %v7176_v60 }
 0x1c0   : > { %v5272_v17 = vadd.f32 %v5271_v30, %v5270_v48  ;;  %v5953_v32 = vpop.f32.mrf.mxu0 }
 0x1c1   : > { %v5273_v56 = vpop.f32.mrf.mxu1  ;;  %v7274_v9 = vadd.f32 %v5953_v32, %v7193_v54 }
 0x1c2   : > { %v1528_v53 = vadd.f32 %v5272_v17, %v7173_v18  ;;  %v7277_v8 = vpop.f32.mrf.mxu0 }
 0x1c3   : > { %v5274_v20 = vpop.f32.mrf.mxu1 }
 0x1c4   : > { %v5275_v49 = vadd.f32 %v5274_v20, %v5273_v56  ;;  %v5956_v59 = vpop.f32.mrf.mxu0 }
 0x1c5   : > { %v5276_v26 = vpop.f32.mrf.mxu1  ;;  %v7282_v42 = vadd.f32 %v5956_v59, %v7210_v39 }
 0x1c6   : > { %v7284_v60 = vadd.f32 %v5275_v49, %v1226_v50  ;;  %v1640_v58 = vpop.f32.mrf.mxu0 }
 0x1c7   : > { %v5277_v24 = vpop.f32.mrf.mxu1  ;;  %v7287_v33 = vadd.f32 %v1640_v58, %v7199_v16 }
 0x1c8   : > { %v5278_v54 = vadd.f32 %v5277_v24, %v5276_v26  ;;  %v5957_v61 = vpop.f32.mrf.mxu0 }
 0x1c9   : > { %v5279_v18 = vpop.f32.mrf.mxu1  ;;  %v7290_v25 = vadd.f32 %v5957_v61, %v7216_v22 }
 0x1ca   : > { %v1536_v52 = vadd.f32 %v5278_v54, %v7184_v43  ;;  %v7293_v48 = vpop.f32.mrf.mxu0 }
 0x1cb   : > { %v5280_v47 = vpop.f32.mrf.mxu1 }
 0x1cc   : > { %v5281_v39 = vadd.f32 %v5280_v47, %v5279_v18  ;;  %v5960_v30 = vpop.f32.mrf.mxu0 }
 0x1cd   : > { %v5282_v36 = vpop.f32.mrf.mxu1  ;;  %v7296_v13 = vadd.f32 %v5960_v30, %v7237_v6  ;;  %v1242_v6 = vadd.f32 %v7201_v46, %v7139_v55 }
 0x1ce   : > { %v1539_v17 = vadd.f32 %v5281_v39, %v7190_v34  ;;  %v1656_v56 = vpop.f32.mrf.mxu0 }
 0x1cf   : > { %v5283_v16 = vpop.f32.mrf.mxu1  ;;  %v7300_v20 = vadd.f32 %v1656_v56, %v7224_v1 }
 0x1d0   : > { %v5284_v32 = vadd.f32 %v5283_v16, %v5282_v36  ;;  %v5961_v50 = vpop.f32.mrf.mxu0 }
 0x1d1   : > { %v5285_v22 = vpop.f32.mrf.mxu1  ;;  %v7303_v43 = vadd.f32 %v5961_v50, %v7244_v63 }
 0x1d2   : > { %v1544_v49 = vadd.f32 %v5284_v32, %v7196_v4  ;;  %v7306_v59 = vpop.f32.mrf.mxu0 }
 0x1d3   : > { %v5286_v26 = vpop.f32.mrf.mxu1 }
 0x1d4   : > { %v5287_v34 = vadd.f32 %v5286_v26, %v5285_v22  ;;  %v5964_v58 = vpop.f32.mrf.mxu0 }
 0x1d5   : > { %v5288_v24 = vpop.f32.mrf.mxu1  ;;  %v7310_v54 = vadd.f32 %v5964_v58, %v1520_v10 }
 0x1d6   : > { %v7312_v1 = vadd.f32 %v5287_v34, %v1242_v6  ;;  %v1672_v61 = vpop.f32.mrf.mxu0 }
 0x1d7   : > { %v5289_v18 = vpop.f32.mrf.mxu1  ;;  %v7315_v63 = vadd.f32 %v1672_v61, %v7252_v15  ;;  %v5163_v15 = vadd.f32 %v7226_v11, %v7218_v38 }
 0x1d8   : > { %v5290_v47 = vadd.f32 %v5289_v18, %v5288_v24  ;;  %v5965_v39 = vpop.f32.mrf.mxu0 }
 0x1d9   : > { %v5291_v4 = vpop.f32.mrf.mxu1  ;;  %v7317_v36 = vadd.f32 %v5965_v39, %v1523_v45 }
 0x1da   : > { %v1552_v30 = vadd.f32 %v5290_v47, %v7207_v62  ;;  %v7320_v46 = vpop.f32.mrf.mxu0 }
 0x1db   : > { %v5292_v55 = vpop.f32.mrf.mxu1 }
 0x1dc   : > { %v5293_v16 = vadd.f32 %v5292_v55, %v5291_v4  ;;  %v5968_v56 = vpop.f32.mrf.mxu0 }
 0x1dd   : > { %v5294_v10 = vpop.f32.mrf.mxu1  ;;  %v7322_v32 = vadd.f32 %v5968_v56, %v1536_v52  ;;  %v1258_v52 = vadd.f32 %v5163_v15, %v7153_v51 }
 0x1de   : > { %v1555_v22 = vadd.f32 %v5293_v16, %v7213_v29  ;;  %v1688_v26 = vpop.f32.mrf.mxu0 }
 0x1df   : > { %v5295_v50 = vpop.f32.mrf.mxu1  ;;  %v7327_v45 = vadd.f32 %v1688_v26, %v1528_v53 }
 0x1e0   : > { %v5296_v6 = vadd.f32 %v5295_v50, %v5294_v10  ;;  %v5969_v62 = vpop.f32.mrf.mxu0 }
 0x1e1   : > { %v5297_v34 = vpop.f32.mrf.mxu1  ;;  %v7329_v24 = vadd.f32 %v5969_v62, %v1539_v17  ;;  %v6349_v17 = vld [vmem:[#allocation8 + $0x78] sm:$0xff]  }
 0x1e2   : > { %v1560_v58 = vadd.f32 %v5296_v6, %v7221_v5  ;;  %v7332_v61 = vpop.f32.mrf.mxu0  ;;  %5614 = vmatprep.subr.bf16.mxu0 %v6349_v17 }
 0x1e3   : > { %v5298_v18 = vpop.f32.mrf.mxu1 }
 0x1e4   : > { %v5299_v29 = vadd.f32 %v5298_v18, %v5297_v34  ;;  %v5972_v4 = vpop.f32.mrf.mxu0 }
 0x1e5   : > { %v5300_v47 = vpop.f32.mrf.mxu1  ;;  %v7335_v39 = vadd.f32 %v5972_v4, %v1552_v30 }
 0x1e6   : > { %v7337_v38 = vadd.f32 %v5299_v29, %v1258_v52  ;;  %v1704_v53 = vpop.f32.mrf.mxu0  ;;  %v5175_v52 = vadd.f32 %v7254_v3, %v7246_v0 }
 0x1e7   : > { %v5301_v11 = vpop.f32.mrf.mxu1  ;;  %v7339_v16 = vadd.f32 %v1704_v53, %v1544_v49 }
 0x1e8   : > { %v5302_v55 = vadd.f32 %v5301_v11, %v5300_v47  ;;  %v5973_v5 = vpop.f32.mrf.mxu0  ;;  %v1274_v17 = vadd.f32 %v5175_v52, %v7167_v28 }
 0x1e9   : > { %v5303_v10 = vpop.f32.mrf.mxu1  ;;  %v7341_v56 = vadd.f32 %v5973_v5, %v1555_v22 }
 0x1ea   : > { %v1568_v50 = vadd.f32 %v5302_v55, %v7234_v19  ;;  %v7344_v26 = vpop.f32.mrf.mxu0 }
 0x1eb   : > { %v5304_v51 = vpop.f32.mrf.mxu1 }
 0x1ec   : > { %v5305_v30 = vadd.f32 %v5304_v51, %v5303_v10  ;;  %v5976_v6 = vpop.f32.mrf.mxu0  ;;  %v5181_v51 = vadd.f32 %v7264_v21, %v7261_v7 }
 0x1ed   : > { %v5306_v15 = vpop.f32.mrf.mxu1  ;;  %v7346_v34 = vadd.f32 %v5976_v6, %v1568_v50 }
 0x1ee   : > { %v1571_v62 = vadd.f32 %v5305_v30, %v7241_v57  ;;  %v1720_v18 = vpop.f32.mrf.mxu0 }
 0x1ef   : > { %v5307_v49 = vpop.f32.mrf.mxu1  ;;  %v7351_v29 = vadd.f32 %v1720_v18, %v1560_v58  ;;  %v1279_v58 = vadd.f32 %v7155_v44, %v7259_v14  ;;  %v1282_v18 = vadd.f32 %v7162_v27, %v5181_v51 }
 0x1f0   : > { %v5308_v22 = vadd.f32 %v5307_v49, %v5306_v15  ;;  %v5977_v47 = vpop.f32.mrf.mxu0 }
 0x1f1   : > { %v5309_v19 = vpop.f32.mrf.mxu1  ;;  %v7353_v4 = vadd.f32 %v5977_v47, %v1571_v62 }
 0x1f2   : > { %v1576_v11 = vadd.f32 %v5308_v22, %v7249_v12  ;;  %v7356_v55 = vpop.f32.mrf.mxu0 }
 0x1f3   : > { %v5310_v53 = vpop.f32.mrf.mxu1 }
 0x1f4   : > { %v5311_v57 = vadd.f32 %v5310_v53, %v5309_v19  ;;  %v5980_v5 = vpop.f32.mrf.mxu0 }
 0x1f5   : > { %v5312_v10 = vpop.f32.mrf.mxu1 }
 0x1f6   : > { %v7359_v50 = vadd.f32 %v5311_v57, %v1274_v17  ;;  %v1736_v3 = vpop.f32.mrf.mxu0 }
 0x1f7   : > { %v5313_v0 = vpop.f32.mrf.mxu1  ;;  %v7365_v12 = vadd.f32 %v1736_v3, %v1576_v11  ;;  %v7383_v3 = vld [vmem:[%s8296_s3] ss:$0 sm:$0xff] }
 0x1f8   : > { %v5314_v30 = vadd.f32 %v5313_v0, %v5312_v10  ;;  %v5981_v6 = vpop.f32.mrf.mxu0  ;;  %v7377_v10 = vld [vmem:[%s8295_s2] ss:$0 sm:$0xff] }
 0x1f9   : > { %v5315_v15 = vpop.f32.mrf.mxu1 }
 0x1fa   : > { %v1584_v62 = vadd.f32 %v5314_v30, %v1279_v58  ;;  %v7367_v49 = vpop.f32.mrf.mxu0  ;;  %v1628_v30 = vadd.f32 %v7277_v8, %v7181_v23 }
 0x1fb   : > { %v5316_v28 = vpop.f32.mrf.mxu1 }
 0x1fc   : > { %v7370_v52 = vadd.f32 %v5980_v5, %v1584_v62  ;;  %v5317_v22 = vadd.f32 %v5316_v28, %v5315_v15  ;;  %v5358_v19 = vpop.f32.mrf.mxu0 }
 0x1fd   : > { %v6000_v47 = vpop.f32.mrf.mxu1 }
 0x1fe   : > { %v1587_v44 = vadd.f32 %v5317_v22, %v1282_v18  ;;  %v5359_v14 = vpop.f32.mrf.mxu0 }
 0x1ff   : > { %v2283_v53 = vpop.f32.mrf.mxu1  ;;  %v5360_v21 = vadd.f32 %v5359_v14, %v5358_v19 }
 0x200   : > { %v7372_v7 = vadd.f32 %v5981_v6, %v1587_v44  ;;  %v5361_v11 = vpop.f32.mrf.mxu0 }
 0x201   : > { %v6001_v17 = vpop.f32.mrf.mxu1  ;;  %v2284_v57 = vadd.f32 %v5360_v21, %v2283_v53 }
 0x202   : > { %v5362_v27 = vpop.f32.mrf.mxu0 }
 0x203   : > { %v2410_v5 = vadd.f32 %v2284_v57, %v7271_v41  ;;  %v5363_v0 = vadd.f32 %v5362_v27, %v5361_v11  ;;  %v2286_v58 = vpop.f32.mrf.mxu1 }
 0x204   : > { %v5364_v51 = vpop.f32.mrf.mxu0 }
 0x205   : > { %v2449_v15 = vmul.f32 %v7377_v10, %v2410_v5  ;;  %v2287_v6 = vadd.f32 %v5363_v0, %v2286_v58  ;;  %v6004_v19 = vpop.f32.mrf.mxu1 }
 0x206   : > { %v5365_v62 = vpop.f32.mrf.mxu0 }
 0x207   : > { %v2488_v28 = vadd.f32 %v7383_v3, %v2449_v15  ;;  %v2411_v18 = vadd.f32 %v2287_v6, %v1628_v30  ;;  %v5366_v22 = vadd.f32 %v5365_v62, %v5364_v51  ;;  %v2299_v57 = vpop.f32.mrf.mxu1 }
 0x208   : > { %v5367_v41 = vpop.f32.mrf.mxu0 }
 0x209   : > { %v2520_v44 = vmax.f32 %v2488_v28, 0.0  ;;  %v2450_v14 = vmul.f32 %v7377_v10, %v2411_v18  ;;  %v2292_v53 = vadd.f32 %v6000_v47, %v5366_v22  ;;  %v6005_v62 = vpop.f32.mrf.mxu1 }
 0x20a   : > { %v5368_v21 = vpop.f32.mrf.mxu0 }
 0x20b   : > { %2552 = vst [vmem:[#allocation2 + $0x19] sm:$0xff] %v2520_v44  ;;  %v2489_v11 = vadd.f32 %v7383_v3, %v2450_v14  ;;  %v2412_v23 = vadd.f32 %v2292_v53, %v7267_v31  ;;  %v5369_v8 = vadd.f32 %v5368_v21, %v5367_v41  ;;  %v2302_v21 = vpop.f32.mrf.mxu1 }
 0x20c   : > { %v5370_v27 = vpop.f32.mrf.mxu0 }
 0x20d   : > { %v2521_v5 = vmax.f32 %v2489_v11, 0.0  ;;  %v2451_v0 = vmul.f32 %v7377_v10, %v2412_v23  ;;  %v2295_v58 = vadd.f32 %v6001_v17, %v5369_v8 }
 0x20e   : > { %v5371_v51 = vpop.f32.mrf.mxu0 }
 0x20f   : > { %2553 = vst [vmem:[#allocation2 + $0x21] sm:$0xff] %v2521_v5  ;;  %v2490_v30 = vadd.f32 %v7383_v3, %v2451_v0  ;;  %v2413_v15 = vadd.f32 %v2295_v58, %v7274_v9  ;;  %v5372_v47 = vadd.f32 %v5371_v51, %v5370_v27  ;;  %v2856_v6 = vpack.c.bf16 %v2521_v5, %v2520_v44 }
 0x210   : > { %v5373_v28 = vpop.f32.mrf.mxu0  ;;  %v1644_v9 = vadd.f32 %v7293_v48, %v7204_v35  ;;  %v6345_v48 = vld [vmem:[#allocation8 + $0xb0] sm:$0xff]  }
 0x211   : > { %v2522_v18 = vmax.f32 %v2490_v30, 0.0  ;;  %v2452_v31 = vmul.f32 %v7377_v10, %v2413_v15  ;;  %v2300_v22 = vadd.f32 %v5372_v47, %v2299_v57  ;;  %3144 = vmatprep.mubr.bf16.mxu1 %v2856_v6  ;;  %v7402_v6 = vpop.f32.mrf.mxu1 }
 0x212   : > { %v5374_v41 = vpop.f32.mrf.mxu0  ;;  %v2776_v15 = vld [vmem:[#allocation2 + $0x18] sm:$0xff] }
 0x213   : > { %2554 = vst [vmem:[#allocation2 + $0x31] sm:$0xff] %v2522_v18  ;;  %v2491_v14 = vadd.f32 %v7383_v3, %v2452_v31  ;;  %v2414_v17 = vadd.f32 %v2300_v22, %v7287_v33  ;;  %v5375_v53 = vadd.f32 %v5374_v41, %v5373_v28 }
 0x214   : > { %v5376_v11 = vpop.f32.mrf.mxu0 }
 0x215   : > { %v2523_v44 = vmax.f32 %v2491_v14, 0.0  ;;  %v2453_v23 = vmul.f32 %v7377_v10, %v2414_v17  ;;  %v2303_v8 = vadd.f32 %v5375_v53, %v2302_v21 }
 0x216   : > { %v5377_v27 = vpop.f32.mrf.mxu0  ;;  %v2872_v5 = vld [vmem:[#allocation2 + $0x1a] sm:$0xff]  ;;  %v2873_v57 = vld [vmem:[#allocation2 + $0x22] sm:$0xff] }
 0x217   : > { %v2777_v0 = vld [vmem:[#allocation2 + $0x20] sm:$0xff]  ;;  %2555 = vst [vmem:[#allocation2 + $0x39] sm:$0xff] %v2523_v44  ;;  %v2492_v58 = vadd.f32 %v7383_v3, %v2453_v23  ;;  %v2415_v51 = vadd.f32 %v2303_v8, %v1644_v9  ;;  %v5378_v30 = vadd.f32 %v5377_v27, %v5376_v11  ;;  %v2904_v33 = vpack.c.bf16 %v2873_v57, %v2872_v5  ;;  %v2315_v11 = vpop.f32.mrf.mxu1  ;;  %v6350_v8 = vld [vmem:[#allocation8 + $0x38] sm:$0xff]  }
 0x218   : > { %v5379_v47 = vpop.f32.mrf.mxu0  ;;  %v2808_v28 = vpack.c.bf16 %v2777_v0, %v2776_v15  ;;  %v2857_v35 = vpack.c.bf16 %v2523_v44, %v2522_v18  ;;  %v6346_v18 = vld [vmem:[#allocation8 + $0xa8] sm:$0xff]  }
 0x219   : > { %v2524_v31 = vmax.f32 %v2492_v58, 0.0  ;;  %v2454_v22 = vmul.f32 %v7377_v10, %v2415_v51  ;;  %v2308_v41 = vadd.f32 %v6004_v19, %v5378_v30  ;;  %6046 = vmatprep.mubr.bf16.mxu0 %v2904_v33  ;;  %v7411_v33 = vpop.f32.mrf.mxu1 }
 0x21a   : > { %v5380_v14 = vpop.f32.mrf.mxu0  ;;  %3145 = vmatmul.mubr.bf16.vlgmr.msra.gmra.mxu1 %v2808_v28  ;;  %v2778_v30 = vld [vmem:[#allocation2 + $0x30] sm:$0xff] }
 0x21b   : > { %2556 = vst [vmem:[#allocation2 + $0x49] sm:$0xff] %v2524_v31  ;;  %v2493_v17 = vadd.f32 %v7383_v3, %v2454_v22  ;;  %v2416_v53 = vadd.f32 %v2308_v41, %v7282_v42  ;;  %v5381_v21 = vadd.f32 %v5380_v14, %v5379_v47  ;;  %6079 = vmatpush3.bf16.msra.mxu1 %v7231_v40 }
 0x21c   : > { %3152 = vmatprep.mubr.bf16.mxu1 %v2857_v35  ;;  %v5382_v9 = vpop.f32.mrf.mxu0  ;;  %6080 = vmatprep.subr.bf16.mxu1 %v6345_v48  ;;  %v6351_v35 = vld [vmem:[#allocation8 + $0x70] sm:$0xff]  }
 0x21d   : > { %v2525_v44 = vmax.f32 %v2493_v17, 0.0  ;;  %v2455_v23 = vmul.f32 %v7377_v10, %v2416_v53  ;;  %v2311_v19 = vadd.f32 %v6005_v62, %v5381_v21  ;;  %v6347_v62 = vld [vmem:[#allocation8 + $0xa0] sm:$0xff]  }
 0x21e   : > { %v5383_v27 = vpop.f32.mrf.mxu0  ;;  %v2874_v5 = vld [vmem:[#allocation2 + $0x32] sm:$0xff]  ;;  %v2875_v57 = vld [vmem:[#allocation2 + $0x3a] sm:$0xff] }
 0x21f   : > { %v2779_v0 = vld [vmem:[#allocation2 + $0x38] sm:$0xff]  ;;  %2557 = vst [vmem:[#allocation2 + $0x51] sm:$0xff] %v2525_v44  ;;  %v2494_v42 = vadd.f32 %v7383_v3, %v2455_v23  ;;  %v2417_v58 = vadd.f32 %v2311_v19, %v7290_v25  ;;  %v5384_v40 = vadd.f32 %v5383_v27, %v5382_v9  ;;  %v2905_v51 = vpack.c.bf16 %v2875_v57, %v2874_v5  ;;  %v6352_v25 = vld [vmem:[#allocation8 + $0x30] sm:$0xff]  }
 0x220   : > { %6081 = vmatpush3.bf16.msra.mxu1 %v6345_v48  ;;  %v5385_v15 = vpop.f32.mrf.mxu0  ;;  %v2809_v47 = vpack.c.bf16 %v2779_v0, %v2778_v30  ;;  %v2858_v28 = vpack.c.bf16 %v2525_v44, %v2524_v31  ;;  %v2318_v31 = vpop.f32.mrf.mxu1  ;;  %v6348_v44 = vld [vmem:[#allocation8 + $0x98] sm:$0xff]   ;;  %v6354_v23 = vld [vmem:[#allocation8 + $0x68] sm:$0xff]  }
 0x221   : > { %6082 = vmatprep.subr.bf16.mxu1 %v6346_v18  ;;  %v2526_v22 = vmax.f32 %v2494_v42, 0.0  ;;  %v2456_v41 = vmul.f32 %v7377_v10, %v2417_v58  ;;  %v2316_v14 = vadd.f32 %v5384_v40, %v2315_v11  ;;  %6047 = vmatmul.mubr.bf16.vlgmr.msra.gmra.mxu0 %v2905_v51  ;;  %v1660_v11 = vadd.f32 %v7306_v59, %v7229_v2  ;;  %v6355_v5 = vld [vmem:[#allocation8 + $0x28] sm:$0xff]  }
 0x222   : > { %v5386_v17 = vpop.f32.mrf.mxu0  ;;  %3153 = vmatmul.mubr.bf16.gmra.mxu1 %v2809_v47  ;;  %5615 = vmatpush3.bf16.msra.mxu0 %v6350_v8  ;;  %v2780_v30 = vld [vmem:[#allocation2 + $0x48] sm:$0xff]  ;;  %v7420_v2 = vpop.f32.mrf.mxu1 }
 0x223   : > { %2558 = vst [vmem:[#allocation2 + $0x61] sm:$0xff] %v2526_v22  ;;  %v2495_v48 = vadd.f32 %v7383_v3, %v2456_v41  ;;  %v2418_v53 = vadd.f32 %v2316_v14, %v7300_v20  ;;  %v5387_v21 = vadd.f32 %v5386_v17, %v5385_v15  ;;  %3160 = vmatprep.mubr.bf16.mxu1 %v2858_v28  ;;  %v6353_v28 = vld [vmem:[#allocation8 + $0x90] sm:$0xff]  }
 0x224   : > { %6083 = vmatpush3.bf16.msra.mxu1 %v6346_v18  ;;  %v5388_v9 = vpop.f32.mrf.mxu0  ;;  %5616 = vmatprep.subr.bf16.mxu0 %v6351_v35  ;;  %v6356_v35 = vld [vmem:[#allocation8 + $0x60] sm:$0xff]  }
 0x225   : > { %6084 = vmatprep.subr.bf16.mxu1 %v6347_v62  ;;  %v2527_v19 = vmax.f32 %v2495_v48, 0.0  ;;  %v2457_v8 = vmul.f32 %v7377_v10, %v2418_v53  ;;  %v2319_v27 = vadd.f32 %v5387_v21, %v2318_v31  ;;  %v6357_v48 = vld [vmem:[#allocation8 + $0x20] sm:$0xff]   ;;  %v2331_v21 = vpop.f32.mrf.mxu1 }
 0x226   : > { %v5389_v57 = vpop.f32.mrf.mxu0  ;;  %v2876_v0 = vld [vmem:[#allocation2 + $0x4a] sm:$0xff]  ;;  %v2877_v20 = vld [vmem:[#allocation2 + $0x52] sm:$0xff]  ;;  %5617 = vmatpush3.bf16.msra.mxu0 %v6352_v25 }
 0x227   : > { %v2781_v42 = vld [vmem:[#allocation2 + $0x50] sm:$0xff]  ;;  %2559 = vst [vmem:[#allocation2 + $0x69] sm:$0xff] %v2527_v19  ;;  %v2496_v18 = vadd.f32 %v7383_v3, %v2457_v8  ;;  %v2419_v58 = vadd.f32 %v2319_v27, %v1660_v11  ;;  %v5390_v40 = vadd.f32 %v5389_v57, %v5388_v9  ;;  %v2906_v51 = vpack.c.bf16 %v2877_v20, %v2876_v0  ;;  %v6358_v9 = vld [vmem:[#allocation8 + $0x88] sm:$0xff]   ;;  %v6360_v8 = vld [vmem:[#allocation8 + $0x18] sm:$0xff]  }
 0x228   : > { %6085 = vmatpush3.bf16.msra.mxu1 %v6347_v62  ;;  %v5391_v15 = vpop.f32.mrf.mxu0  ;;  %v2810_v59 = vpack.c.bf16 %v2781_v42, %v2780_v30  ;;  %v2859_v47 = vpack.c.bf16 %v2527_v19, %v2526_v22  ;;  %5618 = vmatprep.subr.bf16.mxu0 %v6354_v23  ;;  %v6359_v23 = vld [vmem:[#allocation8 + $0x58] sm:$0xff]   ;;  %v6361_v30 = vld [vmem:[#allocation8 + $0x50] sm:$0xff]  }
 0x229   : > { %6086 = vmatprep.subr.bf16.mxu1 %v6348_v44  ;;  %v2528_v41 = vmax.f32 %v2496_v18, 0.0  ;;  %v2458_v14 = vmul.f32 %v7377_v10, %v2419_v58  ;;  %v2324_v17 = vadd.f32 %v7402_v6, %v5390_v40  ;;  %6050 = vmatprep.mubr.bf16.mxu0 %v2906_v51  ;;  %v7432_v58 = vpop.f32.mrf.mxu1 }
 0x22a   : > { %v5392_v25 = vpop.f32.mrf.mxu0  ;;  %3161 = vmatmul.mubr.bf16.gmra.mxu1 %v2810_v59  ;;  %5619 = vmatpush3.bf16.msra.mxu0 %v6355_v5  ;;  %v2782_v18 = vld [vmem:[#allocation2 + $0x60] sm:$0xff] }
 0x22b   : > { %2560 = vst [vmem:[#allocation2 + $0x79] sm:$0xff] %v2528_v41  ;;  %v2497_v62 = vadd.f32 %v7383_v3, %v2458_v14  ;;  %v2420_v53 = vadd.f32 %v2324_v17, %v7296_v13  ;;  %v5393_v22 = vadd.f32 %v5392_v25, %v5391_v15  ;;  %3168 = vmatprep.mubr.bf16.mxu1 %v2859_v47  ;;  %v6363_v15 = vld [vmem:[#allocation8 + $0x80] sm:$0xff]   ;;  %v6362_v14 = vld [vmem:[#allocation8 + $0x10] sm:$0xff]   ;;  %v2334_v25 = vpop.f32.mrf.mxu1 }
 0x22c   : > { %6087 = vmatpush3.bf16.msra.mxu1 %v6348_v44  ;;  %v5394_v31 = vpop.f32.mrf.mxu0  ;;  %5620 = vmatprep.subr.bf16.mxu0 %v6356_v35 }
 0x22d   : > { %6088 = vmatprep.subr.bf16.mxu1 %v6353_v28  ;;  %v2529_v6 = vmax.f32 %v2497_v62, 0.0  ;;  %v2459_v11 = vmul.f32 %v7377_v10, %v2420_v53  ;;  %v2327_v19 = vadd.f32 %v7411_v33, %v5393_v22  ;;  %v6364_v62 = vld [vmem:[#allocation8 + $0x48] sm:$0xff]   ;;  %v6368_v53 = vld [vmem:[#allocation8 + $0x1f8] sm:$0xff]   ;;  %v1676_v22 = vadd.f32 %v7320_v46, %v7257_v37  ;;  %v6366_v37 = vld [vmem:[#allocation8 + $0x40] sm:$0xff]  }
 0x22e   : > { %v5395_v27 = vpop.f32.mrf.mxu0  ;;  %v2878_v5 = vld [vmem:[#allocation2 + $0x62] sm:$0xff]  ;;  %v2879_v57 = vld [vmem:[#allocation2 + $0x6a] sm:$0xff]  ;;  %5621 = vmatpush3.bf16.msra.mxu0 %v6357_v48 }
 0x22f   : > { %v2783_v0 = vld [vmem:[#allocation2 + $0x68] sm:$0xff]  ;;  %2561 = vst [vmem:[#allocation2 + $0x81] sm:$0xff] %v2529_v6  ;;  %v2498_v13 = vadd.f32 %v7383_v3, %v2459_v11  ;;  %v2421_v44 = vadd.f32 %v2327_v19, %v7303_v43  ;;  %v5396_v20 = vadd.f32 %v5395_v27, %v5394_v31  ;;  %v7430_v42 = vpack.c.bf16 %v2879_v57, %v2878_v5 }
 0x230   : > { %6089 = vmatpush3.bf16.msra.mxu1 %v6353_v28  ;;  %v5397_v40 = vpop.f32.mrf.mxu0  ;;  %v2811_v33 = vpack.c.bf16 %v2783_v0, %v2782_v18  ;;  %v2860_v51 = vpack.c.bf16 %v2529_v6, %v2528_v41  ;;  %5622 = vmatprep.subr.bf16.mxu0 %v6359_v23  ;;  %v6365_v6 = vld [vmem:[#allocation8 + $0x8] sm:$0xff]  }
 0x231   : > { %6090 = vmatprep.subr.bf16.mxu1 %v6358_v9  ;;  %v2530_v59 = vmax.f32 %v2498_v13, 0.0  ;;  %v2460_v47 = vmul.f32 %v7377_v10, %v2421_v44  ;;  %v2332_v35 = vadd.f32 %v5396_v20, %v2331_v21  ;;  %6051 = vmatmul.mubr.bf16.gmra.mxu0 %v7430_v42  ;;  %v7444_v13 = vpop.f32.mrf.mxu1 }
 0x232   : > { %v5398_v43 = vpop.f32.mrf.mxu0  ;;  %3169 = vmatmul.mubr.bf16.gmra.mxu1 %v2811_v33  ;;  %5623 = vmatpush3.bf16.msra.mxu0 %v6360_v8  ;;  %v2784_v0 = vld [vmem:[#allocation2 + $0x78] sm:$0xff] }
 0x233   : > { %2562 = vst [vmem:[#allocation2 + $0x91] sm:$0xff] %v2530_v59  ;;  %v2499_v28 = vadd.f32 %v7383_v3, %v2460_v47  ;;  %v2422_v17 = vadd.f32 %v2332_v35, %v7315_v63  ;;  %v5399_v41 = vadd.f32 %v5398_v43, %v5397_v40  ;;  %3176 = vmatprep.mubr.bf16.mxu1 %v2860_v51  ;;  %v2347_v43 = vpop.f32.mrf.mxu1 }
 0x234   : > { %6091 = vmatpush3.bf16.msra.mxu1 %v6358_v9  ;;  %v5400_v48 = vpop.f32.mrf.mxu0  ;;  %5624 = vmatprep.subr.bf16.mxu0 %v6361_v30  ;;  %v6367_v30 = vld [vmem:[#allocation8] sm:$0xff]  }
 0x235   : > { %6092 = vmatprep.subr.bf16.mxu1 %v6363_v15  ;;  %v2531_v21 = vmax.f32 %v2499_v28, 0.0  ;;  %v2461_v31 = vmul.f32 %v7377_v10, %v2422_v17  ;;  %v2335_v23 = vadd.f32 %v5399_v41, %v2334_v25 }
 0x236   : > { %v5401_v11 = vpop.f32.mrf.mxu0  ;;  %v2880_v19 = vld [vmem:[#allocation2 + $0x7a] sm:$0xff]  ;;  %v2881_v63 = vld [vmem:[#allocation2 + $0x82] sm:$0xff]  ;;  %5625 = vmatpush3.bf16.msra.mxu0 %v6362_v14 }
 0x237   : > { %v2785_v8 = vld [vmem:[#allocation2 + $0x80] sm:$0xff]  ;;  %2563 = vst [vmem:[#allocation2 + $0x99] sm:$0xff] %v2531_v21  ;;  %v2500_v9 = vadd.f32 %v7383_v3, %v2461_v31  ;;  %v2423_v27 = vadd.f32 %v2335_v23, %v1676_v22  ;;  %v5402_v5 = vadd.f32 %v5401_v11, %v5400_v48  ;;  %v7442_v57 = vpack.c.bf16 %v2881_v63, %v2880_v19  ;;  %v6017_v23 = vpop.f32.mrf.mxu1 }
 0x238   : > { %6093 = vmatpush3.bf16.msra.mxu1 %v6363_v15  ;;  %v5403_v46 = vpop.f32.mrf.mxu0  ;;  %v2812_v44 = vpack.c.bf16 %v2785_v8, %v2784_v0  ;;  %v2861_v20 = vpack.c.bf16 %v2531_v21, %v2530_v59  ;;  %5626 = vmatprep.subr.bf16.mxu0 %v6364_v62  ;;  %v7451_v59 = vld [vmem:[#allocation8 + $0x238] sm:$0xff]  }
 0x239   : > { %5750 = vmatprep.subr.bf16.mxu1 %v6368_v53  ;;  %v2532_v18 = vmax.f32 %v2500_v9, 0.0  ;;  %v2462_v40 = vmul.f32 %v7377_v10, %v2423_v27  ;;  %v2340_v33 = vadd.f32 %v7420_v2, %v5402_v5  ;;  %6054 = vmatprep.mubr.bf16.mxu0 %v7442_v57  ;;  %v2350_v0 = vpop.f32.mrf.mxu1 }
 0x23a   : > { %v5404_v51 = vpop.f32.mrf.mxu0  ;;  %3177 = vmatmul.mubr.bf16.gmra.mxu1 %v2812_v44  ;;  %5627 = vmatpush3.bf16.msra.mxu0 %v6365_v6  ;;  %v2786_v31 = vld [vmem:[#allocation2 + $0x90] sm:$0xff] }
 0x23b   : > { %2564 = vst [vmem:[#allocation2 + $0xa9] sm:$0xff] %v2532_v18  ;;  %v2501_v15 = vadd.f32 %v7383_v3, %v2462_v40  ;;  %v2424_v47 = vadd.f32 %v2340_v33, %v7310_v54  ;;  %v5405_v35 = vadd.f32 %v5404_v51, %v5403_v46  ;;  %3184 = vmatprep.mubr.bf16.mxu1 %v2861_v20 }
 0x23c   : > { %5628 = vmatprep.subr.bf16.mxu0 %v6366_v37  ;;  %v5406_v14 = vpop.f32.mrf.mxu0  ;;  %v1692_v46 = vadd.f32 %v7332_v61, %v7284_v60 }
 0x23d   : > { %v2533_v28 = vmax.f32 %v2501_v15, 0.0  ;;  %v2463_v2 = vmul.f32 %v7377_v10, %v2424_v47  ;;  %v2343_v17 = vadd.f32 %v7432_v58, %v5405_v35 }
 0x23e   : > { %v5407_v41 = vpop.f32.mrf.mxu0  ;;  %v2882_v25 = vld [vmem:[#allocation2 + $0x92] sm:$0xff]  ;;  %v2883_v48 = vld [vmem:[#allocation2 + $0x9a] sm:$0xff]  ;;  %5629 = vmatpush3.bf16.msra.mxu0 %v6367_v30 }
 0x23f   : > { %v2787_v62 = vld [vmem:[#allocation2 + $0x98] sm:$0xff]  ;;  %2565 = vst [vmem:[#allocation2 + $0xb1] sm:$0xff] %v2533_v28  ;;  %v2502_v54 = vadd.f32 %v7383_v3, %v2463_v2  ;;  %v2425_v53 = vadd.f32 %v2343_v17, %v7317_v36  ;;  %v5408_v22 = vadd.f32 %v5407_v41, %v5406_v14  ;;  %v7457_v21 = vpack.c.bf16 %v2883_v48, %v2882_v25 }
 0x240   : > { %6126 = vmatprep.subr.bf16.mxu0 %v7451_v59  ;;  %v5409_v6 = vpop.f32.mrf.mxu0  ;;  %v2813_v11 = vpack.c.bf16 %v2787_v62, %v2786_v31  ;;  %v2862_v58 = vpack.c.bf16 %v2533_v28, %v2532_v18  ;;  %v7470_v28 = vpop.f32.mrf.mxu1 }
 0x241   : > { %v2534_v19 = vmax.f32 %v2502_v54, 0.0  ;;  %v2464_v63 = vmul.f32 %v7377_v10, %v2425_v53  ;;  %v2348_v8 = vadd.f32 %v5408_v22, %v2347_v43  ;;  %6055 = vmatmul.mubr.bf16.gmra.mxu0 %v7457_v21 }
 0x242   : > { %v5410_v9 = vpop.f32.mrf.mxu0  ;;  %3185 = vmatmul.mubr.bf16.gmra.mxu1 %v2813_v11  ;;  %v2788_v43 = vld [vmem:[#allocation2 + $0xa8] sm:$0xff]  ;;  %v2363_v53 = vpop.f32.mrf.mxu1 }
 0x243   : > { %2566 = vst [vmem:[#allocation2 + $0xc1] sm:$0xff] %v2534_v19  ;;  %v2503_v36 = vadd.f32 %v7383_v3, %v2464_v63  ;;  %v2426_v27 = vadd.f32 %v2348_v8, %v7327_v45  ;;  %v5411_v5 = vadd.f32 %v5410_v9, %v5409_v6  ;;  %3192 = vmatprep.mubr.bf16.mxu1 %v2862_v58 }
 0x244   : > { %v5412_v37 = vpop.f32.mrf.mxu0 }
 0x245   : > { %v2535_v44 = vmax.f32 %v2503_v36, 0.0  ;;  %v2465_v20 = vmul.f32 %v7377_v10, %v2426_v27  ;;  %v2351_v18 = vadd.f32 %v5411_v5, %v2350_v0  ;;  %v6021_v5 = vpop.f32.mrf.mxu1 }
 0x246   : > { %v5413_v40 = vpop.f32.mrf.mxu0  ;;  %v2884_v33 = vld [vmem:[#allocation2 + $0xaa] sm:$0xff]  ;;  %v2885_v51 = vld [vmem:[#allocation2 + $0xb2] sm:$0xff] }
 0x247   : > { %v2789_v30 = vld [vmem:[#allocation2 + $0xb0] sm:$0xff]  ;;  %2567 = vst [vmem:[#allocation2 + $0xc9] sm:$0xff] %v2535_v44  ;;  %v2504_v15 = vadd.f32 %v7383_v3, %v2465_v20  ;;  %v2427_v47 = vadd.f32 %v2351_v18, %v1692_v46  ;;  %v5414_v45 = vadd.f32 %v5413_v40, %v5412_v37  ;;  %v7468_v35 = vpack.c.bf16 %v2885_v51, %v2884_v33  ;;  %v2366_v51 = vpop.f32.mrf.mxu1 }
 0x248   : > { %v5415_v14 = vpop.f32.mrf.mxu0  ;;  %v2814_v60 = vpack.c.bf16 %v2789_v30, %v2788_v43  ;;  %v2863_v61 = vpack.c.bf16 %v2535_v44, %v2534_v19 }
 0x249   : > { %v2536_v2 = vmax.f32 %v2504_v15, 0.0  ;;  %v2466_v17 = vmul.f32 %v7377_v10, %v2427_v47  ;;  %v2356_v41 = vadd.f32 %v7444_v13, %v5414_v45  ;;  %6058 = vmatprep.mubr.bf16.mxu0 %v7468_v35  ;;  %v1708_v15 = vadd.f32 %v7344_v26, %v7312_v1 }
 0x24a   : > { %v5416_v25 = vpop.f32.mrf.mxu0  ;;  %3193 = vmatmul.mubr.bf16.gmra.mxu1 %v2814_v60 }
 0x24b   : > { %2568 = vst [vmem:[#allocation2 + $0xd9] sm:$0xff] %v2536_v2  ;;  %v2505_v48 = vadd.f32 %v7383_v3, %v2466_v17  ;;  %v2428_v62 = vadd.f32 %v2356_v41, %v7322_v32  ;;  %v5417_v54 = vadd.f32 %v5416_v25, %v5415_v14  ;;  %3200 = vmatprep.mubr.bf16.mxu1 %v2863_v61  ;;  %v2790_v32 = vld [vmem:[#allocation2 + $0xc0] sm:$0xff] }
 0x24c   : > { %v5418_v22 = vpop.f32.mrf.mxu0 }
 0x24d   : > { %v2537_v31 = vmax.f32 %v2505_v48, 0.0  ;;  %v2467_v6 = vmul.f32 %v7377_v10, %v2428_v62  ;;  %v2359_v11 = vadd.f32 %v6017_v23, %v5417_v54  ;;  %v7495_v54 = vpop.f32.mrf.mxu1 }
 0x24e   : > { %v5419_v58 = vpop.f32.mrf.mxu0  ;;  %v2886_v19 = vld [vmem:[#allocation2 + $0xc2] sm:$0xff]  ;;  %v2887_v13 = vld [vmem:[#allocation2 + $0xca] sm:$0xff] }
 0x24f   : > { %v2791_v63 = vld [vmem:[#allocation2 + $0xc8] sm:$0xff]  ;;  %2569 = vst [vmem:[#allocation2 + $0xe1] sm:$0xff] %v2537_v31  ;;  %v2506_v8 = vadd.f32 %v7383_v3, %v2467_v6  ;;  %v2429_v9 = vadd.f32 %v2359_v11, %v7329_v24  ;;  %v5420_v36 = vadd.f32 %v5419_v58, %v5418_v22  ;;  %v7480_v27 = vpack.c.bf16 %v2887_v13, %v2886_v19  ;;  %v2379_v13 = vpop.f32.mrf.mxu1 }
 0x250   : > { %v5421_v0 = vpop.f32.mrf.mxu0  ;;  %v7482_v37 = vpack.c.bf16 %v2791_v63, %v2790_v32  ;;  %v2864_v46 = vpack.c.bf16 %v2537_v31, %v2536_v2 }
 0x251   : > { %v2538_v44 = vmax.f32 %v2506_v8, 0.0  ;;  %v2468_v23 = vmul.f32 %v7377_v10, %v2429_v9  ;;  %v2364_v20 = vadd.f32 %v5420_v36, %v2363_v53  ;;  %6059 = vmatmul.mubr.bf16.gmra.mxu0 %v7480_v27 }
 0x252   : > { %v5422_v18 = vpop.f32.mrf.mxu0  ;;  %3201 = vmatmul.mubr.bf16.gmra.mxu1 %v7482_v37  ;;  %v2792_v48 = vld [vmem:[#allocation2 + $0xd8] sm:$0xff] }
 0x253   : > { %2570 = vst [vmem:[#allocation2 + $0xf1] sm:$0xff] %v2538_v44  ;;  %v2507_v24 = vadd.f32 %v7383_v3, %v2468_v23  ;;  %v2430_v40 = vadd.f32 %v2364_v20, %v7339_v16  ;;  %v5423_v33 = vadd.f32 %v5422_v18, %v5421_v0  ;;  %3208 = vmatprep.mubr.bf16.mxu1 %v2864_v46 }
 0x254   : > { %v5424_v30 = vpop.f32.mrf.mxu0 }
 0x255   : > { %v2539_v47 = vmax.f32 %v2507_v24, 0.0  ;;  %v2469_v45 = vmul.f32 %v7377_v10, %v2430_v40  ;;  %v2367_v43 = vadd.f32 %v5423_v33, %v2366_v51  ;;  %v6025_v24 = vpop.f32.mrf.mxu1 }
 0x256   : > { %v5425_v14 = vpop.f32.mrf.mxu0  ;;  %v2888_v60 = vld [vmem:[#allocation2 + $0xda] sm:$0xff]  ;;  %v2889_v61 = vld [vmem:[#allocation2 + $0xe2] sm:$0xff] }
 0x257   : > { %v2793_v2 = vld [vmem:[#allocation2 + $0xe0] sm:$0xff]  ;;  %2571 = vst [vmem:[#allocation2 + $0xf9] sm:$0xff] %v2539_v47  ;;  %v2508_v17 = vadd.f32 %v7383_v3, %v2469_v45  ;;  %v2431_v41 = vadd.f32 %v2367_v43, %v1708_v15  ;;  %v5426_v16 = vadd.f32 %v5425_v14, %v5424_v30  ;;  %v7493_v25 = vpack.c.bf16 %v2889_v61, %v2888_v60  ;;  %v2382_v14 = vpop.f32.mrf.mxu1 }
 0x258   : > { %v5427_v62 = vpop.f32.mrf.mxu0  ;;  %v7497_v1 = vpack.c.bf16 %v2793_v2, %v2792_v48  ;;  %v2865_v26 = vpack.c.bf16 %v2539_v47, %v2538_v44  ;;  %v1724_v61 = vadd.f32 %v7356_v55, %v7337_v38 }
 0x259   : > { %v2540_v53 = vmax.f32 %v2508_v17, 0.0  ;;  %v2470_v22 = vmul.f32 %v7377_v10, %v2431_v41  ;;  %v2372_v31 = vadd.f32 %v7470_v28, %v5426_v16  ;;  %6062 = vmatprep.mubr.bf16.mxu0 %v7493_v25 }
 0x25a   : > { %v5428_v6 = vpop.f32.mrf.mxu0  ;;  %3209 = vmatmul.mubr.bf16.gmra.mxu1 %v7497_v1 }
 0x25b   : > { %2572 = vst [vmem:[#allocation2 + $0x109] sm:$0xff] %v2540_v53  ;;  %v2509_v11 = vadd.f32 %v7383_v3, %v2470_v22  ;;  %v2432_v58 = vadd.f32 %v2372_v31, %v7335_v39  ;;  %v5429_v19 = vadd.f32 %v5428_v6, %v5427_v62  ;;  %3216 = vmatprep.mubr.bf16.mxu1 %v2865_v26  ;;  %v2794_v39 = vld [vmem:[#allocation2 + $0xf0] sm:$0xff] }
 0x25c   : > { %v5430_v63 = vpop.f32.mrf.mxu0 }
 0x25d   : > { %v2541_v8 = vmax.f32 %v2509_v11, 0.0  ;;  %v2471_v9 = vmul.f32 %v7377_v10, %v2432_v58  ;;  %v2375_v36 = vadd.f32 %v6021_v5, %v5429_v19  ;;  %v7523_v58 = vpop.f32.mrf.mxu1 }
 0x25e   : > { %v5431_v32 = vpop.f32.mrf.mxu0  ;;  %v2890_v28 = vld [vmem:[#allocation2 + $0xf2] sm:$0xff]  ;;  %v2891_v0 = vld [vmem:[#allocation2 + $0xfa] sm:$0xff] }
 0x25f   : > { %v2795_v46 = vld [vmem:[#allocation2 + $0xf8] sm:$0xff]  ;;  %2573 = vst [vmem:[#allocation2 + $0x111] sm:$0xff] %v2541_v8  ;;  %v2510_v44 = vadd.f32 %v7383_v3, %v2471_v9  ;;  %v2433_v23 = vadd.f32 %v2375_v36, %v7341_v56  ;;  %v5432_v20 = vadd.f32 %v5431_v32, %v5430_v63  ;;  %v7508_v18 = vpack.c.bf16 %v2891_v0, %v2890_v28  ;;  %v2395_v28 = vpop.f32.mrf.mxu1 }
 0x260   : > { %v5433_v40 = vpop.f32.mrf.mxu0  ;;  %v7510_v33 = vpack.c.bf16 %v2795_v46, %v2794_v39  ;;  %v2866_v51 = vpack.c.bf16 %v2541_v8, %v2540_v53 }
 0x261   : > { %v2542_v30 = vmax.f32 %v2510_v44, 0.0  ;;  %v2472_v5 = vmul.f32 %v7377_v10, %v2433_v23  ;;  %v2380_v15 = vadd.f32 %v5432_v20, %v2379_v13  ;;  %6063 = vmatmul.mubr.bf16.gmra.mxu0 %v7508_v18 }
 0x262   : > { %v5434_v47 = vpop.f32.mrf.mxu0  ;;  %3217 = vmatmul.mubr.bf16.gmra.mxu1 %v7510_v33  ;;  %v2796_v6 = vld [vmem:[#allocation2 + $0x108] sm:$0xff] }
 0x263   : > { %2574 = vst [vmem:[#allocation2 + $0x121] sm:$0xff] %v2542_v30  ;;  %v2511_v56 = vadd.f32 %v7383_v3, %v2472_v5  ;;  %v2434_v45 = vadd.f32 %v2380_v15, %v7351_v29  ;;  %v5435_v43 = vadd.f32 %v5434_v47, %v5433_v40  ;;  %3224 = vmatprep.mubr.bf16.mxu1 %v2866_v51  ;;  %v6029_v47 = vpop.f32.mrf.mxu1 }
 0x264   : > { %v5436_v60 = vpop.f32.mrf.mxu0 }
 0x265   : > { %v2543_v2 = vmax.f32 %v2511_v56, 0.0  ;;  %v2473_v17 = vmul.f32 %v7377_v10, %v2434_v45  ;;  %v2383_v41 = vadd.f32 %v5435_v43, %v2382_v14 }
 0x266   : > { %v5437_v16 = vpop.f32.mrf.mxu0  ;;  %v2892_v48 = vld [vmem:[#allocation2 + $0x10a] sm:$0xff]  ;;  %v2893_v62 = vld [vmem:[#allocation2 + $0x112] sm:$0xff] }
 0x267   : > { %v2797_v26 = vld [vmem:[#allocation2 + $0x110] sm:$0xff]  ;;  %2575 = vst [vmem:[#allocation2 + $0x129] sm:$0xff] %v2543_v2  ;;  %v2512_v53 = vadd.f32 %v7383_v3, %v2473_v17  ;;  %v2435_v22 = vadd.f32 %v2383_v41, %v1724_v61  ;;  %v5438_v29 = vadd.f32 %v5437_v16, %v5436_v60  ;;  %v7521_v31 = vpack.c.bf16 %v2893_v62, %v2892_v48  ;;  %v2398_v41 = vpop.f32.mrf.mxu1 }
 0x268   : > { %v5439_v11 = vpop.f32.mrf.mxu0  ;;  %v7525_v38 = vpack.c.bf16 %v2797_v26, %v2796_v6  ;;  %v2867_v55 = vpack.c.bf16 %v2543_v2, %v2542_v30  ;;  %v1740_v48 = vadd.f32 %v7367_v49, %v7359_v50 }
 0x269   : > { %v2544_v19 = vmax.f32 %v2512_v53, 0.0  ;;  %v2474_v13 = vmul.f32 %v7377_v10, %v2435_v22  ;;  %v2388_v63 = vadd.f32 %v7495_v54, %v5438_v29  ;;  %6066 = vmatprep.mubr.bf16.mxu0 %v7521_v31 }
 0x26a   : > { %v5440_v8 = vpop.f32.mrf.mxu0  ;;  %3225 = vmatmul.mubr.bf16.gmra.mxu1 %v7525_v38 }
 0x26b   : > { %2576 = vst [vmem:[#allocation2 + $0x139] sm:$0xff] %v2544_v19  ;;  %v2513_v9 = vadd.f32 %v7383_v3, %v2474_v13  ;;  %v2436_v36 = vadd.f32 %v2388_v63, %v7346_v34  ;;  %v5441_v32 = vadd.f32 %v5440_v8, %v5439_v11  ;;  %3232 = vmatprep.mubr.bf16.mxu1 %v2867_v55  ;;  %v2798_v34 = vld [vmem:[#allocation2 + $0x120] sm:$0xff] }
 0x26c   : > { %v5442_v0 = vpop.f32.mrf.mxu0 }
 0x26d   : > { %v2545_v46 = vmax.f32 %v2513_v9, 0.0  ;;  %v2475_v44 = vmul.f32 %v7377_v10, %v2436_v36  ;;  %v2391_v23 = vadd.f32 %v6025_v24, %v5441_v32 }
 0x26e   : > { %v5443_v20 = vpop.f32.mrf.mxu0  ;;  %v2894_v54 = vld [vmem:[#allocation2 + $0x122] sm:$0xff]  ;;  %v2895_v39 = vld [vmem:[#allocation2 + $0x12a] sm:$0xff] }
 0x26f   : > { %v2799_v40 = vld [vmem:[#allocation2 + $0x128] sm:$0xff]  ;;  %2577 = vst [vmem:[#allocation2 + $0x141] sm:$0xff] %v2545_v46  ;;  %v2514_v51 = vadd.f32 %v7383_v3, %v2475_v44  ;;  %v2437_v30 = vadd.f32 %v2391_v23, %v7353_v4  ;;  %v5444_v5 = vadd.f32 %v5443_v20, %v5442_v0  ;;  %v7536_v15 = vpack.c.bf16 %v2895_v39, %v2894_v54 }
 0x270   : > { %v5445_v56 = vpop.f32.mrf.mxu0  ;;  %v7538_v45 = vpack.c.bf16 %v2799_v40, %v2798_v34  ;;  %v2868_v43 = vpack.c.bf16 %v2545_v46, %v2544_v19 }
 0x271   : > { %v2546_v14 = vmax.f32 %v2514_v51, 0.0  ;;  %v2476_v24 = vmul.f32 %v7377_v10, %v2437_v30  ;;  %v2396_v60 = vadd.f32 %v5444_v5, %v2395_v28  ;;  %6067 = vmatmul.mubr.bf16.gmra.mxu0 %v7536_v15 }
 0x272   : > { %v5446_v61 = vpop.f32.mrf.mxu0  ;;  %3233 = vmatmul.mubr.bf16.gmra.mxu1 %v7538_v45  ;;  %v2800_v63 = vld [vmem:[#allocation2 + $0x138] sm:$0xff] }
 0x273   : > { %2578 = vst [vmem:[#allocation2 + $0x151] sm:$0xff] %v2546_v14  ;;  %v2515_v4 = vadd.f32 %v7383_v3, %v2476_v24  ;;  %v2438_v2 = vadd.f32 %v2396_v60, %v7365_v12  ;;  %v5447_v17 = vadd.f32 %v5446_v61, %v5445_v56  ;;  %3240 = vmatprep.mubr.bf16.mxu1 %v2868_v43 }
 0x274   : > { %v5448_v16 = vpop.f32.mrf.mxu0 }
 0x275   : > { %v2547_v62 = vmax.f32 %v2515_v4, 0.0  ;;  %v2477_v26 = vmul.f32 %v7377_v10, %v2438_v2  ;;  %v2399_v53 = vadd.f32 %v5447_v17, %v2398_v41 }
 0x276   : > { %v5449_v22 = vpop.f32.mrf.mxu0  ;;  %v2896_v29 = vld [vmem:[#allocation2 + $0x13a] sm:$0xff]  ;;  %v2897_v6 = vld [vmem:[#allocation2 + $0x142] sm:$0xff] }
 0x277   : > { %v2801_v11 = vld [vmem:[#allocation2 + $0x140] sm:$0xff]  ;;  %2579 = vst [vmem:[#allocation2 + $0x159] sm:$0xff] %v2547_v62  ;;  %v2516_v55 = vadd.f32 %v7383_v3, %v2477_v26  ;;  %v2439_v19 = vadd.f32 %v2399_v53, %v1740_v48  ;;  %v5450_v12 = vadd.f32 %v5449_v22, %v5448_v16  ;;  %v7549_v13 = vpack.c.bf16 %v2897_v6, %v2896_v29  ;;  %v2633_v48 = vld [vmem:[#allocation2 + $0x9] sm:$0xff] }
 0x278   : > { %v5451_v8 = vpop.f32.mrf.mxu0  ;;  %v7551_v9 = vpack.c.bf16 %v2801_v11, %v2800_v63  ;;  %v2869_v50 = vpack.c.bf16 %v2547_v62, %v2546_v14  ;;  %v2632_v16 = vld [vmem:[#allocation2 + $0x1] sm:$0xff]  ;;  %v2681_v26 = vld [vmem:[#allocation2 + $0xa] sm:$0xff] }
 0x279   : > { %v2548_v49 = vmax.f32 %v2516_v55, 0.0  ;;  %v2478_v36 = vmul.f32 %v7377_v10, %v2439_v19  ;;  %v2404_v32 = vadd.f32 %v7523_v58, %v5450_v12  ;;  %6070 = vmatprep.mubr.bf16.mxu0 %v7549_v13  ;;  %v2680_v62 = vld [vmem:[#allocation2 + $0x2] sm:$0xff]  ;;  %v2664_v11 = vpack.c.bf16 %v2633_v48, %v2632_v16  ;;  %v2639_v48 = vld [vmem:[#allocation2 + $0x51] sm:$0xff] }
 0x27a   : > { %v5452_v28 = vpop.f32.mrf.mxu0  ;;  %3241 = vmatmul.mubr.bf16.gmra.mxu1 %v7551_v9  ;;  %v2802_v39 = vld [vmem:[#allocation2 + $0x150] sm:$0xff]  ;;  %v2712_v12 = vpack.c.bf16 %v2681_v26, %v2680_v62  ;;  %v2584_v63 = vld [vmem:[#allocation2] sm:$0xff]  ;;  %v6378_v16 = vld [vmem:[#allocation8 + $0x1d8] sm:$0xff]  }
 0x27b   : > { %2580 = vst [vmem:[#allocation2 + $0x169] sm:$0xff] %v2548_v49  ;;  %v2517_v0 = vadd.f32 %v7383_v3, %v2478_v36  ;;  %v2440_v46 = vadd.f32 %v2404_v32, %v7370_v52  ;;  %v5453_v44 = vadd.f32 %v5452_v28, %v5451_v8  ;;  %3248 = vmatprep.mubr.bf16.mxu1 %v2869_v50  ;;  %v7580_v8 = vld [vmem:[#allocation2 + $0x8] sm:$0xff]  ;;  %v2682_v36 = vld [vmem:[#allocation2 + $0x1a] sm:$0xff]  ;;  %v2684_v28 = vld [vmem:[#allocation2 + $0x32] sm:$0xff] }
 0x27c   : > { %v2616_v50 = vpack.c.bf16 %v7580_v8, %v2584_v63  ;;  %v2683_v32 = vld [vmem:[#allocation2 + $0x22] sm:$0xff]  ;;  %v2588_v26 = vld [vmem:[#allocation2 + $0x30] sm:$0xff] }
 0x27d   : > { %v2549_v23 = vmax.f32 %v2517_v0, 0.0  ;;  %v2479_v20 = vmul.f32 %v7377_v10, %v2440_v46  ;;  %v2407_v54 = vadd.f32 %v6029_v47, %v5453_v44  ;;  %v6393_v10 = vld [vmem:[%s8295_s2] ss:$0 sm:$0xff]  ;;  %v6369_v44 = vld [vmem:[#allocation8 + $0x1b8] sm:$0xff]  }
 0x27e   : > { %v2898_v40 = vld [vmem:[#allocation2 + $0x152] sm:$0xff]  ;;  %v2899_v51 = vld [vmem:[#allocation2 + $0x15a] sm:$0xff]  ;;  %v6388_v62 = vld [vmem:[#allocation8 + $0x218] sm:$0xff]  }
 0x27f   : > { %v2803_v58 = vld [vmem:[#allocation2 + $0x158] sm:$0xff]  ;;  %2581 = vst [vmem:[#allocation2 + $0x171] sm:$0xff] %v2549_v23  ;;  %v2518_v30 = vadd.f32 %v7383_v3, %v2479_v20  ;;  %v2441_v5 = vadd.f32 %v2407_v54, %v7372_v7  ;;  %v7562_v34 = vpack.c.bf16 %v2899_v51, %v2898_v40  ;;  %v2870_v52 = vpack.c.bf16 %v2549_v23, %v2548_v49  ;;  %v6394_v7 = vld [vmem:[%s8296_s3] ss:$0 sm:$0xff]  ;;  %v2635_v49 = vld [vmem:[#allocation2 + $0x21] sm:$0xff] }
 0x280   : > { %v7564_v56 = vpack.c.bf16 %v2803_v58, %v2802_v39  ;;  %v2685_v0 = vld [vmem:[#allocation2 + $0x3a] sm:$0xff]  ;;  %v2713_v20 = vpack.c.bf16 %v2683_v32, %v2682_v36  ;;  %v2641_v63 = vld [vmem:[#allocation2 + $0x69] sm:$0xff] }
 0x281   : > { %v2550_v43 = vmax.f32 %v2518_v30, 0.0  ;;  %v2480_v47 = vmul.f32 %v6393_v10, %v2441_v5  ;;  %6071 = vmatmul.mubr.bf16.gmra.mxu0 %v7562_v34  ;;  %v2634_v46 = vld [vmem:[#allocation2 + $0x19] sm:$0xff]  ;;  %v7583_v39 = vpack.c.bf16 %v2685_v0, %v2684_v28  ;;  %v2640_v32 = vld [vmem:[#allocation2 + $0x61] sm:$0xff] }
 0x282   : > { %3249 = vmatmul.mubr.bf16.gmra.mxu1 %v7564_v56  ;;  %v2804_v24 = vld [vmem:[#allocation2 + $0x168] sm:$0xff]  ;;  %v2665_v23 = vpack.c.bf16 %v2635_v49, %v2634_v46  ;;  %v6371_v54 = vld [vmem:[#allocation8 + $0x1f0] sm:$0xff]   ;;  %v6373_v5 = vld [vmem:[#allocation8 + $0x1e8] sm:$0xff]   ;;  %v7604_v0 = vpack.c.bf16 %v2641_v63, %v2640_v32 }
 0x283   : > { %2582 = vst [vmem:[#allocation2 + $0x181] sm:$0xff] %v2550_v43  ;;  %v2519_v3 = vadd.f32 %v6394_v7, %v2480_v47  ;;  %3256 = vmatprep.mubr.bf16.mxu1 %v2870_v52  ;;  %v6375_v40 = vld [vmem:[#allocation8 + $0x230] sm:$0xff]   ;;  %v2686_v52 = vld [vmem:[#allocation2 + $0x4a] sm:$0xff]  ;;  %v6380_v10 = vld [vmem:[#allocation8 + $0x228] sm:$0xff]  }
 0x284   : > { %v6372_v51 = vld [vmem:[#allocation8 + $0x1b0] sm:$0xff]   ;;  %v2586_v47 = vld [vmem:[#allocation2 + $0x18] sm:$0xff]  ;;  %v2590_v49 = vld [vmem:[#allocation2 + $0x48] sm:$0xff] }
 0x285   : > { %v2551_v14 = vmax.f32 %v2519_v3, 0.0  ;;  %v2587_v58 = vld [vmem:[#allocation2 + $0x20] sm:$0xff]  ;;  %v2636_v3 = vld [vmem:[#allocation2 + $0x31] sm:$0xff] }
 0x286   : > { %v2900_v60 = vld [vmem:[#allocation2 + $0x16a] sm:$0xff]  ;;  %v2901_v61 = vld [vmem:[#allocation2 + $0x172] sm:$0xff]  ;;  %v2617_v7 = vpack.c.bf16 %v2587_v58, %v2586_v47 }
 0x287   : > { %v2805_v4 = vld [vmem:[#allocation2 + $0x170] sm:$0xff]  ;;  %2583 = vst [vmem:[#allocation2 + $0x189] sm:$0xff] %v2551_v14  ;;  %v7574_v2 = vpack.c.bf16 %v2901_v61, %v2900_v60  ;;  %v2871_v41 = vpack.c.bf16 %v2551_v14, %v2550_v43  ;;  %v2637_v30 = vld [vmem:[#allocation2 + $0x39] sm:$0xff] }
 0x288   : > { %v7576_v17 = vpack.c.bf16 %v2805_v4, %v2804_v24  ;;  %v2687_v43 = vld [vmem:[#allocation2 + $0x52] sm:$0xff]  ;;  %v7587_v24 = vpack.c.bf16 %v2637_v30, %v2636_v3  ;;  %v2646_v47 = vld [vmem:[#allocation2 + $0xa9] sm:$0xff] }
 0x289   : > { %6074 = vmatprep.mubr.bf16.mxu0 %v7574_v2  ;;  %v6374_v14 = vld [vmem:[#allocation8 + $0x1a8] sm:$0xff]   ;;  %v7589_v60 = vpack.c.bf16 %v2687_v43, %v2686_v52  ;;  %v6385_v61 = vld [vmem:[#allocation8 + $0x220] sm:$0xff]  }
 0x28a   : > { %3257 = vmatmul.mubr.bf16.gmra.mxu1 %v7576_v17  ;;  %v2806_v53 = vld [vmem:[#allocation2 + $0x180] sm:$0xff]  ;;  %v6377_v4 = vld [vmem:[#allocation8 + $0x1a0] sm:$0xff]   ;;  %v6384_v28 = vld [vmem:[#allocation8 + $0x188] sm:$0xff]  }
 0x28b   : > { %3264 = vmatprep.mubr.bf16.mxu1 %v2871_v41  ;;  %v2589_v41 = vld [vmem:[#allocation2 + $0x38] sm:$0xff]  ;;  %v6387_v46 = vld [vmem:[#allocation8 + $0x180] sm:$0xff]  }
 0x28c   : > { %v2594_v58 = vld [vmem:[#allocation2 + $0x78] sm:$0xff]  ;;  %v2599_v3 = vld [vmem:[#allocation2 + $0xb0] sm:$0xff] }
 0x28d   : > { %v2597_v43 = vld [vmem:[#allocation2 + $0x98] sm:$0xff] }
 0x28e   : > { %v2902_v22 = vld [vmem:[#allocation2 + $0x182] sm:$0xff]  ;;  %v2903_v29 = vld [vmem:[#allocation2 + $0x18a] sm:$0xff] }
 0x28f   : > { %v2807_v6 = vld [vmem:[#allocation2 + $0x188] sm:$0xff]  ;;  %v2919_v55 = vpack.c.bf16 %v2903_v29, %v2902_v22 }
 0x290   : > { %v2823_v19 = vpack.c.bf16 %v2807_v6, %v2806_v53  ;;  %v7594_v53 = vpack.c.bf16 %v2589_v41, %v2588_v26  ;;  %v2638_v22 = vld [vmem:[#allocation2 + $0x49] sm:$0xff] }
 0x291   : > { %6075 = vmatmul.mubr.bf16.gmra.mxu0 %v2919_v55  ;;  %v6379_v29 = vld [vmem:[#allocation8 + $0x198] sm:$0xff]   ;;  %v7596_v6 = vpack.c.bf16 %v2639_v48, %v2638_v22  ;;  %v6382_v55 = vld [vmem:[#allocation8 + $0x190] sm:$0xff]  }
 0x292   : > { %3265 = vmatmul.mubr.bf16.gmra.mxu1 %v2823_v19  ;;  %3610 = vmatprep.mubr.bf16.mxu0 %v2664_v11  ;;  %v6381_v11 = vld [vmem:[#allocation8 + $0x1d0] sm:$0xff]   ;;  %v2591_v19 = vld [vmem:[#allocation2 + $0x50] sm:$0xff] }
 0x293   : > { %6094 = vmatprep.mubr.bf16.mxu1 %v2712_v12  ;;  %v6383_v12 = vld [vmem:[#allocation8 + $0x1c8] sm:$0xff]   ;;  %v7602_v36 = vpack.c.bf16 %v2591_v19, %v2590_v49 }
 0x294   : > { %v2655_v19 = vld [vmem:[#allocation2 + $0x111] sm:$0xff] }
 0x299   : > { %3611 = vmatmul.mubr.bf16.vlgmr.msra.gmra.mxu0 %v2616_v50  ;;  %v6390_v50 = vld [vmem:[#allocation8 + $0x208] sm:$0xff]  }
 0x29a   : > { %3618 = vmatprep.mubr.bf16.mxu0 %v2665_v23  ;;  %6095 = vmatmul.mubr.bf16.vlgmr.msra.gmra.mxu1 %v2713_v20  ;;  %v2643_v23 = vld [vmem:[#allocation2 + $0x81] sm:$0xff] }
 0x29b   : > { %6098 = vmatprep.mubr.bf16.mxu1 %v7583_v39  ;;  %5751 = vmatpush3.bf16.msra.mxu1 %v6369_v44  ;;  %v2593_v44 = vld [vmem:[#allocation2 + $0x68] sm:$0xff]  ;;  %v2592_v20 = vld [vmem:[#allocation2 + $0x60] sm:$0xff] }
 0x29c   : > { %6127 = vmatpush3.bf16.msra.mxu0 %v7451_v59  ;;  %5752 = vmatprep.subr.bf16.mxu1 %v6371_v54  ;;  %v6376_v59 = vld [vmem:[#allocation8 + $0x1e0] sm:$0xff]   ;;  %v7610_v54 = vpack.c.bf16 %v2593_v44, %v2592_v20  ;;  %v2656_v20 = vld [vmem:[#allocation2 + $0x121] sm:$0xff] }
 0x29d   : > { %6128 = vmatprep.subr.bf16.mxu0 %v6375_v40 }
 0x29f   : > { %5753 = vmatpush3.bf16.msra.mxu1 %v6372_v51 }
 0x2a0   : > { %5754 = vmatprep.subr.bf16.mxu1 %v6373_v5  ;;  %6129 = vmatpush3.bf16.msra.mxu0 %v6375_v40  ;;  %v2642_v40 = vld [vmem:[#allocation2 + $0x79] sm:$0xff]  ;;  %v2644_v5 = vld [vmem:[#allocation2 + $0x91] sm:$0xff] }
 0x2a1   : > { %3619 = vmatmul.mubr.bf16.gmra.mxu0 %v2617_v7  ;;  %6130 = vmatprep.subr.bf16.mxu0 %v6380_v10  ;;  %v7612_v51 = vpack.c.bf16 %v2643_v23, %v2642_v40 }
 0x2a2   : > { %3626 = vmatprep.mubr.bf16.mxu0 %v7587_v24  ;;  %6099 = vmatmul.mubr.bf16.gmra.mxu1 %v7589_v60 }
 0x2a3   : > { %6102 = vmatprep.mubr.bf16.mxu1 %v7430_v42  ;;  %5755 = vmatpush3.bf16.msra.mxu1 %v6374_v14  ;;  %v6389_v42 = vld [vmem:[#allocation8 + $0x210] sm:$0xff]   ;;  %v2598_v14 = vld [vmem:[#allocation2 + $0xa8] sm:$0xff] }
 0x2a4   : > { %5756 = vmatprep.subr.bf16.mxu1 %v6376_v59  ;;  %6131 = vmatpush3.bf16.msra.mxu0 %v6380_v10  ;;  %v2596_v10 = vld [vmem:[#allocation2 + $0x90] sm:$0xff]  ;;  %v2648_v59 = vld [vmem:[#allocation2 + $0xc1] sm:$0xff] }
 0x2a5   : > { %6132 = vmatprep.subr.bf16.mxu0 %v6385_v61 }
 0x2a7   : > { %5757 = vmatpush3.bf16.msra.mxu1 %v6377_v4  ;;  %v2651_v4 = vld [vmem:[#allocation2 + $0xe1] sm:$0xff] }
 0x2a8   : > { %5758 = vmatprep.subr.bf16.mxu1 %v6378_v16  ;;  %6133 = vmatpush3.bf16.msra.mxu0 %v6385_v61 }
 0x2a9   : > { %3627 = vmatmul.mubr.bf16.gmra.mxu0 %v7594_v53  ;;  %6134 = vmatprep.subr.bf16.mxu0 %v6388_v62 }
 0x2aa   : > { %3634 = vmatprep.mubr.bf16.mxu0 %v7596_v6  ;;  %6103 = vmatmul.mubr.bf16.gmra.mxu1 %v7442_v57  ;;  %v6386_v57 = vld [vmem:[#allocation8 + $0x1c0] sm:$0xff]  }
 0x2ab   : > { %6106 = vmatprep.mubr.bf16.mxu1 %v7457_v21  ;;  %5759 = vmatpush3.bf16.msra.mxu1 %v6379_v29  ;;  %v6391_v21 = vld [vmem:[#allocation8 + $0x200] sm:$0xff]  }
 0x2ac   : > { %5760 = vmatprep.subr.bf16.mxu1 %v6381_v11  ;;  %6135 = vmatpush3.bf16.msra.mxu0 %v6388_v62  ;;  %v2653_v62 = vld [vmem:[#allocation2 + $0xf9] sm:$0xff] }
 0x2ad   : > { %6136 = vmatprep.subr.bf16.mxu0 %v6389_v42 }
 0x2af   : > { %5761 = vmatpush3.bf16.msra.mxu1 %v6382_v55 }
 0x2b0   : > { %5762 = vmatprep.subr.bf16.mxu1 %v6383_v12  ;;  %6137 = vmatpush3.bf16.msra.mxu0 %v6389_v42 }
 0x2b1   : > { %3635 = vmatmul.mubr.bf16.gmra.mxu0 %v7602_v36  ;;  %6138 = vmatprep.subr.bf16.mxu0 %v6390_v50 }
 0x2b2   : > { %3642 = vmatprep.mubr.bf16.mxu0 %v7604_v0  ;;  %6107 = vmatmul.mubr.bf16.gmra.mxu1 %v7468_v35  ;;  %v2595_v35 = vld [vmem:[#allocation2 + $0x80] sm:$0xff] }
 0x2b3   : > { %6110 = vmatprep.mubr.bf16.mxu1 %v7480_v27  ;;  %5763 = vmatpush3.bf16.msra.mxu1 %v6384_v28  ;;  %v2645_v27 = vld [vmem:[#allocation2 + $0x99] sm:$0xff]  ;;  %v7618_v30 = vpack.c.bf16 %v2595_v35, %v2594_v58 }
 0x2b4   : > { %5764 = vmatprep.subr.bf16.mxu1 %v6386_v57  ;;  %6139 = vmatpush3.bf16.msra.mxu0 %v6390_v50  ;;  %v7620_v52 = vpack.c.bf16 %v2645_v27, %v2644_v5  ;;  %v2654_v50 = vld [vmem:[#allocation2 + $0x109] sm:$0xff] }
 0x2b5   : > { %6140 = vmatprep.subr.bf16.mxu0 %v6391_v21  ;;  %v7660_v32 = vpack.c.bf16 %v2655_v19, %v2654_v50  ;;  %v2662_v50 = vld [vmem:[#allocation2 + $0x169] sm:$0xff] }
 0x2b7   : > { %5765 = vmatpush3.bf16.msra.mxu1 %v6387_v46  ;;  %v2657_v46 = vld [vmem:[#allocation2 + $0x129] sm:$0xff] }
 0x2b8   : > { %6141 = vmatpush3.bf16.msra.mxu0 %v6391_v21  ;;  %v7670_v35 = vpack.c.bf16 %v2657_v46, %v2656_v20 }
 0x2b9   : > { %3643 = vmatmul.mubr.bf16.gmra.mxu0 %v7610_v54 }
 0x2ba   : > { %3650 = vmatprep.mubr.bf16.mxu0 %v7612_v51  ;;  %6111 = vmatmul.mubr.bf16.gmra.mxu1 %v7493_v25  ;;  %v2647_v25 = vld [vmem:[#allocation2 + $0xb1] sm:$0xff] }
 0x2bb   : > { %6114 = vmatprep.mubr.bf16.mxu1 %v7508_v18  ;;  %v7626_v18 = vpack.c.bf16 %v2597_v43, %v2596_v10  ;;  %v7628_v7 = vpack.c.bf16 %v2647_v25, %v2646_v47  ;;  %v2659_v25 = vld [vmem:[#allocation2 + $0x141] sm:$0xff] }
 0x2c1   : > { %3651 = vmatmul.mubr.bf16.gmra.mxu0 %v7618_v30 }
 0x2c2   : > { %3658 = vmatprep.mubr.bf16.mxu0 %v7620_v52  ;;  %6115 = vmatmul.mubr.bf16.gmra.mxu1 %v7521_v31  ;;  %v2649_v31 = vld [vmem:[#allocation2 + $0xc9] sm:$0xff] }
 0x2c3   : > { %6118 = vmatprep.mubr.bf16.mxu1 %v7536_v15  ;;  %v7634_v15 = vpack.c.bf16 %v2599_v3, %v2598_v14  ;;  %v7636_v61 = vpack.c.bf16 %v2649_v31, %v2648_v59  ;;  %v2658_v3 = vld [vmem:[#allocation2 + $0x139] sm:$0xff] }
 0x2c4   : > { %v7682_v14 = vpack.c.bf16 %v2659_v25, %v2658_v3 }
 0x2c9   : > { %3659 = vmatmul.mubr.bf16.gmra.mxu0 %v7626_v18 }
 0x2ca   : > { %3666 = vmatprep.mubr.bf16.mxu0 %v7628_v7  ;;  %6119 = vmatmul.mubr.bf16.gmra.mxu1 %v7549_v13  ;;  %v2650_v13 = vld [vmem:[#allocation2 + $0xd9] sm:$0xff] }
 0x2cb   : > { %6122 = vmatprep.mubr.bf16.mxu1 %v7562_v34  ;;  %v7642_v41 = vpack.c.bf16 %v2651_v4, %v2650_v13 }
 0x2d1   : > { %3667 = vmatmul.mubr.bf16.gmra.mxu0 %v7634_v15 }
 0x2d2   : > { %3674 = vmatprep.mubr.bf16.mxu0 %v7636_v61  ;;  %6123 = vmatmul.mubr.bf16.gmra.mxu1 %v7574_v2  ;;  %v2652_v2 = vld [vmem:[#allocation2 + $0xf1] sm:$0xff] }
 0x2d3   : > { %4268 = vmatprep.mubr.bf16.mxu1 %v7587_v24  ;;  %v7648_v24 = vpack.c.bf16 %v2653_v62, %v2652_v2  ;;  %v2660_v62 = vld [vmem:[#allocation2 + $0x151] sm:$0xff] }
 0x2d9   : > { %3675 = vmatmul.mubr.bf16.gmra.mxu0 %v7482_v37 }
 0x2da   : > { %v5494_v34 = vpop.f32.mrf.mxu1  ;;  %3682 = vmatprep.mubr.bf16.mxu0 %v7642_v41  ;;  %4269 = vmatmul.mubr.bf16.vlgmr.msra.gmra.mxu1 %v7594_v53 }
 0x2db   : > { %4276 = vmatprep.mubr.bf16.mxu1 %v7596_v6 }
 0x2dc   : > { %v5495_v16 = vpop.f32.mrf.mxu1 }
 0x2dd   : > { %v5496_v48 = vadd.f32 %v5495_v16, %v5494_v34  ;;  %v2661_v34 = vld [vmem:[#allocation2 + $0x159] sm:$0xff] }
 0x2de   : > { %v5497_v26 = vpop.f32.mrf.mxu1  ;;  %v7692_v2 = vpack.c.bf16 %v2661_v34, %v2660_v62 }
 0x2e0   : > { %v5498_v22 = vpop.f32.mrf.mxu1 }
 0x2e1   : > { %v7650_v29 = vadd.f32 %v5498_v22, %v5497_v26  ;;  %v6048_v11 = vpop.f32.mrf.mxu0  ;;  %3683 = vmatmul.mubr.bf16.gmra.mxu0 %v7497_v1 }
 0x2e2   : > { %v5500_v37 = vpop.f32.mrf.mxu1  ;;  %3690 = vmatprep.mubr.bf16.mxu0 %v7648_v24  ;;  %4277 = vmatmul.mubr.bf16.gmra.mxu1 %v7602_v36 }
 0x2e3   : > { %v3307_v53 = vpop.f32.mrf.mxu0  ;;  %4284 = vmatprep.mubr.bf16.mxu1 %v7604_v0 }
 0x2e4   : > { %v7656_v6 = vadd.f32 %v5496_v48, %v3307_v53  ;;  %v5501_v42 = vpop.f32.mrf.mxu1 }
 0x2e5   : > { %v5502_v55 = vadd.f32 %v5501_v42, %v5500_v37  ;;  %v6049_v28 = vpop.f32.mrf.mxu0  ;;  %v2663_v42 = vld [vmem:[#allocation2 + $0x171] sm:$0xff] }
 0x2e6   : > { %v5503_v12 = vpop.f32.mrf.mxu1 }
 0x2e7   : > { %v7658_v63 = vadd.f32 %v6048_v11, %v5502_v55  ;;  %v7668_v23 = vpop.f32.mrf.mxu0  ;;  %v3913_v55 = vld [vmem:[#allocation2 + $0xc8] sm:$0xff] }
 0x2e8   : > { %v5504_v49 = vpop.f32.mrf.mxu1 }
 0x2e9   : > { %v5505_v1 = vadd.f32 %v5504_v49, %v5503_v12  ;;  %3691 = vmatmul.mubr.bf16.gmra.mxu0 %v7510_v33  ;;  %v3912_v49 = vld [vmem:[#allocation2 + $0xc0] sm:$0xff] }
 0x2ea   : > { %v5506_v36 = vpop.f32.mrf.mxu1  ;;  %3698 = vmatprep.mubr.bf16.mxu0 %v7660_v32  ;;  %4285 = vmatmul.mubr.bf16.gmra.mxu1 %v7610_v54 }
 0x2eb   : > { %v7665_v0 = vadd.f32 %v6049_v28, %v5505_v1  ;;  %4292 = vmatprep.mubr.bf16.mxu1 %v7612_v51  ;;  %v7704_v1 = vpack.c.bf16 %v2663_v42, %v2662_v50  ;;  %v3938_v28 = vpack.c.bf16 %v3913_v55, %v3912_v49  ;;  %v3919_v55 = vld [vmem:[#allocation2 + $0x110] sm:$0xff]  ;;  %v4005_v50 = vld [vmem:[#allocation2 + $0x9a] sm:$0xff] }
 0x2ec   : > { %v5507_v57 = vpop.f32.mrf.mxu1 }
 0x2ed   : > { %v5508_v21 = vadd.f32 %v5507_v57, %v5506_v36 }
 0x2ee   : > { %v5509_v44 = vpop.f32.mrf.mxu1 }
 0x2f0   : > { %v5510_v40 = vpop.f32.mrf.mxu1 }
 0x2f1   : > { %v7672_v33 = vadd.f32 %v5510_v40, %v5509_v44  ;;  %v6052_v27 = vpop.f32.mrf.mxu0  ;;  %3699 = vmatmul.mubr.bf16.gmra.mxu0 %v7525_v38  ;;  %v3915_v44 = vld [vmem:[#allocation2 + $0xe0] sm:$0xff] }
 0x2f2   : > { %v5512_v54 = vpop.f32.mrf.mxu1  ;;  %3706 = vmatprep.mubr.bf16.mxu0 %v7670_v35  ;;  %4293 = vmatmul.mubr.bf16.gmra.mxu1 %v7618_v30 }
 0x2f3   : > { %v3323_v51 = vpop.f32.mrf.mxu0  ;;  %4300 = vmatprep.mubr.bf16.mxu1 %v7620_v52 }
 0x2f4   : > { %v7678_v58 = vadd.f32 %v5508_v21, %v3323_v51  ;;  %v5513_v5 = vpop.f32.mrf.mxu1 }
 0x2f5   : > { %v5514_v43 = vadd.f32 %v5513_v5, %v5512_v54  ;;  %v6053_v59 = vpop.f32.mrf.mxu0 }
 0x2f6   : > { %v5515_v10 = vpop.f32.mrf.mxu1 }
 0x2f7   : > { %v7680_v47 = vadd.f32 %v6052_v27, %v5514_v43  ;;  %v7690_v48 = vpop.f32.mrf.mxu0  ;;  %v3914_v27 = vld [vmem:[#allocation2 + $0xd8] sm:$0xff] }
 0x2f8   : > { %v5516_v31 = vpop.f32.mrf.mxu1  ;;  %v3939_v51 = vpack.c.bf16 %v3915_v44, %v3914_v27  ;;  %v4006_v27 = vld [vmem:[#allocation2 + $0xaa] sm:$0xff] }
 0x2f9   : > { %v5517_v38 = vadd.f32 %v5516_v31, %v5515_v10  ;;  %3707 = vmatmul.mubr.bf16.gmra.mxu0 %v7538_v45 }
 0x2fa   : > { %v5518_v30 = vpop.f32.mrf.mxu1  ;;  %3714 = vmatprep.mubr.bf16.mxu0 %v7682_v14  ;;  %4301 = vmatmul.mubr.bf16.gmra.mxu1 %v7626_v18 }
 0x2fb   : > { %v7687_v52 = vadd.f32 %v6053_v59, %v5517_v38  ;;  %4308 = vmatprep.mubr.bf16.mxu1 %v7628_v7  ;;  %v3917_v38 = vld [vmem:[#allocation2 + $0xf8] sm:$0xff]  ;;  %v4000_v59 = vld [vmem:[#allocation2 + $0x62] sm:$0xff] }
 0x2fc   : > { %v5519_v4 = vpop.f32.mrf.mxu1 }
 0x2fd   : > { %v5520_v13 = vadd.f32 %v5519_v4, %v5518_v30  ;;  %v4001_v30 = vld [vmem:[#allocation2 + $0x6a] sm:$0xff] }
 0x2fe   : > { %v5521_v16 = vpop.f32.mrf.mxu1 }
 0x300   : > { %v5522_v26 = vpop.f32.mrf.mxu1 }
 0x301   : > { %v7694_v45 = vadd.f32 %v5522_v26, %v5521_v16  ;;  %v6056_v22 = vpop.f32.mrf.mxu0  ;;  %3715 = vmatmul.mubr.bf16.gmra.mxu0 %v7551_v9  ;;  %v4030_v26 = vpack.c.bf16 %v4001_v30, %v4000_v59  ;;  %v3920_v59 = vld [vmem:[#allocation2 + $0x120] sm:$0xff] }
 0x302   : > { %v5524_v18 = vpop.f32.mrf.mxu1  ;;  %3722 = vmatprep.mubr.bf16.mxu0 %v7692_v2  ;;  %4309 = vmatmul.mubr.bf16.gmra.mxu1 %v7634_v15 }
 0x303   : > { %v3339_v7 = vpop.f32.mrf.mxu0  ;;  %4316 = vmatprep.mubr.bf16.mxu1 %v7636_v61 }
 0x304   : > { %v7700_v11 = vadd.f32 %v5520_v13, %v3339_v7  ;;  %v5525_v37 = vpop.f32.mrf.mxu1 }
 0x305   : > { %v5526_v53 = vadd.f32 %v5525_v37, %v5524_v18  ;;  %v6057_v15 = vpop.f32.mrf.mxu0  ;;  %v4002_v37 = vld [vmem:[#allocation2 + $0x7a] sm:$0xff] }
 0x306   : > { %v5527_v19 = vpop.f32.mrf.mxu1 }
 0x307   : > { %v7702_v12 = vadd.f32 %v6056_v22, %v5526_v53  ;;  %v7711_v40 = vpop.f32.mrf.mxu0  ;;  %v4003_v53 = vld [vmem:[#allocation2 + $0x82] sm:$0xff] }
 0x308   : > { %v5528_v9 = vpop.f32.mrf.mxu1 }
 0x309   : > { %v5529_v36 = vadd.f32 %v5528_v9, %v5527_v19  ;;  %3723 = vmatmul.mubr.bf16.gmra.mxu0 %v7564_v56  ;;  %v4004_v19 = vld [vmem:[#allocation2 + $0x92] sm:$0xff]  ;;  %v4031_v9 = vpack.c.bf16 %v4003_v53, %v4002_v37  ;;  %v3923_v37 = vld [vmem:[#allocation2 + $0x140] sm:$0xff] }
 0x30a   : > { %v5530_v61 = vpop.f32.mrf.mxu1  ;;  %3730 = vmatprep.mubr.bf16.mxu0 %v7704_v1  ;;  %4317 = vmatmul.mubr.bf16.gmra.mxu1 %v3938_v28  ;;  %v3918_v28 = vld [vmem:[#allocation2 + $0x108] sm:$0xff]  ;;  %v4012_v53 = vld [vmem:[#allocation2 + $0xf2] sm:$0xff] }
 0x30b   : > { %v7708_v57 = vadd.f32 %v6057_v15, %v5529_v36  ;;  %4324 = vmatprep.mubr.bf16.mxu1 %v7642_v41  ;;  %v3941_v15 = vpack.c.bf16 %v3919_v55, %v3918_v28 }
 0x30c   : > { %v5531_v21 = vpop.f32.mrf.mxu1 }
 0x30d   : > { %v5532_v46 = vadd.f32 %v5531_v21, %v5530_v61 }
 0x30e   : > { %v5533_v20 = vpop.f32.mrf.mxu1 }
 0x310   : > { %v5534_v54 = vpop.f32.mrf.mxu1 }
 0x311   : > { %v5535_v5 = vadd.f32 %v5534_v54, %v5533_v20  ;;  %v6060_v56 = vpop.f32.mrf.mxu0  ;;  %3731 = vmatmul.mubr.bf16.gmra.mxu0 %v7576_v17  ;;  %v3916_v17 = vld [vmem:[#allocation2 + $0xf0] sm:$0xff] }
 0x312   : > { %v5536_v43 = vpop.f32.mrf.mxu1  ;;  %4325 = vmatmul.mubr.bf16.gmra.mxu1 %v3939_v51  ;;  %6142 = vmatprep.mubr.bf16.mxu0 %v7583_v39  ;;  %v3940_v39 = vpack.c.bf16 %v3917_v38, %v3916_v17  ;;  %v4007_v54 = vld [vmem:[#allocation2 + $0xb2] sm:$0xff] }
 0x313   : > { %v3355_v25 = vpop.f32.mrf.mxu0  ;;  %4332 = vmatprep.mubr.bf16.mxu1 %v7648_v24  ;;  %v4033_v38 = vpack.c.bf16 %v4007_v54, %v4006_v27  ;;  %v3925_v54 = vld [vmem:[#allocation2 + $0x158] sm:$0xff] }
 0x314   : > { %v7716_v41 = vadd.f32 %v5532_v46, %v3355_v25  ;;  %v5537_v10 = vpop.f32.mrf.mxu1  ;;  %v4009_v25 = vld [vmem:[#allocation2 + $0xca] sm:$0xff] }
 0x315   : > { %v5538_v3 = vadd.f32 %v5537_v10, %v5536_v43  ;;  %v6061_v31 = vpop.f32.mrf.mxu0  ;;  %v4008_v43 = vld [vmem:[#allocation2 + $0xc2] sm:$0xff] }
 0x316   : > { %v5539_v4 = vpop.f32.mrf.mxu1 }
 0x317   : > { %v7718_v13 = vadd.f32 %v6060_v56, %v5538_v3  ;;  %v3358_v34 = vpop.f32.mrf.mxu0  ;;  %v3921_v56 = vld [vmem:[#allocation2 + $0x128] sm:$0xff] }
 0x318   : > { %v7720_v16 = vadd.f32 %v5535_v5, %v3358_v34  ;;  %v5540_v62 = vpop.f32.mrf.mxu1  ;;  %v4034_v34 = vpack.c.bf16 %v4009_v25, %v4008_v43 }
 0x319   : > { %v5541_v22 = vadd.f32 %v5540_v62, %v5539_v4  ;;  %6143 = vmatmul.mubr.bf16.vlgmr.msra.gmra.mxu0 %v7589_v60  ;;  %v4032_v60 = vpack.c.bf16 %v4005_v50, %v4004_v19  ;;  %v3922_v50 = vld [vmem:[#allocation2 + $0x138] sm:$0xff] }
 0x31a   : > { %v5542_v24 = vpop.f32.mrf.mxu1  ;;  %4333 = vmatmul.mubr.bf16.gmra.mxu1 %v3940_v39  ;;  %6146 = vmatprep.mubr.bf16.mxu0 %v4030_v26 }
 0x31b   : > { %v7723_v18 = vadd.f32 %v6061_v31, %v5541_v22  ;;  %4340 = vmatprep.mubr.bf16.mxu1 %v7660_v32  ;;  %v4010_v22 = vld [vmem:[#allocation2 + $0xda] sm:$0xff] }
 0x31c   : > { %v5543_v7 = vpop.f32.mrf.mxu1 }
 0x31d   : > { %v5544_v42 = vadd.f32 %v5543_v7, %v5542_v24  ;;  %v4011_v24 = vld [vmem:[#allocation2 + $0xe2] sm:$0xff] }
 0x31e   : > { %v5545_v49 = vpop.f32.mrf.mxu1  ;;  %v4035_v19 = vpack.c.bf16 %v4011_v24, %v4010_v22  ;;  %v4019_v22 = vld [vmem:[#allocation2 + $0x142] sm:$0xff] }
 0x320   : > { %v5546_v36 = vpop.f32.mrf.mxu1 }
 0x321   : > { %v5547_v61 = vadd.f32 %v5546_v36, %v5545_v49  ;;  %v6064_v21 = vpop.f32.mrf.mxu0  ;;  %6147 = vmatmul.mubr.bf16.gmra.mxu0 %v4031_v9  ;;  %v3943_v9 = vpack.c.bf16 %v3923_v37, %v3922_v50  ;;  %v4020_v37 = vld [vmem:[#allocation2 + $0x152] sm:$0xff]  ;;  %v3926_v50 = vld [vmem:[#allocation2 + $0x168] sm:$0xff] }
 0x322   : > { %v5548_v46 = vpop.f32.mrf.mxu1  ;;  %4341 = vmatmul.mubr.bf16.gmra.mxu1 %v3941_v15  ;;  %6150 = vmatprep.mubr.bf16.mxu0 %v4032_v60 }
 0x323   : > { %v3371_v32 = vpop.f32.mrf.mxu0  ;;  %4348 = vmatprep.mubr.bf16.mxu1 %v7670_v35  ;;  %v3942_v35 = vpack.c.bf16 %v3921_v56, %v3920_v59 }
 0x324   : > { %v7727_v44 = vadd.f32 %v5544_v42, %v3371_v32  ;;  %v5549_v20 = vpop.f32.mrf.mxu1  ;;  %v4013_v42 = vld [vmem:[#allocation2 + $0xfa] sm:$0xff]  ;;  %v4015_v32 = vld [vmem:[#allocation2 + $0x112] sm:$0xff] }
 0x325   : > { %v5550_v51 = vadd.f32 %v5549_v20, %v5548_v46  ;;  %v6065_v5 = vpop.f32.mrf.mxu0  ;;  %v4036_v28 = vpack.c.bf16 %v4013_v42, %v4012_v53  ;;  %v4014_v46 = vld [vmem:[#allocation2 + $0x10a] sm:$0xff]  ;;  %v4021_v53 = vld [vmem:[#allocation2 + $0x15a] sm:$0xff] }
 0x326   : > { %v5551_v10 = vpop.f32.mrf.mxu1 }
 0x327   : > { %v7729_v3 = vadd.f32 %v6064_v21, %v5550_v51  ;;  %v3374_v31 = vpop.f32.mrf.mxu0  ;;  %v4016_v51 = vld [vmem:[#allocation2 + $0x122] sm:$0xff] }
 0x328   : > { %v7731_v30 = vadd.f32 %v5547_v61, %v3374_v31  ;;  %v5552_v4 = vpop.f32.mrf.mxu1  ;;  %v3924_v31 = vld [vmem:[#allocation2 + $0x150] sm:$0xff] }
 0x329   : > { %v5553_v17 = vadd.f32 %v5552_v4, %v5551_v10  ;;  %6151 = vmatmul.mubr.bf16.gmra.mxu0 %v4033_v38  ;;  %v4037_v10 = vpack.c.bf16 %v4015_v32, %v4014_v46  ;;  %v4022_v46 = vld [vmem:[#allocation2 + $0x16a] sm:$0xff] }
 0x32a   : > { %v5554_v62 = vpop.f32.mrf.mxu1  ;;  %4349 = vmatmul.mubr.bf16.gmra.mxu1 %v3942_v35  ;;  %6154 = vmatprep.mubr.bf16.mxu0 %v4034_v34 }
 0x32b   : > { %v7733_v39 = vadd.f32 %v6065_v5, %v5553_v17  ;;  %4356 = vmatprep.mubr.bf16.mxu1 %v7682_v14  ;;  %v4017_v5 = vld [vmem:[#allocation2 + $0x12a] sm:$0xff] }
 0x32c   : > { %v5555_v26 = vpop.f32.mrf.mxu1  ;;  %v4038_v4 = vpack.c.bf16 %v4017_v5, %v4016_v51  ;;  %v3979_v51 = vld [vmem:[#allocation2 + $0x1a1] sm:$0xff] }
 0x32d   : > { %v5556_v7 = vadd.f32 %v5555_v26, %v5554_v62  ;;  %v4018_v26 = vld [vmem:[#allocation2 + $0x13a] sm:$0xff] }
 0x32e   : > { %v5557_v55 = vpop.f32.mrf.mxu1 }
 0x330   : > { %v5558_v49 = vpop.f32.mrf.mxu1 }
 0x331   : > { %v5559_v36 = vadd.f32 %v5558_v49, %v5557_v55  ;;  %v6068_v15 = vpop.f32.mrf.mxu0  ;;  %6155 = vmatmul.mubr.bf16.gmra.mxu0 %v4035_v19  ;;  %v3977_v55 = vld [vmem:[#allocation2 + $0x189] sm:$0xff]  ;;  %v4039_v19 = vpack.c.bf16 %v4019_v22, %v4018_v26 }
 0x332   : > { %v5560_v60 = vpop.f32.mrf.mxu1  ;;  %4357 = vmatmul.mubr.bf16.gmra.mxu1 %v3943_v9  ;;  %6158 = vmatprep.mubr.bf16.mxu0 %v4036_v28  ;;  %v4040_v28 = vpack.c.bf16 %v4021_v53, %v4020_v37 }
 0x333   : > { %v3387_v14 = vpop.f32.mrf.mxu0  ;;  %4364 = vmatprep.mubr.bf16.mxu1 %v7692_v2  ;;  %v3944_v2 = vpack.c.bf16 %v3925_v54, %v3924_v31  ;;  %v3978_v54 = vld [vmem:[#allocation2 + $0x199] sm:$0xff]  ;;  %v4025_v31 = vld [vmem:[#allocation2 + $0x18a] sm:$0xff] }
 0x334   : > { %v7737_v61 = vadd.f32 %v5556_v7, %v3387_v14  ;;  %v5561_v21 = vpop.f32.mrf.mxu1  ;;  %v3927_v7 = vld [vmem:[#allocation2 + $0x170] sm:$0xff] }
 0x335   : > { %v5562_v20 = vadd.f32 %v5561_v21, %v5560_v60  ;;  %v6069_v27 = vpop.f32.mrf.mxu0  ;;  %v3945_v9 = vpack.c.bf16 %v3927_v7, %v3926_v50  ;;  %v3930_v50 = vld [vmem:[#allocation2 + $0x198] sm:$0xff] }
 0x336   : > { %v5563_v56 = vpop.f32.mrf.mxu1 }
 0x337   : > { %v7739_v43 = vadd.f32 %v6068_v15, %v5562_v20  ;;  %v3390_v25 = vpop.f32.mrf.mxu0 }
 0x338   : > { %v7741_v38 = vadd.f32 %v5559_v36, %v3390_v25  ;;  %v5564_v59 = vpop.f32.mrf.mxu1  ;;  %v3976_v36 = vld [vmem:[#allocation2 + $0x181] sm:$0xff] }
 0x339   : > { %v5565_v35 = vadd.f32 %v5564_v59, %v5563_v56  ;;  %6159 = vmatmul.mubr.bf16.gmra.mxu0 %v4037_v10  ;;  %v3994_v14 = vpack.c.bf16 %v3977_v55, %v3976_v36  ;;  %v3929_v25 = vld [vmem:[#allocation2 + $0x188] sm:$0xff] }
 0x33a   : > { %v5566_v34 = vpop.f32.mrf.mxu1  ;;  %4365 = vmatmul.mubr.bf16.gmra.mxu1 %v3944_v2  ;;  %6162 = vmatprep.mubr.bf16.mxu0 %v4038_v4  ;;  %v4024_v10 = vld [vmem:[#allocation2 + $0x182] sm:$0xff] }
 0x33b   : > { %v7743_v17 = vadd.f32 %v6069_v27, %v5565_v35  ;;  %4372 = vmatprep.mubr.bf16.mxu1 %v7704_v1  ;;  %v4023_v27 = vld [vmem:[#allocation2 + $0x172] sm:$0xff]  ;;  %v4042_v7 = vpack.c.bf16 %v4025_v31, %v4024_v10  ;;  %v4027_v55 = vld [vmem:[#allocation2 + $0x1a2] sm:$0xff] }
 0x33c   : > { %v5567_v62 = vpop.f32.mrf.mxu1  ;;  %v4041_v35 = vpack.c.bf16 %v4023_v27, %v4022_v46 }
 0x33d   : > { %v5568_v24 = vadd.f32 %v5567_v62, %v5566_v34  ;;  %v3928_v34 = vld [vmem:[#allocation2 + $0x180] sm:$0xff]  ;;  %v3995_v62 = vpack.c.bf16 %v3979_v51, %v3978_v54 }
 0x33e   : > { %v5569_v42 = vpop.f32.mrf.mxu1 }
 0x340   : > { %v5570_v49 = vpop.f32.mrf.mxu1 }
 0x341   : > { %v5571_v15 = vadd.f32 %v5570_v49, %v5569_v42  ;;  %v6072_v60 = vpop.f32.mrf.mxu0  ;;  %6163 = vmatmul.mubr.bf16.gmra.mxu0 %v4039_v19  ;;  %v4026_v42 = vld [vmem:[#allocation2 + $0x19a] sm:$0xff] }
 0x342   : > { %v5572_v1 = vpop.f32.mrf.mxu1  ;;  %4373 = vmatmul.mubr.bf16.gmra.mxu1 %v3945_v9  ;;  %6166 = vmatprep.mubr.bf16.mxu0 %v4040_v28  ;;  %v4043_v28 = vpack.c.bf16 %v4027_v55, %v4026_v42  ;;  %v3311_v42 = vadd.f32 %v7650_v29, %v7668_v23 }
 0x343   : > { %v3403_v21 = vpop.f32.mrf.mxu0  ;;  %4380 = vmatprep.mubr.bf16.mxu1 %v3994_v14 }
 0x344   : > { %v7746_v32 = vadd.f32 %v5568_v24, %v3403_v21  ;;  %v5573_v20 = vpop.f32.mrf.mxu1  ;;  %v3946_v24 = vpack.c.bf16 %v3929_v25, %v3928_v34 }
 0x345   : > { %v5574_v5 = vadd.f32 %v5573_v20, %v5572_v1  ;;  %v6073_v56 = vpop.f32.mrf.mxu0 }
 0x346   : > { %v5575_v59 = vpop.f32.mrf.mxu1 }
 0x347   : > { %v7748_v2 = vadd.f32 %v6072_v60, %v5574_v5  ;;  %v3406_v4 = vpop.f32.mrf.mxu0 }
 0x348   : > { %v7750_v26 = vadd.f32 %v5571_v15, %v3406_v4  ;;  %v5576_v22 = vpop.f32.mrf.mxu1  ;;  %v3947_v15 = vpack.c.bf16 %v7580_v8, %v3930_v50 }
 0x349   : > { %v5577_v37 = vadd.f32 %v5576_v22, %v5575_v59  ;;  %6167 = vmatmul.mubr.bf16.gmra.mxu0 %v4041_v35 }
 0x34a   : > { %v5578_v53 = vpop.f32.mrf.mxu1  ;;  %4381 = vmatmul.mubr.bf16.gmra.mxu1 %v3946_v24  ;;  %6170 = vmatprep.mubr.bf16.mxu0 %v4042_v7 }
 0x34b   : > { %v7752_v19 = vadd.f32 %v6073_v56, %v5577_v37  ;;  %4388 = vmatprep.mubr.bf16.mxu1 %v3995_v62 }
 0x34c   : > { %v5579_v49 = vpop.f32.mrf.mxu1 }
 0x34d   : > { %v5580_v9 = vadd.f32 %v5579_v49, %v5578_v53 }
 0x34e   : > { %v5581_v36 = vpop.f32.mrf.mxu1 }
 0x350   : > { %v5582_v60 = vpop.f32.mrf.mxu1 }
 0x351   : > { %v5583_v14 = vadd.f32 %v5582_v60, %v5581_v36  ;;  %v6076_v1 = vpop.f32.mrf.mxu0  ;;  %6171 = vmatmul.mubr.bf16.gmra.mxu0 %v4043_v28 }
 0x352   : > { %v5584_v21 = vpop.f32.mrf.mxu1  ;;  %4389 = vmatmul.mubr.bf16.gmra.mxu1 %v3947_v15 }
 0x353   : > { %v3419_v46 = vpop.f32.mrf.mxu0 }
 0x354   : > { %v7755_v20 = vadd.f32 %v5580_v9, %v3419_v46  ;;  %v5585_v27 = vpop.f32.mrf.mxu1 }
 0x355   : > { %v5586_v54 = vadd.f32 %v5585_v27, %v5584_v21  ;;  %v6077_v51 = vpop.f32.mrf.mxu0 }
 0x356   : > { %v5587_v5 = vpop.f32.mrf.mxu1 }
 0x357   : > { %v7757_v56 = vadd.f32 %v6076_v1, %v5586_v54  ;;  %v3422_v25 = vpop.f32.mrf.mxu0 }
 0x358   : > { %v7759_v10 = vadd.f32 %v5583_v14, %v3422_v25  ;;  %v5588_v31 = vpop.f32.mrf.mxu1 }
 0x359   : > { %v5589_v8 = vadd.f32 %v5588_v31, %v5587_v5  ;;  %v5630_v59 = vpop.f32.mrf.mxu0 }
 0x35a   : > { %v6096_v4 = vpop.f32.mrf.mxu1 }
 0x35b   : > { %v7761_v35 = vadd.f32 %v6077_v51, %v5589_v8  ;;  %v5631_v34 = vpop.f32.mrf.mxu0 }
 0x35c   : > { %v5632_v62 = vadd.f32 %v5631_v34, %v5630_v59  ;;  %v3773_v22 = vpop.f32.mrf.mxu1 }
 0x35d   : > { %v5633_v24 = vpop.f32.mrf.mxu0 }
 0x35e   : > { %v3613_v7 = vadd.f32 %v5632_v62, %v7656_v6  ;;  %v6097_v37 = vpop.f32.mrf.mxu1 }
 0x35f   : > { %v5634_v53 = vpop.f32.mrf.mxu0 }
 0x360   : > { %v7766_v55 = vadd.f32 %v3773_v22, %v3613_v7  ;;  %v5635_v50 = vadd.f32 %v5634_v53, %v5633_v24  ;;  %v3776_v49 = vpop.f32.mrf.mxu1  ;;  %v3327_v7 = vadd.f32 %v7672_v33, %v7690_v48 }
 0x361   : > { %v5636_v9 = vpop.f32.mrf.mxu0 }
 0x362   : > { %v3616_v28 = vadd.f32 %v5635_v50, %v3311_v42  ;;  %v6100_v36 = vpop.f32.mrf.mxu1 }
 0x363   : > { %v5637_v15 = vpop.f32.mrf.mxu0 }
 0x364   : > { %v7768_v60 = vadd.f32 %v3776_v49, %v3616_v28  ;;  %v5638_v14 = vadd.f32 %v5637_v15, %v5636_v9  ;;  %v3789_v1 = vpop.f32.mrf.mxu1 }
 0x365   : > { %v5639_v21 = vpop.f32.mrf.mxu0 }
 0x366   : > { %v3621_v6 = vadd.f32 %v5638_v14, %v7658_v63  ;;  %v6101_v46 = vpop.f32.mrf.mxu1 }
 0x367   : > { %v5640_v27 = vpop.f32.mrf.mxu0 }
 0x368   : > { %v5641_v54 = vadd.f32 %v5640_v27, %v5639_v21  ;;  %v3792_v51 = vpop.f32.mrf.mxu1  ;;  %v7771_v29 = vadd.f32 %v6096_v4, %v3621_v6 }
 0x369   : > { %v5642_v23 = vpop.f32.mrf.mxu0 }
 0x36a   : > { %v3624_v5 = vadd.f32 %v5641_v54, %v7665_v0  ;;  %v6104_v25 = vpop.f32.mrf.mxu1 }
 0x36b   : > { %v5643_v31 = vpop.f32.mrf.mxu0 }
 0x36c   : > { %v5644_v8 = vadd.f32 %v5643_v31, %v5642_v23  ;;  %v3805_v59 = vpop.f32.mrf.mxu1  ;;  %v7774_v34 = vadd.f32 %v6097_v37, %v3624_v5 }
 0x36d   : > { %v5645_v62 = vpop.f32.mrf.mxu0 }
 0x36e   : > { %v3629_v22 = vadd.f32 %v5644_v8, %v7678_v58  ;;  %v6105_v24 = vpop.f32.mrf.mxu1 }
 0x36f   : > { %v5646_v63 = vpop.f32.mrf.mxu0 }
 0x370   : > { %v5647_v53 = vadd.f32 %v5646_v63, %v5645_v62  ;;  %v3808_v4 = vpop.f32.mrf.mxu1  ;;  %v7779_v42 = vadd.f32 %v3789_v1, %v3629_v22 }
 0x371   : > { %v5648_v50 = vpop.f32.mrf.mxu0 }
 0x372   : > { %v3632_v0 = vadd.f32 %v5647_v53, %v3327_v7  ;;  %v7781_v49 = vpop.f32.mrf.mxu1 }
 0x373   : > { %v5649_v9 = vpop.f32.mrf.mxu0 }
 0x374   : > { %v5650_v28 = vadd.f32 %v5649_v9, %v5648_v50  ;;  %v3821_v37 = vpop.f32.mrf.mxu1  ;;  %v7783_v15 = vadd.f32 %v3792_v51, %v3632_v0 }
 0x375   : > { %v5651_v14 = vpop.f32.mrf.mxu0 }
 0x376   : > { %v3637_v58 = vadd.f32 %v5650_v28, %v7680_v47  ;;  %v7786_v21 = vpop.f32.mrf.mxu1 }
 0x377   : > { %v5652_v6 = vpop.f32.mrf.mxu0 }
 0x378   : > { %v5653_v33 = vadd.f32 %v5652_v6, %v5651_v14  ;;  %v3824_v48 = vpop.f32.mrf.mxu1  ;;  %v7788_v27 = vadd.f32 %v6100_v36, %v3637_v58  ;;  %v3343_v36 = vadd.f32 %v7694_v45, %v7711_v40 }
 0x379   : > { %v5654_v1 = vpop.f32.mrf.mxu0 }
 0x37a   : > { %v3640_v54 = vadd.f32 %v5653_v33, %v7687_v52  ;;  %v7791_v23 = vpop.f32.mrf.mxu1 }
 0x37b   : > { %v5655_v5 = vpop.f32.mrf.mxu0 }
 0x37c   : > { %v5656_v31 = vadd.f32 %v5655_v5, %v5654_v1  ;;  %v7793_v8 = vpop.f32.mrf.mxu1  ;;  %v7795_v51 = vadd.f32 %v6101_v46, %v3640_v54 }
 0x37d   : > { %v5657_v62 = vpop.f32.mrf.mxu0 }
 0x37e   : > { %v3645_v47 = vadd.f32 %v5656_v31, %v7700_v11  ;;  %v7798_v22 = vpop.f32.mrf.mxu1 }
 0x37f   : > { %v5658_v63 = vpop.f32.mrf.mxu0 }
 0x380   : > { %v5659_v7 = vadd.f32 %v5658_v63, %v5657_v62  ;;  %v7802_v53 = vpop.f32.mrf.mxu1  ;;  %v7804_v52 = vadd.f32 %v3805_v59, %v3645_v47 }
 0x381   : > { %v5660_v50 = vpop.f32.mrf.mxu0 }
 0x382   : > { %v3648_v0 = vadd.f32 %v5659_v7, %v3343_v36  ;;  %v7806_v9 = vpop.f32.mrf.mxu1 }
 0x383   : > { %v5661_v46 = vpop.f32.mrf.mxu0 }
 0x384   : > { %v5662_v28 = vadd.f32 %v5661_v46, %v5660_v50  ;;  %v7808_v14 = vpop.f32.mrf.mxu1  ;;  %v7810_v11 = vadd.f32 %v3808_v4, %v3648_v0 }
 0x385   : > { %v5663_v58 = vpop.f32.mrf.mxu0 }
 0x386   : > { %v3653_v6 = vadd.f32 %v5662_v28, %v7702_v12  ;;  %v7813_v33 = vpop.f32.mrf.mxu1 }
 0x387   : > { %v5664_v45 = vpop.f32.mrf.mxu0 }
 0x388   : > { %v5665_v40 = vadd.f32 %v5664_v45, %v5663_v58  ;;  %v7815_v1 = vpop.f32.mrf.mxu1  ;;  %v7817_v59 = vadd.f32 %v6104_v25, %v3653_v6 }
 0x389   : > { %v5666_v54 = vpop.f32.mrf.mxu0 }
 0x38a   : > { %v3656_v5 = vadd.f32 %v5665_v40, %v7708_v57  ;;  %v7820_v31 = vpop.f32.mrf.mxu1 }
 0x38b   : > { %v5667_v62 = vpop.f32.mrf.mxu0 }
 0x38c   : > { %v5668_v47 = vadd.f32 %v5667_v62, %v5666_v54  ;;  %v7822_v4 = vpop.f32.mrf.mxu1  ;;  %v7824_v63 = vadd.f32 %v6105_v24, %v3656_v5 }
 0x38d   : > { %v5669_v12 = vpop.f32.mrf.mxu0 }
 0x38e   : > { %v3661_v36 = vadd.f32 %v5668_v47, %v7716_v41  ;;  %v7827_v7 = vpop.f32.mrf.mxu1 }
 0x38f   : > { %v5670_v50 = vpop.f32.mrf.mxu0 }
 0x390   : > { %v5671_v0 = vadd.f32 %v5670_v50, %v5669_v12  ;;  %v7829_v25 = vpop.f32.mrf.mxu1  ;;  %v7831_v46 = vadd.f32 %v3821_v37, %v3661_v36 }
 0x391   : > { %v5672_v57 = vpop.f32.mrf.mxu0 }
 0x392   : > { %v3664_v28 = vadd.f32 %v5671_v0, %v7720_v16  ;;  %v7834_v58 = vpop.f32.mrf.mxu1 }
 0x393   : > { %8318 = vst [vmem:[#allocation13_spill] sm:$0xff] %v7834_v58  ;;  %v5673_v6 = vpop.f32.mrf.mxu0 }
 0x394   : > { %v5674_v45 = vadd.f32 %v5673_v6, %v5672_v57  ;;  %v7836_v24 = vpop.f32.mrf.mxu1  ;;  %v7838_v40 = vadd.f32 %v3824_v48, %v3664_v28 }
 0x395   : > { %v5675_v41 = vpop.f32.mrf.mxu0 }
 0x396   : > { %v3669_v54 = vadd.f32 %v5674_v45, %v7718_v13  ;;  %v7841_v5 = vpop.f32.mrf.mxu1 }
 0x397   : > { %8319 = vst [vmem:[#allocation14_spill] sm:$0xff] %v7841_v5  ;;  %v5676_v62 = vpop.f32.mrf.mxu0 }
 0x398   : > { %v5677_v47 = vadd.f32 %v5676_v62, %v5675_v41  ;;  %v7843_v37 = vpop.f32.mrf.mxu1  ;;  %v7846_v12 = vadd.f32 %v7781_v49, %v3669_v54 }
 0x399   : > { %v5678_v16 = vpop.f32.mrf.mxu0 }
 0x39a   : > { %v3672_v36 = vadd.f32 %v5677_v47, %v7723_v18  ;;  %v7849_v50 = vpop.f32.mrf.mxu1 }
 0x39b   : > { %v5679_v0 = vpop.f32.mrf.mxu0 }
 0x39c   : > { %v5680_v48 = vadd.f32 %v5679_v0, %v5678_v16  ;;  %v7851_v57 = vpop.f32.mrf.mxu1  ;;  %v7854_v13 = vadd.f32 %v7786_v21, %v3672_v36 }
 0x39d   : > { %v5681_v28 = vpop.f32.mrf.mxu0 }
 0x39e   : > { %v3677_v6 = vadd.f32 %v5680_v48, %v7727_v44  ;;  %v7857_v45 = vpop.f32.mrf.mxu1 }
 0x39f   : > { %v5682_v41 = vpop.f32.mrf.mxu0 }
 0x3a0   : > { %v5683_v49 = vadd.f32 %v5682_v41, %v5681_v28  ;;  %v7859_v54 = vpop.f32.mrf.mxu1  ;;  %v7862_v18 = vadd.f32 %v7793_v8, %v3677_v6 }
 0x3a1   : > { %v5684_v62 = vpop.f32.mrf.mxu0 }
 0x3a2   : > { %8320 = vst [vmem:[#allocation15_spill] sm:$0xff] %v7862_v18  ;;  %v3680_v47 = vadd.f32 %v5683_v49, %v7731_v30  ;;  %v7865_v16 = vpop.f32.mrf.mxu1 }
 0x3a3   : > { %v5685_v0 = vpop.f32.mrf.mxu0 }
 0x3a4   : > { %v5686_v21 = vadd.f32 %v5685_v0, %v5684_v62  ;;  %v7867_v36 = vpop.f32.mrf.mxu1  ;;  %v7870_v44 = vadd.f32 %v7802_v53, %v3680_v47 }
 0x3a5   : > { %v5687_v48 = vpop.f32.mrf.mxu0 }
 0x3a6   : > { %8321 = vst [vmem:[#allocation16_spill] sm:$0xff] %v7870_v44  ;;  %v3685_v28 = vadd.f32 %v5686_v21, %v7729_v3  ;;  %v7873_v41 = vpop.f32.mrf.mxu1 }
 0x3a7   : > { %v5688_v5 = vpop.f32.mrf.mxu0 }
 0x3a8   : > { %v5689_v8 = vadd.f32 %v5688_v5, %v5687_v48  ;;  %v7875_v6 = vpop.f32.mrf.mxu1  ;;  %v7878_v30 = vadd.f32 %v7791_v23, %v3685_v28 }
 0x3a9   : > { %v5690_v49 = vpop.f32.mrf.mxu0 }
 0x3aa   : > { %v3688_v62 = vadd.f32 %v5689_v8, %v7733_v39  ;;  %v7881_v0 = vpop.f32.mrf.mxu1 }
 0x3ab   : > { %v5691_v58 = vpop.f32.mrf.mxu0 }
 0x3ac   : > { %v5692_v53 = vadd.f32 %v5691_v58, %v5690_v49  ;;  %v7883_v47 = vpop.f32.mrf.mxu1  ;;  %v7886_v3 = vadd.f32 %v7798_v22, %v3688_v62 }
 0x3ad   : > { %v5693_v21 = vpop.f32.mrf.mxu0 }
 0x3ae   : > { %8322 = vst [vmem:[#allocation17_spill] sm:$0xff] %v7886_v3  ;;  %v3693_v5 = vadd.f32 %v5692_v53, %v7737_v61  ;;  %v7889_v48 = vpop.f32.mrf.mxu1 }
 0x3af   : > { %v5694_v44 = vpop.f32.mrf.mxu0 }
 0x3b0   : > { %v5695_v23 = vadd.f32 %v5694_v44, %v5693_v21  ;;  %v7891_v28 = vpop.f32.mrf.mxu1  ;;  %v7894_v39 = vadd.f32 %v7808_v14, %v3693_v5 }
 0x3b1   : > { %v5696_v8 = vpop.f32.mrf.mxu0 }
 0x3b2   : > { %8323 = vst [vmem:[#allocation18_spill] sm:$0xff] %v7894_v39  ;;  %v3696_v58 = vadd.f32 %v5695_v23, %v7741_v38  ;;  %v7897_v49 = vpop.f32.mrf.mxu1 }
 0x3b3   : > { %v5697_v18 = vpop.f32.mrf.mxu0 }
 0x3b4   : > { %v5698_v22 = vadd.f32 %v5697_v18, %v5696_v8  ;;  %v7899_v62 = vpop.f32.mrf.mxu1  ;;  %v7902_v61 = vadd.f32 %v7815_v1, %v3696_v58 }
 0x3b5   : > { %v5699_v53 = vpop.f32.mrf.mxu0 }
 0x3b6   : > { %8324 = vst [vmem:[#allocation19_spill] sm:$0xff] %v7902_v61  ;;  %v3701_v44 = vadd.f32 %v5698_v22, %v7739_v43  ;;  %v7905_v21 = vpop.f32.mrf.mxu1 }
 0x3b7   : > { %v5700_v3 = vpop.f32.mrf.mxu0 }
 0x3b8   : > { %v5701_v14 = vadd.f32 %v5700_v3, %v5699_v53  ;;  %v7907_v5 = vpop.f32.mrf.mxu1  ;;  %v7910_v38 = vadd.f32 %v7806_v9, %v3701_v44 }
 0x3b9   : > { %v5702_v23 = vpop.f32.mrf.mxu0 }
 0x3ba   : > { %8325 = vst [vmem:[#allocation20_spill] sm:$0xff] %v7910_v38  ;;  %v3704_v18 = vadd.f32 %v5701_v14, %v7743_v17  ;;  %v7913_v8 = vpop.f32.mrf.mxu1 }
 0x3bb   : > { %v5703_v39 = vpop.f32.mrf.mxu0 }
 0x3bc   : > { %v5704_v1 = vadd.f32 %v5703_v39, %v5702_v23  ;;  %v7915_v58 = vpop.f32.mrf.mxu1  ;;  %v7918_v43 = vadd.f32 %v7813_v33, %v3704_v18 }
 0x3bd   : > { %v5705_v22 = vpop.f32.mrf.mxu0 }
 0x3be   : > { %8326 = vst [vmem:[#allocation21_spill] sm:$0xff] %v7918_v43  ;;  %v3709_v3 = vadd.f32 %v5704_v1, %v7746_v32  ;;  %v7921_v53 = vpop.f32.mrf.mxu1 }
 0x3bf   : > { %v5706_v61 = vpop.f32.mrf.mxu0 }
 0x3c0   : > { %v5707_v9 = vadd.f32 %v5706_v61, %v5705_v22  ;;  %v7923_v44 = vpop.f32.mrf.mxu1  ;;  %v7926_v17 = vadd.f32 %v7822_v4, %v3709_v3 }
 0x3c1   : > { %v5708_v14 = vpop.f32.mrf.mxu0 }
 0x3c2   : > { %8327 = vst [vmem:[#allocation22_spill] sm:$0xff] %v7926_v17  ;;  %v3712_v39 = vadd.f32 %v5707_v9, %v7750_v26  ;;  %v7929_v23 = vpop.f32.mrf.mxu1 }
 0x3c3   : > { %v5709_v38 = vpop.f32.mrf.mxu0 }
 0x3c4   : > { %v5710_v33 = vadd.f32 %v5709_v38, %v5708_v14  ;;  %v7931_v18 = vpop.f32.mrf.mxu1  ;;  %v7934_v32 = vadd.f32 %v7829_v25, %v3712_v39 }
 0x3c5   : > { %v5711_v1 = vpop.f32.mrf.mxu0 }
 0x3c6   : > { %8328 = vst [vmem:[#allocation23_spill] sm:$0xff] %v7934_v32  ;;  %v3717_v61 = vadd.f32 %v5710_v33, %v7748_v2  ;;  %v7937_v22 = vpop.f32.mrf.mxu1 }
 0x3c7   : > { %v5712_v43 = vpop.f32.mrf.mxu0 }
 0x3c8   : > { %v5713_v4 = vadd.f32 %v5712_v43, %v5711_v1  ;;  %v7939_v3 = vpop.f32.mrf.mxu1  ;;  %v7942_v26 = vadd.f32 %v7820_v31, %v3717_v61 }
 0x3c9   : > { %v5714_v9 = vpop.f32.mrf.mxu0 }
 0x3ca   : > { %8329 = vst [vmem:[#allocation24_spill] sm:$0xff] %v7942_v26  ;;  %v3720_v38 = vadd.f32 %v5713_v4, %v7752_v19  ;;  %v7945_v14 = vpop.f32.mrf.mxu1 }
 0x3cb   : > { %v5715_v17 = vpop.f32.mrf.mxu0 }
 0x3cc   : > { %v5716_v25 = vadd.f32 %v5715_v17, %v5714_v9  ;;  %v7947_v39 = vpop.f32.mrf.mxu1  ;;  %v7950_v2 = vadd.f32 %v7827_v7, %v3720_v38 }
 0x3cd   : > { %v5717_v33 = vpop.f32.mrf.mxu0 }
 0x3ce   : > { %v3725_v43 = vadd.f32 %v5716_v25, %v7755_v20  ;;  %v7953_v1 = vpop.f32.mrf.mxu1 }
 0x3cf   : > { %v5718_v32 = vpop.f32.mrf.mxu0 }
 0x3d0   : > { %v5719_v31 = vadd.f32 %v5718_v32, %v5717_v33  ;;  %v7955_v61 = vpop.f32.mrf.mxu1  ;;  %v7958_v19 = vadd.f32 %v7836_v24, %v3725_v43  ;;  %v5774_v43 = vadd.f32 %v7867_v36, %v7865_v16  ;;  %v5777_v36 = vadd.f32 %v7875_v6, %v7873_v41 }
 0x3d1   : > { %v5720_v4 = vpop.f32.mrf.mxu0 }
 0x3d2   : > { %8330 = vst [vmem:[#allocation25_spill] sm:$0xff] %v7958_v19  ;;  %v3728_v17 = vadd.f32 %v5719_v31, %v7759_v10  ;;  %v7961_v9 = vpop.f32.mrf.mxu1 }
 0x3d3   : > { %v5721_v26 = vpop.f32.mrf.mxu0 }
 0x3d4   : > { %v5722_v7 = vadd.f32 %v5721_v26, %v5720_v4  ;;  %v7963_v38 = vpop.f32.mrf.mxu1  ;;  %v7966_v20 = vadd.f32 %v7843_v37, %v3728_v17  ;;  %v5768_v26 = vadd.f32 %v7851_v57, %v7849_v50  ;;  %v7987_v17 = vld [vmem:[%s8298_s5] ss:$0 sm:$0xff] }
 0x3d5   : > { %v5723_v25 = vpop.f32.mrf.mxu0 }
 0x3d6   : > { %8331 = vst [vmem:[#allocation26_spill] sm:$0xff] %v7966_v20  ;;  %v7969_v32 = vadd.f32 %v5722_v7, %v7757_v56  ;;  %v7971_v33 = vpop.f32.mrf.mxu1 }
 0x3d7   : > { %v5724_v24 = vpop.f32.mrf.mxu0 }
 0x3d8   : > { %v5725_v10 = vadd.f32 %v5724_v24, %v5723_v25  ;;  %v7975_v31 = vpop.f32.mrf.mxu1 }
 0x3d9   : > { %v6144_v19 = vpop.f32.mrf.mxu0 }
 0x3da   : > { %v7980_v37 = vadd.f32 %v5725_v10, %v7761_v35  ;;  %v4440_v4 = vadd.f32 %v6144_v19, %v5774_v43  ;;  %v7982_v56 = vpop.f32.mrf.mxu1  ;;  %v7997_v35 = vld [vmem:[%s8299_s6] ss:$0 sm:$0xff]  ;;  %v5771_v19 = vadd.f32 %v7859_v54, %v7857_v45  ;;  %v5786_v45 = vadd.f32 %v7899_v62, %v7897_v49  ;;  %v4668_v54 = vld [vmem:[%s6730_s17] sm:$0xff]  ;;  %v4671_v49 = vld [vmem:[%s6730_s17 + $0x18] sm:$0xff] }
 0x3db   : > { %v4431_v16 = vpop.f32.mrf.mxu0 }
 0x3dc   : > { %8332 = vst [vmem:[#allocation27_spill] sm:$0xff] %v7980_v37  ;;  %v4560_v7 = vadd.f32 %v4440_v4, %v7771_v29  ;;  %v4432_v25 = vadd.f32 %v5768_v26, %v4431_v16  ;;  %v7992_v50 = vpop.f32.mrf.mxu1  ;;  %v4670_v29 = vld [vmem:[%s6730_s17 + $0x10] sm:$0xff] }
 0x3dd   : > { %v6145_v57 = vpop.f32.mrf.mxu0 }
 0x3de   : > { %v4599_v24 = vmul.f32 %v7987_v17, %v4560_v7  ;;  %v4558_v43 = vadd.f32 %v4432_v25, %v7766_v55  ;;  %v4443_v41 = vadd.f32 %v6145_v57, %v5777_v36  ;;  %v8003_v6 = vpop.f32.mrf.mxu1 }
 0x3df   : > { %v4434_v10 = vpop.f32.mrf.mxu0 }
 0x3e0   : > { %v4638_v26 = vadd.f32 %v7997_v35, %v4599_v24  ;;  %v4597_v4 = vmul.f32 %v7987_v17, %v4558_v43  ;;  %v4561_v16 = vadd.f32 %v4443_v41, %v7774_v34  ;;  %v4435_v37 = vadd.f32 %v5771_v19, %v4434_v10  ;;  %v8009_v20 = vpop.f32.mrf.mxu1 }
 0x3e1   : > { %v6148_v55 = vpop.f32.mrf.mxu0  ;;  %v5780_v34 = vadd.f32 %v7883_v47, %v7881_v0  ;;  %v5789_v19 = vadd.f32 %v7907_v5, %v7905_v21 }
 0x3e2   : > { %v4702_v36 = vadd.f32 %v4670_v29, %v4638_v26  ;;  %v4636_v7 = vadd.f32 %v7997_v35, %v4597_v4  ;;  %v4600_v25 = vmul.f32 %v7987_v17, %v4561_v16  ;;  %v4559_v57 = vadd.f32 %v4435_v37, %v7768_v60  ;;  %v8017_v24 = vpop.f32.mrf.mxu1  ;;  %v4669_v37 = vld [vmem:[%s6730_s17 + $0x8] sm:$0xff] }
 0x3e3   : > { %v4456_v62 = vadd.f32 %v6148_v55, %v5786_v45  ;;  %v4447_v43 = vpop.f32.mrf.mxu0  ;;  %v5783_v60 = vadd.f32 %v7891_v28, %v7889_v48 }
 0x3e4   : > { %v4734_v41 = vmax.f32 %v4702_v36, 0.0  ;;  %v4700_v29 = vadd.f32 %v4668_v54, %v4636_v7  ;;  %v4639_v10 = vadd.f32 %v7997_v35, %v4600_v25  ;;  %v4598_v26 = vmul.f32 %v7987_v17, %v4559_v57  ;;  %v8026_v4 = vpop.f32.mrf.mxu1  ;;  %v4674_v57 = vld [vmem:[%s6730_s17 + $0x30] sm:$0xff] }
 0x3e5   : > { %v4564_v0 = vadd.f32 %v4456_v62, %v7788_v27  ;;  %v4448_v47 = vadd.f32 %v5780_v34, %v4447_v43  ;;  %v6149_v21 = vpop.f32.mrf.mxu0  ;;  %v5798_v27 = vadd.f32 %v7931_v18, %v7929_v23  ;;  %v5792_v23 = vadd.f32 %v7915_v58, %v7913_v8  ;;  %v4675_v8 = vld [vmem:[%s6730_s17 + $0x38] sm:$0xff] }
 0x3e6   : > { %4766 = vst [vmem:[%s8034_s30 + $0x10] sm:$0xff] %v4734_v41  ;;  %v4732_v5 = vmax.f32 %v4700_v29, 0.0  ;;  %v4703_v16 = vadd.f32 %v4671_v49, %v4639_v10  ;;  %v4637_v45 = vadd.f32 %v7997_v35, %v4598_v26  ;;  %v4459_v54 = vadd.f32 %v6149_v21, %v5789_v19  ;;  %v8038_v55 = vpop.f32.mrf.mxu1  ;;  %v4672_v41 = vld [vmem:[%s6730_s17 + $0x20] sm:$0xff] }
 0x3e7   : > { %v4603_v48 = vmul.f32 %v7987_v17, %v4564_v0  ;;  %v4562_v28 = vadd.f32 %v4448_v47, %v7779_v42  ;;  %v4450_v36 = vpop.f32.mrf.mxu0 }
 0x3e8   : > { %4764 = vst [vmem:[%s8034_s30] sm:$0xff] %v4732_v5  ;;  %v4735_v7 = vmax.f32 %v4703_v16, 0.0  ;;  %v4701_v25 = vadd.f32 %v4669_v37, %v4637_v45  ;;  %v4565_v34 = vadd.f32 %v4459_v54, %v7795_v51  ;;  %v4451_v19 = vadd.f32 %v5783_v60, %v4450_v36  ;;  %v8047_v49 = vpop.f32.mrf.mxu1 }
 0x3e9   : > { %v4642_v18 = vadd.f32 %v7997_v35, %v4603_v48  ;;  %v4601_v62 = vmul.f32 %v7987_v17, %v4562_v28  ;;  %v6152_v42 = vpop.f32.mrf.mxu0  ;;  %v5801_v16 = vadd.f32 %v7939_v3, %v7937_v22  ;;  %v5810_v22 = vadd.f32 %v7963_v38, %v7961_v9 }
 0x3ea   : > { %4767 = vst [vmem:[%s8034_s30 + $0x18] sm:$0xff] %v4735_v7  ;;  %v4733_v43 = vmax.f32 %v4701_v25, 0.0  ;;  %v4604_v29 = vmul.f32 %v7987_v17, %v4565_v34  ;;  %v4563_v51 = vadd.f32 %v4451_v19, %v7783_v15  ;;  %v4472_v10 = vadd.f32 %v6152_v42, %v5798_v27  ;;  %v8057_v26 = vpop.f32.mrf.mxu1  ;;  %v4673_v27 = vld [vmem:[%s6730_s17 + $0x28] sm:$0xff]  ;;  %v4678_v34 = vld [vmem:[%s6730_s17 + $0x50] sm:$0xff] }
 0x3eb   : > { %v4706_v60 = vadd.f32 %v4674_v57, %v4642_v18  ;;  %v4640_v37 = vadd.f32 %v7997_v35, %v4601_v62  ;;  %v4463_v58 = vpop.f32.mrf.mxu0  ;;  %v5795_v57 = vadd.f32 %v7923_v44, %v7921_v53  ;;  %v5804_v53 = vadd.f32 %v7947_v39, %v7945_v14  ;;  %v4676_v44 = vld [vmem:[%s6730_s17 + $0x40] sm:$0xff] }
 0x3ec   : > { %4765 = vst [vmem:[%s8034_s30 + $0x8] sm:$0xff] %v4733_v43  ;;  %v4643_v0 = vadd.f32 %v7997_v35, %v4604_v29  ;;  %v4602_v47 = vmul.f32 %v7987_v17, %v4563_v51  ;;  %v4568_v21 = vadd.f32 %v4472_v10, %v7817_v59  ;;  %v4464_v5 = vadd.f32 %v5792_v23, %v4463_v58  ;;  %v8065_v15 = vpop.f32.mrf.mxu1 }
 0x3ed   : > { %v4738_v45 = vmax.f32 %v4706_v60, 0.0  ;;  %v4704_v54 = vadd.f32 %v4672_v41, %v4640_v37  ;;  %v6153_v48 = vpop.f32.mrf.mxu0  ;;  %v5813_v14 = vadd.f32 %v7975_v31, %v7971_v33 }
 0x3ee   : > { %v4707_v28 = vadd.f32 %v4675_v8, %v4643_v0  ;;  %v4641_v36 = vadd.f32 %v7997_v35, %v4602_v47  ;;  %v4607_v7 = vmul.f32 %v7987_v17, %v4568_v21  ;;  %v4566_v25 = vadd.f32 %v4464_v5, %v7804_v52  ;;  %v8073_v59 = vpop.f32.mrf.mxu1  ;;  %v4679_v47 = vld [vmem:[%s6730_s17 + $0x58] sm:$0xff] }
 0x3ef   : > { %4770 = vst [vmem:[%s8034_s30 + $0x30] sm:$0xff] %v4738_v45  ;;  %v4736_v3 = vmax.f32 %v4704_v54, 0.0  ;;  %v4475_v19 = vadd.f32 %v6153_v48, %v5801_v16  ;;  %v4466_v23 = vpop.f32.mrf.mxu0  ;;  %v5807_v45 = vadd.f32 %v7955_v61, %v7953_v1  ;;  %v4682_v1 = vld [vmem:[%s6730_s17 + $0x70] sm:$0xff] }
 0x3f0   : > { %v4739_v18 = vmax.f32 %v4707_v28, 0.0  ;;  %v4705_v62 = vadd.f32 %v4673_v27, %v4641_v36  ;;  %v4646_v42 = vadd.f32 %v7997_v35, %v4607_v7  ;;  %v4605_v52 = vmul.f32 %v7987_v17, %v4566_v25  ;;  %v8083_v43 = vpop.f32.mrf.mxu1  ;;  %v4677_v27 = vld [vmem:[%s6730_s17 + $0x48] sm:$0xff] }
 0x3f1   : > { %4768 = vst [vmem:[%s8034_s30 + $0x20] sm:$0xff] %v4736_v3  ;;  %v4569_v9 = vadd.f32 %v4475_v19, %v7824_v63  ;;  %v4467_v38 = vadd.f32 %v5795_v57, %v4466_v23  ;;  %v6156_v41 = vpop.f32.mrf.mxu0  ;;  %v5822_v19 = vadd.f32 %v8026_v4, %v8017_v24  ;;  %v5825_v24 = vadd.f32 %v8047_v49, %v8038_v55 }
 0x3f2   : > { %4771 = vst [vmem:[%s8034_s30 + $0x38] sm:$0xff] %v4739_v18  ;;  %v4737_v29 = vmax.f32 %v4705_v62, 0.0  ;;  %v4710_v51 = vadd.f32 %v4678_v34, %v4646_v42  ;;  %v4644_v10 = vadd.f32 %v7997_v35, %v4605_v52  ;;  %v4488_v60 = vadd.f32 %v6156_v41, %v5810_v22  ;;  %v8092_v37 = vpop.f32.mrf.mxu1  ;;  %v4680_v62 = vld [vmem:[%s6730_s17 + $0x60] sm:$0xff]  ;;  %v4683_v41 = vld [vmem:[%s6730_s17 + $0x78] sm:$0xff] }
 0x3f3   : > { %v4608_v39 = vmul.f32 %v7987_v17, %v4569_v9  ;;  %v4567_v63 = vadd.f32 %v4467_v38, %v7810_v11  ;;  %v4479_v8 = vpop.f32.mrf.mxu0  ;;  %v5816_v38 = vadd.f32 %v7992_v50, %v7982_v56  ;;  %v5819_v56 = vadd.f32 %v8009_v20, %v8003_v6  ;;  %v4681_v50 = vld [vmem:[%s6730_s17 + $0x68] sm:$0xff]  ;;  %v8333_v6 = vld [vmem:[#allocation15_spill] sm:$0xff] }
 0x3f4   : > { %4769 = vst [vmem:[%s8034_s30 + $0x28] sm:$0xff] %v4737_v29  ;;  %v4742_v58 = vmax.f32 %v4710_v51, 0.0  ;;  %v4708_v0 = vadd.f32 %v4676_v44, %v4644_v10  ;;  %v4572_v21 = vadd.f32 %v4488_v60, %v7846_v12  ;;  %v4480_v5 = vadd.f32 %v5804_v53, %v4479_v8  ;;  %v5833_v16 = vpop.f32.mrf.mxu1 }
 0x3f5   : > { %v4647_v33 = vadd.f32 %v7997_v35, %v4608_v39  ;;  %v4606_v31 = vmul.f32 %v7987_v17, %v4567_v63  ;;  %v6157_v54 = vpop.f32.mrf.mxu0 }
 0x3f6   : > { %4774 = vst [vmem:[%s8034_s30 + $0x50] sm:$0xff] %v4742_v58  ;;  %v4740_v11 = vmax.f32 %v4708_v0, 0.0  ;;  %v4611_v48 = vmul.f32 %v7987_v17, %v4572_v21  ;;  %v4570_v28 = vadd.f32 %v4480_v5, %v7831_v46  ;;  %v4491_v12 = vadd.f32 %v6157_v54, %v5813_v14  ;;  %v8109_v36 = vpop.f32.mrf.mxu1  ;;  %v4686_v54 = vld [vmem:[%s6730_s17 + $0x90] sm:$0xff] }
 0x3f7   : > { %v4711_v7 = vadd.f32 %v4679_v47, %v4647_v33  ;;  %v4645_v25 = vadd.f32 %v7997_v35, %v4606_v31  ;;  %v4482_v61 = vpop.f32.mrf.mxu0  ;;  %v5834_v5 = vadd.f32 %v5833_v16, %v8092_v37  ;;  %v5828_v37 = vadd.f32 %v8065_v15, %v8057_v26 }
 0x3f8   : > { %4772 = vst [vmem:[%s8034_s30 + $0x40] sm:$0xff] %v4740_v11  ;;  %v4650_v57 = vadd.f32 %v7997_v35, %v4611_v48  ;;  %v4609_v22 = vmul.f32 %v7987_v17, %v4570_v28  ;;  %v4573_v3 = vadd.f32 %v4491_v12, %v7854_v13  ;;  %v4483_v34 = vadd.f32 %v5807_v45, %v4482_v61  ;;  %v8117_v46 = vpop.f32.mrf.mxu1  ;;  %v8334_v11 = vld [vmem:[#allocation17_spill] sm:$0xff] }
 0x3f9   : > { %v4743_v23 = vmax.f32 %v4711_v7, 0.0  ;;  %v4709_v18 = vadd.f32 %v4677_v27, %v4645_v25  ;;  %v6160_v42 = vpop.f32.mrf.mxu0 }
 0x3fa   : > { %v4714_v52 = vadd.f32 %v4682_v1, %v4650_v57  ;;  %v4648_v53 = vadd.f32 %v7997_v35, %v4609_v22  ;;  %v4612_v44 = vmul.f32 %v7987_v17, %v4573_v3  ;;  %v4571_v9 = vadd.f32 %v4483_v34, %v7838_v40  ;;  %v8125_v13 = vpop.f32.mrf.mxu1  ;;  %v4684_v1 = vld [vmem:[%s6730_s17 + $0x80] sm:$0xff]  ;;  %v8335_v57 = vld [vmem:[#allocation16_spill] sm:$0xff] }
 0x3fb   : > { %4775 = vst [vmem:[%s8034_s30 + $0x58] sm:$0xff] %v4743_v23  ;;  %v4741_v4 = vmax.f32 %v4709_v18, 0.0  ;;  %v4504_v29 = vadd.f32 %v6160_v42, %v5822_v19  ;;  %v4495_v51 = vpop.f32.mrf.mxu0  ;;  %v4687_v18 = vld [vmem:[%s6730_s17 + $0x98] sm:$0xff] }
 0x3fc   : > { %v4746_v10 = vmax.f32 %v4714_v52, 0.0  ;;  %v4712_v60 = vadd.f32 %v4680_v62, %v4648_v53  ;;  %v4651_v14 = vadd.f32 %v7997_v35, %v4612_v44  ;;  %v4610_v40 = vmul.f32 %v7987_v17, %v4571_v9  ;;  %v8135_v39 = vpop.f32.mrf.mxu1  ;;  %v8336_v42 = vld [vmem:[#allocation20_spill] sm:$0xff] }
 0x3fd   : > { %4773 = vst [vmem:[%s8034_s30 + $0x48] sm:$0xff] %v4741_v4  ;;  %v4576_v55 = vadd.f32 %v4504_v29, %v7878_v30  ;;  %v4496_v49 = vadd.f32 %v5816_v38, %v4495_v51  ;;  %v6161_v63 = vpop.f32.mrf.mxu0  ;;  %v5837_v9 = vadd.f32 %v8117_v46, %v8109_v36  ;;  %v4685_v4 = vld [vmem:[%s6730_s17 + $0x88] sm:$0xff]  ;;  %v4690_v36 = vld [vmem:[%s6730_s17 + $0xb0] sm:$0xff] }
 0x3fe   : > { %4778 = vst [vmem:[%s8034_s30 + $0x70] sm:$0xff] %v4746_v10  ;;  %v4744_v8 = vmax.f32 %v4712_v60, 0.0  ;;  %v4715_v58 = vadd.f32 %v4683_v41, %v4651_v14  ;;  %v4649_v0 = vadd.f32 %v7997_v35, %v4610_v40  ;;  %v4507_v47 = vadd.f32 %v6161_v63, %v5825_v24  ;;  %v8144_v21 = vpop.f32.mrf.mxu1  ;;  %v8337_v60 = vld [vmem:[#allocation18_spill] sm:$0xff] }
 0x3ff   : > { %v4615_v20 = vmul.f32 %v7987_v17, %v4576_v55  ;;  %v4574_v45 = vadd.f32 %v4496_v49, %v8333_v6  ;;  %v4498_v30 = vpop.f32.mrf.mxu0 }
 0x400   : > { %4776 = vst [vmem:[%s8034_s30 + $0x60] sm:$0xff] %v4744_v8  ;;  %v4747_v33 = vmax.f32 %v4715_v58, 0.0  ;;  %v4713_v31 = vadd.f32 %v4681_v50, %v4649_v0  ;;  %v4577_v27 = vadd.f32 %v4507_v47, %v8334_v11  ;;  %v4499_v48 = vadd.f32 %v5819_v56, %v4498_v30  ;;  %v8152_v28 = vpop.f32.mrf.mxu1 }
 0x401   : > { %v4654_v16 = vadd.f32 %v7997_v35, %v4615_v20  ;;  %v4613_v12 = vmul.f32 %v7987_v17, %v4574_v45  ;;  %v6164_v7 = vpop.f32.mrf.mxu0  ;;  %v5831_v56 = vadd.f32 %v8083_v43, %v8073_v59  ;;  %v4688_v59 = vld [vmem:[%s6730_s17 + $0xa0] sm:$0xff] }
 0x402   : > { %4779 = vst [vmem:[%s8034_s30 + $0x78] sm:$0xff] %v4747_v33  ;;  %v4745_v25 = vmax.f32 %v4713_v31, 0.0  ;;  %v4616_v61 = vmul.f32 %v7987_v17, %v4577_v27  ;;  %v4575_v22 = vadd.f32 %v4499_v48, %v8335_v57  ;;  %v4520_v3 = vadd.f32 %v6164_v7, %v5834_v5  ;;  %v5844_v34 = vpop.f32.mrf.mxu1  ;;  %v8338_v43 = vld [vmem:[#allocation21_spill] sm:$0xff]  ;;  %v8339_v48 = vld [vmem:[#allocation19_spill] sm:$0xff]  ;;  %v4691_v7 = vld [vmem:[%s6730_s17 + $0xb8] sm:$0xff] }
 0x403   : > { %v4718_v19 = vadd.f32 %v4686_v54, %v4654_v16  ;;  %v4652_v23 = vadd.f32 %v7997_v35, %v4613_v12  ;;  %v4511_v26 = vpop.f32.mrf.mxu0  ;;  %v5840_v5 = vadd.f32 %v8135_v39, %v8125_v13 }
 0x404   : > { %4777 = vst [vmem:[%s8034_s30 + $0x68] sm:$0xff] %v4745_v25  ;;  %v4655_v15 = vadd.f32 %v7997_v35, %v4616_v61  ;;  %v4614_v62 = vmul.f32 %v7987_v17, %v4575_v22  ;;  %v4580_v52 = vadd.f32 %v4520_v3, %v8336_v42  ;;  %v4512_v53 = vadd.f32 %v5828_v37, %v4511_v26  ;;  %v5845_v44 = vpop.f32.mrf.mxu1  ;;  %v8340_v25 = vld [vmem:[#allocation24_spill] sm:$0xff] }
 0x405   : > { %v4750_v38 = vmax.f32 %v4718_v19, 0.0  ;;  %v4716_v24 = vadd.f32 %v4684_v1, %v4652_v23  ;;  %v6165_v41 = vpop.f32.mrf.mxu0  ;;  %v5846_v46 = vadd.f32 %v5845_v44, %v5844_v34  ;;  %v5843_v22 = vadd.f32 %v8152_v28, %v8144_v21 }
 0x406   : > { %v4719_v29 = vadd.f32 %v4687_v18, %v4655_v15  ;;  %v4653_v51 = vadd.f32 %v7997_v35, %v4614_v62  ;;  %v4619_v10 = vmul.f32 %v7987_v17, %v4580_v52  ;;  %v4578_v14 = vadd.f32 %v4512_v53, %v8337_v60  ;;  %v5847_v40 = vpop.f32.mrf.mxu1  ;;  %v4689_v18 = vld [vmem:[%s6730_s17 + $0xa8] sm:$0xff] }
 0x407   : > { %4782 = vst [vmem:[%s8034_s30 + $0x90] sm:$0xff] %v4750_v38  ;;  %v4748_v50 = vmax.f32 %v4716_v24, 0.0  ;;  %v4523_v55 = vadd.f32 %v6165_v41, %v5837_v9  ;;  %v4514_v49 = vpop.f32.mrf.mxu0  ;;  %v8341_v15 = vld [vmem:[#allocation22_spill] sm:$0xff]  ;;  %v4694_v9 = vld [vmem:[%s6730_s17 + $0xd0] sm:$0xff] }
 0x408   : > { %v4751_v63 = vmax.f32 %v4719_v29, 0.0  ;;  %v4717_v8 = vadd.f32 %v4685_v4, %v4653_v51  ;;  %v4658_v58 = vadd.f32 %v7997_v35, %v4619_v10  ;;  %v4617_v0 = vmul.f32 %v7987_v17, %v4578_v14  ;;  %v5848_v47 = vpop.f32.mrf.mxu1  ;;  %v4692_v10 = vld [vmem:[%s6730_s17 + $0xc0] sm:$0xff] }
 0x409   : > { %4780 = vst [vmem:[%s8034_s30 + $0x80] sm:$0xff] %v4748_v50  ;;  %v4581_v20 = vadd.f32 %v4523_v55, %v8338_v43  ;;  %v4515_v6 = vadd.f32 %v5831_v56, %v4514_v49  ;;  %v6168_v45 = vpop.f32.mrf.mxu0  ;;  %v5849_v13 = vadd.f32 %v5848_v47, %v5847_v40  ;;  %v8342_v50 = vld [vmem:[#allocation23_spill] sm:$0xff]  ;;  %v4695_v49 = vld [vmem:[%s6730_s17 + $0xd8] sm:$0xff] }
 0x40a   : > { %4783 = vst [vmem:[%s8034_s30 + $0x98] sm:$0xff] %v4751_v63  ;;  %v4749_v30 = vmax.f32 %v4717_v8, 0.0  ;;  %v4722_v33 = vadd.f32 %v4690_v36, %v4658_v58  ;;  %v4656_v31 = vadd.f32 %v7997_v35, %v4617_v0  ;;  %v4536_v54 = vadd.f32 %v6168_v45, %v5846_v46  ;;  %v5850_v11 = vpop.f32.mrf.mxu1 }
 0x40b   : > { %v4620_v27 = vmul.f32 %v7987_v17, %v4581_v20  ;;  %v4579_v37 = vadd.f32 %v4515_v6, %v8339_v48  ;;  %v4527_v39 = vpop.f32.mrf.mxu0  ;;  %v8344_v48 = vld [vmem:[#allocation25_spill] sm:$0xff] }
 0x40c   : > { %4781 = vst [vmem:[%s8034_s30 + $0x88] sm:$0xff] %v4749_v30  ;;  %v4754_v16 = vmax.f32 %v4722_v33, 0.0  ;;  %v4720_v12 = vadd.f32 %v4688_v59, %v4656_v31  ;;  %v4584_v1 = vadd.f32 %v4536_v54, %v8340_v25  ;;  %v4528_v61 = vadd.f32 %v5840_v5, %v4527_v39  ;;  %v5851_v57 = vpop.f32.mrf.mxu1  ;;  %v4693_v59 = vld [vmem:[%s6730_s17 + $0xc8] sm:$0xff] }
 0x40d   : > { %v4659_v3 = vadd.f32 %v7997_v35, %v4620_v27  ;;  %v4618_v34 = vmul.f32 %v7987_v17, %v4579_v37  ;;  %v6169_v19 = vpop.f32.mrf.mxu0 }
 0x40e   : > { %4786 = vst [vmem:[%s8034_s30 + $0xb0] sm:$0xff] %v4754_v16  ;;  %v4752_v23 = vmax.f32 %v4720_v12, 0.0  ;;  %v4623_v26 = vmul.f32 %v7987_v17, %v4584_v1  ;;  %v4582_v62 = vadd.f32 %v4528_v61, %v8341_v15  ;;  %v4539_v42 = vadd.f32 %v6169_v19, %v5849_v13  ;;  %v5853_v52 = vpop.f32.mrf.mxu1  ;;  %v8346_v19 = vld [vmem:[#allocation27_spill] sm:$0xff] }
 0x40f   : > { %v4723_v53 = vadd.f32 %v4691_v7, %v4659_v3  ;;  %v4657_v44 = vadd.f32 %v7997_v35, %v4618_v34  ;;  %v4530_v21 = vpop.f32.mrf.mxu0  ;;  %v4696_v3 = vld [vmem:[%s6730_s17 + $0xe0] sm:$0xff] }
 0x410   : > { %4784 = vst [vmem:[%s8034_s30 + $0xa0] sm:$0xff] %v4752_v23  ;;  %v4662_v28 = vadd.f32 %v7997_v35, %v4623_v26  ;;  %v4621_v38 = vmul.f32 %v7987_v17, %v4582_v62  ;;  %v4585_v24 = vadd.f32 %v4539_v42, %v7950_v2  ;;  %v4531_v4 = vadd.f32 %v5843_v22, %v4530_v21  ;;  %v5854_v41 = vpop.f32.mrf.mxu1  ;;  %v8347_v23 = vld [vmem:[#allocation14_spill] sm:$0xff]  ;;  %v4698_v42 = vld [vmem:[%s6730_s17 + $0xf0] sm:$0xff] }
 0x411   : > { %v4755_v29 = vmax.f32 %v4723_v53, 0.0  ;;  %v4721_v51 = vadd.f32 %v4689_v18, %v4657_v44  ;;  %v6172_v60 = vpop.f32.mrf.mxu0  ;;  %v5852_v2 = vadd.f32 %v5851_v57, %v5850_v11  ;;  %v5855_v31 = vadd.f32 %v5854_v41, %v5853_v52  ;;  %v8343_v11 = vld [vmem:[#allocation13_spill] sm:$0xff] }
 0x412   : > { %v4726_v14 = vadd.f32 %v4694_v9, %v4662_v28  ;;  %v4660_v40 = vadd.f32 %v7997_v35, %v4621_v38  ;;  %v4624_v56 = vmul.f32 %v7987_v17, %v4585_v24  ;;  %v4583_v36 = vadd.f32 %v4531_v4, %v8342_v50  ;;  %v5856_v46 = vpop.f32.mrf.mxu1  ;;  %v4697_v9 = vld [vmem:[%s6730_s17 + $0xe8] sm:$0xff] }
 0x413   : > { %4787 = vst [vmem:[%s8034_s30 + $0xb8] sm:$0xff] %v4755_v29  ;;  %v4753_v55 = vmax.f32 %v4721_v51, 0.0  ;;  %v4543_v63 = vpop.f32.mrf.mxu0  ;;  %v3894_v27 = vadd.f32 %v8343_v11, %v7969_v32  ;;  %v8345_v32 = vld [vmem:[#allocation26_spill] sm:$0xff]  ;;  %v3897_v18 = vadd.f32 %v8347_v23, %v8346_v19  ;;  %v4699_v29 = vld [vmem:[%s6730_s17 + $0xf8] sm:$0xff]  ;;  %s4797_s17 = scalar_lea.sflag [#allocation5], %s6724_s15 }
 0x414   : > { %v4758_v8 = vmax.f32 %v4726_v14, 0.0  ;;  %v4724_v58 = vadd.f32 %v4692_v10, %v4660_v40  ;;  %v4663_v0 = vadd.f32 %v7997_v35, %v4624_v56  ;;  %v4622_v47 = vmul.f32 %v7987_v17, %v4583_v36  ;;  %v5857_v5 = vpop.f32.mrf.mxu1 }
 0x415   : > { %4785 = vst [vmem:[%s8034_s30 + $0xa8] sm:$0xff] %v4753_v55  ;;  %v4544_v43 = vadd.f32 %v5852_v2, %v4543_v63  ;;  %v5858_v20 = vadd.f32 %v5857_v5, %v5856_v46  ;;  %v6173_v6 = vpop.f32.mrf.mxu0 }
 0x416   : > { %4790 = vst [vmem:[%s8034_s30 + $0xd0] sm:$0xff] %v4758_v8  ;;  %v4756_v45 = vmax.f32 %v4724_v58, 0.0  ;;  %v4727_v30 = vadd.f32 %v4695_v49, %v4663_v0  ;;  %v4661_v33 = vadd.f32 %v7997_v35, %v4622_v47  ;;  %v5859_v54 = vpop.f32.mrf.mxu1 }
 0x417   : > { %v4586_v37 = vadd.f32 %v4544_v43, %v8344_v48  ;;  %v4552_v13 = vadd.f32 %v6172_v60, %v5858_v20  ;;  %v4546_v39 = vpop.f32.mrf.mxu0 }
 0x418   : > { %4788 = vst [vmem:[%s8034_s30 + $0xc0] sm:$0xff] %v4756_v45  ;;  %v4759_v16 = vmax.f32 %v4727_v30, 0.0  ;;  %v4725_v12 = vadd.f32 %v4693_v59, %v4661_v33  ;;  %v4547_v7 = vadd.f32 %v5855_v31, %v4546_v39  ;;  %v5860_v25 = vpop.f32.mrf.mxu1 }
 0x419   : > { %v4625_v1 = vmul.f32 %v7987_v17, %v4586_v37  ;;  %v4588_v61 = vadd.f32 %v4552_v13, %v3894_v27  ;;  %v5861_v57 = vadd.f32 %v5860_v25, %v5859_v54 }
 0x41a   : > { %4791 = vst [vmem:[%s8034_s30 + $0xd8] sm:$0xff] %v4759_v16  ;;  %v4757_v22 = vmax.f32 %v4725_v12, 0.0  ;;  %v4587_v34 = vadd.f32 %v4547_v7, %v8345_v32 }
 0x41b   : > { %v4664_v26 = vadd.f32 %v7997_v35, %v4625_v1  ;;  %v4627_v15 = vmul.f32 %v7987_v17, %v4588_v61  ;;  %v4555_v62 = vadd.f32 %v6173_v6, %v5861_v57 }
 0x41c   : > { %4789 = vst [vmem:[%s8034_s30 + $0xc8] sm:$0xff] %v4757_v22  ;;  %v4626_v52 = vmul.f32 %v7987_v17, %v4587_v34 }
 0x41d   : > { %v4728_v53 = vadd.f32 %v4696_v3, %v4664_v26  ;;  %v4666_v44 = vadd.f32 %v7997_v35, %v4627_v15  ;;  %v4589_v21 = vadd.f32 %v4555_v62, %v3897_v18 }
 0x41e   : > { %v4665_v28 = vadd.f32 %v7997_v35, %v4626_v52 }
 0x41f   : > { %v4760_v38 = vmax.f32 %v4728_v53, 0.0  ;;  %v4730_v24 = vadd.f32 %v4698_v42, %v4666_v44  ;;  %v4628_v4 = vmul.f32 %v7987_v17, %v4589_v21 }
 0x420   : > { %v4729_v41 = vadd.f32 %v4697_v9, %v4665_v28 }
 0x421   : > { %4792 = vst [vmem:[%s8034_s30 + $0xe0] sm:$0xff] %v4760_v38  ;;  %v4762_v51 = vmax.f32 %v4730_v24, 0.0  ;;  %v4667_v10 = vadd.f32 %v7997_v35, %v4628_v4 }
 0x422   : > { %v4761_v60 = vmax.f32 %v4729_v41, 0.0 }
 0x423   : > { %4794 = vst [vmem:[%s8034_s30 + $0xf0] sm:$0xff] %v4762_v51  ;;  %v4731_v14 = vadd.f32 %v4699_v29, %v4667_v10 }
 0x424   : > { %4793 = vst [vmem:[%s8034_s30 + $0xe8] sm:$0xff] %v4761_v60 }
 0x425   : > { %v4763_v17 = vmax.f32 %v4731_v14, 0.0 }
 0x427   : > { %4795 = vst [vmem:[%s8034_s30 + $0xf8] sm:$0xff] %v4763_v17 }
 0x428   : > { %6489 = shalt.err (!%p6486_p9)
}
 0x429   : > { %s6490_s10 = scalar_lea.hbm %s8247_s21, 4096  ;;  %s6494_s16 = scalar_lea.hbm %s8300_s7, 8192 }
 0x42a   : > { %p6491_p13 = scmp.ne.s32.totalorder %s8247_s21, %s6490_s10  ;;  %p6495_p4 = scmp.lt.s32.totalorder %s8247_s21, %s8300_s7 }
 0x42b   : > { %p6496_p8 = scmp.lt.s32.totalorder %s6494_s16, %s6490_s10 }
 0x42c   : > { %p6492_p5 = pnand %p6491_p13, %p8348_p10 }
 0x42d   : > { %p6497_p3 = por %p6496_p8, %p6495_p4 }
 0x42e   : > { %p6493_p0 = pneg %p6492_p5 }
 0x430   : > { %p6498_p11 = pnand %p6497_p3, %p6493_p0 }
 0x432   : > { %6501 = shalt.err (!%p6498_p11)
}
 0x433   : > { %s6555_s18 = smov 128   ;;  %s6556_s20 = smov 8  }
 0x434   : > { %6184 = dma.vmem_to_hbm [thread:$0]  (%p8348_p10), %s8249_s9, 4096, %s8247_s21, %s4797_s17, %s6555_s18, %s6555_s18, %s6556_s20  }
 0x435 PF: > { %s4825_s22 = sand.u32 1, %s6532_s24   ;;  %p8349_p1 = scmp.ne.s32.totalorder %s8307_s8, 0 }
 0x436   : > { %p8350_p2 = scmp.ge.s32.totalorder %s6544_s27, 2  ;;  %s4826_s28 = scalar_lea.sflag [#allocation5], %s4825_s22 }
 0x438   : > { %p6198_p6 = pnand %p8350_p2, %p8349_p1 }
 0x43a   : > { %p6199_p12 = pneg %p6198_p6 }
 0x43c   : > { %6527 = dma.done.wait (%p6199_p12), %s4826_s28, 4096  }
 0x43d   : > { %6529 = vsyncadd (%p6199_p12), %s4826_s28, 4294963200  ;;  %p21_p7 = scmp.ge.s32.totalorder %s6669_s23, 4   ;;  %s8351_s24 = smov %s6536_s25 }
 0x43e   : > { %s8352_s25 = smov %s6540_s26  ;;  %s8353_s26 = smov %s6685_s12 }
 0x43f   : > { %s8354_s27 = smov %s6669_s23  ;;  %23 = sbr.rel (!%p21_p7) target bundleno = 8 (0x8), region = 104 }
 0x444   :  { %4831 = vsyncpa [#allocation4], 1 }
 0x445   :  { %4833 = vsyncpa [#allocation4 + $0x1], 1 }
 0x446   :  { %4834 = vsyncpa [#allocation7], 1 }
 0x447   :  { %4835 = vsyncpa [#allocation5], 1 }
 0x448   :  { %4837 = vsyncpa [#allocation5 + $0x1], 1 }

// kernel: tpu_custom_call.1
= control target key start
LH: loop header
LB: loop body
LE: loop exit
PB: predicated region body
PF: predicated region fallthrough
CT: control target
= control target key end

     0   :  { %s8293_s0 = inlined_call_operand.hbm [shape: f32[2,16,16,128], index: 0, kind: input, shape index: {}]   ;;  %s8294_s1 = inlined_call_operand.hbm [shape: bf16[1152,128], index: 1, kind: input, shape index: {}]   ;;  %s8295_s2 = inlined_call_operand.vmem [shape: f32[1,128], index: 2, kind: input, shape index: {}]   ;;  %s8296_s3 = inlined_call_operand.vmem [shape: f32[1,128], index: 3, kind: input, shape index: {}]   ;;  %s8297_s4 = inlined_call_operand.hbm [shape: bf16[1152,128], index: 4, kind: input, shape index: {}]   ;;  %s8298_s5 = inlined_call_operand.vmem [shape: f32[1,128], index: 5, kind: input, shape index: {}]   ;;  %s8299_s6 = inlined_call_operand.vmem [shape: f32[1,128], index: 6, kind: input, shape index: {}]   ;;  %s8300_s7 = inlined_call_operand.hbm [shape: f32[2,16,16,128], index: 7, kind: output, shape index: {}]  }
   0x1   :  { %8305 = sst [smem:[#allocation28_spill]] %s8294_s1 }
   0x2   :  { %12 = vsyncpa [#allocation4], 0 }
   0x3   :  { %14 = vsyncpa [#allocation4 + $0x1], 0 }
   0x4   :  { %15 = vsyncpa [#allocation7], 0 }
   0x5   :  { %16 = vsyncpa [#allocation5], 0 }
   0x6   :  { %18 = vsyncpa [#allocation5 + $0x1], 0  ;;  %s6597_s24 = smov 0   ;;  %s6599_s25 = smov 0  }
   0x7   :  { %s6601_s26 = smov 0   ;;  %s6603_s27 = smov 0  }
   0x8 LB: > { %s6618_s28 = sadd.s32 4294967295, %s6544_s27   ;;  %s4902_s29 = sadd.s32 4294967294, %s6544_s27   ;;  %s6544_s27 = sphi %s6603_s27, %s8354_s27   ;;  %s6540_s26 = sphi %s6601_s26, %s8353_s26   ;;  %s6536_s25 = sphi %s6599_s25, %s8352_s25   ;;  %s6532_s24 = sphi %s6597_s24, %s8351_s24  }
   0x9   : > { %p44_p0 = scmp.ne.s32.totalorder %s6536_s25, %s6532_s24  ;;  %p8301_p1 = scmp.eq.s32.totalorder %s6618_s28, 0 }
   0xa   : > { %p200_p3 = scmp.eq.s32.totalorder %s4902_s29, 1  ;;  %p4903_p5 = scmp.ge.s32.totalorder %s6544_s27, 1 }
   0xb   : > { %p6627_p4 = por %p8301_p1, %p44_p0  ;;  %p207_p7 = scmp.lt.s32.totalorder %s6544_s27, 3 }
   0xc   : > { %p6632_p6 = por %p200_p3, %p44_p0  ;;  %s6546_s10 = smov [#allocation6]  }
   0xd   : > { %s8306_s30 = scalar_select %p6627_p4, 1, 0 }
   0xe   : > { %s8307_s8 = scalar_select %p6632_p6, 1, 0 }
   0xf   : > { %p6637_p8 = pnand %p4903_p5, %p207_p7  ;;  %s219_s11 = sshll.u32 %s6546_s10, 4  ;;  %s220_s11 = int_to_ptr.vmem [resolvable:$true] %s219_s11 }
  0x10   : > { %s6547_s13 = smov [#allocation8]   ;;  %s6407_s15 = scalar_lea.vmem %s220_s11, 9216 }
  0x11   : > { %s8308_s9 = scalar_select %p6637_p8, 1, 0 }
  0x12   : > { %p6186_p9 = pneg %p6637_p8  ;;  %s238_s14 = sshll.u32 %s6547_s13, 4  ;;  %s239_s14 = int_to_ptr.vmem [resolvable:$true] %s238_s14 }
  0x13   : > { %p6408_p13 = scmp.ne.s32.totalorder %s220_s11, %s6407_s15  ;;  %p6415_p5 = scmp.lt.s32.totalorder %s220_s11, %s220_s11 }
  0x14   : > { %p6646_p11 = pnand %p6186_p9, %p8301_p1  ;;  %p6416_p7 = scmp.lt.s32.totalorder %s6407_s15, %s6407_s15 }
  0x16   : > { %p6398_p12 = pneg %p6646_p11  ;;  %p6417_p10 = por %p6416_p7, %p6415_p5 }
  0x18   : > { %p6410_p0 = pnand %p6408_p13, %p6398_p12 }
  0x1a   : > { %p6411_p3 = pneg %p6410_p0 }
  0x1c   : > { %p6418_p9 = pnand %p6417_p10, %p6411_p3 }
  0x1e   : > { %6421 = shalt.err (!%p6418_p9)
}
  0x1f   : > { %s6548_s16 = smov 64   ;;  %s6549_s17 = smov 4  }
  0x20   : > { %s8310_s1 = sld [smem:[#allocation28_spill]]  ;;  %s6433_s20 = scalar_lea.vmem %s239_s14, 9216 }
  0x21   : > { %p6434_p1 = scmp.ne.s32.totalorder %s239_s14, %s6433_s20  ;;  %p6441_p2 = scmp.lt.s32.totalorder %s239_s14, %s239_s14 }
  0x22   : > { %p6442_p6 = scmp.lt.s32.totalorder %s6433_s20, %s6433_s20 }
  0x23   : > { %p6436_p13 = pnand %p6434_p1, %p6398_p12 }
  0x24   : > { %p6443_p5 = por %p6442_p6, %p6441_p2 }
  0x25   : > { %p6437_p0 = pneg %p6436_p13 }
  0x26   : > { %6189 = dma.hbm_to_vmem [thread:$0]  (!%p6646_p11), %s8310_s1, 9216, %s220_s11, [#allocation7], %s6548_s16, %s6548_s16, %s6549_s17  }
  0x27   : > { %p6444_p10 = pnand %p6443_p5, %p6437_p0 }
  0x29   : > { %6447 = shalt.err (!%p6444_p10)
}
  0x2a   : > { %6192 = dma.hbm_to_vmem [thread:$0]  (!%p6646_p11), %s8297_s4, 9216, %s239_s14, [#allocation7], %s6548_s16, %s6548_s16, %s6549_s17  }
  0x2b   : > { %s6669_s23 = sadd.s32 1, %s6544_s27   ;;  %s31_s29 = sadd.s32 1, %s6540_s26 }
  0x2c   : > { %s28_s10 = ssub.s32 %s6544_s27, %s6669_s23  ;;  %p38_p1 = scmp.ne.s32.totalorder %s6540_s26, %s6536_s25 }
  0x2d   : > { %p29_p2 = scmp.eq.s32.totalorder %s28_s10, 0  ;;  %p39_p6 = scmp.eq.s32.totalorder %s6544_s27, 0 }
  0x2e   : > { %p8311_p12 = scmp.eq.s32.totalorder %s6618_s28, 1  ;;  %p6203_p7 = scmp.lt.s32.totalorder %s6544_s27, 2 }
  0x2f   : > { %s6685_s12 = scalar_select %p29_p2, %s6540_s26, %s31_s29  }
  0x30   : > { %p6679_p3 = por %p8311_p12, %p38_p1  ;;  %p40_p9 = por %p39_p6, %p38_p1 }
  0x31   : > { %s258_s13 = sand.u32 1, %s6540_s26   ;;  %s5068_s14 = sshll.u32 %s6544_s27, 12 }
  0x32   : > { %s8312_s11 = scalar_select %p6679_p3, 1, 0 }
  0x33   : > { %s4907_s15 = sshll.u32 %s258_s13, 8  ;;  %s6692_s18 = scalar_lea.hbm %s8293_s0, %s5068_s14 }
  0x34   : > { %s262_s19 = scalar_lea.vmem [#allocation3], %s4907_s15  ;;  %p6696_p11 = pnand %p6203_p7, %p40_p9 }
  0x35   : > { %s269_s20 = sshll.u32 %s262_s19, 4  ;;  %s6700_s22 = scalar_lea.sflag [#allocation4], %s258_s13  ;;  %s6694_s20 = int_to_ptr.vmem [resolvable:$true] %s269_s20 }
  0x36   : > { %s6448_s29 = scalar_lea.hbm %s6692_s18, 4096  ;;  %p6450_p0 = pneg %p6696_p11 }
  0x37   : > { %p6449_p13 = scmp.ne.s32.totalorder %s6692_s18, %s6448_s29  ;;  %s6453_s15 = scalar_lea.hbm %s8293_s0, 8192 }
  0x38   : > { %p6454_p1 = scmp.lt.s32.totalorder %s6692_s18, %s8293_s0  ;;  %p6455_p2 = scmp.lt.s32.totalorder %s6453_s15, %s6448_s29 }
  0x39   : > { %p6451_p5 = pnand %p6450_p0, %p6449_p13 }
  0x3a   : > { %p6456_p6 = por %p6455_p2, %p6454_p1 }
  0x3b   : > { %p6452_p10 = pneg %p6451_p5 }
  0x3d   : > { %p6457_p12 = pnand %p6456_p6, %p6452_p10 }
  0x3f   : > { %6460 = shalt.err (!%p6457_p12)
}
  0x40   : > { %s6461_s13 = scalar_lea.vmem %s6694_s20, 4096  ;;  %s6550_s19 = smov [#allocation3]  }
  0x41   : > { %p6462_p7 = scmp.ne.s32.totalorder %s6694_s20, %s6461_s13  ;;  %s6466_s1 = sshll.u32 %s6550_s19, 4  ;;  %s6467_s1 = int_to_ptr.vmem [resolvable:$false] %s6466_s1 }
  0x42   : > { %s6468_s10 = scalar_lea.vmem %s6467_s1, 8192  ;;  %p6469_p5 = scmp.lt.s32.totalorder %s6694_s20, %s6467_s1 }
  0x43   : > { %p6464_p9 = pnand %p6462_p7, %p6450_p0  ;;  %p6470_p3 = scmp.lt.s32.totalorder %s6468_s10, %s6461_s13 }
  0x45   : > { %p6465_p13 = pneg %p6464_p9  ;;  %p6471_p4 = por %p6470_p3, %p6469_p5 }
  0x47   : > { %p6472_p8 = pnand %p6471_p4, %p6465_p13 }
  0x49   : > { %6475 = shalt.err (!%p6472_p8)
}
  0x4a   : > { %s6551_s29 = smov 128   ;;  %s6552_s14 = smov 8  }
  0x4b   : > { %6196 = dma.hbm_to_vmem [thread:$0]  (!%p6696_p11), %s6692_s18, 4096, %s6694_s20, %s6700_s22, %s6551_s29, %s6551_s29, %s6552_s14  }
  0x4c   : > { %p8314_p0 = scmp.ne.s32.totalorder %s8308_s9, 0 }
  0x4e   : > { %281 = sbr.rel (%p8314_p0) target bundleno = 1077 (0x435), region = 48 }
  0x53   : > { %s6724_s15 = sand.u32 1, %s6536_s25   ;;  %p8315_p4 = scmp.ne.s32.totalorder %s8306_s30, 0 }
  0x54   : > { %s4911_s1 = sshll.u32 %s6724_s15, 8  ;;  %s284_s16 = scalar_lea.sflag [#allocation4], %s6724_s15 }
  0x55   : > { %s6730_s17 = scalar_lea.vmem [#allocation3], %s4911_s1 }
  0x56   : > { %6519 = dma.done.wait (%p8315_p4), %s284_s16, 4096  }
  0x57   : > { %6521 = vsyncadd (%p8315_p4), %s284_s16, 4294963200  ;;  %p8316_p8 = scmp.eq.s32.totalorder %s6618_s28, 0 }
  0x59   : > { %6523 = dma.done.wait (%p8316_p8), [#allocation7], 18432   ;;  %p8317_p3 = pmov %p8316_p8 }
  0x5a   : > { %v6553_v0 = vmov 0.0   ;;  %v6248_v1 = vld [vmem:[#allocation6 + $0x138] sm:$0xff]   ;;  %v6251_v4 = vld [vmem:[#allocation6 + $0x130] sm:$0xff]   ;;  %v6254_v7 = vld [vmem:[#allocation6 + $0x128] sm:$0xff]   ;;  %s8034_s30 = scalar_lea.vmem [#allocation9], %s4911_s1  ;;  %s5069_s1 = sshll.u32 %s6618_s28, 12 }
  0x5b   : > { %6525 = vsyncadd (%p8317_p3), [#allocation7], 4294948864  ;;  %353 = vst [vmem:[#allocation2 + $0x29] sm:$0x7f] %v6553_v0  ;;  %v6249_v2 = vld [vmem:[#allocation6 + $0x178] sm:$0xff]   ;;  %5070 = vmatprep.subr.bf16.mxu0 %v6248_v1  ;;  %v6252_v5 = vld [vmem:[#allocation6 + $0x170] sm:$0xff]   ;;  %s8247_s21 = scalar_lea.hbm %s8300_s7, %s5069_s1 }
  0x5c   : > { %327 = vst [vmem:[#allocation2] sm:$0xff] %v6553_v0  ;;  %328 = vst [vmem:[#allocation2 + $0x8] sm:$0xff] %v6553_v0  ;;  %v6250_v3 = vld [vmem:[#allocation6 + $0xf8] sm:$0xff]   ;;  %5886 = vmatprep.subr.bf16.mxu1 %v6249_v2  ;;  %v6253_v6 = vld [vmem:[#allocation6 + $0xf0] sm:$0xff]   ;;  %s4810_s9 = sshll.u32 %s8034_s30, 4  ;;  %p8348_p10 = scmp.ne.s32.totalorder %s8312_s11, 0  ;;  %s8249_s9 = int_to_ptr.vmem [resolvable:$true] %s4810_s9 }
  0x5d   : > { %329 = vst [vmem:[#allocation2 + $0x10] sm:$0xff] %v6553_v0  ;;  %331 = vst [vmem:[#allocation2 + $0x198] sm:$0xff] %v6553_v0  ;;  %5071 = vmatpush3.bf16.msra.mxu0 %v6250_v3  ;;  %5887 = vmatpush3.bf16.msra.mxu1 %v6249_v2  ;;  %v6255_v8 = vld [vmem:[#allocation6 + $0x168] sm:$0xff]   ;;  %v6257_v10 = vld [vmem:[#allocation6 + $0x120] sm:$0xff]   ;;  %s6476_s22 = scalar_lea.vmem %s8249_s9, 4096  ;;  %s6554_s28 = smov [#allocation9]  }
  0x5e   : > { %332 = vst [vmem:[#allocation2 + $0x1a0] sm:$0xff] %v6553_v0  ;;  %333 = vst [vmem:[#allocation2 + $0x1a8] sm:$0xff] %v6553_v0  ;;  %5072 = vmatprep.subr.bf16.mxu0 %v6251_v4  ;;  %5888 = vmatprep.subr.bf16.mxu1 %v6252_v5  ;;  %v6256_v9 = vld [vmem:[#allocation6 + $0xe8] sm:$0xff]   ;;  %v6258_v11 = vld [vmem:[#allocation6 + $0x160] sm:$0xff]   ;;  %p6477_p11 = scmp.ne.s32.totalorder %s8249_s9, %s6476_s22  ;;  %s6480_s13 = sshll.u32 %s6554_s28, 4  ;;  %s6481_s13 = int_to_ptr.vmem [resolvable:$false] %s6480_s13 }
  0x5f   : > { %335 = vst [vmem:[#allocation2 + $0x18] sm:$0x1] %v6553_v0  ;;  %336 = vst [vmem:[#allocation2 + $0x30] sm:$0x1] %v6553_v0  ;;  %v6259_v12 = vld [vmem:[#allocation6 + $0xe0] sm:$0xff]   ;;  %v6260_v13 = vld [vmem:[#allocation6 + $0x118] sm:$0xff]   ;;  %p6483_p6 = scmp.lt.s32.totalorder %s8249_s9, %s6481_s13 }
  0x60   : > { %337 = vst [vmem:[#allocation2 + $0x48] sm:$0x1] %v6553_v0  ;;  %338 = vst [vmem:[#allocation2 + $0x60] sm:$0x1] %v6553_v0  ;;  %v6261_v14 = vld [vmem:[#allocation6 + $0x158] sm:$0xff]   ;;  %v6263_v16 = vld [vmem:[#allocation6 + $0x110] sm:$0xff]   ;;  %p6478_p1 = pnand %p6477_p11, %p8348_p10 }
  0x61   : > { %339 = vst [vmem:[#allocation2 + $0x78] sm:$0x1] %v6553_v0  ;;  %340 = vst [vmem:[#allocation2 + $0x90] sm:$0x1] %v6553_v0  ;;  %5073 = vmatpush3.bf16.msra.mxu0 %v6253_v6  ;;  %5889 = vmatpush3.bf16.msra.mxu1 %v6252_v5  ;;  %v6262_v15 = vld [vmem:[#allocation6 + $0xd8] sm:$0xff]   ;;  %v6264_v17 = vld [vmem:[#allocation6 + $0x150] sm:$0xff]  }
  0x62   : > { %341 = vst [vmem:[#allocation2 + $0xa8] sm:$0x1] %v6553_v0  ;;  %342 = vst [vmem:[#allocation2 + $0xc0] sm:$0x1] %v6553_v0  ;;  %5074 = vmatprep.subr.bf16.mxu0 %v6254_v7  ;;  %5890 = vmatprep.subr.bf16.mxu1 %v6255_v8  ;;  %v6265_v18 = vld [vmem:[#allocation6 + $0xd0] sm:$0xff]   ;;  %v6266_v19 = vld [vmem:[#allocation6 + $0x108] sm:$0xff]   ;;  %p6479_p2 = pneg %p6478_p1 }
  0x63   : > { %343 = vst [vmem:[#allocation2 + $0xd8] sm:$0x1] %v6553_v0  ;;  %344 = vst [vmem:[#allocation2 + $0xf0] sm:$0x1] %v6553_v0  ;;  %v6267_v20 = vld [vmem:[#allocation6 + $0x148] sm:$0xff]   ;;  %v6269_v22 = vld [vmem:[#allocation6 + $0x100] sm:$0xff]  }
  0x64   : > { %345 = vst [vmem:[#allocation2 + $0x108] sm:$0x1] %v6553_v0  ;;  %346 = vst [vmem:[#allocation2 + $0x120] sm:$0x1] %v6553_v0  ;;  %v6268_v21 = vld [vmem:[#allocation6 + $0xc8] sm:$0xff]   ;;  %v6270_v23 = vld [vmem:[#allocation6 + $0x140] sm:$0xff]  }
  0x65   : > { %347 = vst [vmem:[#allocation2 + $0x138] sm:$0x1] %v6553_v0  ;;  %348 = vst [vmem:[#allocation2 + $0x150] sm:$0x1] %v6553_v0  ;;  %5075 = vmatpush3.bf16.msra.mxu0 %v6256_v9  ;;  %5891 = vmatpush3.bf16.msra.mxu1 %v6255_v8  ;;  %v370_v24 = vld [vmem:[%s6730_s17] sm:$0xff]  ;;  %v371_v25 = vld [vmem:[%s6730_s17 + $0x8] sm:$0xff] }
  0x66   : > { %349 = vst [vmem:[#allocation2 + $0x168] sm:$0x1] %v6553_v0  ;;  %350 = vst [vmem:[#allocation2 + $0x180] sm:$0x1] %v6553_v0  ;;  %5076 = vmatprep.subr.bf16.mxu0 %v6257_v10  ;;  %5892 = vmatprep.subr.bf16.mxu1 %v6258_v11  ;;  %v372_v26 = vld [vmem:[%s6730_s17 + $0x10] sm:$0xff]  ;;  %v6785_v27 = vpack.c.bf16 %v371_v25, %v370_v24  ;;  %v373_v28 = vld [vmem:[%s6730_s17 + $0x18] sm:$0xff] }
  0x67   : > { %354 = vst [vmem:[#allocation2 + $0x41] sm:$0x7f] %v6553_v0  ;;  %355 = vst [vmem:[#allocation2 + $0x59] sm:$0x7f] %v6553_v0  ;;  %v6271_v29 = vld [vmem:[#allocation6 + $0xc0] sm:$0xff]   ;;  %v6272_v30 = vld [vmem:[#allocation6 + $0xb8] sm:$0xff]   ;;  %v6809_v47 = vpack.c.bf16 %v373_v28, %v372_v26 }
  0x68   : > { %356 = vst [vmem:[#allocation2 + $0x71] sm:$0x7f] %v6553_v0  ;;  %357 = vst [vmem:[#allocation2 + $0x89] sm:$0x7f] %v6553_v0  ;;  %995 = vmatprep.mubr.bf16.mxu0 %v6785_v27  ;;  %v6273_v31 = vld [vmem:[#allocation6 + $0x78] sm:$0xff]   ;;  %v374_v32 = vld [vmem:[%s6730_s17 + $0x20] sm:$0xff] }
  0x69   : > { %358 = vst [vmem:[#allocation2 + $0xa1] sm:$0x7f] %v6553_v0  ;;  %359 = vst [vmem:[#allocation2 + $0xb9] sm:$0x7f] %v6553_v0  ;;  %5077 = vmatpush3.bf16.msra.mxu0 %v6259_v12  ;;  %5893 = vmatpush3.bf16.msra.mxu1 %v6258_v11  ;;  %v375_v33 = vld [vmem:[%s6730_s17 + $0x28] sm:$0xff]  ;;  %v6792_v34 = vld [vmem:[%s6730_s17 + $0x30] sm:$0xff] }
  0x6a   : > { %360 = vst [vmem:[#allocation2 + $0xd1] sm:$0x7f] %v6553_v0  ;;  %361 = vst [vmem:[#allocation2 + $0xe9] sm:$0x7f] %v6553_v0  ;;  %5078 = vmatprep.subr.bf16.mxu0 %v6260_v13  ;;  %5894 = vmatprep.subr.bf16.mxu1 %v6261_v14  ;;  %v6795_v35 = vld [vmem:[%s6730_s17 + $0x38] sm:$0xff]  ;;  %v6800_v37 = vld [vmem:[%s6730_s17 + $0x40] sm:$0xff]  ;;  %v6837_v2 = vpack.c.bf16 %v375_v33, %v374_v32 }
  0x6b   : > { %362 = vst [vmem:[#allocation2 + $0x101] sm:$0x7f] %v6553_v0  ;;  %363 = vst [vmem:[#allocation2 + $0x119] sm:$0x7f] %v6553_v0  ;;  %v6274_v36 = vld [vmem:[#allocation6 + $0x38] sm:$0xff]   ;;  %v6275_v48 = vld [vmem:[#allocation6 + $0x70] sm:$0xff]  }
  0x6c   : > { %364 = vst [vmem:[#allocation2 + $0x131] sm:$0x7f] %v6553_v0  ;;  %365 = vst [vmem:[#allocation2 + $0x149] sm:$0x7f] %v6553_v0  ;;  %v6812_v49 = vld [vmem:[%s6730_s17 + $0x48] sm:$0xff]  ;;  %v6276_v50 = vld [vmem:[#allocation6 + $0x30] sm:$0xff]  }
  0x6d   : > { %366 = vst [vmem:[#allocation2 + $0x161] sm:$0x7f] %v6553_v0  ;;  %367 = vst [vmem:[#allocation2 + $0x179] sm:$0x7f] %v6553_v0  ;;  %5079 = vmatpush3.bf16.msra.mxu0 %v6262_v15  ;;  %5895 = vmatpush3.bf16.msra.mxu1 %v6261_v14  ;;  %v6817_v51 = vld [vmem:[%s6730_s17 + $0x50] sm:$0xff]  ;;  %v6820_v52 = vld [vmem:[%s6730_s17 + $0x58] sm:$0xff] }
  0x6e   : > { %368 = vst [vmem:[#allocation2 + $0x191] sm:$0x7f] %v6553_v0  ;;  %334 = vst [vmem:[#allocation2] sm:$0x1] %v6553_v0  ;;  %5080 = vmatprep.subr.bf16.mxu0 %v6263_v16  ;;  %5896 = vmatprep.subr.bf16.mxu1 %v6264_v17  ;;  %v6277_v60 = vld [vmem:[#allocation6 + $0xb0] sm:$0xff]   ;;  %v6278_v61 = vld [vmem:[#allocation6 + $0x68] sm:$0xff]  }
  0x6f   : > { %351 = vst [vmem:[#allocation2 + $0x198] sm:$0x1] %v6553_v0  ;;  %352 = vst [vmem:[#allocation2 + $0x11] sm:$0x7f] %v6553_v0  ;;  %v6835_v1 = vld [vmem:[%s6730_s17 + $0x60] sm:$0xff]  ;;  %v6279_v3 = vld [vmem:[#allocation6 + $0x28] sm:$0xff]  }
  0x70   : > { %369 = vst [vmem:[#allocation2 + $0x1a9] sm:$0x7f] %v6553_v0  ;;  %403 = vst [vmem:[#allocation2 + $0x19] sm:$0xff] %v370_v24  ;;  %v6840_v4 = vld [vmem:[%s6730_s17 + $0x68] sm:$0xff]  ;;  %v6845_v7 = vld [vmem:[%s6730_s17 + $0x70] sm:$0xff]  ;;  %s6482_s19 = scalar_lea.vmem %s6481_s13, 8192 }
  0x71   : > { %5081 = vmatpush3.bf16.msra.mxu0 %v6265_v18  ;;  %5897 = vmatpush3.bf16.msra.mxu1 %v6264_v17  ;;  %404 = vst [vmem:[#allocation2 + $0x21] sm:$0xff] %v371_v25  ;;  %405 = vst [vmem:[#allocation2 + $0x31] sm:$0xff] %v372_v26  ;;  %v6850_v12 = vld [vmem:[%s6730_s17 + $0x78] sm:$0xff]  ;;  %v6280_v13 = vld [vmem:[#allocation6 + $0x60] sm:$0xff]   ;;  %p6484_p12 = scmp.lt.s32.totalorder %s6482_s19, %s6476_s22 }
  0x72   : > { %5082 = vmatprep.subr.bf16.mxu0 %v6266_v19  ;;  %5898 = vmatprep.subr.bf16.mxu1 %v6267_v20  ;;  %406 = vst [vmem:[#allocation2 + $0x39] sm:$0xff] %v373_v28  ;;  %407 = vst [vmem:[#allocation2 + $0x49] sm:$0xff] %v374_v32  ;;  %v6281_v15 = vld [vmem:[#allocation6 + $0x20] sm:$0xff]   ;;  %v6862_v17 = vld [vmem:[%s6730_s17 + $0x88] sm:$0xff] }
  0x73   : > { %408 = vst [vmem:[#allocation2 + $0x51] sm:$0xff] %v375_v33  ;;  %409 = vst [vmem:[#allocation2 + $0x61] sm:$0xff] %v6792_v34  ;;  %v6859_v16 = vld [vmem:[%s6730_s17 + $0x80] sm:$0xff]  ;;  %v6867_v18 = vld [vmem:[%s6730_s17 + $0x90] sm:$0xff]  ;;  %p6485_p7 = por %p6484_p12, %p6483_p6 }
  0x74   : > { %410 = vst [vmem:[#allocation2 + $0x69] sm:$0xff] %v6795_v35  ;;  %411 = vst [vmem:[#allocation2 + $0x79] sm:$0xff] %v6800_v37  ;;  %v6870_v19 = vld [vmem:[%s6730_s17 + $0x98] sm:$0xff]  ;;  %v6887_v32 = vld [vmem:[%s6730_s17 + $0xa0] sm:$0xff] }
  0x75   : > { %5083 = vmatpush3.bf16.msra.mxu0 %v6268_v21  ;;  %5899 = vmatpush3.bf16.msra.mxu1 %v6267_v20  ;;  %412 = vst [vmem:[#allocation2 + $0x81] sm:$0xff] %v6812_v49  ;;  %413 = vst [vmem:[#allocation2 + $0x91] sm:$0xff] %v6817_v51  ;;  %v6283_v28 = vld [vmem:[#allocation6 + $0x58] sm:$0xff]   ;;  %v6890_v33 = vld [vmem:[%s6730_s17 + $0xa8] sm:$0xff]  ;;  %p6486_p9 = pnand %p6485_p7, %p6479_p2 }
  0x76   : > { %5084 = vmatprep.subr.bf16.mxu0 %v6269_v22  ;;  %5900 = vmatprep.subr.bf16.mxu1 %v6270_v23  ;;  %414 = vst [vmem:[#allocation2 + $0x99] sm:$0xff] %v6820_v52  ;;  %415 = vst [vmem:[#allocation2 + $0xa9] sm:$0xff] %v6835_v1  ;;  %v6282_v22 = vld [vmem:[#allocation6 + $0xa8] sm:$0xff]  }
  0x77   : > { %v627_v40 = vld [vmem:[#allocation2 + $0x18] sm:$0xff]  ;;  %416 = vst [vmem:[#allocation2 + $0xb1] sm:$0xff] %v6840_v4  ;;  %417 = vst [vmem:[#allocation2 + $0xc1] sm:$0xff] %v6845_v7 }
  0x78   : > { %v723_v38 = vld [vmem:[#allocation2 + $0x1a] sm:$0xff]  ;;  %v724_v39 = vld [vmem:[#allocation2 + $0x22] sm:$0xff]  ;;  %v629_v55 = vld [vmem:[#allocation2 + $0x30] sm:$0xff]  ;;  %418 = vst [vmem:[#allocation2 + $0xc9] sm:$0xff] %v6850_v12 }
  0x79   : > { %5085 = vmatpush3.bf16.msra.mxu0 %v6271_v29  ;;  %5901 = vmatpush3.bf16.msra.mxu1 %v6270_v23  ;;  %v6803_v41 = vpack.c.bf16 %v724_v39, %v723_v38  ;;  %v628_v42 = vld [vmem:[#allocation2 + $0x20] sm:$0xff]  ;;  %v725_v43 = vld [vmem:[#allocation2 + $0x32] sm:$0xff]  ;;  %v631_v9 = vld [vmem:[#allocation2 + $0x48] sm:$0xff]  ;;  %419 = vst [vmem:[#allocation2 + $0xd9] sm:$0xff] %v6859_v16  ;;  %v6880_v23 = vpack.c.bf16 %v6795_v35, %v6792_v34 }
  0x7a   : > { %v726_v44 = vld [vmem:[#allocation2 + $0x3a] sm:$0xff]  ;;  %5934 = vmatprep.subr.bf16.mxu0 %v6272_v30  ;;  %5206 = vmatprep.subr.bf16.mxu1 %v6273_v31  ;;  %v6805_v45 = vpack.c.bf16 %v628_v42, %v627_v40  ;;  %v727_v53 = vld [vmem:[#allocation2 + $0x4a] sm:$0xff]  ;;  %v728_v54 = vld [vmem:[#allocation2 + $0x52] sm:$0xff]  ;;  %420 = vst [vmem:[#allocation2 + $0xe1] sm:$0xff] %v6862_v17 }
  0x7b   : > { %v6807_v46 = vpack.c.bf16 %v726_v44, %v725_v43  ;;  %5902 = vmatprep.mubr.bf16.mxu1 %v6803_v41  ;;  %v6826_v56 = vpack.c.bf16 %v728_v54, %v727_v53  ;;  %v630_v57 = vld [vmem:[#allocation2 + $0x38] sm:$0xff]  ;;  %v729_v58 = vld [vmem:[#allocation2 + $0x62] sm:$0xff]  ;;  %v730_v59 = vld [vmem:[#allocation2 + $0x6a] sm:$0xff]  ;;  %421 = vst [vmem:[#allocation2 + $0xf1] sm:$0xff] %v6867_v18 }
  0x7c   : > { %996 = vmatmul.mubr.bf16.vlgmr.msra.gmra.mxu0 %v6805_v45  ;;  %v6830_v62 = vpack.c.bf16 %v630_v57, %v629_v55  ;;  %v6832_v63 = vpack.c.bf16 %v730_v59, %v729_v58  ;;  %v731_v5 = vld [vmem:[#allocation2 + $0x7a] sm:$0xff]  ;;  %v732_v6 = vld [vmem:[#allocation2 + $0x82] sm:$0xff]  ;;  %v632_v10 = vld [vmem:[#allocation2 + $0x50] sm:$0xff]  ;;  %422 = vst [vmem:[#allocation2 + $0xf9] sm:$0xff] %v6870_v19 }
  0x7d   : > { %5903 = vmatmul.mubr.bf16.vlgmr.msra.gmra.mxu1 %v6807_v46  ;;  %5935 = vmatpush3.bf16.msra.mxu0 %v6272_v30  ;;  %v6847_v8 = vpack.c.bf16 %v732_v6, %v731_v5  ;;  %v733_v11 = vld [vmem:[#allocation2 + $0x92] sm:$0xff]  ;;  %v734_v14 = vld [vmem:[#allocation2 + $0x9a] sm:$0xff]  ;;  %v6872_v20 = vpack.c.bf16 %v632_v10, %v631_v9  ;;  %v634_v30 = vld [vmem:[#allocation2 + $0x68] sm:$0xff]  ;;  %423 = vst [vmem:[#allocation2 + $0x109] sm:$0xff] %v6887_v32 }
  0x7e   : > { %5207 = vmatpush3.bf16.msra.mxu1 %v6274_v36  ;;  %1003 = vmatprep.mubr.bf16.mxu0 %v6809_v47  ;;  %v6874_v21 = vpack.c.bf16 %v734_v14, %v733_v11  ;;  %v735_v24 = vld [vmem:[#allocation2 + $0xaa] sm:$0xff]  ;;  %v736_v25 = vld [vmem:[#allocation2 + $0xb2] sm:$0xff]  ;;  %v633_v29 = vld [vmem:[#allocation2 + $0x60] sm:$0xff]  ;;  %424 = vst [vmem:[#allocation2 + $0x111] sm:$0xff] %v6890_v33 }
  0x7f   : > { %5208 = vmatprep.subr.bf16.mxu1 %v6275_v48  ;;  %5906 = vmatprep.mubr.bf16.mxu1 %v6826_v56  ;;  %v6882_v26 = vpack.c.bf16 %v736_v25, %v735_v24  ;;  %v6284_v31 = vld [vmem:[#allocation6 + $0x18] sm:$0xff]   ;;  %v6897_v36 = vld [vmem:[%s6730_s17 + $0xb0] sm:$0xff]  ;;  %v6904_v42 = vpack.c.bf16 %v634_v30, %v633_v29  ;;  %v6910_v48 = vpack.c.bf16 %v6812_v49, %v6800_v37  ;;  %v394_v54 = vld [vmem:[%s6730_s17 + $0xc0] sm:$0xff] }
  0x80   : > { %5936 = vmatprep.subr.bf16.mxu0 %v6277_v60  ;;  %v737_v34 = vld [vmem:[#allocation2 + $0xc2] sm:$0xff]  ;;  %v738_v35 = vld [vmem:[#allocation2 + $0xca] sm:$0xff]  ;;  %425 = vst [vmem:[#allocation2 + $0x121] sm:$0xff] %v6897_v36  ;;  %v395_v55 = vld [vmem:[%s6730_s17 + $0xc8] sm:$0xff]  ;;  %v6934_v24 = vpack.c.bf16 %v6820_v52, %v6817_v51 }
  0x81   : > { %5937 = vmatpush3.bf16.msra.mxu0 %v6277_v60  ;;  %v739_v38 = vld [vmem:[#allocation2 + $0xda] sm:$0xff]  ;;  %v740_v39 = vld [vmem:[#allocation2 + $0xe2] sm:$0xff]  ;;  %v6906_v43 = vpack.c.bf16 %v738_v35, %v737_v34  ;;  %427 = vst [vmem:[#allocation2 + $0x139] sm:$0xff] %v394_v54  ;;  %428 = vst [vmem:[#allocation2 + $0x141] sm:$0xff] %v395_v55 }
  0x82   : > { %5209 = vmatpush3.bf16.msra.mxu1 %v6276_v50  ;;  %5938 = vmatprep.subr.bf16.mxu0 %v6282_v22  ;;  %v6900_v40 = vld [vmem:[%s6730_s17 + $0xb8] sm:$0xff]  ;;  %v6285_v44 = vld [vmem:[#allocation6 + $0x50] sm:$0xff]   ;;  %v6912_v50 = vpack.c.bf16 %v740_v39, %v739_v38  ;;  %v635_v57 = vld [vmem:[#allocation2 + $0x78] sm:$0xff] }
  0x83   : > { %5210 = vmatprep.subr.bf16.mxu1 %v6278_v61  ;;  %426 = vst [vmem:[#allocation2 + $0x129] sm:$0xff] %v6900_v40  ;;  %v6286_v53 = vld [vmem:[#allocation6 + $0x10] sm:$0xff]   ;;  %v397_v60 = vld [vmem:[%s6730_s17 + $0xd8] sm:$0xff]  ;;  %v6918_v61 = vpack.c.bf16 %v395_v55, %v394_v54  ;;  %v741_v37 = vld [vmem:[#allocation2 + $0xf2] sm:$0xff] }
  0x84   : > { %1004 = vmatmul.mubr.bf16.gmra.mxu0 %v6830_v62  ;;  %v636_v58 = vld [vmem:[#allocation2 + $0x80] sm:$0xff]  ;;  %430 = vst [vmem:[#allocation2 + $0x159] sm:$0xff] %v397_v60  ;;  %v6287_v5 = vld [vmem:[#allocation6 + $0xa0] sm:$0xff]   ;;  %v6288_v10 = vld [vmem:[#allocation6 + $0x48] sm:$0xff]  }
  0x85   : > { %5907 = vmatmul.mubr.bf16.gmra.mxu1 %v6832_v63  ;;  %1011 = vmatprep.mubr.bf16.mxu0 %v6837_v2  ;;  %v396_v59 = vld [vmem:[%s6730_s17 + $0xd0] sm:$0xff]  ;;  %v743_v6 = vld [vmem:[#allocation2 + $0x10a] sm:$0xff]  ;;  %v744_v9 = vld [vmem:[#allocation2 + $0x112] sm:$0xff] }
  0x86   : > { %5910 = vmatprep.mubr.bf16.mxu1 %v6847_v8  ;;  %5211 = vmatpush3.bf16.msra.mxu1 %v6279_v3  ;;  %v742_v49 = vld [vmem:[#allocation2 + $0xfa] sm:$0xff]  ;;  %429 = vst [vmem:[#allocation2 + $0x151] sm:$0xff] %v396_v59  ;;  %v6922_v3 = vpack.c.bf16 %v397_v60, %v396_v59  ;;  %v6936_v25 = vpack.c.bf16 %v744_v9, %v743_v6  ;;  %v6942_v29 = vld [vmem:[%s6730_s17 + $0xf8] sm:$0xff]  ;;  %v637_v51 = vld [vmem:[#allocation2 + $0x90] sm:$0xff] }
  0x87   : > { %5212 = vmatprep.subr.bf16.mxu1 %v6280_v13  ;;  %5939 = vmatpush3.bf16.msra.mxu0 %v6282_v22  ;;  %v6289_v11 = vld [vmem:[#allocation6 + $0x8] sm:$0xff]   ;;  %v6926_v13 = vpack.c.bf16 %v636_v58, %v635_v57  ;;  %v6928_v14 = vpack.c.bf16 %v742_v49, %v741_v37  ;;  %434 = vst [vmem:[#allocation2 + $0x189] sm:$0xff] %v6942_v29  ;;  %v6290_v34 = vld [vmem:[#allocation6 + $0x40] sm:$0xff]   ;;  %v6292_v54 = vld [vmem:[#allocation6 + $0x98] sm:$0xff]  }
  0x88   : > { %5940 = vmatprep.subr.bf16.mxu0 %v6287_v5  ;;  %v399_v22 = vld [vmem:[%s6730_s17 + $0xe8] sm:$0xff]  ;;  %v6291_v39 = vld [vmem:[#allocation6] sm:$0xff]   ;;  %v6960_v58 = vpack.c.bf16 %v6840_v4, %v6835_v1  ;;  %v6293_v60 = vld [vmem:[#allocation6 + $0x238] sm:$0xff]  }
  0x89   : > { %432 = vst [vmem:[#allocation2 + $0x171] sm:$0xff] %v399_v22  ;;  %v638_v52 = vld [vmem:[#allocation2 + $0x98] sm:$0xff]  ;;  %v639_v37 = vld [vmem:[#allocation2 + $0xa8] sm:$0xff]  ;;  %v640_v49 = vld [vmem:[#allocation2 + $0xb0] sm:$0xff] }
  0x8a   : > { %5213 = vmatpush3.bf16.msra.mxu1 %v6281_v15  ;;  %v398_v15 = vld [vmem:[%s6730_s17 + $0xe0] sm:$0xff]  ;;  %v745_v35 = vld [vmem:[#allocation2 + $0x122] sm:$0xff]  ;;  %v6954_v55 = vpack.c.bf16 %v638_v52, %v637_v51 }
  0x8b   : > { %5214 = vmatprep.subr.bf16.mxu1 %v6283_v28  ;;  %5941 = vmatpush3.bf16.msra.mxu0 %v6287_v5  ;;  %431 = vst [vmem:[#allocation2 + $0x169] sm:$0xff] %v398_v15  ;;  %v6939_v28 = vld [vmem:[%s6730_s17 + $0xf0] sm:$0xff]  ;;  %v6944_v30 = vpack.c.bf16 %v399_v22, %v398_v15  ;;  %v746_v38 = vld [vmem:[#allocation2 + $0x12a] sm:$0xff]  ;;  %v6974_v22 = vpack.c.bf16 %v6850_v12, %v6845_v7 }
  0x8c   : > { %1012 = vmatmul.mubr.bf16.gmra.mxu0 %v6872_v20  ;;  %433 = vst [vmem:[#allocation2 + $0x181] sm:$0xff] %v6939_v28  ;;  %v6956_v57 = vpack.c.bf16 %v746_v38, %v745_v35  ;;  %5942 = vmatprep.subr.bf16.mxu0 %v6292_v54  ;;  %v6294_v5 = vld [vmem:[#allocation6 + $0x90] sm:$0xff]   ;;  %v642_v35 = vld [vmem:[#allocation2 + $0xc8] sm:$0xff] }
  0x8d   : > { %5911 = vmatmul.mubr.bf16.gmra.mxu1 %v6874_v21  ;;  %1019 = vmatprep.mubr.bf16.mxu0 %v6880_v23  ;;  %v749_v6 = vld [vmem:[#allocation2 + $0x152] sm:$0xff]  ;;  %v750_v9 = vld [vmem:[#allocation2 + $0x15a] sm:$0xff]  ;;  %v6300_v12 = vld [vmem:[#allocation6 + $0x1f8] sm:$0xff]  }
  0x8e   : > { %5914 = vmatprep.mubr.bf16.mxu1 %v6882_v26  ;;  %5215 = vmatpush3.bf16.msra.mxu1 %v6284_v31  ;;  %v722_v31 = vpack.c.bf16 %v6942_v29, %v6939_v28  ;;  %v6970_v15 = vpack.c.bf16 %v750_v9, %v749_v6  ;;  %v641_v52 = vld [vmem:[#allocation2 + $0xc0] sm:$0xff]  ;;  %v754_v7 = vld [vmem:[#allocation2 + $0x18a] sm:$0xff]  ;;  %v6306_v28 = vld [vmem:[#allocation6 + $0x1a8] sm:$0xff]  }
  0x8f   : > { %5216 = vmatprep.subr.bf16.mxu1 %v6285_v44  ;;  %v747_v44 = vld [vmem:[#allocation2 + $0x13a] sm:$0xff]  ;;  %5943 = vmatpush3.bf16.msra.mxu0 %v6292_v54  ;;  %v6308_v29 = vld [vmem:[#allocation6 + $0x1e0] sm:$0xff]  }
  0x90   : > { %v752_v4 = vld [vmem:[#allocation2 + $0x172] sm:$0xff]  ;;  %5944 = vmatprep.subr.bf16.mxu0 %v6294_v5  ;;  %v483_v38 = vld [vmem:[#allocation2 + $0x1] sm:$0xff] }
  0x91   : > { %v644_v6 = vld [vmem:[#allocation2 + $0xe0] sm:$0xff] }
  0x92   : > { %5217 = vmatpush3.bf16.msra.mxu1 %v6286_v53  ;;  %v748_v53 = vld [vmem:[#allocation2 + $0x142] sm:$0xff]  ;;  %v751_v1 = vld [vmem:[#allocation2 + $0x16a] sm:$0xff] }
  0x93   : > { %5218 = vmatprep.subr.bf16.mxu1 %v6288_v10  ;;  %v6962_v59 = vpack.c.bf16 %v748_v53, %v747_v44  ;;  %5945 = vmatpush3.bf16.msra.mxu0 %v6294_v5  ;;  %v6296_v10 = vld [vmem:[#allocation6 + $0x88] sm:$0xff]   ;;  %v6976_v51 = vpack.c.bf16 %v752_v4, %v751_v1  ;;  %v753_v44 = vld [vmem:[#allocation2 + $0x182] sm:$0xff]  ;;  %v6982_v53 = vpack.c.bf16 %v642_v35, %v641_v52 }
  0x94   : > { %1020 = vmatmul.mubr.bf16.gmra.mxu0 %v6904_v42  ;;  %5946 = vmatprep.subr.bf16.mxu0 %v6296_v10  ;;  %v770_v54 = vpack.c.bf16 %v754_v7, %v753_v44  ;;  %v643_v5 = vld [vmem:[#allocation2 + $0xd8] sm:$0xff]  ;;  %v435_v9 = vld [vmem:[#allocation2] sm:$0xff]  ;;  %v650_v44 = vld [vmem:[#allocation2 + $0x128] sm:$0xff] }
  0x95   : > { %5915 = vmatmul.mubr.bf16.gmra.mxu1 %v6906_v43  ;;  %1027 = vmatprep.mubr.bf16.mxu0 %v6910_v48  ;;  %v6990_v1 = vpack.c.bf16 %v644_v6, %v643_v5  ;;  %v467_v4 = vpack.c.bf16 %v6553_v0, %v435_v9  ;;  %v646_v52 = vld [vmem:[#allocation2 + $0xf8] sm:$0xff]  ;;  %v7004_v0 = vpack.c.bf16 %v6890_v33, %v6887_v32  ;;  %v6307_v33 = vld [vmem:[#allocation6 + $0x210] sm:$0xff]   ;;  %v653_v7 = vld [vmem:[#allocation2 + $0x150] sm:$0xff] }
  0x96   : > { %5918 = vmatprep.mubr.bf16.mxu1 %v6912_v50  ;;  %5219 = vmatpush3.bf16.msra.mxu1 %v6289_v11  ;;  %v6968_v11 = vpack.c.bf16 %v640_v49, %v639_v37  ;;  %v6986_v37 = vpack.c.bf16 %v6862_v17, %v6859_v16  ;;  %v6295_v16 = vld [vmem:[#allocation6 + $0x230] sm:$0xff]   ;;  %v645_v17 = vld [vmem:[#allocation2 + $0xf0] sm:$0xff]  ;;  %v7014_v32 = vpack.c.bf16 %v6900_v40, %v6897_v36  ;;  %v6301_v9 = vld [vmem:[#allocation6 + $0x1b8] sm:$0xff]  }
  0x97   : > { %5220 = vmatprep.subr.bf16.mxu1 %v6290_v34  ;;  %5947 = vmatpush3.bf16.msra.mxu0 %v6296_v10  ;;  %v6298_v34 = vld [vmem:[#allocation6 + $0x80] sm:$0xff]   ;;  %v6995_v10 = vpack.c.bf16 %v6870_v19, %v6867_v18  ;;  %v7000_v35 = vpack.c.bf16 %v646_v52, %v645_v17  ;;  %v652_v40 = vld [vmem:[#allocation2 + $0x140] sm:$0xff] }
  0x98   : > { %5948 = vmatprep.subr.bf16.mxu0 %v6298_v34  ;;  %v6299_v18 = vld [vmem:[#allocation6 + $0x220] sm:$0xff]   ;;  %v657_v5 = vld [vmem:[#allocation2 + $0x180] sm:$0xff] }
  0x99   : > { %v648_v19 = vld [vmem:[#allocation2 + $0x110] sm:$0xff] }
  0x9a   : > { %5221 = vmatpush3.bf16.msra.mxu1 %v6291_v39  ;;  %v484_v39 = vld [vmem:[#allocation2 + $0x9] sm:$0xff] }
  0x9b   : > { %5982 = vmatprep.subr.bf16.mxu1 %v6293_v60  ;;  %5949 = vmatpush3.bf16.msra.mxu0 %v6298_v34  ;;  %v515_v49 = vpack.c.bf16 %v484_v39, %v483_v38  ;;  %v6297_v34 = vld [vmem:[#allocation6 + $0x228] sm:$0xff]   ;;  %v649_v39 = vld [vmem:[#allocation2 + $0x120] sm:$0xff]  ;;  %v6317_v36 = vld [vmem:[#allocation6 + $0x200] sm:$0xff]  }
  0x9c   : > { %1028 = vmatmul.mubr.bf16.gmra.mxu0 %v6926_v13  ;;  %5342 = vmatprep.subr.bf16.mxu0 %v6300_v12  ;;  %v654_v12 = vld [vmem:[#allocation2 + $0x158] sm:$0xff]  ;;  %v532_v6 = vld [vmem:[#allocation2 + $0xa] sm:$0xff] }
  0x9d   : > { %5919 = vmatmul.mubr.bf16.gmra.mxu1 %v6928_v14  ;;  %1035 = vmatprep.mubr.bf16.mxu0 %v6934_v24 }
  0x9e   : > { %5922 = vmatprep.mubr.bf16.mxu1 %v6936_v25 }
  0xa4   : > { %1036 = vmatmul.mubr.bf16.gmra.mxu0 %v6954_v55 }
  0xa5   : > { %5923 = vmatmul.mubr.bf16.gmra.mxu1 %v6956_v57  ;;  %1043 = vmatprep.mubr.bf16.mxu0 %v6960_v58 }
  0xa6   : > { %5926 = vmatprep.mubr.bf16.mxu1 %v6962_v59 }
  0xac   : > { %1044 = vmatmul.mubr.bf16.gmra.mxu0 %v6968_v11 }
  0xad   : > { %5927 = vmatmul.mubr.bf16.gmra.mxu1 %v6970_v15  ;;  %1051 = vmatprep.mubr.bf16.mxu0 %v6974_v22 }
  0xae   : > { %5930 = vmatprep.mubr.bf16.mxu1 %v6976_v51 }
  0xb4   : > { %1052 = vmatmul.mubr.bf16.gmra.mxu0 %v6982_v53 }
  0xb5   : > { %5931 = vmatmul.mubr.bf16.gmra.mxu1 %v770_v54  ;;  %1059 = vmatprep.mubr.bf16.mxu0 %v6986_v37  ;;  %v656_v54 = vld [vmem:[#allocation2 + $0x170] sm:$0xff] }
  0xb6   : > { %1461 = vmatprep.mubr.bf16.mxu1 %v515_v49 }
  0xbc   : > { %1060 = vmatmul.mubr.bf16.gmra.mxu0 %v6990_v1 }
  0xbd   : > { %1462 = vmatmul.mubr.bf16.vlgmr.msra.gmra.mxu1 %v467_v4  ;;  %1067 = vmatprep.mubr.bf16.mxu0 %v6995_v10  ;;  %v6303_v4 = vld [vmem:[#allocation6 + $0x1f0] sm:$0xff]  }
  0xbe   : > { %5983 = vmatpush3.bf16.msra.mxu1 %v6293_v60  ;;  %1469 = vmatprep.mubr.bf16.mxu1 %v6785_v27  ;;  %v647_v27 = vld [vmem:[#allocation2 + $0x108] sm:$0xff] }
  0xbf   : > { %5984 = vmatprep.subr.bf16.mxu1 %v6295_v16  ;;  %v6302_v60 = vld [vmem:[#allocation6 + $0x218] sm:$0xff]   ;;  %v7010_v38 = vpack.c.bf16 %v648_v19, %v647_v27 }
  0xc0   : > { %v1855_v27 = vld [vmem:[#allocation2 + $0x82] sm:$0xff] }
  0xc1   : > { %v1804_v19 = vld [vmem:[#allocation2 + $0x61] sm:$0xff] }
  0xc2   : > { %5985 = vmatpush3.bf16.msra.mxu1 %v6295_v16  ;;  %v6304_v16 = vld [vmem:[#allocation6 + $0x1b0] sm:$0xff]  }
  0xc3   : > { %5986 = vmatprep.subr.bf16.mxu1 %v6297_v34 }
  0xc4   : > { %1068 = vmatmul.mubr.bf16.gmra.mxu0 %v7000_v35 }
  0xc5   : > { %1470 = vmatmul.mubr.bf16.gmra.mxu1 %v6805_v45  ;;  %1075 = vmatprep.mubr.bf16.mxu0 %v7004_v0  ;;  %v6312_v45 = vld [vmem:[#allocation6 + $0x208] sm:$0xff]  }
  0xc6   : > { %1477 = vmatprep.mubr.bf16.mxu1 %v6809_v47  ;;  %5987 = vmatpush3.bf16.msra.mxu1 %v6297_v34  ;;  %v7020_v47 = vpack.c.bf16 %v650_v44, %v649_v39  ;;  %v1857_v39 = vld [vmem:[#allocation2 + $0x9a] sm:$0xff] }
  0xc7   : > { %5988 = vmatprep.subr.bf16.mxu1 %v6299_v18 }
  0xca   : > { %5989 = vmatpush3.bf16.msra.mxu1 %v6299_v18  ;;  %v1854_v18 = vld [vmem:[#allocation2 + $0x7a] sm:$0xff] }
  0xcb   : > { %5990 = vmatprep.subr.bf16.mxu1 %v6302_v60 }
  0xcc   : > { %1076 = vmatmul.mubr.bf16.gmra.mxu0 %v7010_v38 }
  0xcd   : > { %1478 = vmatmul.mubr.bf16.gmra.mxu1 %v6830_v62  ;;  %1083 = vmatprep.mubr.bf16.mxu0 %v7014_v32  ;;  %v651_v62 = vld [vmem:[#allocation2 + $0x138] sm:$0xff] }
  0xce   : > { %1485 = vmatprep.mubr.bf16.mxu1 %v6837_v2  ;;  %5991 = vmatpush3.bf16.msra.mxu1 %v6302_v60  ;;  %v7026_v2 = vpack.c.bf16 %v652_v40, %v651_v62  ;;  %v1883_v62 = vpack.c.bf16 %v1855_v27, %v1854_v18 }
  0xcf   : > { %5992 = vmatprep.subr.bf16.mxu1 %v6307_v33 }
  0xd2   : > { %5993 = vmatpush3.bf16.msra.mxu1 %v6307_v33  ;;  %v1856_v33 = vld [vmem:[#allocation2 + $0x92] sm:$0xff] }
  0xd3   : > { %5994 = vmatprep.subr.bf16.mxu1 %v6312_v45 }
  0xd4   : > { %1084 = vmatmul.mubr.bf16.gmra.mxu0 %v7020_v47 }
  0xd5   : > { %1486 = vmatmul.mubr.bf16.gmra.mxu1 %v6872_v20  ;;  %1091 = vmatprep.mubr.bf16.mxu0 %v6918_v61  ;;  %v7032_v20 = vpack.c.bf16 %v654_v12, %v653_v7  ;;  %v1884_v7 = vpack.c.bf16 %v1857_v39, %v1856_v33  ;;  %v1761_v33 = vld [vmem:[#allocation2 + $0x98] sm:$0xff] }
  0xd6   : > { %1493 = vmatprep.mubr.bf16.mxu1 %v6880_v23  ;;  %5995 = vmatpush3.bf16.msra.mxu1 %v6312_v45  ;;  %v655_v23 = vld [vmem:[#allocation2 + $0x168] sm:$0xff] }
  0xd7   : > { %5996 = vmatprep.subr.bf16.mxu1 %v6317_v36  ;;  %v7038_v49 = vpack.c.bf16 %v656_v54, %v655_v23 }
  0xda   : > { %5997 = vmatpush3.bf16.msra.mxu1 %v6317_v36 }
  0xdc   : > { %1092 = vmatmul.mubr.bf16.gmra.mxu0 %v7026_v2 }
  0xdd   : > { %1494 = vmatmul.mubr.bf16.gmra.mxu1 %v6904_v42  ;;  %1099 = vmatprep.mubr.bf16.mxu0 %v6922_v3  ;;  %v658_v42 = vld [vmem:[#allocation2 + $0x188] sm:$0xff] }
  0xde   : > { %1501 = vmatprep.mubr.bf16.mxu1 %v6910_v48  ;;  %v531_v48 = vld [vmem:[#allocation2 + $0x2] sm:$0xff] }
  0xe4   : > { %1100 = vmatmul.mubr.bf16.gmra.mxu0 %v7032_v20 }
  0xe5   : > { %1502 = vmatmul.mubr.bf16.gmra.mxu1 %v6926_v13  ;;  %1107 = vmatprep.mubr.bf16.mxu0 %v6944_v30  ;;  %v674_v13 = vpack.c.bf16 %v658_v42, %v657_v5  ;;  %v1756_v5 = vld [vmem:[#allocation2 + $0x60] sm:$0xff]  ;;  %v1757_v42 = vld [vmem:[#allocation2 + $0x68] sm:$0xff] }
  0xe6   : > { %1509 = vmatprep.mubr.bf16.mxu1 %v6934_v24  ;;  %v563_v24 = vpack.c.bf16 %v532_v6, %v531_v48  ;;  %v1806_v6 = vld [vmem:[#allocation2 + $0x79] sm:$0xff] }
  0xec   : > { %1108 = vmatmul.mubr.bf16.gmra.mxu0 %v7038_v49 }
  0xed   : > { %1510 = vmatmul.mubr.bf16.gmra.mxu1 %v6954_v55  ;;  %1115 = vmatprep.mubr.bf16.mxu0 %v722_v31  ;;  %v6305_v55 = vld [vmem:[#allocation6 + $0x1e8] sm:$0xff]   ;;  %v6310_v31 = vld [vmem:[#allocation6 + $0x1d8] sm:$0xff]  }
  0xee   : > { %1517 = vmatprep.mubr.bf16.mxu1 %v6960_v58  ;;  %v6311_v58 = vld [vmem:[#allocation6 + $0x198] sm:$0xff]  }
  0xf4   : > { %1116 = vmatmul.mubr.bf16.gmra.mxu0 %v674_v13  ;;  %v1858_v13 = vld [vmem:[#allocation2 + $0xaa] sm:$0xff] }
  0xf5   : > { %1518 = vmatmul.mubr.bf16.gmra.mxu1 %v6968_v11  ;;  %5950 = vmatprep.mubr.bf16.mxu0 %v563_v24  ;;  %v6316_v11 = vld [vmem:[#allocation6 + $0x188] sm:$0xff]  }
  0xf6   : > { %1525 = vmatprep.mubr.bf16.mxu1 %v6974_v22  ;;  %v6318_v22 = vld [vmem:[#allocation6 + $0x1c0] sm:$0xff]  }
  0xf7   : > { %v1859_v24 = vld [vmem:[#allocation2 + $0xb2] sm:$0xff] }
  0xfc   : > { %5951 = vmatmul.mubr.bf16.vlgmr.msra.gmra.mxu0 %v6803_v41  ;;  %v6309_v41 = vld [vmem:[#allocation6 + $0x1a0] sm:$0xff]  }
  0xfd   : > { %1526 = vmatmul.mubr.bf16.gmra.mxu1 %v6982_v53  ;;  %5343 = vmatpush3.bf16.msra.mxu0 %v6301_v9  ;;  %v1802_v53 = vld [vmem:[#allocation2 + $0x49] sm:$0xff] }
  0xfe   : > { %1533 = vmatprep.mubr.bf16.mxu1 %v6986_v37  ;;  %5954 = vmatprep.mubr.bf16.mxu0 %v6807_v46  ;;  %v6313_v46 = vld [vmem:[#allocation6 + $0x1d0] sm:$0xff]  }
  0xff   : > { %5344 = vmatprep.subr.bf16.mxu0 %v6303_v4  ;;  %v1852_v37 = vld [vmem:[#allocation2 + $0x62] sm:$0xff] }
 0x101   : > { %5345 = vmatpush3.bf16.msra.mxu0 %v6304_v16  ;;  %v1807_v16 = vld [vmem:[#allocation2 + $0x81] sm:$0xff] }
 0x102   : > { %5346 = vmatprep.subr.bf16.mxu0 %v6305_v55  ;;  %v1860_v55 = vld [vmem:[#allocation2 + $0xc2] sm:$0xff] }
 0x104   : > { %5955 = vmatmul.mubr.bf16.gmra.mxu0 %v6826_v56  ;;  %v6314_v56 = vld [vmem:[#allocation6 + $0x190] sm:$0xff]  }
 0x105   : > { %1534 = vmatmul.mubr.bf16.gmra.mxu1 %v6990_v1  ;;  %5958 = vmatprep.mubr.bf16.mxu0 %v6832_v63  ;;  %v6315_v63 = vld [vmem:[#allocation6 + $0x1c8] sm:$0xff]  }
 0x106   : > { %1541 = vmatprep.mubr.bf16.mxu1 %v6995_v10  ;;  %5347 = vmatpush3.bf16.msra.mxu0 %v6306_v28  ;;  %v1861_v28 = vld [vmem:[#allocation2 + $0xca] sm:$0xff] }
 0x107   : > { %5348 = vmatprep.subr.bf16.mxu0 %v6308_v29 }
 0x10a   : > { %5349 = vmatpush3.bf16.msra.mxu0 %v6309_v41 }
 0x10b   : > { %5350 = vmatprep.subr.bf16.mxu0 %v6310_v31 }
 0x10c   : > { %5959 = vmatmul.mubr.bf16.gmra.mxu0 %v6847_v8  ;;  %v6319_v8 = vld [vmem:[#allocation6 + $0x180] sm:$0xff]  }
 0x10d   : > { %1542 = vmatmul.mubr.bf16.gmra.mxu1 %v7000_v35  ;;  %5962 = vmatprep.mubr.bf16.mxu0 %v6874_v21  ;;  %v1800_v21 = vld [vmem:[#allocation2 + $0x31] sm:$0xff] }
 0x10e   : > { %1549 = vmatprep.mubr.bf16.mxu1 %v7004_v0  ;;  %5351 = vmatpush3.bf16.msra.mxu0 %v6311_v58  ;;  %v1754_v0 = vld [vmem:[#allocation2 + $0x48] sm:$0xff]  ;;  %v1786_v58 = vpack.c.bf16 %v1757_v42, %v1756_v5 }
 0x10f   : > { %5352 = vmatprep.subr.bf16.mxu0 %v6313_v46  ;;  %v1885_v46 = vpack.c.bf16 %v1859_v24, %v1858_v13 }
 0x112   : > { %5353 = vmatpush3.bf16.msra.mxu0 %v6314_v56 }
 0x113   : > { %5354 = vmatprep.subr.bf16.mxu0 %v6315_v63  ;;  %v1835_v63 = vpack.c.bf16 %v1807_v16, %v1806_v6 }
 0x114   : > { %5963 = vmatmul.mubr.bf16.gmra.mxu0 %v6882_v26  ;;  %v1801_v26 = vld [vmem:[#allocation2 + $0x39] sm:$0xff] }
 0x115   : > { %1550 = vmatmul.mubr.bf16.gmra.mxu1 %v7010_v38  ;;  %5966 = vmatprep.mubr.bf16.mxu0 %v6906_v43  ;;  %v1848_v43 = vld [vmem:[#allocation2 + $0x32] sm:$0xff] }
 0x116   : > { %1557 = vmatprep.mubr.bf16.mxu1 %v7014_v32  ;;  %5355 = vmatpush3.bf16.msra.mxu0 %v6316_v11  ;;  %v1805_v32 = vld [vmem:[#allocation2 + $0x69] sm:$0xff]  ;;  %v1886_v11 = vpack.c.bf16 %v1861_v28, %v1860_v55 }
 0x117   : > { %5356 = vmatprep.subr.bf16.mxu0 %v6318_v22  ;;  %v6320_v55 = vld [vmem:[#allocation8 + $0x138] sm:$0xff]  }
 0x118   : > { %v6321_v28 = vld [vmem:[#allocation8 + $0xf8] sm:$0xff]   ;;  %5478 = vmatprep.subr.bf16.mxu1 %v6320_v55 }
 0x11a   : > { %5357 = vmatpush3.bf16.msra.mxu0 %v6319_v8 }
 0x11c   : > { %5967 = vmatmul.mubr.bf16.gmra.mxu0 %v6912_v50  ;;  %v1849_v50 = vld [vmem:[#allocation2 + $0x3a] sm:$0xff] }
 0x11d   : > { %1558 = vmatmul.mubr.bf16.gmra.mxu1 %v7020_v47  ;;  %5970 = vmatprep.mubr.bf16.mxu0 %v6928_v14  ;;  %v1880_v14 = vpack.c.bf16 %v1849_v50, %v1848_v43  ;;  %v1758_v50 = vld [vmem:[#allocation2 + $0x78] sm:$0xff] }
 0x11e   : > { %1565 = vmatprep.mubr.bf16.mxu1 %v6918_v61  ;;  %v1832_v61 = vpack.c.bf16 %v1801_v26, %v1800_v21 }
 0x124   : > { %5971 = vmatmul.mubr.bf16.gmra.mxu0 %v6936_v25  ;;  %v1753_v25 = vld [vmem:[#allocation2 + $0x38] sm:$0xff] }
 0x125   : > { %1566 = vmatmul.mubr.bf16.gmra.mxu1 %v7026_v2  ;;  %5974 = vmatprep.mubr.bf16.mxu0 %v6956_v57  ;;  %v1850_v57 = vld [vmem:[#allocation2 + $0x4a] sm:$0xff]  ;;  %v1834_v2 = vpack.c.bf16 %v1805_v32, %v1804_v19 }
 0x126   : > { %1573 = vmatprep.mubr.bf16.mxu1 %v6922_v3  ;;  %v1752_v3 = vld [vmem:[#allocation2 + $0x30] sm:$0xff] }
 0x127   : > { %v1784_v1 = vpack.c.bf16 %v1753_v25, %v1752_v3  ;;  %v1808_v3 = vld [vmem:[#allocation2 + $0x91] sm:$0xff]  ;;  %v1862_v25 = vld [vmem:[#allocation2 + $0xda] sm:$0xff] }
 0x128   : > { %v1760_v32 = vld [vmem:[#allocation2 + $0x90] sm:$0xff] }
 0x129   : > { %v1788_v5 = vpack.c.bf16 %v1761_v33, %v1760_v32  ;;  %v1765_v32 = vld [vmem:[#allocation2 + $0xc8] sm:$0xff] }
 0x12c   : > { %5975 = vmatmul.mubr.bf16.gmra.mxu0 %v6962_v59  ;;  %v1851_v59 = vld [vmem:[#allocation2 + $0x52] sm:$0xff] }
 0x12d   : > { %1574 = vmatmul.mubr.bf16.gmra.mxu1 %v7032_v20  ;;  %5978 = vmatprep.mubr.bf16.mxu0 %v6970_v15  ;;  %v1853_v15 = vld [vmem:[#allocation2 + $0x6a] sm:$0xff]  ;;  %v1881_v10 = vpack.c.bf16 %v1851_v59, %v1850_v57  ;;  %v1863_v57 = vld [vmem:[#allocation2 + $0xe2] sm:$0xff] }
 0x12e   : > { %1581 = vmatprep.mubr.bf16.mxu1 %v6944_v30  ;;  %v1803_v30 = vld [vmem:[#allocation2 + $0x51] sm:$0xff]  ;;  %v1882_v52 = vpack.c.bf16 %v1853_v15, %v1852_v37  ;;  %v1865_v15 = vld [vmem:[#allocation2 + $0xfa] sm:$0xff] }
 0x12f   : > { %v1833_v17 = vpack.c.bf16 %v1803_v30, %v1802_v53  ;;  %v1809_v30 = vld [vmem:[#allocation2 + $0x99] sm:$0xff] }
 0x130   : > { %v1864_v37 = vld [vmem:[#allocation2 + $0xf2] sm:$0xff] }
 0x134   : > { %5979 = vmatmul.mubr.bf16.gmra.mxu0 %v6976_v51  ;;  %v1755_v51 = vld [vmem:[#allocation2 + $0x50] sm:$0xff] }
 0x135   : > { %1582 = vmatmul.mubr.bf16.gmra.mxu1 %v7038_v49  ;;  %2120 = vmatprep.mubr.bf16.mxu0 %v1832_v61  ;;  %v1785_v36 = vpack.c.bf16 %v1755_v51, %v1754_v0  ;;  %v1759_v61 = vld [vmem:[#allocation2 + $0x80] sm:$0xff]  ;;  %v1836_v0 = vpack.c.bf16 %v1809_v30, %v1808_v3  ;;  %v1888_v51 = vpack.c.bf16 %v1865_v15, %v1864_v37 }
 0x136   : > { %5998 = vmatprep.mubr.bf16.mxu1 %v1880_v14  ;;  %v1873_v3 = vld [vmem:[#allocation2 + $0x15a] sm:$0xff] }
 0x13c   : > { %v5086_v34 = vpop.f32.mrf.mxu0  ;;  %2121 = vmatmul.mubr.bf16.vlgmr.msra.gmra.mxu0 %v1784_v1 }
 0x13d   : > { %v5904_v35 = vpop.f32.mrf.mxu1  ;;  %5999 = vmatmul.mubr.bf16.vlgmr.msra.gmra.mxu1 %v1881_v10  ;;  %2128 = vmatprep.mubr.bf16.mxu0 %v1833_v17 }
 0x13e   : > { %6002 = vmatprep.mubr.bf16.mxu1 %v1882_v52  ;;  %v5087_v60 = vpop.f32.mrf.mxu0  ;;  %v1787_v52 = vpack.c.bf16 %v1759_v61, %v1758_v50  ;;  %v1813_v50 = vld [vmem:[#allocation2 + $0xc9] sm:$0xff]  ;;  %v1872_v61 = vld [vmem:[#allocation2 + $0x152] sm:$0xff]  ;;  %5479 = vmatpush3.bf16.msra.mxu1 %v6321_v28 }
 0x13f   : > { %v1158_v38 = vpop.f32.mrf.mxu1  ;;  %v5088_v44 = vadd.f32 %v5087_v60, %v5086_v34  ;;  %v1887_v34 = vpack.c.bf16 %v1863_v57, %v1862_v25 }
 0x140   : > { %v5089_v45 = vpop.f32.mrf.mxu0 }
 0x141   : > { %v5905_v47 = vpop.f32.mrf.mxu1  ;;  %v7078_v40 = vadd.f32 %v5088_v44, %v1158_v38  ;;  %v1810_v44 = vld [vmem:[#allocation2 + $0xa9] sm:$0xff] }
 0x142   : > { %v5090_v12 = vpop.f32.mrf.mxu0 }
 0x143   : > { %v1161_v20 = vpop.f32.mrf.mxu1  ;;  %v5091_v23 = vadd.f32 %v5090_v12, %v5089_v45  ;;  %v1866_v45 = vld [vmem:[#allocation2 + $0x10a] sm:$0xff] }
 0x144   : > { %v5092_v54 = vpop.f32.mrf.mxu0  ;;  %2129 = vmatmul.mubr.bf16.gmra.mxu0 %v1785_v36  ;;  %v1869_v12 = vld [vmem:[#allocation2 + $0x12a] sm:$0xff] }
 0x145   : > { %v7080_v49 = vpop.f32.mrf.mxu1  ;;  %6003 = vmatmul.mubr.bf16.gmra.mxu1 %v1883_v62  ;;  %v7082_v48 = vadd.f32 %v5091_v23, %v1161_v20  ;;  %2136 = vmatprep.mubr.bf16.mxu0 %v1834_v2  ;;  %v1811_v2 = vld [vmem:[#allocation2 + $0xb1] sm:$0xff] }
 0x146   : > { %6006 = vmatprep.mubr.bf16.mxu1 %v1884_v7  ;;  %v5093_v9 = vpop.f32.mrf.mxu0  ;;  %v1868_v7 = vld [vmem:[#allocation2 + $0x122] sm:$0xff]  ;;  %v1837_v13 = vpack.c.bf16 %v1811_v2, %v1810_v44  ;;  %v1874_v44 = vld [vmem:[#allocation2 + $0x16a] sm:$0xff] }
 0x147   : > { %v1174_v4 = vpop.f32.mrf.mxu1  ;;  %v5094_v29 = vadd.f32 %v5093_v9, %v5092_v54  ;;  %v1890_v24 = vpack.c.bf16 %v1869_v12, %v1868_v7  ;;  %v1815_v2 = vld [vmem:[#allocation2 + $0xe1] sm:$0xff]  ;;  %v1877_v12 = vld [vmem:[#allocation2 + $0x18a] sm:$0xff] }
 0x148   : > { %v5095_v41 = vpop.f32.mrf.mxu0  ;;  %v1876_v7 = vld [vmem:[#allocation2 + $0x182] sm:$0xff] }
 0x149   : > { %v7084_v31 = vpop.f32.mrf.mxu1  ;;  %v7086_v56 = vadd.f32 %v5904_v35, %v5094_v29 }
 0x14a   : > { %v5096_v22 = vpop.f32.mrf.mxu0 }
 0x14b   : > { %v1177_v8 = vpop.f32.mrf.mxu1  ;;  %v5097_v21 = vadd.f32 %v5096_v22, %v5095_v41  ;;  %v1871_v22 = vld [vmem:[#allocation2 + $0x142] sm:$0xff] }
 0x14c   : > { %v5098_v26 = vpop.f32.mrf.mxu0  ;;  %2137 = vmatmul.mubr.bf16.gmra.mxu0 %v1786_v58  ;;  %v1762_v58 = vld [vmem:[#allocation2 + $0xa8] sm:$0xff] }
 0x14d   : > { %v7088_v43 = vpop.f32.mrf.mxu1  ;;  %6007 = vmatmul.mubr.bf16.gmra.mxu1 %v1885_v46  ;;  %v7090_v14 = vadd.f32 %v5905_v47, %v5097_v21  ;;  %2144 = vmatprep.mubr.bf16.mxu0 %v1835_v63  ;;  %v1867_v47 = vld [vmem:[#allocation2 + $0x112] sm:$0xff]  ;;  %v1812_v63 = vld [vmem:[#allocation2 + $0xc1] sm:$0xff] }
 0x14e   : > { %6010 = vmatprep.mubr.bf16.mxu1 %v1886_v11  ;;  %v5099_v59 = vpop.f32.mrf.mxu0  ;;  %v1889_v42 = vpack.c.bf16 %v1867_v47, %v1866_v45  ;;  %v1763_v46 = vld [vmem:[#allocation2 + $0xb0] sm:$0xff]  ;;  %v1838_v15 = vpack.c.bf16 %v1813_v50, %v1812_v63  ;;  %v6327_v50 = vld [vmem:[#allocation8 + $0x170] sm:$0xff]  }
 0x14f   : > { %v7092_v53 = vpop.f32.mrf.mxu1  ;;  %v5100_v1 = vadd.f32 %v5099_v59, %v5098_v26  ;;  %v1875_v45 = vld [vmem:[#allocation2 + $0x172] sm:$0xff] }
 0x150   : > { %v5101_v10 = vpop.f32.mrf.mxu0 }
 0x151   : > { %v7094_v17 = vpop.f32.mrf.mxu1  ;;  %v7096_v35 = vadd.f32 %v5100_v1, %v1174_v4  ;;  %v1892_v1 = vpack.c.bf16 %v1873_v3, %v1872_v61 }
 0x152   : > { %v5102_v18 = vpop.f32.mrf.mxu0 }
 0x153   : > { %v7098_v27 = vpop.f32.mrf.mxu1  ;;  %v5103_v19 = vadd.f32 %v5102_v18, %v5101_v10 }
 0x154   : > { %v5104_v60 = vpop.f32.mrf.mxu0  ;;  %2145 = vmatmul.mubr.bf16.gmra.mxu0 %v1787_v52 }
 0x155   : > { %v7100_v38 = vpop.f32.mrf.mxu1  ;;  %6011 = vmatmul.mubr.bf16.gmra.mxu1 %v1887_v34  ;;  %v7102_v39 = vadd.f32 %v5103_v19, %v1177_v8  ;;  %2152 = vmatprep.mubr.bf16.mxu0 %v1836_v0  ;;  %v6322_v8 = vld [vmem:[#allocation8 + $0x178] sm:$0xff]   ;;  %v6323_v0 = vld [vmem:[#allocation8 + $0x130] sm:$0xff]  }
 0x156   : > { %6014 = vmatprep.mubr.bf16.mxu1 %v1888_v51  ;;  %v5105_v36 = vpop.f32.mrf.mxu0  ;;  %6030 = vmatprep.subr.bf16.mxu0 %v6322_v8  ;;  %v6324_v51 = vld [vmem:[#allocation8 + $0xf0] sm:$0xff]  }
 0x157   : > { %v7104_v62 = vpop.f32.mrf.mxu1  ;;  %v5106_v20 = vadd.f32 %v5105_v36, %v5104_v60  ;;  %6031 = vmatpush3.bf16.msra.mxu0 %v6322_v8  ;;  %v1764_v60 = vld [vmem:[#allocation2 + $0xc0] sm:$0xff]  ;;  %5480 = vmatprep.subr.bf16.mxu1 %v6323_v0 }
 0x158   : > { %v5107_v23 = vpop.f32.mrf.mxu0  ;;  %5481 = vmatpush3.bf16.msra.mxu1 %v6324_v51  ;;  %6032 = vmatprep.subr.bf16.mxu0 %v6327_v50 }
 0x159   : > { %v7106_v54 = vpop.f32.mrf.mxu1  ;;  %v7109_v6 = vadd.f32 %v7080_v49, %v5106_v20  ;;  %v1870_v49 = vld [vmem:[#allocation2 + $0x13a] sm:$0xff] }
 0x15a   : > { %v5108_v9 = vpop.f32.mrf.mxu0  ;;  %v1891_v30 = vpack.c.bf16 %v1871_v22, %v1870_v49  ;;  %v1766_v49 = vld [vmem:[#allocation2 + $0xd8] sm:$0xff]  ;;  %v1767_v22 = vld [vmem:[#allocation2 + $0xe0] sm:$0xff] }
 0x15b   : > { %v7111_v4 = vpop.f32.mrf.mxu1  ;;  %v5109_v16 = vadd.f32 %v5108_v9, %v5107_v23  ;;  %v1894_v9 = vpack.c.bf16 %v1877_v12, %v1876_v7  ;;  %6033 = vmatpush3.bf16.msra.mxu0 %v6327_v50  ;;  %v1818_v12 = vld [vmem:[#allocation2 + $0x109] sm:$0xff] }
 0x15c   : > { %v5110_v29 = vpop.f32.mrf.mxu0  ;;  %2153 = vmatmul.mubr.bf16.gmra.mxu0 %v1788_v5 }
 0x15d   : > { %v7113_v41 = vpop.f32.mrf.mxu1  ;;  %6015 = vmatmul.mubr.bf16.gmra.mxu1 %v1889_v42  ;;  %v7116_v11 = vadd.f32 %v7084_v31, %v5109_v16  ;;  %2160 = vmatprep.mubr.bf16.mxu0 %v1837_v13  ;;  %v1789_v31 = vpack.c.bf16 %v1763_v46, %v1762_v58  ;;  %v1790_v42 = vpack.c.bf16 %v1765_v32, %v1764_v60  ;;  %v6326_v58 = vld [vmem:[#allocation8 + $0xe8] sm:$0xff]   ;;  %v6328_v60 = vld [vmem:[#allocation8 + $0x120] sm:$0xff]  }
 0x15e   : > { %6018 = vmatprep.mubr.bf16.mxu1 %v1890_v24  ;;  %v5111_v21 = vpop.f32.mrf.mxu0  ;;  %v6329_v32 = vld [vmem:[#allocation8 + $0xe0] sm:$0xff]  }
 0x15f   : > { %v7118_v26 = vpop.f32.mrf.mxu1  ;;  %v5112_v25 = vadd.f32 %v5111_v21, %v5110_v29  ;;  %v6325_v29 = vld [vmem:[#allocation8 + $0x128] sm:$0xff]   ;;  %v1879_v21 = vld [vmem:[#allocation2 + $0x1a2] sm:$0xff] }
 0x160   : > { %v5113_v57 = vpop.f32.mrf.mxu0  ;;  %5482 = vmatprep.subr.bf16.mxu1 %v6325_v29 }
 0x161   : > { %v7120_v59 = vpop.f32.mrf.mxu1  ;;  %v7123_v37 = vadd.f32 %v5112_v25, %v7092_v53  ;;  %v1814_v53 = vld [vmem:[#allocation2 + $0xd9] sm:$0xff]  ;;  %v1816_v25 = vld [vmem:[#allocation2 + $0xf1] sm:$0xff]  ;;  %5483 = vmatpush3.bf16.msra.mxu1 %v6326_v58 }
 0x162   : > { %v5114_v10 = vpop.f32.mrf.mxu0  ;;  %v1839_v24 = vpack.c.bf16 %v1815_v2, %v1814_v53  ;;  %v1769_v2 = vld [vmem:[#allocation2 + $0xf8] sm:$0xff]  ;;  %5484 = vmatprep.subr.bf16.mxu1 %v6328_v60 }
 0x163   : > { %v7125_v52 = vpop.f32.mrf.mxu1  ;;  %v5115_v34 = vadd.f32 %v5114_v10, %v5113_v57  ;;  %v1817_v57 = vld [vmem:[#allocation2 + $0xf9] sm:$0xff] }
 0x164   : > { %v5116_v18 = vpop.f32.mrf.mxu0  ;;  %2161 = vmatmul.mubr.bf16.gmra.mxu0 %v1789_v31 }
 0x165   : > { %v7127_v19 = vpop.f32.mrf.mxu1  ;;  %6019 = vmatmul.mubr.bf16.gmra.mxu1 %v1891_v30  ;;  %v7130_v33 = vadd.f32 %v5115_v34, %v7098_v27  ;;  %2168 = vmatprep.mubr.bf16.mxu0 %v1838_v15  ;;  %v1893_v27 = vpack.c.bf16 %v1875_v45, %v1874_v44  ;;  %v1840_v34 = vpack.c.bf16 %v1817_v57, %v1816_v25  ;;  %v1821_v25 = vld [vmem:[#allocation2 + $0x129] sm:$0xff] }
 0x166   : > { %6022 = vmatprep.mubr.bf16.mxu1 %v1892_v1  ;;  %v5117_v47 = vpop.f32.mrf.mxu0  ;;  %v1791_v1 = vpack.c.bf16 %v1767_v22, %v1766_v49  ;;  %5485 = vmatpush3.bf16.msra.mxu1 %v6329_v32  ;;  %v1770_v22 = vld [vmem:[#allocation2 + $0x108] sm:$0xff] }
 0x167   : > { %v7132_v36 = vpop.f32.mrf.mxu1  ;;  %v5118_v20 = vadd.f32 %v5117_v47, %v5116_v18  ;;  %v1768_v47 = vld [vmem:[#allocation2 + $0xf0] sm:$0xff] }
 0x168   : > { %v5119_v23 = vpop.f32.mrf.mxu0 }
 0x169   : > { %v7134_v5 = vpop.f32.mrf.mxu1  ;;  %v7137_v13 = vadd.f32 %v7088_v43, %v5118_v20  ;;  %v1878_v43 = vld [vmem:[#allocation2 + $0x19a] sm:$0xff]  ;;  %v1819_v20 = vld [vmem:[#allocation2 + $0x111] sm:$0xff] }
 0x16a   : > { %v5120_v16 = vpop.f32.mrf.mxu0 }
 0x16b   : > { %v7139_v55 = vpop.f32.mrf.mxu1  ;;  %v5121_v28 = vadd.f32 %v5120_v16, %v5119_v23 }
 0x16c   : > { %v5122_v46 = vpop.f32.mrf.mxu0  ;;  %2169 = vmatmul.mubr.bf16.gmra.mxu0 %v1790_v42 }
 0x16d   : > { %v7141_v63 = vpop.f32.mrf.mxu1  ;;  %6023 = vmatmul.mubr.bf16.gmra.mxu1 %v1893_v27  ;;  %v7144_v8 = vadd.f32 %v7094_v17, %v5121_v28  ;;  %2176 = vmatprep.mubr.bf16.mxu0 %v1839_v24  ;;  %v1895_v17 = vpack.c.bf16 %v1879_v21, %v1878_v43  ;;  %v1792_v24 = vpack.c.bf16 %v1769_v2, %v1768_v47  ;;  %v1771_v43 = vld [vmem:[#allocation2 + $0x110] sm:$0xff] }
 0x16e   : > { %6026 = vmatprep.mubr.bf16.mxu1 %v1894_v9  ;;  %v5123_v61 = vpop.f32.mrf.mxu0 }
 0x16f   : > { %v7146_v3 = vpop.f32.mrf.mxu1  ;;  %v5124_v31 = vadd.f32 %v5123_v61, %v5122_v46  ;;  %v1820_v61 = vld [vmem:[#allocation2 + $0x121] sm:$0xff] }
 0x170   : > { %v5125_v30 = vpop.f32.mrf.mxu0 }
 0x171   : > { %v7148_v15 = vpop.f32.mrf.mxu1  ;;  %v7151_v10 = vadd.f32 %v5124_v31, %v7104_v62  ;;  %v6330_v31 = vld [vmem:[#allocation8 + $0x118] sm:$0xff]  }
 0x172   : > { %v5126_v0 = vpop.f32.mrf.mxu0  ;;  %5486 = vmatprep.subr.bf16.mxu1 %v6330_v31  ;;  %v6337_v31 = vld [vmem:[#allocation8 + $0x160] sm:$0xff]  }
 0x173   : > { %v7153_v51 = vpop.f32.mrf.mxu1  ;;  %v5127_v18 = vadd.f32 %v5126_v0, %v5125_v30  ;;  %v6331_v30 = vld [vmem:[#allocation8 + $0xd8] sm:$0xff]   ;;  %v1793_v0 = vpack.c.bf16 %v1771_v43, %v1770_v22 }
 0x174   : > { %v5128_v53 = vpop.f32.mrf.mxu0  ;;  %2177 = vmatmul.mubr.bf16.gmra.mxu0 %v1791_v1  ;;  %v6332_v1 = vld [vmem:[#allocation8 + $0x168] sm:$0xff]   ;;  %5487 = vmatpush3.bf16.msra.mxu1 %v6331_v30 }
 0x175   : > { %v7155_v44 = vpop.f32.mrf.mxu1  ;;  %6027 = vmatmul.mubr.bf16.gmra.mxu1 %v1895_v17  ;;  %v7158_v45 = vadd.f32 %v5127_v18, %v7111_v4  ;;  %2184 = vmatprep.mubr.bf16.mxu0 %v1840_v34  ;;  %v1841_v4 = vpack.c.bf16 %v1819_v20, %v1818_v12  ;;  %v1772_v20 = vld [vmem:[#allocation2 + $0x120] sm:$0xff] }
 0x176   : > { %v5129_v62 = vpop.f32.mrf.mxu0  ;;  %6034 = vmatprep.subr.bf16.mxu0 %v6332_v1 }
 0x177   : > { %v7160_v7 = vpop.f32.mrf.mxu1  ;;  %v5130_v23 = vadd.f32 %v5129_v62, %v5128_v53  ;;  %6035 = vmatpush3.bf16.msra.mxu0 %v6332_v1 }
 0x178   : > { %v5131_v42 = vpop.f32.mrf.mxu0  ;;  %6036 = vmatprep.subr.bf16.mxu0 %v6337_v31 }
 0x179   : > { %v7162_v27 = vpop.f32.mrf.mxu1  ;;  %v7165_v9 = vadd.f32 %v7100_v38, %v5130_v23 }
 0x17a   : > { %v5132_v16 = vpop.f32.mrf.mxu0 }
 0x17b   : > { %v7167_v28 = vpop.f32.mrf.mxu1  ;;  %v5133_v29 = vadd.f32 %v5132_v16, %v5131_v42  ;;  %6037 = vmatpush3.bf16.msra.mxu0 %v6337_v31 }
 0x17c   : > { %v5134_v58 = vpop.f32.mrf.mxu0  ;;  %2185 = vmatmul.mubr.bf16.gmra.mxu0 %v1792_v24  ;;  %v1822_v24 = vld [vmem:[#allocation2 + $0x139] sm:$0xff] }
 0x17d   : > { %v5222_v46 = vpop.f32.mrf.mxu1  ;;  %v7170_v49 = vadd.f32 %v7106_v54, %v5133_v29  ;;  %2192 = vmatprep.mubr.bf16.mxu0 %v1841_v4  ;;  %v1842_v54 = vpack.c.bf16 %v1821_v25, %v1820_v61  ;;  %v1823_v4 = vld [vmem:[#allocation2 + $0x141] sm:$0xff] }
 0x17e   : > { %v5135_v21 = vpop.f32.mrf.mxu0 }
 0x17f   : > { %v5223_v50 = vpop.f32.mrf.mxu1  ;;  %v5136_v38 = vadd.f32 %v5135_v21, %v5134_v58  ;;  %v1843_v21 = vpack.c.bf16 %v1823_v4, %v1822_v24  ;;  %v6336_v24 = vld [vmem:[#allocation8 + $0xc8] sm:$0xff]  }
 0x180   : > { %v5224_v57 = vadd.f32 %v5223_v50, %v5222_v46  ;;  %v5137_v17 = vpop.f32.mrf.mxu0 }
 0x181   : > { %v5225_v34 = vpop.f32.mrf.mxu1  ;;  %v7173_v18 = vadd.f32 %v5136_v38, %v7118_v26  ;;  %v1773_v26 = vld [vmem:[#allocation2 + $0x128] sm:$0xff] }
 0x182   : > { %v7176_v60 = vadd.f32 %v5224_v57, %v7078_v40  ;;  %v5138_v32 = vpop.f32.mrf.mxu0  ;;  %v1794_v22 = vpack.c.bf16 %v1773_v26, %v1772_v20  ;;  %v6333_v57 = vld [vmem:[#allocation8 + $0x110] sm:$0xff]   ;;  %v6335_v20 = vld [vmem:[#allocation8 + $0x108] sm:$0xff]   ;;  %v6338_v26 = vld [vmem:[#allocation8 + $0x158] sm:$0xff]  }
 0x183   : > { %v5226_v53 = vpop.f32.mrf.mxu1  ;;  %v7178_v47 = vadd.f32 %v5138_v32, %v5137_v17  ;;  %v6334_v17 = vld [vmem:[#allocation8 + $0xd0] sm:$0xff]   ;;  %5488 = vmatprep.subr.bf16.mxu1 %v6333_v57  ;;  %6038 = vmatprep.subr.bf16.mxu0 %v6338_v26  ;;  %v1777_v57 = vld [vmem:[#allocation2 + $0x158] sm:$0xff] }
 0x184   : > { %v5227_v2 = vadd.f32 %v5226_v53, %v5225_v34  ;;  %v5140_v62 = vpop.f32.mrf.mxu0  ;;  %2193 = vmatmul.mubr.bf16.gmra.mxu0 %v1793_v0  ;;  %v1775_v0 = vld [vmem:[#allocation2 + $0x140] sm:$0xff]  ;;  %v1824_v53 = vld [vmem:[#allocation2 + $0x151] sm:$0xff]  ;;  %5489 = vmatpush3.bf16.msra.mxu1 %v6334_v17 }
 0x185   : > { %v5228_v12 = vpop.f32.mrf.mxu1  ;;  %2200 = vmatprep.mubr.bf16.mxu0 %v1842_v54  ;;  %5490 = vmatprep.subr.bf16.mxu1 %v6335_v20  ;;  %v1827_v17 = vld [vmem:[#allocation2 + $0x171] sm:$0xff] }
 0x186   : > { %v7181_v23 = vadd.f32 %v5227_v2, %v7082_v48  ;;  %v5141_v40 = vpop.f32.mrf.mxu0  ;;  %v1825_v2 = vld [vmem:[#allocation2 + $0x159] sm:$0xff]  ;;  %6039 = vmatpush3.bf16.msra.mxu0 %v6338_v26 }
 0x187   : > { %v5229_v42 = vpop.f32.mrf.mxu1  ;;  %v5142_v16 = vadd.f32 %v5141_v40, %v5140_v62 }
 0x188   : > { %v5230_v29 = vadd.f32 %v5229_v42, %v5228_v12  ;;  %v5143_v58 = vpop.f32.mrf.mxu0  ;;  %5491 = vmatpush3.bf16.msra.mxu1 %v6336_v24 }
 0x189   : > { %v5231_v46 = vpop.f32.mrf.mxu1  ;;  %v7184_v43 = vadd.f32 %v7113_v41, %v5142_v16  ;;  %v1774_v41 = vld [vmem:[#allocation2 + $0x138] sm:$0xff] }
 0x18a   : > { %v7187_v50 = vadd.f32 %v5230_v29, %v7086_v56  ;;  %v5144_v61 = vpop.f32.mrf.mxu0  ;;  %v1795_v42 = vpack.c.bf16 %v1775_v0, %v1774_v41 }
 0x18b   : > { %v5232_v25 = vpop.f32.mrf.mxu1  ;;  %v5145_v48 = vadd.f32 %v5144_v61, %v5143_v58  ;;  %v6341_v61 = vld [vmem:[#allocation8 + $0x150] sm:$0xff]  }
 0x18c   : > { %v5233_v38 = vadd.f32 %v5232_v25, %v5231_v46  ;;  %v5146_v30 = vpop.f32.mrf.mxu0  ;;  %2201 = vmatmul.mubr.bf16.gmra.mxu0 %v1794_v22  ;;  %6040 = vmatprep.subr.bf16.mxu0 %v6341_v61 }
 0x18d   : > { %v5234_v1 = vpop.f32.mrf.mxu1  ;;  %v7190_v34 = vadd.f32 %v7120_v59, %v5145_v48  ;;  %2208 = vmatprep.mubr.bf16.mxu0 %v1843_v21  ;;  %v6339_v21 = vld [vmem:[#allocation8 + $0x100] sm:$0xff]   ;;  %6041 = vmatpush3.bf16.msra.mxu0 %v6341_v61  ;;  %v1828_v61 = vld [vmem:[#allocation2 + $0x181] sm:$0xff] }
 0x18e   : > { %v7193_v54 = vadd.f32 %v5233_v38, %v7090_v14  ;;  %v5147_v56 = vpop.f32.mrf.mxu0  ;;  %v1844_v14 = vpack.c.bf16 %v1825_v2, %v1824_v53  ;;  %v1776_v38 = vld [vmem:[#allocation2 + $0x150] sm:$0xff]  ;;  %5492 = vmatprep.subr.bf16.mxu1 %v6339_v21 }
 0x18f   : > { %v5235_v32 = vpop.f32.mrf.mxu1  ;;  %v5148_v62 = vadd.f32 %v5147_v56, %v5146_v30  ;;  %v6342_v56 = vld [vmem:[#allocation8 + $0x148] sm:$0xff]   ;;  %v1796_v2 = vpack.c.bf16 %v1777_v57, %v1776_v38 }
 0x190   : > { %v5236_v12 = vadd.f32 %v5235_v32, %v5234_v1  ;;  %v5149_v59 = vpop.f32.mrf.mxu0  ;;  %v1826_v1 = vld [vmem:[#allocation2 + $0x169] sm:$0xff]  ;;  %6042 = vmatprep.subr.bf16.mxu0 %v6342_v56 }
 0x191   : > { %v5237_v40 = vpop.f32.mrf.mxu1  ;;  %v7196_v4 = vadd.f32 %v5148_v62, %v7132_v36  ;;  %v6340_v36 = vld [vmem:[#allocation8 + $0xc0] sm:$0xff]   ;;  %6043 = vmatpush3.bf16.msra.mxu0 %v6342_v56 }
 0x192   : > { %v7199_v16 = vadd.f32 %v5236_v12, %v7096_v35  ;;  %v5150_v29 = vpop.f32.mrf.mxu0  ;;  %5493 = vmatpush3.bf16.msra.mxu1 %v6340_v36  ;;  %v1845_v12 = vpack.c.bf16 %v1827_v17, %v1826_v1 }
 0x193   : > { %v5238_v58 = vpop.f32.mrf.mxu1  ;;  %v7201_v46 = vadd.f32 %v5150_v29, %v5149_v59 }
 0x194   : > { %v5239_v22 = vadd.f32 %v5238_v58, %v5237_v40  ;;  %v5152_v25 = vpop.f32.mrf.mxu0  ;;  %2209 = vmatmul.mubr.bf16.gmra.mxu0 %v1795_v42  ;;  %v1779_v58 = vld [vmem:[#allocation2 + $0x170] sm:$0xff] }
 0x195   : > { %v5240_v48 = vpop.f32.mrf.mxu1  ;;  %2216 = vmatprep.mubr.bf16.mxu0 %v1844_v14  ;;  %v6344_v14 = vld [vmem:[#allocation8 + $0x140] sm:$0xff]  }
 0x196   : > { %v7204_v35 = vadd.f32 %v5239_v22, %v7102_v39  ;;  %v5153_v31 = vpop.f32.mrf.mxu0  ;;  %6044 = vmatprep.subr.bf16.mxu0 %v6344_v14 }
 0x197   : > { %v5241_v30 = vpop.f32.mrf.mxu1  ;;  %v5154_v41 = vadd.f32 %v5153_v31, %v5152_v25  ;;  %v1829_v25 = vld [vmem:[#allocation2 + $0x189] sm:$0xff]  ;;  %6045 = vmatpush3.bf16.msra.mxu0 %v6344_v14 }
 0x198   : > { %v5242_v0 = vadd.f32 %v5241_v30, %v5240_v48  ;;  %v5155_v32 = vpop.f32.mrf.mxu0  ;;  %v1846_v30 = vpack.c.bf16 %v1829_v25, %v1828_v61 }
 0x199   : > { %v5243_v53 = vpop.f32.mrf.mxu1  ;;  %v7207_v62 = vadd.f32 %v7127_v19, %v5154_v41  ;;  %v1778_v19 = vld [vmem:[#allocation2 + $0x168] sm:$0xff] }
 0x19a   : > { %v7210_v39 = vadd.f32 %v5242_v0, %v7109_v6  ;;  %v5156_v20 = vpop.f32.mrf.mxu0  ;;  %v1797_v31 = vpack.c.bf16 %v1779_v58, %v1778_v19 }
 0x19b   : > { %v5244_v26 = vpop.f32.mrf.mxu1  ;;  %v5157_v59 = vadd.f32 %v5156_v20, %v5155_v32  ;;  %v1780_v32 = vld [vmem:[#allocation2 + $0x180] sm:$0xff] }
 0x19c   : > { %v5245_v40 = vadd.f32 %v5244_v26, %v5243_v53  ;;  %v5158_v42 = vpop.f32.mrf.mxu0  ;;  %2217 = vmatmul.mubr.bf16.gmra.mxu0 %v1796_v2  ;;  %v1781_v53 = vld [vmem:[#allocation2 + $0x188] sm:$0xff]  ;;  %v1830_v20 = vld [vmem:[#allocation2 + $0x199] sm:$0xff] }
 0x19d   : > { %v5246_v24 = vpop.f32.mrf.mxu1  ;;  %v7213_v29 = vadd.f32 %v7134_v5, %v5157_v59  ;;  %2224 = vmatprep.mubr.bf16.mxu0 %v1845_v12  ;;  %v1831_v26 = vld [vmem:[#allocation2 + $0x1a1] sm:$0xff]  ;;  %v1798_v14 = vpack.c.bf16 %v1781_v53, %v1780_v32 }
 0x19e   : > { %v7216_v22 = vadd.f32 %v5245_v40, %v7116_v11  ;;  %v5159_v6 = vpop.f32.mrf.mxu0  ;;  %v7231_v40 = vld [vmem:[#allocation8 + $0xb8] sm:$0xff]   ;;  %v1847_v58 = vpack.c.bf16 %v1831_v26, %v1830_v20 }
 0x19f   : > { %v5247_v21 = vpop.f32.mrf.mxu1  ;;  %v5160_v48 = vadd.f32 %v5159_v6, %v5158_v42  ;;  %6078 = vmatprep.subr.bf16.mxu1 %v7231_v40  ;;  %v6392_v32 = vld [vmem:[#allocation2 + $0x8] sm:$0xff] }
 0x1a0   : > { %v5248_v36 = vadd.f32 %v5247_v21, %v5246_v24  ;;  %v7218_v38 = vpop.f32.mrf.mxu0 }
 0x1a1   : > { %v5249_v57 = vpop.f32.mrf.mxu1  ;;  %v7221_v5 = vadd.f32 %v5160_v48, %v7146_v3 }
 0x1a2   : > { %v7224_v1 = vadd.f32 %v5248_v36, %v7123_v37  ;;  %v7226_v11 = vpop.f32.mrf.mxu0 }
 0x1a3   : > { %v5250_v17 = vpop.f32.mrf.mxu1 }
 0x1a4   : > { %v5251_v41 = vadd.f32 %v5250_v17, %v5249_v57  ;;  %v5164_v0 = vpop.f32.mrf.mxu0  ;;  %2225 = vmatmul.mubr.bf16.gmra.mxu0 %v1797_v31  ;;  %v1782_v31 = vld [vmem:[#allocation2 + $0x198] sm:$0xff] }
 0x1a5   : > { %v5252_v56 = vpop.f32.mrf.mxu1  ;;  %2232 = vmatprep.mubr.bf16.mxu0 %v1846_v30  ;;  %v1799_v53 = vpack.c.bf16 %v6392_v32, %v1782_v31 }
 0x1a6   : > { %v7229_v2 = vadd.f32 %v5251_v41, %v7130_v33  ;;  %v5165_v12 = vpop.f32.mrf.mxu0 }
 0x1a7   : > { %v5253_v3 = vpop.f32.mrf.mxu1  ;;  %v5166_v59 = vadd.f32 %v5165_v12, %v5164_v0 }
 0x1a8   : > { %v5254_v37 = vadd.f32 %v5253_v3, %v5252_v56  ;;  %v5167_v42 = vpop.f32.mrf.mxu0 }
 0x1a9   : > { %v5255_v24 = vpop.f32.mrf.mxu1  ;;  %v7234_v19 = vadd.f32 %v7141_v63, %v5166_v59 }
 0x1aa   : > { %v7237_v6 = vadd.f32 %v5254_v37, %v7137_v13  ;;  %v5168_v33 = vpop.f32.mrf.mxu0 }
 0x1ab   : > { %v5256_v21 = vpop.f32.mrf.mxu1  ;;  %v5169_v61 = vadd.f32 %v5168_v33, %v5167_v42 }
 0x1ac   : > { %v5257_v25 = vadd.f32 %v5256_v21, %v5255_v24  ;;  %v5170_v48 = vpop.f32.mrf.mxu0  ;;  %2233 = vmatmul.mubr.bf16.gmra.mxu0 %v1798_v14 }
 0x1ad   : > { %v5258_v36 = vpop.f32.mrf.mxu1  ;;  %v7241_v57 = vadd.f32 %v7148_v15, %v5169_v61  ;;  %2240 = vmatprep.mubr.bf16.mxu0 %v1847_v58 }
 0x1ae   : > { %v7244_v63 = vadd.f32 %v5257_v25, %v7144_v8  ;;  %v5171_v30 = vpop.f32.mrf.mxu0 }
 0x1af   : > { %v5259_v13 = vpop.f32.mrf.mxu1  ;;  %v5172_v17 = vadd.f32 %v5171_v30, %v5170_v48 }
 0x1b0   : > { %v5260_v41 = vadd.f32 %v5259_v13, %v5258_v36  ;;  %v7246_v0 = vpop.f32.mrf.mxu0 }
 0x1b1   : > { %v5261_v56 = vpop.f32.mrf.mxu1  ;;  %v7249_v12 = vadd.f32 %v5172_v17, %v7160_v7 }
 0x1b2   : > { %v7252_v15 = vadd.f32 %v5260_v41, %v7151_v10  ;;  %v7254_v3 = vpop.f32.mrf.mxu0 }
 0x1b3   : > { %v5262_v20 = vpop.f32.mrf.mxu1 }
 0x1b4   : > { %v5263_v8 = vadd.f32 %v5262_v20, %v5261_v56  ;;  %v5176_v26 = vpop.f32.mrf.mxu0  ;;  %2241 = vmatmul.mubr.bf16.gmra.mxu0 %v1799_v53 }
 0x1b5   : > { %v5264_v59 = vpop.f32.mrf.mxu1 }
 0x1b6   : > { %v7257_v37 = vadd.f32 %v5263_v8, %v7158_v45  ;;  %v5177_v42 = vpop.f32.mrf.mxu0 }
 0x1b7   : > { %v5265_v24 = vpop.f32.mrf.mxu1  ;;  %v7259_v14 = vadd.f32 %v5177_v42, %v5176_v26 }
 0x1b8   : > { %v5266_v58 = vadd.f32 %v5265_v24, %v5264_v59  ;;  %v7261_v7 = vpop.f32.mrf.mxu0 }
 0x1b9   : > { %v5267_v33 = vpop.f32.mrf.mxu1 }
 0x1ba   : > { %v1520_v10 = vadd.f32 %v5266_v58, %v7165_v9  ;;  %v7264_v21 = vpop.f32.mrf.mxu0 }
 0x1bb   : > { %v5268_v61 = vpop.f32.mrf.mxu1 }
 0x1bc   : > { %v5269_v25 = vadd.f32 %v5268_v61, %v5267_v33  ;;  %v5952_v36 = vpop.f32.mrf.mxu0 }
 0x1bd   : > { %v5270_v48 = vpop.f32.mrf.mxu1  ;;  %v7267_v31 = vadd.f32 %v5952_v36, %v7187_v50  ;;  %v1226_v50 = vadd.f32 %v7178_v47, %v7125_v52 }
 0x1be   : > { %v1523_v45 = vadd.f32 %v5269_v25, %v7170_v49  ;;  %v1624_v13 = vpop.f32.mrf.mxu0 }
 0x1bf   : > { %v5271_v30 = vpop.f32.mrf.mxu1  ;;  %v7271_v41 = vadd.f32 %v1624_v13, %v7176_v60 }
 0x1c0   : > { %v5272_v17 = vadd.f32 %v5271_v30, %v5270_v48  ;;  %v5953_v32 = vpop.f32.mrf.mxu0 }
 0x1c1   : > { %v5273_v56 = vpop.f32.mrf.mxu1  ;;  %v7274_v9 = vadd.f32 %v5953_v32, %v7193_v54 }
 0x1c2   : > { %v1528_v53 = vadd.f32 %v5272_v17, %v7173_v18  ;;  %v7277_v8 = vpop.f32.mrf.mxu0 }
 0x1c3   : > { %v5274_v20 = vpop.f32.mrf.mxu1 }
 0x1c4   : > { %v5275_v49 = vadd.f32 %v5274_v20, %v5273_v56  ;;  %v5956_v59 = vpop.f32.mrf.mxu0 }
 0x1c5   : > { %v5276_v26 = vpop.f32.mrf.mxu1  ;;  %v7282_v42 = vadd.f32 %v5956_v59, %v7210_v39 }
 0x1c6   : > { %v7284_v60 = vadd.f32 %v5275_v49, %v1226_v50  ;;  %v1640_v58 = vpop.f32.mrf.mxu0 }
 0x1c7   : > { %v5277_v24 = vpop.f32.mrf.mxu1  ;;  %v7287_v33 = vadd.f32 %v1640_v58, %v7199_v16 }
 0x1c8   : > { %v5278_v54 = vadd.f32 %v5277_v24, %v5276_v26  ;;  %v5957_v61 = vpop.f32.mrf.mxu0 }
 0x1c9   : > { %v5279_v18 = vpop.f32.mrf.mxu1  ;;  %v7290_v25 = vadd.f32 %v5957_v61, %v7216_v22 }
 0x1ca   : > { %v1536_v52 = vadd.f32 %v5278_v54, %v7184_v43  ;;  %v7293_v48 = vpop.f32.mrf.mxu0 }
 0x1cb   : > { %v5280_v47 = vpop.f32.mrf.mxu1 }
 0x1cc   : > { %v5281_v39 = vadd.f32 %v5280_v47, %v5279_v18  ;;  %v5960_v30 = vpop.f32.mrf.mxu0 }
 0x1cd   : > { %v5282_v36 = vpop.f32.mrf.mxu1  ;;  %v7296_v13 = vadd.f32 %v5960_v30, %v7237_v6  ;;  %v1242_v6 = vadd.f32 %v7201_v46, %v7139_v55 }
 0x1ce   : > { %v1539_v17 = vadd.f32 %v5281_v39, %v7190_v34  ;;  %v1656_v56 = vpop.f32.mrf.mxu0 }
 0x1cf   : > { %v5283_v16 = vpop.f32.mrf.mxu1  ;;  %v7300_v20 = vadd.f32 %v1656_v56, %v7224_v1 }
 0x1d0   : > { %v5284_v32 = vadd.f32 %v5283_v16, %v5282_v36  ;;  %v5961_v50 = vpop.f32.mrf.mxu0 }
 0x1d1   : > { %v5285_v22 = vpop.f32.mrf.mxu1  ;;  %v7303_v43 = vadd.f32 %v5961_v50, %v7244_v63 }
 0x1d2   : > { %v1544_v49 = vadd.f32 %v5284_v32, %v7196_v4  ;;  %v7306_v59 = vpop.f32.mrf.mxu0 }
 0x1d3   : > { %v5286_v26 = vpop.f32.mrf.mxu1 }
 0x1d4   : > { %v5287_v34 = vadd.f32 %v5286_v26, %v5285_v22  ;;  %v5964_v58 = vpop.f32.mrf.mxu0 }
 0x1d5   : > { %v5288_v24 = vpop.f32.mrf.mxu1  ;;  %v7310_v54 = vadd.f32 %v5964_v58, %v1520_v10 }
 0x1d6   : > { %v7312_v1 = vadd.f32 %v5287_v34, %v1242_v6  ;;  %v1672_v61 = vpop.f32.mrf.mxu0 }
 0x1d7   : > { %v5289_v18 = vpop.f32.mrf.mxu1  ;;  %v7315_v63 = vadd.f32 %v1672_v61, %v7252_v15  ;;  %v5163_v15 = vadd.f32 %v7226_v11, %v7218_v38 }
 0x1d8   : > { %v5290_v47 = vadd.f32 %v5289_v18, %v5288_v24  ;;  %v5965_v39 = vpop.f32.mrf.mxu0 }
 0x1d9   : > { %v5291_v4 = vpop.f32.mrf.mxu1  ;;  %v7317_v36 = vadd.f32 %v5965_v39, %v1523_v45 }
 0x1da   : > { %v1552_v30 = vadd.f32 %v5290_v47, %v7207_v62  ;;  %v7320_v46 = vpop.f32.mrf.mxu0 }
 0x1db   : > { %v5292_v55 = vpop.f32.mrf.mxu1 }
 0x1dc   : > { %v5293_v16 = vadd.f32 %v5292_v55, %v5291_v4  ;;  %v5968_v56 = vpop.f32.mrf.mxu0 }
 0x1dd   : > { %v5294_v10 = vpop.f32.mrf.mxu1  ;;  %v7322_v32 = vadd.f32 %v5968_v56, %v1536_v52  ;;  %v1258_v52 = vadd.f32 %v5163_v15, %v7153_v51 }
 0x1de   : > { %v1555_v22 = vadd.f32 %v5293_v16, %v7213_v29  ;;  %v1688_v26 = vpop.f32.mrf.mxu0 }
 0x1df   : > { %v5295_v50 = vpop.f32.mrf.mxu1  ;;  %v7327_v45 = vadd.f32 %v1688_v26, %v1528_v53 }
 0x1e0   : > { %v5296_v6 = vadd.f32 %v5295_v50, %v5294_v10  ;;  %v5969_v62 = vpop.f32.mrf.mxu0 }
 0x1e1   : > { %v5297_v34 = vpop.f32.mrf.mxu1  ;;  %v7329_v24 = vadd.f32 %v5969_v62, %v1539_v17  ;;  %v6349_v17 = vld [vmem:[#allocation8 + $0x78] sm:$0xff]  }
 0x1e2   : > { %v1560_v58 = vadd.f32 %v5296_v6, %v7221_v5  ;;  %v7332_v61 = vpop.f32.mrf.mxu0  ;;  %5614 = vmatprep.subr.bf16.mxu0 %v6349_v17 }
 0x1e3   : > { %v5298_v18 = vpop.f32.mrf.mxu1 }
 0x1e4   : > { %v5299_v29 = vadd.f32 %v5298_v18, %v5297_v34  ;;  %v5972_v4 = vpop.f32.mrf.mxu0 }
 0x1e5   : > { %v5300_v47 = vpop.f32.mrf.mxu1  ;;  %v7335_v39 = vadd.f32 %v5972_v4, %v1552_v30 }
 0x1e6   : > { %v7337_v38 = vadd.f32 %v5299_v29, %v1258_v52  ;;  %v1704_v53 = vpop.f32.mrf.mxu0  ;;  %v5175_v52 = vadd.f32 %v7254_v3, %v7246_v0 }
 0x1e7   : > { %v5301_v11 = vpop.f32.mrf.mxu1  ;;  %v7339_v16 = vadd.f32 %v1704_v53, %v1544_v49 }
 0x1e8   : > { %v5302_v55 = vadd.f32 %v5301_v11, %v5300_v47  ;;  %v5973_v5 = vpop.f32.mrf.mxu0  ;;  %v1274_v17 = vadd.f32 %v5175_v52, %v7167_v28 }
 0x1e9   : > { %v5303_v10 = vpop.f32.mrf.mxu1  ;;  %v7341_v56 = vadd.f32 %v5973_v5, %v1555_v22 }
 0x1ea   : > { %v1568_v50 = vadd.f32 %v5302_v55, %v7234_v19  ;;  %v7344_v26 = vpop.f32.mrf.mxu0 }
 0x1eb   : > { %v5304_v51 = vpop.f32.mrf.mxu1 }
 0x1ec   : > { %v5305_v30 = vadd.f32 %v5304_v51, %v5303_v10  ;;  %v5976_v6 = vpop.f32.mrf.mxu0  ;;  %v5181_v51 = vadd.f32 %v7264_v21, %v7261_v7 }
 0x1ed   : > { %v5306_v15 = vpop.f32.mrf.mxu1  ;;  %v7346_v34 = vadd.f32 %v5976_v6, %v1568_v50 }
 0x1ee   : > { %v1571_v62 = vadd.f32 %v5305_v30, %v7241_v57  ;;  %v1720_v18 = vpop.f32.mrf.mxu0 }
 0x1ef   : > { %v5307_v49 = vpop.f32.mrf.mxu1  ;;  %v7351_v29 = vadd.f32 %v1720_v18, %v1560_v58  ;;  %v1279_v58 = vadd.f32 %v7155_v44, %v7259_v14  ;;  %v1282_v18 = vadd.f32 %v7162_v27, %v5181_v51 }
 0x1f0   : > { %v5308_v22 = vadd.f32 %v5307_v49, %v5306_v15  ;;  %v5977_v47 = vpop.f32.mrf.mxu0 }
 0x1f1   : > { %v5309_v19 = vpop.f32.mrf.mxu1  ;;  %v7353_v4 = vadd.f32 %v5977_v47, %v1571_v62 }
 0x1f2   : > { %v1576_v11 = vadd.f32 %v5308_v22, %v7249_v12  ;;  %v7356_v55 = vpop.f32.mrf.mxu0 }
 0x1f3   : > { %v5310_v53 = vpop.f32.mrf.mxu1 }
 0x1f4   : > { %v5311_v57 = vadd.f32 %v5310_v53, %v5309_v19  ;;  %v5980_v5 = vpop.f32.mrf.mxu0 }
 0x1f5   : > { %v5312_v10 = vpop.f32.mrf.mxu1 }
 0x1f6   : > { %v7359_v50 = vadd.f32 %v5311_v57, %v1274_v17  ;;  %v1736_v3 = vpop.f32.mrf.mxu0 }
 0x1f7   : > { %v5313_v0 = vpop.f32.mrf.mxu1  ;;  %v7365_v12 = vadd.f32 %v1736_v3, %v1576_v11  ;;  %v7383_v3 = vld [vmem:[%s8296_s3] ss:$0 sm:$0xff] }
 0x1f8   : > { %v5314_v30 = vadd.f32 %v5313_v0, %v5312_v10  ;;  %v5981_v6 = vpop.f32.mrf.mxu0  ;;  %v7377_v10 = vld [vmem:[%s8295_s2] ss:$0 sm:$0xff] }
 0x1f9   : > { %v5315_v15 = vpop.f32.mrf.mxu1 }
 0x1fa   : > { %v1584_v62 = vadd.f32 %v5314_v30, %v1279_v58  ;;  %v7367_v49 = vpop.f32.mrf.mxu0  ;;  %v1628_v30 = vadd.f32 %v7277_v8, %v7181_v23 }
 0x1fb   : > { %v5316_v28 = vpop.f32.mrf.mxu1 }
 0x1fc   : > { %v7370_v52 = vadd.f32 %v5980_v5, %v1584_v62  ;;  %v5317_v22 = vadd.f32 %v5316_v28, %v5315_v15  ;;  %v5358_v19 = vpop.f32.mrf.mxu0 }
 0x1fd   : > { %v6000_v47 = vpop.f32.mrf.mxu1 }
 0x1fe   : > { %v1587_v44 = vadd.f32 %v5317_v22, %v1282_v18  ;;  %v5359_v14 = vpop.f32.mrf.mxu0 }
 0x1ff   : > { %v2283_v53 = vpop.f32.mrf.mxu1  ;;  %v5360_v21 = vadd.f32 %v5359_v14, %v5358_v19 }
 0x200   : > { %v7372_v7 = vadd.f32 %v5981_v6, %v1587_v44  ;;  %v5361_v11 = vpop.f32.mrf.mxu0 }
 0x201   : > { %v6001_v17 = vpop.f32.mrf.mxu1  ;;  %v2284_v57 = vadd.f32 %v5360_v21, %v2283_v53 }
 0x202   : > { %v5362_v27 = vpop.f32.mrf.mxu0 }
 0x203   : > { %v2410_v5 = vadd.f32 %v2284_v57, %v7271_v41  ;;  %v5363_v0 = vadd.f32 %v5362_v27, %v5361_v11  ;;  %v2286_v58 = vpop.f32.mrf.mxu1 }
 0x204   : > { %v5364_v51 = vpop.f32.mrf.mxu0 }
 0x205   : > { %v2449_v15 = vmul.f32 %v7377_v10, %v2410_v5  ;;  %v2287_v6 = vadd.f32 %v5363_v0, %v2286_v58  ;;  %v6004_v19 = vpop.f32.mrf.mxu1 }
 0x206   : > { %v5365_v62 = vpop.f32.mrf.mxu0 }
 0x207   : > { %v2488_v28 = vadd.f32 %v7383_v3, %v2449_v15  ;;  %v2411_v18 = vadd.f32 %v2287_v6, %v1628_v30  ;;  %v5366_v22 = vadd.f32 %v5365_v62, %v5364_v51  ;;  %v2299_v57 = vpop.f32.mrf.mxu1 }
 0x208   : > { %v5367_v41 = vpop.f32.mrf.mxu0 }
 0x209   : > { %v2520_v44 = vmax.f32 %v2488_v28, 0.0  ;;  %v2450_v14 = vmul.f32 %v7377_v10, %v2411_v18  ;;  %v2292_v53 = vadd.f32 %v6000_v47, %v5366_v22  ;;  %v6005_v62 = vpop.f32.mrf.mxu1 }
 0x20a   : > { %v5368_v21 = vpop.f32.mrf.mxu0 }
 0x20b   : > { %2552 = vst [vmem:[#allocation2 + $0x19] sm:$0xff] %v2520_v44  ;;  %v2489_v11 = vadd.f32 %v7383_v3, %v2450_v14  ;;  %v2412_v23 = vadd.f32 %v2292_v53, %v7267_v31  ;;  %v5369_v8 = vadd.f32 %v5368_v21, %v5367_v41  ;;  %v2302_v21 = vpop.f32.mrf.mxu1 }
 0x20c   : > { %v5370_v27 = vpop.f32.mrf.mxu0 }
 0x20d   : > { %v2521_v5 = vmax.f32 %v2489_v11, 0.0  ;;  %v2451_v0 = vmul.f32 %v7377_v10, %v2412_v23  ;;  %v2295_v58 = vadd.f32 %v6001_v17, %v5369_v8 }
 0x20e   : > { %v5371_v51 = vpop.f32.mrf.mxu0 }
 0x20f   : > { %2553 = vst [vmem:[#allocation2 + $0x21] sm:$0xff] %v2521_v5  ;;  %v2490_v30 = vadd.f32 %v7383_v3, %v2451_v0  ;;  %v2413_v15 = vadd.f32 %v2295_v58, %v7274_v9  ;;  %v5372_v47 = vadd.f32 %v5371_v51, %v5370_v27  ;;  %v2856_v6 = vpack.c.bf16 %v2521_v5, %v2520_v44 }
 0x210   : > { %v5373_v28 = vpop.f32.mrf.mxu0  ;;  %v1644_v9 = vadd.f32 %v7293_v48, %v7204_v35  ;;  %v6345_v48 = vld [vmem:[#allocation8 + $0xb0] sm:$0xff]  }
 0x211   : > { %v2522_v18 = vmax.f32 %v2490_v30, 0.0  ;;  %v2452_v31 = vmul.f32 %v7377_v10, %v2413_v15  ;;  %v2300_v22 = vadd.f32 %v5372_v47, %v2299_v57  ;;  %3144 = vmatprep.mubr.bf16.mxu1 %v2856_v6  ;;  %v7402_v6 = vpop.f32.mrf.mxu1 }
 0x212   : > { %v5374_v41 = vpop.f32.mrf.mxu0  ;;  %v2776_v15 = vld [vmem:[#allocation2 + $0x18] sm:$0xff] }
 0x213   : > { %2554 = vst [vmem:[#allocation2 + $0x31] sm:$0xff] %v2522_v18  ;;  %v2491_v14 = vadd.f32 %v7383_v3, %v2452_v31  ;;  %v2414_v17 = vadd.f32 %v2300_v22, %v7287_v33  ;;  %v5375_v53 = vadd.f32 %v5374_v41, %v5373_v28 }
 0x214   : > { %v5376_v11 = vpop.f32.mrf.mxu0 }
 0x215   : > { %v2523_v44 = vmax.f32 %v2491_v14, 0.0  ;;  %v2453_v23 = vmul.f32 %v7377_v10, %v2414_v17  ;;  %v2303_v8 = vadd.f32 %v5375_v53, %v2302_v21 }
 0x216   : > { %v5377_v27 = vpop.f32.mrf.mxu0  ;;  %v2872_v5 = vld [vmem:[#allocation2 + $0x1a] sm:$0xff]  ;;  %v2873_v57 = vld [vmem:[#allocation2 + $0x22] sm:$0xff] }
 0x217   : > { %v2777_v0 = vld [vmem:[#allocation2 + $0x20] sm:$0xff]  ;;  %2555 = vst [vmem:[#allocation2 + $0x39] sm:$0xff] %v2523_v44  ;;  %v2492_v58 = vadd.f32 %v7383_v3, %v2453_v23  ;;  %v2415_v51 = vadd.f32 %v2303_v8, %v1644_v9  ;;  %v5378_v30 = vadd.f32 %v5377_v27, %v5376_v11  ;;  %v2904_v33 = vpack.c.bf16 %v2873_v57, %v2872_v5  ;;  %v2315_v11 = vpop.f32.mrf.mxu1  ;;  %v6350_v8 = vld [vmem:[#allocation8 + $0x38] sm:$0xff]  }
 0x218   : > { %v5379_v47 = vpop.f32.mrf.mxu0  ;;  %v2808_v28 = vpack.c.bf16 %v2777_v0, %v2776_v15  ;;  %v2857_v35 = vpack.c.bf16 %v2523_v44, %v2522_v18  ;;  %v6346_v18 = vld [vmem:[#allocation8 + $0xa8] sm:$0xff]  }
 0x219   : > { %v2524_v31 = vmax.f32 %v2492_v58, 0.0  ;;  %v2454_v22 = vmul.f32 %v7377_v10, %v2415_v51  ;;  %v2308_v41 = vadd.f32 %v6004_v19, %v5378_v30  ;;  %6046 = vmatprep.mubr.bf16.mxu0 %v2904_v33  ;;  %v7411_v33 = vpop.f32.mrf.mxu1 }
 0x21a   : > { %v5380_v14 = vpop.f32.mrf.mxu0  ;;  %3145 = vmatmul.mubr.bf16.vlgmr.msra.gmra.mxu1 %v2808_v28  ;;  %v2778_v30 = vld [vmem:[#allocation2 + $0x30] sm:$0xff] }
 0x21b   : > { %2556 = vst [vmem:[#allocation2 + $0x49] sm:$0xff] %v2524_v31  ;;  %v2493_v17 = vadd.f32 %v7383_v3, %v2454_v22  ;;  %v2416_v53 = vadd.f32 %v2308_v41, %v7282_v42  ;;  %v5381_v21 = vadd.f32 %v5380_v14, %v5379_v47  ;;  %6079 = vmatpush3.bf16.msra.mxu1 %v7231_v40 }
 0x21c   : > { %3152 = vmatprep.mubr.bf16.mxu1 %v2857_v35  ;;  %v5382_v9 = vpop.f32.mrf.mxu0  ;;  %6080 = vmatprep.subr.bf16.mxu1 %v6345_v48  ;;  %v6351_v35 = vld [vmem:[#allocation8 + $0x70] sm:$0xff]  }
 0x21d   : > { %v2525_v44 = vmax.f32 %v2493_v17, 0.0  ;;  %v2455_v23 = vmul.f32 %v7377_v10, %v2416_v53  ;;  %v2311_v19 = vadd.f32 %v6005_v62, %v5381_v21  ;;  %v6347_v62 = vld [vmem:[#allocation8 + $0xa0] sm:$0xff]  }
 0x21e   : > { %v5383_v27 = vpop.f32.mrf.mxu0  ;;  %v2874_v5 = vld [vmem:[#allocation2 + $0x32] sm:$0xff]  ;;  %v2875_v57 = vld [vmem:[#allocation2 + $0x3a] sm:$0xff] }
 0x21f   : > { %v2779_v0 = vld [vmem:[#allocation2 + $0x38] sm:$0xff]  ;;  %2557 = vst [vmem:[#allocation2 + $0x51] sm:$0xff] %v2525_v44  ;;  %v2494_v42 = vadd.f32 %v7383_v3, %v2455_v23  ;;  %v2417_v58 = vadd.f32 %v2311_v19, %v7290_v25  ;;  %v5384_v40 = vadd.f32 %v5383_v27, %v5382_v9  ;;  %v2905_v51 = vpack.c.bf16 %v2875_v57, %v2874_v5  ;;  %v6352_v25 = vld [vmem:[#allocation8 + $0x30] sm:$0xff]  }
 0x220   : > { %6081 = vmatpush3.bf16.msra.mxu1 %v6345_v48  ;;  %v5385_v15 = vpop.f32.mrf.mxu0  ;;  %v2809_v47 = vpack.c.bf16 %v2779_v0, %v2778_v30  ;;  %v2858_v28 = vpack.c.bf16 %v2525_v44, %v2524_v31  ;;  %v2318_v31 = vpop.f32.mrf.mxu1  ;;  %v6348_v44 = vld [vmem:[#allocation8 + $0x98] sm:$0xff]   ;;  %v6354_v23 = vld [vmem:[#allocation8 + $0x68] sm:$0xff]  }
 0x221   : > { %6082 = vmatprep.subr.bf16.mxu1 %v6346_v18  ;;  %v2526_v22 = vmax.f32 %v2494_v42, 0.0  ;;  %v2456_v41 = vmul.f32 %v7377_v10, %v2417_v58  ;;  %v2316_v14 = vadd.f32 %v5384_v40, %v2315_v11  ;;  %6047 = vmatmul.mubr.bf16.vlgmr.msra.gmra.mxu0 %v2905_v51  ;;  %v1660_v11 = vadd.f32 %v7306_v59, %v7229_v2  ;;  %v6355_v5 = vld [vmem:[#allocation8 + $0x28] sm:$0xff]  }
 0x222   : > { %v5386_v17 = vpop.f32.mrf.mxu0  ;;  %3153 = vmatmul.mubr.bf16.gmra.mxu1 %v2809_v47  ;;  %5615 = vmatpush3.bf16.msra.mxu0 %v6350_v8  ;;  %v2780_v30 = vld [vmem:[#allocation2 + $0x48] sm:$0xff]  ;;  %v7420_v2 = vpop.f32.mrf.mxu1 }
 0x223   : > { %2558 = vst [vmem:[#allocation2 + $0x61] sm:$0xff] %v2526_v22  ;;  %v2495_v48 = vadd.f32 %v7383_v3, %v2456_v41  ;;  %v2418_v53 = vadd.f32 %v2316_v14, %v7300_v20  ;;  %v5387_v21 = vadd.f32 %v5386_v17, %v5385_v15  ;;  %3160 = vmatprep.mubr.bf16.mxu1 %v2858_v28  ;;  %v6353_v28 = vld [vmem:[#allocation8 + $0x90] sm:$0xff]  }
 0x224   : > { %6083 = vmatpush3.bf16.msra.mxu1 %v6346_v18  ;;  %v5388_v9 = vpop.f32.mrf.mxu0  ;;  %5616 = vmatprep.subr.bf16.mxu0 %v6351_v35  ;;  %v6356_v35 = vld [vmem:[#allocation8 + $0x60] sm:$0xff]  }
 0x225   : > { %6084 = vmatprep.subr.bf16.mxu1 %v6347_v62  ;;  %v2527_v19 = vmax.f32 %v2495_v48, 0.0  ;;  %v2457_v8 = vmul.f32 %v7377_v10, %v2418_v53  ;;  %v2319_v27 = vadd.f32 %v5387_v21, %v2318_v31  ;;  %v6357_v48 = vld [vmem:[#allocation8 + $0x20] sm:$0xff]   ;;  %v2331_v21 = vpop.f32.mrf.mxu1 }
 0x226   : > { %v5389_v57 = vpop.f32.mrf.mxu0  ;;  %v2876_v0 = vld [vmem:[#allocation2 + $0x4a] sm:$0xff]  ;;  %v2877_v20 = vld [vmem:[#allocation2 + $0x52] sm:$0xff]  ;;  %5617 = vmatpush3.bf16.msra.mxu0 %v6352_v25 }
 0x227   : > { %v2781_v42 = vld [vmem:[#allocation2 + $0x50] sm:$0xff]  ;;  %2559 = vst [vmem:[#allocation2 + $0x69] sm:$0xff] %v2527_v19  ;;  %v2496_v18 = vadd.f32 %v7383_v3, %v2457_v8  ;;  %v2419_v58 = vadd.f32 %v2319_v27, %v1660_v11  ;;  %v5390_v40 = vadd.f32 %v5389_v57, %v5388_v9  ;;  %v2906_v51 = vpack.c.bf16 %v2877_v20, %v2876_v0  ;;  %v6358_v9 = vld [vmem:[#allocation8 + $0x88] sm:$0xff]   ;;  %v6360_v8 = vld [vmem:[#allocation8 + $0x18] sm:$0xff]  }
 0x228   : > { %6085 = vmatpush3.bf16.msra.mxu1 %v6347_v62  ;;  %v5391_v15 = vpop.f32.mrf.mxu0  ;;  %v2810_v59 = vpack.c.bf16 %v2781_v42, %v2780_v30  ;;  %v2859_v47 = vpack.c.bf16 %v2527_v19, %v2526_v22  ;;  %5618 = vmatprep.subr.bf16.mxu0 %v6354_v23  ;;  %v6359_v23 = vld [vmem:[#allocation8 + $0x58] sm:$0xff]   ;;  %v6361_v30 = vld [vmem:[#allocation8 + $0x50] sm:$0xff]  }
 0x229   : > { %6086 = vmatprep.subr.bf16.mxu1 %v6348_v44  ;;  %v2528_v41 = vmax.f32 %v2496_v18, 0.0  ;;  %v2458_v14 = vmul.f32 %v7377_v10, %v2419_v58  ;;  %v2324_v17 = vadd.f32 %v7402_v6, %v5390_v40  ;;  %6050 = vmatprep.mubr.bf16.mxu0 %v2906_v51  ;;  %v7432_v58 = vpop.f32.mrf.mxu1 }
 0x22a   : > { %v5392_v25 = vpop.f32.mrf.mxu0  ;;  %3161 = vmatmul.mubr.bf16.gmra.mxu1 %v2810_v59  ;;  %5619 = vmatpush3.bf16.msra.mxu0 %v6355_v5  ;;  %v2782_v18 = vld [vmem:[#allocation2 + $0x60] sm:$0xff] }
 0x22b   : > { %2560 = vst [vmem:[#allocation2 + $0x79] sm:$0xff] %v2528_v41  ;;  %v2497_v62 = vadd.f32 %v7383_v3, %v2458_v14  ;;  %v2420_v53 = vadd.f32 %v2324_v17, %v7296_v13  ;;  %v5393_v22 = vadd.f32 %v5392_v25, %v5391_v15  ;;  %3168 = vmatprep.mubr.bf16.mxu1 %v2859_v47  ;;  %v6363_v15 = vld [vmem:[#allocation8 + $0x80] sm:$0xff]   ;;  %v6362_v14 = vld [vmem:[#allocation8 + $0x10] sm:$0xff]   ;;  %v2334_v25 = vpop.f32.mrf.mxu1 }
 0x22c   : > { %6087 = vmatpush3.bf16.msra.mxu1 %v6348_v44  ;;  %v5394_v31 = vpop.f32.mrf.mxu0  ;;  %5620 = vmatprep.subr.bf16.mxu0 %v6356_v35 }
 0x22d   : > { %6088 = vmatprep.subr.bf16.mxu1 %v6353_v28  ;;  %v2529_v6 = vmax.f32 %v2497_v62, 0.0  ;;  %v2459_v11 = vmul.f32 %v7377_v10, %v2420_v53  ;;  %v2327_v19 = vadd.f32 %v7411_v33, %v5393_v22  ;;  %v6364_v62 = vld [vmem:[#allocation8 + $0x48] sm:$0xff]   ;;  %v6368_v53 = vld [vmem:[#allocation8 + $0x1f8] sm:$0xff]   ;;  %v1676_v22 = vadd.f32 %v7320_v46, %v7257_v37  ;;  %v6366_v37 = vld [vmem:[#allocation8 + $0x40] sm:$0xff]  }
 0x22e   : > { %v5395_v27 = vpop.f32.mrf.mxu0  ;;  %v2878_v5 = vld [vmem:[#allocation2 + $0x62] sm:$0xff]  ;;  %v2879_v57 = vld [vmem:[#allocation2 + $0x6a] sm:$0xff]  ;;  %5621 = vmatpush3.bf16.msra.mxu0 %v6357_v48 }
 0x22f   : > { %v2783_v0 = vld [vmem:[#allocation2 + $0x68] sm:$0xff]  ;;  %2561 = vst [vmem:[#allocation2 + $0x81] sm:$0xff] %v2529_v6  ;;  %v2498_v13 = vadd.f32 %v7383_v3, %v2459_v11  ;;  %v2421_v44 = vadd.f32 %v2327_v19, %v7303_v43  ;;  %v5396_v20 = vadd.f32 %v5395_v27, %v5394_v31  ;;  %v7430_v42 = vpack.c.bf16 %v2879_v57, %v2878_v5 }
 0x230   : > { %6089 = vmatpush3.bf16.msra.mxu1 %v6353_v28  ;;  %v5397_v40 = vpop.f32.mrf.mxu0  ;;  %v2811_v33 = vpack.c.bf16 %v2783_v0, %v2782_v18  ;;  %v2860_v51 = vpack.c.bf16 %v2529_v6, %v2528_v41  ;;  %5622 = vmatprep.subr.bf16.mxu0 %v6359_v23  ;;  %v6365_v6 = vld [vmem:[#allocation8 + $0x8] sm:$0xff]  }
 0x231   : > { %6090 = vmatprep.subr.bf16.mxu1 %v6358_v9  ;;  %v2530_v59 = vmax.f32 %v2498_v13, 0.0  ;;  %v2460_v47 = vmul.f32 %v7377_v10, %v2421_v44  ;;  %v2332_v35 = vadd.f32 %v5396_v20, %v2331_v21  ;;  %6051 = vmatmul.mubr.bf16.gmra.mxu0 %v7430_v42  ;;  %v7444_v13 = vpop.f32.mrf.mxu1 }
 0x232   : > { %v5398_v43 = vpop.f32.mrf.mxu0  ;;  %3169 = vmatmul.mubr.bf16.gmra.mxu1 %v2811_v33  ;;  %5623 = vmatpush3.bf16.msra.mxu0 %v6360_v8  ;;  %v2784_v0 = vld [vmem:[#allocation2 + $0x78] sm:$0xff] }
 0x233   : > { %2562 = vst [vmem:[#allocation2 + $0x91] sm:$0xff] %v2530_v59  ;;  %v2499_v28 = vadd.f32 %v7383_v3, %v2460_v47  ;;  %v2422_v17 = vadd.f32 %v2332_v35, %v7315_v63  ;;  %v5399_v41 = vadd.f32 %v5398_v43, %v5397_v40  ;;  %3176 = vmatprep.mubr.bf16.mxu1 %v2860_v51  ;;  %v2347_v43 = vpop.f32.mrf.mxu1 }
 0x234   : > { %6091 = vmatpush3.bf16.msra.mxu1 %v6358_v9  ;;  %v5400_v48 = vpop.f32.mrf.mxu0  ;;  %5624 = vmatprep.subr.bf16.mxu0 %v6361_v30  ;;  %v6367_v30 = vld [vmem:[#allocation8] sm:$0xff]  }
 0x235   : > { %6092 = vmatprep.subr.bf16.mxu1 %v6363_v15  ;;  %v2531_v21 = vmax.f32 %v2499_v28, 0.0  ;;  %v2461_v31 = vmul.f32 %v7377_v10, %v2422_v17  ;;  %v2335_v23 = vadd.f32 %v5399_v41, %v2334_v25 }
 0x236   : > { %v5401_v11 = vpop.f32.mrf.mxu0  ;;  %v2880_v19 = vld [vmem:[#allocation2 + $0x7a] sm:$0xff]  ;;  %v2881_v63 = vld [vmem:[#allocation2 + $0x82] sm:$0xff]  ;;  %5625 = vmatpush3.bf16.msra.mxu0 %v6362_v14 }
 0x237   : > { %v2785_v8 = vld [vmem:[#allocation2 + $0x80] sm:$0xff]  ;;  %2563 = vst [vmem:[#allocation2 + $0x99] sm:$0xff] %v2531_v21  ;;  %v2500_v9 = vadd.f32 %v7383_v3, %v2461_v31  ;;  %v2423_v27 = vadd.f32 %v2335_v23, %v1676_v22  ;;  %v5402_v5 = vadd.f32 %v5401_v11, %v5400_v48  ;;  %v7442_v57 = vpack.c.bf16 %v2881_v63, %v2880_v19  ;;  %v6017_v23 = vpop.f32.mrf.mxu1 }
 0x238   : > { %6093 = vmatpush3.bf16.msra.mxu1 %v6363_v15  ;;  %v5403_v46 = vpop.f32.mrf.mxu0  ;;  %v2812_v44 = vpack.c.bf16 %v2785_v8, %v2784_v0  ;;  %v2861_v20 = vpack.c.bf16 %v2531_v21, %v2530_v59  ;;  %5626 = vmatprep.subr.bf16.mxu0 %v6364_v62  ;;  %v7451_v59 = vld [vmem:[#allocation8 + $0x238] sm:$0xff]  }
 0x239   : > { %5750 = vmatprep.subr.bf16.mxu1 %v6368_v53  ;;  %v2532_v18 = vmax.f32 %v2500_v9, 0.0  ;;  %v2462_v40 = vmul.f32 %v7377_v10, %v2423_v27  ;;  %v2340_v33 = vadd.f32 %v7420_v2, %v5402_v5  ;;  %6054 = vmatprep.mubr.bf16.mxu0 %v7442_v57  ;;  %v2350_v0 = vpop.f32.mrf.mxu1 }
 0x23a   : > { %v5404_v51 = vpop.f32.mrf.mxu0  ;;  %3177 = vmatmul.mubr.bf16.gmra.mxu1 %v2812_v44  ;;  %5627 = vmatpush3.bf16.msra.mxu0 %v6365_v6  ;;  %v2786_v31 = vld [vmem:[#allocation2 + $0x90] sm:$0xff] }
 0x23b   : > { %2564 = vst [vmem:[#allocation2 + $0xa9] sm:$0xff] %v2532_v18  ;;  %v2501_v15 = vadd.f32 %v7383_v3, %v2462_v40  ;;  %v2424_v47 = vadd.f32 %v2340_v33, %v7310_v54  ;;  %v5405_v35 = vadd.f32 %v5404_v51, %v5403_v46  ;;  %3184 = vmatprep.mubr.bf16.mxu1 %v2861_v20 }
 0x23c   : > { %5628 = vmatprep.subr.bf16.mxu0 %v6366_v37  ;;  %v5406_v14 = vpop.f32.mrf.mxu0  ;;  %v1692_v46 = vadd.f32 %v7332_v61, %v7284_v60 }
 0x23d   : > { %v2533_v28 = vmax.f32 %v2501_v15, 0.0  ;;  %v2463_v2 = vmul.f32 %v7377_v10, %v2424_v47  ;;  %v2343_v17 = vadd.f32 %v7432_v58, %v5405_v35 }
 0x23e   : > { %v5407_v41 = vpop.f32.mrf.mxu0  ;;  %v2882_v25 = vld [vmem:[#allocation2 + $0x92] sm:$0xff]  ;;  %v2883_v48 = vld [vmem:[#allocation2 + $0x9a] sm:$0xff]  ;;  %5629 = vmatpush3.bf16.msra.mxu0 %v6367_v30 }
 0x23f   : > { %v2787_v62 = vld [vmem:[#allocation2 + $0x98] sm:$0xff]  ;;  %2565 = vst [vmem:[#allocation2 + $0xb1] sm:$0xff] %v2533_v28  ;;  %v2502_v54 = vadd.f32 %v7383_v3, %v2463_v2  ;;  %v2425_v53 = vadd.f32 %v2343_v17, %v7317_v36  ;;  %v5408_v22 = vadd.f32 %v5407_v41, %v5406_v14  ;;  %v7457_v21 = vpack.c.bf16 %v2883_v48, %v2882_v25 }
 0x240   : > { %6126 = vmatprep.subr.bf16.mxu0 %v7451_v59  ;;  %v5409_v6 = vpop.f32.mrf.mxu0  ;;  %v2813_v11 = vpack.c.bf16 %v2787_v62, %v2786_v31  ;;  %v2862_v58 = vpack.c.bf16 %v2533_v28, %v2532_v18  ;;  %v7470_v28 = vpop.f32.mrf.mxu1 }
 0x241   : > { %v2534_v19 = vmax.f32 %v2502_v54, 0.0  ;;  %v2464_v63 = vmul.f32 %v7377_v10, %v2425_v53  ;;  %v2348_v8 = vadd.f32 %v5408_v22, %v2347_v43  ;;  %6055 = vmatmul.mubr.bf16.gmra.mxu0 %v7457_v21 }
 0x242   : > { %v5410_v9 = vpop.f32.mrf.mxu0  ;;  %3185 = vmatmul.mubr.bf16.gmra.mxu1 %v2813_v11  ;;  %v2788_v43 = vld [vmem:[#allocation2 + $0xa8] sm:$0xff]  ;;  %v2363_v53 = vpop.f32.mrf.mxu1 }
 0x243   : > { %2566 = vst [vmem:[#allocation2 + $0xc1] sm:$0xff] %v2534_v19  ;;  %v2503_v36 = vadd.f32 %v7383_v3, %v2464_v63  ;;  %v2426_v27 = vadd.f32 %v2348_v8, %v7327_v45  ;;  %v5411_v5 = vadd.f32 %v5410_v9, %v5409_v6  ;;  %3192 = vmatprep.mubr.bf16.mxu1 %v2862_v58 }
 0x244   : > { %v5412_v37 = vpop.f32.mrf.mxu0 }
 0x245   : > { %v2535_v44 = vmax.f32 %v2503_v36, 0.0  ;;  %v2465_v20 = vmul.f32 %v7377_v10, %v2426_v27  ;;  %v2351_v18 = vadd.f32 %v5411_v5, %v2350_v0  ;;  %v6021_v5 = vpop.f32.mrf.mxu1 }
 0x246   : > { %v5413_v40 = vpop.f32.mrf.mxu0  ;;  %v2884_v33 = vld [vmem:[#allocation2 + $0xaa] sm:$0xff]  ;;  %v2885_v51 = vld [vmem:[#allocation2 + $0xb2] sm:$0xff] }
 0x247   : > { %v2789_v30 = vld [vmem:[#allocation2 + $0xb0] sm:$0xff]  ;;  %2567 = vst [vmem:[#allocation2 + $0xc9] sm:$0xff] %v2535_v44  ;;  %v2504_v15 = vadd.f32 %v7383_v3, %v2465_v20  ;;  %v2427_v47 = vadd.f32 %v2351_v18, %v1692_v46  ;;  %v5414_v45 = vadd.f32 %v5413_v40, %v5412_v37  ;;  %v7468_v35 = vpack.c.bf16 %v2885_v51, %v2884_v33  ;;  %v2366_v51 = vpop.f32.mrf.mxu1 }
 0x248   : > { %v5415_v14 = vpop.f32.mrf.mxu0  ;;  %v2814_v60 = vpack.c.bf16 %v2789_v30, %v2788_v43  ;;  %v2863_v61 = vpack.c.bf16 %v2535_v44, %v2534_v19 }
 0x249   : > { %v2536_v2 = vmax.f32 %v2504_v15, 0.0  ;;  %v2466_v17 = vmul.f32 %v7377_v10, %v2427_v47  ;;  %v2356_v41 = vadd.f32 %v7444_v13, %v5414_v45  ;;  %6058 = vmatprep.mubr.bf16.mxu0 %v7468_v35  ;;  %v1708_v15 = vadd.f32 %v7344_v26, %v7312_v1 }
 0x24a   : > { %v5416_v25 = vpop.f32.mrf.mxu0  ;;  %3193 = vmatmul.mubr.bf16.gmra.mxu1 %v2814_v60 }
 0x24b   : > { %2568 = vst [vmem:[#allocation2 + $0xd9] sm:$0xff] %v2536_v2  ;;  %v2505_v48 = vadd.f32 %v7383_v3, %v2466_v17  ;;  %v2428_v62 = vadd.f32 %v2356_v41, %v7322_v32  ;;  %v5417_v54 = vadd.f32 %v5416_v25, %v5415_v14  ;;  %3200 = vmatprep.mubr.bf16.mxu1 %v2863_v61  ;;  %v2790_v32 = vld [vmem:[#allocation2 + $0xc0] sm:$0xff] }
 0x24c   : > { %v5418_v22 = vpop.f32.mrf.mxu0 }
 0x24d   : > { %v2537_v31 = vmax.f32 %v2505_v48, 0.0  ;;  %v2467_v6 = vmul.f32 %v7377_v10, %v2428_v62  ;;  %v2359_v11 = vadd.f32 %v6017_v23, %v5417_v54  ;;  %v7495_v54 = vpop.f32.mrf.mxu1 }
 0x24e   : > { %v5419_v58 = vpop.f32.mrf.mxu0  ;;  %v2886_v19 = vld [vmem:[#allocation2 + $0xc2] sm:$0xff]  ;;  %v2887_v13 = vld [vmem:[#allocation2 + $0xca] sm:$0xff] }
 0x24f   : > { %v2791_v63 = vld [vmem:[#allocation2 + $0xc8] sm:$0xff]  ;;  %2569 = vst [vmem:[#allocation2 + $0xe1] sm:$0xff] %v2537_v31  ;;  %v2506_v8 = vadd.f32 %v7383_v3, %v2467_v6  ;;  %v2429_v9 = vadd.f32 %v2359_v11, %v7329_v24  ;;  %v5420_v36 = vadd.f32 %v5419_v58, %v5418_v22  ;;  %v7480_v27 = vpack.c.bf16 %v2887_v13, %v2886_v19  ;;  %v2379_v13 = vpop.f32.mrf.mxu1 }
 0x250   : > { %v5421_v0 = vpop.f32.mrf.mxu0  ;;  %v7482_v37 = vpack.c.bf16 %v2791_v63, %v2790_v32  ;;  %v2864_v46 = vpack.c.bf16 %v2537_v31, %v2536_v2 }
 0x251   : > { %v2538_v44 = vmax.f32 %v2506_v8, 0.0  ;;  %v2468_v23 = vmul.f32 %v7377_v10, %v2429_v9  ;;  %v2364_v20 = vadd.f32 %v5420_v36, %v2363_v53  ;;  %6059 = vmatmul.mubr.bf16.gmra.mxu0 %v7480_v27 }
 0x252   : > { %v5422_v18 = vpop.f32.mrf.mxu0  ;;  %3201 = vmatmul.mubr.bf16.gmra.mxu1 %v7482_v37  ;;  %v2792_v48 = vld [vmem:[#allocation2 + $0xd8] sm:$0xff] }
 0x253   : > { %2570 = vst [vmem:[#allocation2 + $0xf1] sm:$0xff] %v2538_v44  ;;  %v2507_v24 = vadd.f32 %v7383_v3, %v2468_v23  ;;  %v2430_v40 = vadd.f32 %v2364_v20, %v7339_v16  ;;  %v5423_v33 = vadd.f32 %v5422_v18, %v5421_v0  ;;  %3208 = vmatprep.mubr.bf16.mxu1 %v2864_v46 }
 0x254   : > { %v5424_v30 = vpop.f32.mrf.mxu0 }
 0x255   : > { %v2539_v47 = vmax.f32 %v2507_v24, 0.0  ;;  %v2469_v45 = vmul.f32 %v7377_v10, %v2430_v40  ;;  %v2367_v43 = vadd.f32 %v5423_v33, %v2366_v51  ;;  %v6025_v24 = vpop.f32.mrf.mxu1 }
 0x256   : > { %v5425_v14 = vpop.f32.mrf.mxu0  ;;  %v2888_v60 = vld [vmem:[#allocation2 + $0xda] sm:$0xff]  ;;  %v2889_v61 = vld [vmem:[#allocation2 + $0xe2] sm:$0xff] }
 0x257   : > { %v2793_v2 = vld [vmem:[#allocation2 + $0xe0] sm:$0xff]  ;;  %2571 = vst [vmem:[#allocation2 + $0xf9] sm:$0xff] %v2539_v47  ;;  %v2508_v17 = vadd.f32 %v7383_v3, %v2469_v45  ;;  %v2431_v41 = vadd.f32 %v2367_v43, %v1708_v15  ;;  %v5426_v16 = vadd.f32 %v5425_v14, %v5424_v30  ;;  %v7493_v25 = vpack.c.bf16 %v2889_v61, %v2888_v60  ;;  %v2382_v14 = vpop.f32.mrf.mxu1 }
 0x258   : > { %v5427_v62 = vpop.f32.mrf.mxu0  ;;  %v7497_v1 = vpack.c.bf16 %v2793_v2, %v2792_v48  ;;  %v2865_v26 = vpack.c.bf16 %v2539_v47, %v2538_v44  ;;  %v1724_v61 = vadd.f32 %v7356_v55, %v7337_v38 }
 0x259   : > { %v2540_v53 = vmax.f32 %v2508_v17, 0.0  ;;  %v2470_v22 = vmul.f32 %v7377_v10, %v2431_v41  ;;  %v2372_v31 = vadd.f32 %v7470_v28, %v5426_v16  ;;  %6062 = vmatprep.mubr.bf16.mxu0 %v7493_v25 }
 0x25a   : > { %v5428_v6 = vpop.f32.mrf.mxu0  ;;  %3209 = vmatmul.mubr.bf16.gmra.mxu1 %v7497_v1 }
 0x25b   : > { %2572 = vst [vmem:[#allocation2 + $0x109] sm:$0xff] %v2540_v53  ;;  %v2509_v11 = vadd.f32 %v7383_v3, %v2470_v22  ;;  %v2432_v58 = vadd.f32 %v2372_v31, %v7335_v39  ;;  %v5429_v19 = vadd.f32 %v5428_v6, %v5427_v62  ;;  %3216 = vmatprep.mubr.bf16.mxu1 %v2865_v26  ;;  %v2794_v39 = vld [vmem:[#allocation2 + $0xf0] sm:$0xff] }
 0x25c   : > { %v5430_v63 = vpop.f32.mrf.mxu0 }
 0x25d   : > { %v2541_v8 = vmax.f32 %v2509_v11, 0.0  ;;  %v2471_v9 = vmul.f32 %v7377_v10, %v2432_v58  ;;  %v2375_v36 = vadd.f32 %v6021_v5, %v5429_v19  ;;  %v7523_v58 = vpop.f32.mrf.mxu1 }
 0x25e   : > { %v5431_v32 = vpop.f32.mrf.mxu0  ;;  %v2890_v28 = vld [vmem:[#allocation2 + $0xf2] sm:$0xff]  ;;  %v2891_v0 = vld [vmem:[#allocation2 + $0xfa] sm:$0xff] }
 0x25f   : > { %v2795_v46 = vld [vmem:[#allocation2 + $0xf8] sm:$0xff]  ;;  %2573 = vst [vmem:[#allocation2 + $0x111] sm:$0xff] %v2541_v8  ;;  %v2510_v44 = vadd.f32 %v7383_v3, %v2471_v9  ;;  %v2433_v23 = vadd.f32 %v2375_v36, %v7341_v56  ;;  %v5432_v20 = vadd.f32 %v5431_v32, %v5430_v63  ;;  %v7508_v18 = vpack.c.bf16 %v2891_v0, %v2890_v28  ;;  %v2395_v28 = vpop.f32.mrf.mxu1 }
 0x260   : > { %v5433_v40 = vpop.f32.mrf.mxu0  ;;  %v7510_v33 = vpack.c.bf16 %v2795_v46, %v2794_v39  ;;  %v2866_v51 = vpack.c.bf16 %v2541_v8, %v2540_v53 }
 0x261   : > { %v2542_v30 = vmax.f32 %v2510_v44, 0.0  ;;  %v2472_v5 = vmul.f32 %v7377_v10, %v2433_v23  ;;  %v2380_v15 = vadd.f32 %v5432_v20, %v2379_v13  ;;  %6063 = vmatmul.mubr.bf16.gmra.mxu0 %v7508_v18 }
 0x262   : > { %v5434_v47 = vpop.f32.mrf.mxu0  ;;  %3217 = vmatmul.mubr.bf16.gmra.mxu1 %v7510_v33  ;;  %v2796_v6 = vld [vmem:[#allocation2 + $0x108] sm:$0xff] }
 0x263   : > { %2574 = vst [vmem:[#allocation2 + $0x121] sm:$0xff] %v2542_v30  ;;  %v2511_v56 = vadd.f32 %v7383_v3, %v2472_v5  ;;  %v2434_v45 = vadd.f32 %v2380_v15, %v7351_v29  ;;  %v5435_v43 = vadd.f32 %v5434_v47, %v5433_v40  ;;  %3224 = vmatprep.mubr.bf16.mxu1 %v2866_v51  ;;  %v6029_v47 = vpop.f32.mrf.mxu1 }
 0x264   : > { %v5436_v60 = vpop.f32.mrf.mxu0 }
 0x265   : > { %v2543_v2 = vmax.f32 %v2511_v56, 0.0  ;;  %v2473_v17 = vmul.f32 %v7377_v10, %v2434_v45  ;;  %v2383_v41 = vadd.f32 %v5435_v43, %v2382_v14 }
 0x266   : > { %v5437_v16 = vpop.f32.mrf.mxu0  ;;  %v2892_v48 = vld [vmem:[#allocation2 + $0x10a] sm:$0xff]  ;;  %v2893_v62 = vld [vmem:[#allocation2 + $0x112] sm:$0xff] }
 0x267   : > { %v2797_v26 = vld [vmem:[#allocation2 + $0x110] sm:$0xff]  ;;  %2575 = vst [vmem:[#allocation2 + $0x129] sm:$0xff] %v2543_v2  ;;  %v2512_v53 = vadd.f32 %v7383_v3, %v2473_v17  ;;  %v2435_v22 = vadd.f32 %v2383_v41, %v1724_v61  ;;  %v5438_v29 = vadd.f32 %v5437_v16, %v5436_v60  ;;  %v7521_v31 = vpack.c.bf16 %v2893_v62, %v2892_v48  ;;  %v2398_v41 = vpop.f32.mrf.mxu1 }
 0x268   : > { %v5439_v11 = vpop.f32.mrf.mxu0  ;;  %v7525_v38 = vpack.c.bf16 %v2797_v26, %v2796_v6  ;;  %v2867_v55 = vpack.c.bf16 %v2543_v2, %v2542_v30  ;;  %v1740_v48 = vadd.f32 %v7367_v49, %v7359_v50 }
 0x269   : > { %v2544_v19 = vmax.f32 %v2512_v53, 0.0  ;;  %v2474_v13 = vmul.f32 %v7377_v10, %v2435_v22  ;;  %v2388_v63 = vadd.f32 %v7495_v54, %v5438_v29  ;;  %6066 = vmatprep.mubr.bf16.mxu0 %v7521_v31 }
 0x26a   : > { %v5440_v8 = vpop.f32.mrf.mxu0  ;;  %3225 = vmatmul.mubr.bf16.gmra.mxu1 %v7525_v38 }
 0x26b   : > { %2576 = vst [vmem:[#allocation2 + $0x139] sm:$0xff] %v2544_v19  ;;  %v2513_v9 = vadd.f32 %v7383_v3, %v2474_v13  ;;  %v2436_v36 = vadd.f32 %v2388_v63, %v7346_v34  ;;  %v5441_v32 = vadd.f32 %v5440_v8, %v5439_v11  ;;  %3232 = vmatprep.mubr.bf16.mxu1 %v2867_v55  ;;  %v2798_v34 = vld [vmem:[#allocation2 + $0x120] sm:$0xff] }
 0x26c   : > { %v5442_v0 = vpop.f32.mrf.mxu0 }
 0x26d   : > { %v2545_v46 = vmax.f32 %v2513_v9, 0.0  ;;  %v2475_v44 = vmul.f32 %v7377_v10, %v2436_v36  ;;  %v2391_v23 = vadd.f32 %v6025_v24, %v5441_v32 }
 0x26e   : > { %v5443_v20 = vpop.f32.mrf.mxu0  ;;  %v2894_v54 = vld [vmem:[#allocation2 + $0x122] sm:$0xff]  ;;  %v2895_v39 = vld [vmem:[#allocation2 + $0x12a] sm:$0xff] }
 0x26f   : > { %v2799_v40 = vld [vmem:[#allocation2 + $0x128] sm:$0xff]  ;;  %2577 = vst [vmem:[#allocation2 + $0x141] sm:$0xff] %v2545_v46  ;;  %v2514_v51 = vadd.f32 %v7383_v3, %v2475_v44  ;;  %v2437_v30 = vadd.f32 %v2391_v23, %v7353_v4  ;;  %v5444_v5 = vadd.f32 %v5443_v20, %v5442_v0  ;;  %v7536_v15 = vpack.c.bf16 %v2895_v39, %v2894_v54 }
 0x270   : > { %v5445_v56 = vpop.f32.mrf.mxu0  ;;  %v7538_v45 = vpack.c.bf16 %v2799_v40, %v2798_v34  ;;  %v2868_v43 = vpack.c.bf16 %v2545_v46, %v2544_v19 }
 0x271   : > { %v2546_v14 = vmax.f32 %v2514_v51, 0.0  ;;  %v2476_v24 = vmul.f32 %v7377_v10, %v2437_v30  ;;  %v2396_v60 = vadd.f32 %v5444_v5, %v2395_v28  ;;  %6067 = vmatmul.mubr.bf16.gmra.mxu0 %v7536_v15 }
 0x272   : > { %v5446_v61 = vpop.f32.mrf.mxu0  ;;  %3233 = vmatmul.mubr.bf16.gmra.mxu1 %v7538_v45  ;;  %v2800_v63 = vld [vmem:[#allocation2 + $0x138] sm:$0xff] }
 0x273   : > { %2578 = vst [vmem:[#allocation2 + $0x151] sm:$0xff] %v2546_v14  ;;  %v2515_v4 = vadd.f32 %v7383_v3, %v2476_v24  ;;  %v2438_v2 = vadd.f32 %v2396_v60, %v7365_v12  ;;  %v5447_v17 = vadd.f32 %v5446_v61, %v5445_v56  ;;  %3240 = vmatprep.mubr.bf16.mxu1 %v2868_v43 }
 0x274   : > { %v5448_v16 = vpop.f32.mrf.mxu0 }
 0x275   : > { %v2547_v62 = vmax.f32 %v2515_v4, 0.0  ;;  %v2477_v26 = vmul.f32 %v7377_v10, %v2438_v2  ;;  %v2399_v53 = vadd.f32 %v5447_v17, %v2398_v41 }
 0x276   : > { %v5449_v22 = vpop.f32.mrf.mxu0  ;;  %v2896_v29 = vld [vmem:[#allocation2 + $0x13a] sm:$0xff]  ;;  %v2897_v6 = vld [vmem:[#allocation2 + $0x142] sm:$0xff] }
 0x277   : > { %v2801_v11 = vld [vmem:[#allocation2 + $0x140] sm:$0xff]  ;;  %2579 = vst [vmem:[#allocation2 + $0x159] sm:$0xff] %v2547_v62  ;;  %v2516_v55 = vadd.f32 %v7383_v3, %v2477_v26  ;;  %v2439_v19 = vadd.f32 %v2399_v53, %v1740_v48  ;;  %v5450_v12 = vadd.f32 %v5449_v22, %v5448_v16  ;;  %v7549_v13 = vpack.c.bf16 %v2897_v6, %v2896_v29  ;;  %v2633_v48 = vld [vmem:[#allocation2 + $0x9] sm:$0xff] }
 0x278   : > { %v5451_v8 = vpop.f32.mrf.mxu0  ;;  %v7551_v9 = vpack.c.bf16 %v2801_v11, %v2800_v63  ;;  %v2869_v50 = vpack.c.bf16 %v2547_v62, %v2546_v14  ;;  %v2632_v16 = vld [vmem:[#allocation2 + $0x1] sm:$0xff]  ;;  %v2681_v26 = vld [vmem:[#allocation2 + $0xa] sm:$0xff] }
 0x279   : > { %v2548_v49 = vmax.f32 %v2516_v55, 0.0  ;;  %v2478_v36 = vmul.f32 %v7377_v10, %v2439_v19  ;;  %v2404_v32 = vadd.f32 %v7523_v58, %v5450_v12  ;;  %6070 = vmatprep.mubr.bf16.mxu0 %v7549_v13  ;;  %v2680_v62 = vld [vmem:[#allocation2 + $0x2] sm:$0xff]  ;;  %v2664_v11 = vpack.c.bf16 %v2633_v48, %v2632_v16  ;;  %v2639_v48 = vld [vmem:[#allocation2 + $0x51] sm:$0xff] }
 0x27a   : > { %v5452_v28 = vpop.f32.mrf.mxu0  ;;  %3241 = vmatmul.mubr.bf16.gmra.mxu1 %v7551_v9  ;;  %v2802_v39 = vld [vmem:[#allocation2 + $0x150] sm:$0xff]  ;;  %v2712_v12 = vpack.c.bf16 %v2681_v26, %v2680_v62  ;;  %v2584_v63 = vld [vmem:[#allocation2] sm:$0xff]  ;;  %v6378_v16 = vld [vmem:[#allocation8 + $0x1d8] sm:$0xff]  }
 0x27b   : > { %2580 = vst [vmem:[#allocation2 + $0x169] sm:$0xff] %v2548_v49  ;;  %v2517_v0 = vadd.f32 %v7383_v3, %v2478_v36  ;;  %v2440_v46 = vadd.f32 %v2404_v32, %v7370_v52  ;;  %v5453_v44 = vadd.f32 %v5452_v28, %v5451_v8  ;;  %3248 = vmatprep.mubr.bf16.mxu1 %v2869_v50  ;;  %v7580_v8 = vld [vmem:[#allocation2 + $0x8] sm:$0xff]  ;;  %v2682_v36 = vld [vmem:[#allocation2 + $0x1a] sm:$0xff]  ;;  %v2684_v28 = vld [vmem:[#allocation2 + $0x32] sm:$0xff] }
 0x27c   : > { %v2616_v50 = vpack.c.bf16 %v7580_v8, %v2584_v63  ;;  %v2683_v32 = vld [vmem:[#allocation2 + $0x22] sm:$0xff]  ;;  %v2588_v26 = vld [vmem:[#allocation2 + $0x30] sm:$0xff] }
 0x27d   : > { %v2549_v23 = vmax.f32 %v2517_v0, 0.0  ;;  %v2479_v20 = vmul.f32 %v7377_v10, %v2440_v46  ;;  %v2407_v54 = vadd.f32 %v6029_v47, %v5453_v44  ;;  %v6393_v10 = vld [vmem:[%s8295_s2] ss:$0 sm:$0xff]  ;;  %v6369_v44 = vld [vmem:[#allocation8 + $0x1b8] sm:$0xff]  }
 0x27e   : > { %v2898_v40 = vld [vmem:[#allocation2 + $0x152] sm:$0xff]  ;;  %v2899_v51 = vld [vmem:[#allocation2 + $0x15a] sm:$0xff]  ;;  %v6388_v62 = vld [vmem:[#allocation8 + $0x218] sm:$0xff]  }
 0x27f   : > { %v2803_v58 = vld [vmem:[#allocation2 + $0x158] sm:$0xff]  ;;  %2581 = vst [vmem:[#allocation2 + $0x171] sm:$0xff] %v2549_v23  ;;  %v2518_v30 = vadd.f32 %v7383_v3, %v2479_v20  ;;  %v2441_v5 = vadd.f32 %v2407_v54, %v7372_v7  ;;  %v7562_v34 = vpack.c.bf16 %v2899_v51, %v2898_v40  ;;  %v2870_v52 = vpack.c.bf16 %v2549_v23, %v2548_v49  ;;  %v6394_v7 = vld [vmem:[%s8296_s3] ss:$0 sm:$0xff]  ;;  %v2635_v49 = vld [vmem:[#allocation2 + $0x21] sm:$0xff] }
 0x280   : > { %v7564_v56 = vpack.c.bf16 %v2803_v58, %v2802_v39  ;;  %v2685_v0 = vld [vmem:[#allocation2 + $0x3a] sm:$0xff]  ;;  %v2713_v20 = vpack.c.bf16 %v2683_v32, %v2682_v36  ;;  %v2641_v63 = vld [vmem:[#allocation2 + $0x69] sm:$0xff] }
 0x281   : > { %v2550_v43 = vmax.f32 %v2518_v30, 0.0  ;;  %v2480_v47 = vmul.f32 %v6393_v10, %v2441_v5  ;;  %6071 = vmatmul.mubr.bf16.gmra.mxu0 %v7562_v34  ;;  %v2634_v46 = vld [vmem:[#allocation2 + $0x19] sm:$0xff]  ;;  %v7583_v39 = vpack.c.bf16 %v2685_v0, %v2684_v28  ;;  %v2640_v32 = vld [vmem:[#allocation2 + $0x61] sm:$0xff] }
 0x282   : > { %3249 = vmatmul.mubr.bf16.gmra.mxu1 %v7564_v56  ;;  %v2804_v24 = vld [vmem:[#allocation2 + $0x168] sm:$0xff]  ;;  %v2665_v23 = vpack.c.bf16 %v2635_v49, %v2634_v46  ;;  %v6371_v54 = vld [vmem:[#allocation8 + $0x1f0] sm:$0xff]   ;;  %v6373_v5 = vld [vmem:[#allocation8 + $0x1e8] sm:$0xff]   ;;  %v7604_v0 = vpack.c.bf16 %v2641_v63, %v2640_v32 }
 0x283   : > { %2582 = vst [vmem:[#allocation2 + $0x181] sm:$0xff] %v2550_v43  ;;  %v2519_v3 = vadd.f32 %v6394_v7, %v2480_v47  ;;  %3256 = vmatprep.mubr.bf16.mxu1 %v2870_v52  ;;  %v6375_v40 = vld [vmem:[#allocation8 + $0x230] sm:$0xff]   ;;  %v2686_v52 = vld [vmem:[#allocation2 + $0x4a] sm:$0xff]  ;;  %v6380_v10 = vld [vmem:[#allocation8 + $0x228] sm:$0xff]  }
 0x284   : > { %v6372_v51 = vld [vmem:[#allocation8 + $0x1b0] sm:$0xff]   ;;  %v2586_v47 = vld [vmem:[#allocation2 + $0x18] sm:$0xff]  ;;  %v2590_v49 = vld [vmem:[#allocation2 + $0x48] sm:$0xff] }
 0x285   : > { %v2551_v14 = vmax.f32 %v2519_v3, 0.0  ;;  %v2587_v58 = vld [vmem:[#allocation2 + $0x20] sm:$0xff]  ;;  %v2636_v3 = vld [vmem:[#allocation2 + $0x31] sm:$0xff] }
 0x286   : > { %v2900_v60 = vld [vmem:[#allocation2 + $0x16a] sm:$0xff]  ;;  %v2901_v61 = vld [vmem:[#allocation2 + $0x172] sm:$0xff]  ;;  %v2617_v7 = vpack.c.bf16 %v2587_v58, %v2586_v47 }
 0x287   : > { %v2805_v4 = vld [vmem:[#allocation2 + $0x170] sm:$0xff]  ;;  %2583 = vst [vmem:[#allocation2 + $0x189] sm:$0xff] %v2551_v14  ;;  %v7574_v2 = vpack.c.bf16 %v2901_v61, %v2900_v60  ;;  %v2871_v41 = vpack.c.bf16 %v2551_v14, %v2550_v43  ;;  %v2637_v30 = vld [vmem:[#allocation2 + $0x39] sm:$0xff] }
 0x288   : > { %v7576_v17 = vpack.c.bf16 %v2805_v4, %v2804_v24  ;;  %v2687_v43 = vld [vmem:[#allocation2 + $0x52] sm:$0xff]  ;;  %v7587_v24 = vpack.c.bf16 %v2637_v30, %v2636_v3  ;;  %v2646_v47 = vld [vmem:[#allocation2 + $0xa9] sm:$0xff] }
 0x289   : > { %6074 = vmatprep.mubr.bf16.mxu0 %v7574_v2  ;;  %v6374_v14 = vld [vmem:[#allocation8 + $0x1a8] sm:$0xff]   ;;  %v7589_v60 = vpack.c.bf16 %v2687_v43, %v2686_v52  ;;  %v6385_v61 = vld [vmem:[#allocation8 + $0x220] sm:$0xff]  }
 0x28a   : > { %3257 = vmatmul.mubr.bf16.gmra.mxu1 %v7576_v17  ;;  %v2806_v53 = vld [vmem:[#allocation2 + $0x180] sm:$0xff]  ;;  %v6377_v4 = vld [vmem:[#allocation8 + $0x1a0] sm:$0xff]   ;;  %v6384_v28 = vld [vmem:[#allocation8 + $0x188] sm:$0xff]  }
 0x28b   : > { %3264 = vmatprep.mubr.bf16.mxu1 %v2871_v41  ;;  %v2589_v41 = vld [vmem:[#allocation2 + $0x38] sm:$0xff]  ;;  %v6387_v46 = vld [vmem:[#allocation8 + $0x180] sm:$0xff]  }
 0x28c   : > { %v2594_v58 = vld [vmem:[#allocation2 + $0x78] sm:$0xff]  ;;  %v2599_v3 = vld [vmem:[#allocation2 + $0xb0] sm:$0xff] }
 0x28d   : > { %v2597_v43 = vld [vmem:[#allocation2 + $0x98] sm:$0xff] }
 0x28e   : > { %v2902_v22 = vld [vmem:[#allocation2 + $0x182] sm:$0xff]  ;;  %v2903_v29 = vld [vmem:[#allocation2 + $0x18a] sm:$0xff] }
 0x28f   : > { %v2807_v6 = vld [vmem:[#allocation2 + $0x188] sm:$0xff]  ;;  %v2919_v55 = vpack.c.bf16 %v2903_v29, %v2902_v22 }
 0x290   : > { %v2823_v19 = vpack.c.bf16 %v2807_v6, %v2806_v53  ;;  %v7594_v53 = vpack.c.bf16 %v2589_v41, %v2588_v26  ;;  %v2638_v22 = vld [vmem:[#allocation2 + $0x49] sm:$0xff] }
 0x291   : > { %6075 = vmatmul.mubr.bf16.gmra.mxu0 %v2919_v55  ;;  %v6379_v29 = vld [vmem:[#allocation8 + $0x198] sm:$0xff]   ;;  %v7596_v6 = vpack.c.bf16 %v2639_v48, %v2638_v22  ;;  %v6382_v55 = vld [vmem:[#allocation8 + $0x190] sm:$0xff]  }
 0x292   : > { %3265 = vmatmul.mubr.bf16.gmra.mxu1 %v2823_v19  ;;  %3610 = vmatprep.mubr.bf16.mxu0 %v2664_v11  ;;  %v6381_v11 = vld [vmem:[#allocation8 + $0x1d0] sm:$0xff]   ;;  %v2591_v19 = vld [vmem:[#allocation2 + $0x50] sm:$0xff] }
 0x293   : > { %6094 = vmatprep.mubr.bf16.mxu1 %v2712_v12  ;;  %v6383_v12 = vld [vmem:[#allocation8 + $0x1c8] sm:$0xff]   ;;  %v7602_v36 = vpack.c.bf16 %v2591_v19, %v2590_v49 }
 0x294   : > { %v2655_v19 = vld [vmem:[#allocation2 + $0x111] sm:$0xff] }
 0x299   : > { %3611 = vmatmul.mubr.bf16.vlgmr.msra.gmra.mxu0 %v2616_v50  ;;  %v6390_v50 = vld [vmem:[#allocation8 + $0x208] sm:$0xff]  }
 0x29a   : > { %3618 = vmatprep.mubr.bf16.mxu0 %v2665_v23  ;;  %6095 = vmatmul.mubr.bf16.vlgmr.msra.gmra.mxu1 %v2713_v20  ;;  %v2643_v23 = vld [vmem:[#allocation2 + $0x81] sm:$0xff] }
 0x29b   : > { %6098 = vmatprep.mubr.bf16.mxu1 %v7583_v39  ;;  %5751 = vmatpush3.bf16.msra.mxu1 %v6369_v44  ;;  %v2593_v44 = vld [vmem:[#allocation2 + $0x68] sm:$0xff]  ;;  %v2592_v20 = vld [vmem:[#allocation2 + $0x60] sm:$0xff] }
 0x29c   : > { %6127 = vmatpush3.bf16.msra.mxu0 %v7451_v59  ;;  %5752 = vmatprep.subr.bf16.mxu1 %v6371_v54  ;;  %v6376_v59 = vld [vmem:[#allocation8 + $0x1e0] sm:$0xff]   ;;  %v7610_v54 = vpack.c.bf16 %v2593_v44, %v2592_v20  ;;  %v2656_v20 = vld [vmem:[#allocation2 + $0x121] sm:$0xff] }
 0x29d   : > { %6128 = vmatprep.subr.bf16.mxu0 %v6375_v40 }
 0x29f   : > { %5753 = vmatpush3.bf16.msra.mxu1 %v6372_v51 }
 0x2a0   : > { %5754 = vmatprep.subr.bf16.mxu1 %v6373_v5  ;;  %6129 = vmatpush3.bf16.msra.mxu0 %v6375_v40  ;;  %v2642_v40 = vld [vmem:[#allocation2 + $0x79] sm:$0xff]  ;;  %v2644_v5 = vld [vmem:[#allocation2 + $0x91] sm:$0xff] }
 0x2a1   : > { %3619 = vmatmul.mubr.bf16.gmra.mxu0 %v2617_v7  ;;  %6130 = vmatprep.subr.bf16.mxu0 %v6380_v10  ;;  %v7612_v51 = vpack.c.bf16 %v2643_v23, %v2642_v40 }
 0x2a2   : > { %3626 = vmatprep.mubr.bf16.mxu0 %v7587_v24  ;;  %6099 = vmatmul.mubr.bf16.gmra.mxu1 %v7589_v60 }
 0x2a3   : > { %6102 = vmatprep.mubr.bf16.mxu1 %v7430_v42  ;;  %5755 = vmatpush3.bf16.msra.mxu1 %v6374_v14  ;;  %v6389_v42 = vld [vmem:[#allocation8 + $0x210] sm:$0xff]   ;;  %v2598_v14 = vld [vmem:[#allocation2 + $0xa8] sm:$0xff] }
 0x2a4   : > { %5756 = vmatprep.subr.bf16.mxu1 %v6376_v59  ;;  %6131 = vmatpush3.bf16.msra.mxu0 %v6380_v10  ;;  %v2596_v10 = vld [vmem:[#allocation2 + $0x90] sm:$0xff]  ;;  %v2648_v59 = vld [vmem:[#allocation2 + $0xc1] sm:$0xff] }
 0x2a5   : > { %6132 = vmatprep.subr.bf16.mxu0 %v6385_v61 }
 0x2a7   : > { %5757 = vmatpush3.bf16.msra.mxu1 %v6377_v4  ;;  %v2651_v4 = vld [vmem:[#allocation2 + $0xe1] sm:$0xff] }
 0x2a8   : > { %5758 = vmatprep.subr.bf16.mxu1 %v6378_v16  ;;  %6133 = vmatpush3.bf16.msra.mxu0 %v6385_v61 }
 0x2a9   : > { %3627 = vmatmul.mubr.bf16.gmra.mxu0 %v7594_v53  ;;  %6134 = vmatprep.subr.bf16.mxu0 %v6388_v62 }
 0x2aa   : > { %3634 = vmatprep.mubr.bf16.mxu0 %v7596_v6  ;;  %6103 = vmatmul.mubr.bf16.gmra.mxu1 %v7442_v57  ;;  %v6386_v57 = vld [vmem:[#allocation8 + $0x1c0] sm:$0xff]  }
 0x2ab   : > { %6106 = vmatprep.mubr.bf16.mxu1 %v7457_v21  ;;  %5759 = vmatpush3.bf16.msra.mxu1 %v6379_v29  ;;  %v6391_v21 = vld [vmem:[#allocation8 + $0x200] sm:$0xff]  }
 0x2ac   : > { %5760 = vmatprep.subr.bf16.mxu1 %v6381_v11  ;;  %6135 = vmatpush3.bf16.msra.mxu0 %v6388_v62  ;;  %v2653_v62 = vld [vmem:[#allocation2 + $0xf9] sm:$0xff] }
 0x2ad   : > { %6136 = vmatprep.subr.bf16.mxu0 %v6389_v42 }
 0x2af   : > { %5761 = vmatpush3.bf16.msra.mxu1 %v6382_v55 }
 0x2b0   : > { %5762 = vmatprep.subr.bf16.mxu1 %v6383_v12  ;;  %6137 = vmatpush3.bf16.msra.mxu0 %v6389_v42 }
 0x2b1   : > { %3635 = vmatmul.mubr.bf16.gmra.mxu0 %v7602_v36  ;;  %6138 = vmatprep.subr.bf16.mxu0 %v6390_v50 }
 0x2b2   : > { %3642 = vmatprep.mubr.bf16.mxu0 %v7604_v0  ;;  %6107 = vmatmul.mubr.bf16.gmra.mxu1 %v7468_v35  ;;  %v2595_v35 = vld [vmem:[#allocation2 + $0x80] sm:$0xff] }
 0x2b3   : > { %6110 = vmatprep.mubr.bf16.mxu1 %v7480_v27  ;;  %5763 = vmatpush3.bf16.msra.mxu1 %v6384_v28  ;;  %v2645_v27 = vld [vmem:[#allocation2 + $0x99] sm:$0xff]  ;;  %v7618_v30 = vpack.c.bf16 %v2595_v35, %v2594_v58 }
 0x2b4   : > { %5764 = vmatprep.subr.bf16.mxu1 %v6386_v57  ;;  %6139 = vmatpush3.bf16.msra.mxu0 %v6390_v50  ;;  %v7620_v52 = vpack.c.bf16 %v2645_v27, %v2644_v5  ;;  %v2654_v50 = vld [vmem:[#allocation2 + $0x109] sm:$0xff] }
 0x2b5   : > { %6140 = vmatprep.subr.bf16.mxu0 %v6391_v21  ;;  %v7660_v32 = vpack.c.bf16 %v2655_v19, %v2654_v50  ;;  %v2662_v50 = vld [vmem:[#allocation2 + $0x169] sm:$0xff] }
 0x2b7   : > { %5765 = vmatpush3.bf16.msra.mxu1 %v6387_v46  ;;  %v2657_v46 = vld [vmem:[#allocation2 + $0x129] sm:$0xff] }
 0x2b8   : > { %6141 = vmatpush3.bf16.msra.mxu0 %v6391_v21  ;;  %v7670_v35 = vpack.c.bf16 %v2657_v46, %v2656_v20 }
 0x2b9   : > { %3643 = vmatmul.mubr.bf16.gmra.mxu0 %v7610_v54 }
 0x2ba   : > { %3650 = vmatprep.mubr.bf16.mxu0 %v7612_v51  ;;  %6111 = vmatmul.mubr.bf16.gmra.mxu1 %v7493_v25  ;;  %v2647_v25 = vld [vmem:[#allocation2 + $0xb1] sm:$0xff] }
 0x2bb   : > { %6114 = vmatprep.mubr.bf16.mxu1 %v7508_v18  ;;  %v7626_v18 = vpack.c.bf16 %v2597_v43, %v2596_v10  ;;  %v7628_v7 = vpack.c.bf16 %v2647_v25, %v2646_v47  ;;  %v2659_v25 = vld [vmem:[#allocation2 + $0x141] sm:$0xff] }
 0x2c1   : > { %3651 = vmatmul.mubr.bf16.gmra.mxu0 %v7618_v30 }
 0x2c2   : > { %3658 = vmatprep.mubr.bf16.mxu0 %v7620_v52  ;;  %6115 = vmatmul.mubr.bf16.gmra.mxu1 %v7521_v31  ;;  %v2649_v31 = vld [vmem:[#allocation2 + $0xc9] sm:$0xff] }
 0x2c3   : > { %6118 = vmatprep.mubr.bf16.mxu1 %v7536_v15  ;;  %v7634_v15 = vpack.c.bf16 %v2599_v3, %v2598_v14  ;;  %v7636_v61 = vpack.c.bf16 %v2649_v31, %v2648_v59  ;;  %v2658_v3 = vld [vmem:[#allocation2 + $0x139] sm:$0xff] }
 0x2c4   : > { %v7682_v14 = vpack.c.bf16 %v2659_v25, %v2658_v3 }
 0x2c9   : > { %3659 = vmatmul.mubr.bf16.gmra.mxu0 %v7626_v18 }
 0x2ca   : > { %3666 = vmatprep.mubr.bf16.mxu0 %v7628_v7  ;;  %6119 = vmatmul.mubr.bf16.gmra.mxu1 %v7549_v13  ;;  %v2650_v13 = vld [vmem:[#allocation2 + $0xd9] sm:$0xff] }
 0x2cb   : > { %6122 = vmatprep.mubr.bf16.mxu1 %v7562_v34  ;;  %v7642_v41 = vpack.c.bf16 %v2651_v4, %v2650_v13 }
 0x2d1   : > { %3667 = vmatmul.mubr.bf16.gmra.mxu0 %v7634_v15 }
 0x2d2   : > { %3674 = vmatprep.mubr.bf16.mxu0 %v7636_v61  ;;  %6123 = vmatmul.mubr.bf16.gmra.mxu1 %v7574_v2  ;;  %v2652_v2 = vld [vmem:[#allocation2 + $0xf1] sm:$0xff] }
 0x2d3   : > { %4268 = vmatprep.mubr.bf16.mxu1 %v7587_v24  ;;  %v7648_v24 = vpack.c.bf16 %v2653_v62, %v2652_v2  ;;  %v2660_v62 = vld [vmem:[#allocation2 + $0x151] sm:$0xff] }
 0x2d9   : > { %3675 = vmatmul.mubr.bf16.gmra.mxu0 %v7482_v37 }
 0x2da   : > { %v5494_v34 = vpop.f32.mrf.mxu1  ;;  %3682 = vmatprep.mubr.bf16.mxu0 %v7642_v41  ;;  %4269 = vmatmul.mubr.bf16.vlgmr.msra.gmra.mxu1 %v7594_v53 }
 0x2db   : > { %4276 = vmatprep.mubr.bf16.mxu1 %v7596_v6 }
 0x2dc   : > { %v5495_v16 = vpop.f32.mrf.mxu1 }
 0x2dd   : > { %v5496_v48 = vadd.f32 %v5495_v16, %v5494_v34  ;;  %v2661_v34 = vld [vmem:[#allocation2 + $0x159] sm:$0xff] }
 0x2de   : > { %v5497_v26 = vpop.f32.mrf.mxu1  ;;  %v7692_v2 = vpack.c.bf16 %v2661_v34, %v2660_v62 }
 0x2e0   : > { %v5498_v22 = vpop.f32.mrf.mxu1 }
 0x2e1   : > { %v7650_v29 = vadd.f32 %v5498_v22, %v5497_v26  ;;  %v6048_v11 = vpop.f32.mrf.mxu0  ;;  %3683 = vmatmul.mubr.bf16.gmra.mxu0 %v7497_v1 }
 0x2e2   : > { %v5500_v37 = vpop.f32.mrf.mxu1  ;;  %3690 = vmatprep.mubr.bf16.mxu0 %v7648_v24  ;;  %4277 = vmatmul.mubr.bf16.gmra.mxu1 %v7602_v36 }
 0x2e3   : > { %v3307_v53 = vpop.f32.mrf.mxu0  ;;  %4284 = vmatprep.mubr.bf16.mxu1 %v7604_v0 }
 0x2e4   : > { %v7656_v6 = vadd.f32 %v5496_v48, %v3307_v53  ;;  %v5501_v42 = vpop.f32.mrf.mxu1 }
 0x2e5   : > { %v5502_v55 = vadd.f32 %v5501_v42, %v5500_v37  ;;  %v6049_v28 = vpop.f32.mrf.mxu0  ;;  %v2663_v42 = vld [vmem:[#allocation2 + $0x171] sm:$0xff] }
 0x2e6   : > { %v5503_v12 = vpop.f32.mrf.mxu1 }
 0x2e7   : > { %v7658_v63 = vadd.f32 %v6048_v11, %v5502_v55  ;;  %v7668_v23 = vpop.f32.mrf.mxu0  ;;  %v3913_v55 = vld [vmem:[#allocation2 + $0xc8] sm:$0xff] }
 0x2e8   : > { %v5504_v49 = vpop.f32.mrf.mxu1 }
 0x2e9   : > { %v5505_v1 = vadd.f32 %v5504_v49, %v5503_v12  ;;  %3691 = vmatmul.mubr.bf16.gmra.mxu0 %v7510_v33  ;;  %v3912_v49 = vld [vmem:[#allocation2 + $0xc0] sm:$0xff] }
 0x2ea   : > { %v5506_v36 = vpop.f32.mrf.mxu1  ;;  %3698 = vmatprep.mubr.bf16.mxu0 %v7660_v32  ;;  %4285 = vmatmul.mubr.bf16.gmra.mxu1 %v7610_v54 }
 0x2eb   : > { %v7665_v0 = vadd.f32 %v6049_v28, %v5505_v1  ;;  %4292 = vmatprep.mubr.bf16.mxu1 %v7612_v51  ;;  %v7704_v1 = vpack.c.bf16 %v2663_v42, %v2662_v50  ;;  %v3938_v28 = vpack.c.bf16 %v3913_v55, %v3912_v49  ;;  %v3919_v55 = vld [vmem:[#allocation2 + $0x110] sm:$0xff]  ;;  %v4005_v50 = vld [vmem:[#allocation2 + $0x9a] sm:$0xff] }
 0x2ec   : > { %v5507_v57 = vpop.f32.mrf.mxu1 }
 0x2ed   : > { %v5508_v21 = vadd.f32 %v5507_v57, %v5506_v36 }
 0x2ee   : > { %v5509_v44 = vpop.f32.mrf.mxu1 }
 0x2f0   : > { %v5510_v40 = vpop.f32.mrf.mxu1 }
 0x2f1   : > { %v7672_v33 = vadd.f32 %v5510_v40, %v5509_v44  ;;  %v6052_v27 = vpop.f32.mrf.mxu0  ;;  %3699 = vmatmul.mubr.bf16.gmra.mxu0 %v7525_v38  ;;  %v3915_v44 = vld [vmem:[#allocation2 + $0xe0] sm:$0xff] }
 0x2f2   : > { %v5512_v54 = vpop.f32.mrf.mxu1  ;;  %3706 = vmatprep.mubr.bf16.mxu0 %v7670_v35  ;;  %4293 = vmatmul.mubr.bf16.gmra.mxu1 %v7618_v30 }
 0x2f3   : > { %v3323_v51 = vpop.f32.mrf.mxu0  ;;  %4300 = vmatprep.mubr.bf16.mxu1 %v7620_v52 }
 0x2f4   : > { %v7678_v58 = vadd.f32 %v5508_v21, %v3323_v51  ;;  %v5513_v5 = vpop.f32.mrf.mxu1 }
 0x2f5   : > { %v5514_v43 = vadd.f32 %v5513_v5, %v5512_v54  ;;  %v6053_v59 = vpop.f32.mrf.mxu0 }
 0x2f6   : > { %v5515_v10 = vpop.f32.mrf.mxu1 }
 0x2f7   : > { %v7680_v47 = vadd.f32 %v6052_v27, %v5514_v43  ;;  %v7690_v48 = vpop.f32.mrf.mxu0  ;;  %v3914_v27 = vld [vmem:[#allocation2 + $0xd8] sm:$0xff] }
 0x2f8   : > { %v5516_v31 = vpop.f32.mrf.mxu1  ;;  %v3939_v51 = vpack.c.bf16 %v3915_v44, %v3914_v27  ;;  %v4006_v27 = vld [vmem:[#allocation2 + $0xaa] sm:$0xff] }
 0x2f9   : > { %v5517_v38 = vadd.f32 %v5516_v31, %v5515_v10  ;;  %3707 = vmatmul.mubr.bf16.gmra.mxu0 %v7538_v45 }
 0x2fa   : > { %v5518_v30 = vpop.f32.mrf.mxu1  ;;  %3714 = vmatprep.mubr.bf16.mxu0 %v7682_v14  ;;  %4301 = vmatmul.mubr.bf16.gmra.mxu1 %v7626_v18 }
 0x2fb   : > { %v7687_v52 = vadd.f32 %v6053_v59, %v5517_v38  ;;  %4308 = vmatprep.mubr.bf16.mxu1 %v7628_v7  ;;  %v3917_v38 = vld [vmem:[#allocation2 + $0xf8] sm:$0xff]  ;;  %v4000_v59 = vld [vmem:[#allocation2 + $0x62] sm:$0xff] }
 0x2fc   : > { %v5519_v4 = vpop.f32.mrf.mxu1 }
 0x2fd   : > { %v5520_v13 = vadd.f32 %v5519_v4, %v5518_v30  ;;  %v4001_v30 = vld [vmem:[#allocation2 + $0x6a] sm:$0xff] }
 0x2fe   : > { %v5521_v16 = vpop.f32.mrf.mxu1 }
 0x300   : > { %v5522_v26 = vpop.f32.mrf.mxu1 }
 0x301   : > { %v7694_v45 = vadd.f32 %v5522_v26, %v5521_v16  ;;  %v6056_v22 = vpop.f32.mrf.mxu0  ;;  %3715 = vmatmul.mubr.bf16.gmra.mxu0 %v7551_v9  ;;  %v4030_v26 = vpack.c.bf16 %v4001_v30, %v4000_v59  ;;  %v3920_v59 = vld [vmem:[#allocation2 + $0x120] sm:$0xff] }
 0x302   : > { %v5524_v18 = vpop.f32.mrf.mxu1  ;;  %3722 = vmatprep.mubr.bf16.mxu0 %v7692_v2  ;;  %4309 = vmatmul.mubr.bf16.gmra.mxu1 %v7634_v15 }
 0x303   : > { %v3339_v7 = vpop.f32.mrf.mxu0  ;;  %4316 = vmatprep.mubr.bf16.mxu1 %v7636_v61 }
 0x304   : > { %v7700_v11 = vadd.f32 %v5520_v13, %v3339_v7  ;;  %v5525_v37 = vpop.f32.mrf.mxu1 }
 0x305   : > { %v5526_v53 = vadd.f32 %v5525_v37, %v5524_v18  ;;  %v6057_v15 = vpop.f32.mrf.mxu0  ;;  %v4002_v37 = vld [vmem:[#allocation2 + $0x7a] sm:$0xff] }
 0x306   : > { %v5527_v19 = vpop.f32.mrf.mxu1 }
 0x307   : > { %v7702_v12 = vadd.f32 %v6056_v22, %v5526_v53  ;;  %v7711_v40 = vpop.f32.mrf.mxu0  ;;  %v4003_v53 = vld [vmem:[#allocation2 + $0x82] sm:$0xff] }
 0x308   : > { %v5528_v9 = vpop.f32.mrf.mxu1 }
 0x309   : > { %v5529_v36 = vadd.f32 %v5528_v9, %v5527_v19  ;;  %3723 = vmatmul.mubr.bf16.gmra.mxu0 %v7564_v56  ;;  %v4004_v19 = vld [vmem:[#allocation2 + $0x92] sm:$0xff]  ;;  %v4031_v9 = vpack.c.bf16 %v4003_v53, %v4002_v37  ;;  %v3923_v37 = vld [vmem:[#allocation2 + $0x140] sm:$0xff] }
 0x30a   : > { %v5530_v61 = vpop.f32.mrf.mxu1  ;;  %3730 = vmatprep.mubr.bf16.mxu0 %v7704_v1  ;;  %4317 = vmatmul.mubr.bf16.gmra.mxu1 %v3938_v28  ;;  %v3918_v28 = vld [vmem:[#allocation2 + $0x108] sm:$0xff]  ;;  %v4012_v53 = vld [vmem:[#allocation2 + $0xf2] sm:$0xff] }
 0x30b   : > { %v7708_v57 = vadd.f32 %v6057_v15, %v5529_v36  ;;  %4324 = vmatprep.mubr.bf16.mxu1 %v7642_v41  ;;  %v3941_v15 = vpack.c.bf16 %v3919_v55, %v3918_v28 }
 0x30c   : > { %v5531_v21 = vpop.f32.mrf.mxu1 }
 0x30d   : > { %v5532_v46 = vadd.f32 %v5531_v21, %v5530_v61 }
 0x30e   : > { %v5533_v20 = vpop.f32.mrf.mxu1 }
 0x310   : > { %v5534_v54 = vpop.f32.mrf.mxu1 }
 0x311   : > { %v5535_v5 = vadd.f32 %v5534_v54, %v5533_v20  ;;  %v6060_v56 = vpop.f32.mrf.mxu0  ;;  %3731 = vmatmul.mubr.bf16.gmra.mxu0 %v7576_v17  ;;  %v3916_v17 = vld [vmem:[#allocation2 + $0xf0] sm:$0xff] }
 0x312   : > { %v5536_v43 = vpop.f32.mrf.mxu1  ;;  %4325 = vmatmul.mubr.bf16.gmra.mxu1 %v3939_v51  ;;  %6142 = vmatprep.mubr.bf16.mxu0 %v7583_v39  ;;  %v3940_v39 = vpack.c.bf16 %v3917_v38, %v3916_v17  ;;  %v4007_v54 = vld [vmem:[#allocation2 + $0xb2] sm:$0xff] }
 0x313   : > { %v3355_v25 = vpop.f32.mrf.mxu0  ;;  %4332 = vmatprep.mubr.bf16.mxu1 %v7648_v24  ;;  %v4033_v38 = vpack.c.bf16 %v4007_v54, %v4006_v27  ;;  %v3925_v54 = vld [vmem:[#allocation2 + $0x158] sm:$0xff] }
 0x314   : > { %v7716_v41 = vadd.f32 %v5532_v46, %v3355_v25  ;;  %v5537_v10 = vpop.f32.mrf.mxu1  ;;  %v4009_v25 = vld [vmem:[#allocation2 + $0xca] sm:$0xff] }
 0x315   : > { %v5538_v3 = vadd.f32 %v5537_v10, %v5536_v43  ;;  %v6061_v31 = vpop.f32.mrf.mxu0  ;;  %v4008_v43 = vld [vmem:[#allocation2 + $0xc2] sm:$0xff] }
 0x316   : > { %v5539_v4 = vpop.f32.mrf.mxu1 }
 0x317   : > { %v7718_v13 = vadd.f32 %v6060_v56, %v5538_v3  ;;  %v3358_v34 = vpop.f32.mrf.mxu0  ;;  %v3921_v56 = vld [vmem:[#allocation2 + $0x128] sm:$0xff] }
 0x318   : > { %v7720_v16 = vadd.f32 %v5535_v5, %v3358_v34  ;;  %v5540_v62 = vpop.f32.mrf.mxu1  ;;  %v4034_v34 = vpack.c.bf16 %v4009_v25, %v4008_v43 }
 0x319   : > { %v5541_v22 = vadd.f32 %v5540_v62, %v5539_v4  ;;  %6143 = vmatmul.mubr.bf16.vlgmr.msra.gmra.mxu0 %v7589_v60  ;;  %v4032_v60 = vpack.c.bf16 %v4005_v50, %v4004_v19  ;;  %v3922_v50 = vld [vmem:[#allocation2 + $0x138] sm:$0xff] }
 0x31a   : > { %v5542_v24 = vpop.f32.mrf.mxu1  ;;  %4333 = vmatmul.mubr.bf16.gmra.mxu1 %v3940_v39  ;;  %6146 = vmatprep.mubr.bf16.mxu0 %v4030_v26 }
 0x31b   : > { %v7723_v18 = vadd.f32 %v6061_v31, %v5541_v22  ;;  %4340 = vmatprep.mubr.bf16.mxu1 %v7660_v32  ;;  %v4010_v22 = vld [vmem:[#allocation2 + $0xda] sm:$0xff] }
 0x31c   : > { %v5543_v7 = vpop.f32.mrf.mxu1 }
 0x31d   : > { %v5544_v42 = vadd.f32 %v5543_v7, %v5542_v24  ;;  %v4011_v24 = vld [vmem:[#allocation2 + $0xe2] sm:$0xff] }
 0x31e   : > { %v5545_v49 = vpop.f32.mrf.mxu1  ;;  %v4035_v19 = vpack.c.bf16 %v4011_v24, %v4010_v22  ;;  %v4019_v22 = vld [vmem:[#allocation2 + $0x142] sm:$0xff] }
 0x320   : > { %v5546_v36 = vpop.f32.mrf.mxu1 }
 0x321   : > { %v5547_v61 = vadd.f32 %v5546_v36, %v5545_v49  ;;  %v6064_v21 = vpop.f32.mrf.mxu0  ;;  %6147 = vmatmul.mubr.bf16.gmra.mxu0 %v4031_v9  ;;  %v3943_v9 = vpack.c.bf16 %v3923_v37, %v3922_v50  ;;  %v4020_v37 = vld [vmem:[#allocation2 + $0x152] sm:$0xff]  ;;  %v3926_v50 = vld [vmem:[#allocation2 + $0x168] sm:$0xff] }
 0x322   : > { %v5548_v46 = vpop.f32.mrf.mxu1  ;;  %4341 = vmatmul.mubr.bf16.gmra.mxu1 %v3941_v15  ;;  %6150 = vmatprep.mubr.bf16.mxu0 %v4032_v60 }
 0x323   : > { %v3371_v32 = vpop.f32.mrf.mxu0  ;;  %4348 = vmatprep.mubr.bf16.mxu1 %v7670_v35  ;;  %v3942_v35 = vpack.c.bf16 %v3921_v56, %v3920_v59 }
 0x324   : > { %v7727_v44 = vadd.f32 %v5544_v42, %v3371_v32  ;;  %v5549_v20 = vpop.f32.mrf.mxu1  ;;  %v4013_v42 = vld [vmem:[#allocation2 + $0xfa] sm:$0xff]  ;;  %v4015_v32 = vld [vmem:[#allocation2 + $0x112] sm:$0xff] }
 0x325   : > { %v5550_v51 = vadd.f32 %v5549_v20, %v5548_v46  ;;  %v6065_v5 = vpop.f32.mrf.mxu0  ;;  %v4036_v28 = vpack.c.bf16 %v4013_v42, %v4012_v53  ;;  %v4014_v46 = vld [vmem:[#allocation2 + $0x10a] sm:$0xff]  ;;  %v4021_v53 = vld [vmem:[#allocation2 + $0x15a] sm:$0xff] }
 0x326   : > { %v5551_v10 = vpop.f32.mrf.mxu1 }
 0x327   : > { %v7729_v3 = vadd.f32 %v6064_v21, %v5550_v51  ;;  %v3374_v31 = vpop.f32.mrf.mxu0  ;;  %v4016_v51 = vld [vmem:[#allocation2 + $0x122] sm:$0xff] }
 0x328   : > { %v7731_v30 = vadd.f32 %v5547_v61, %v3374_v31  ;;  %v5552_v4 = vpop.f32.mrf.mxu1  ;;  %v3924_v31 = vld [vmem:[#allocation2 + $0x150] sm:$0xff] }
 0x329   : > { %v5553_v17 = vadd.f32 %v5552_v4, %v5551_v10  ;;  %6151 = vmatmul.mubr.bf16.gmra.mxu0 %v4033_v38  ;;  %v4037_v10 = vpack.c.bf16 %v4015_v32, %v4014_v46  ;;  %v4022_v46 = vld [vmem:[#allocation2 + $0x16a] sm:$0xff] }
 0x32a   : > { %v5554_v62 = vpop.f32.mrf.mxu1  ;;  %4349 = vmatmul.mubr.bf16.gmra.mxu1 %v3942_v35  ;;  %6154 = vmatprep.mubr.bf16.mxu0 %v4034_v34 }
 0x32b   : > { %v7733_v39 = vadd.f32 %v6065_v5, %v5553_v17  ;;  %4356 = vmatprep.mubr.bf16.mxu1 %v7682_v14  ;;  %v4017_v5 = vld [vmem:[#allocation2 + $0x12a] sm:$0xff] }
 0x32c   : > { %v5555_v26 = vpop.f32.mrf.mxu1  ;;  %v4038_v4 = vpack.c.bf16 %v4017_v5, %v4016_v51  ;;  %v3979_v51 = vld [vmem:[#allocation2 + $0x1a1] sm:$0xff] }
 0x32d   : > { %v5556_v7 = vadd.f32 %v5555_v26, %v5554_v62  ;;  %v4018_v26 = vld [vmem:[#allocation2 + $0x13a] sm:$0xff] }
 0x32e   : > { %v5557_v55 = vpop.f32.mrf.mxu1 }
 0x330   : > { %v5558_v49 = vpop.f32.mrf.mxu1 }
 0x331   : > { %v5559_v36 = vadd.f32 %v5558_v49, %v5557_v55  ;;  %v6068_v15 = vpop.f32.mrf.mxu0  ;;  %6155 = vmatmul.mubr.bf16.gmra.mxu0 %v4035_v19  ;;  %v3977_v55 = vld [vmem:[#allocation2 + $0x189] sm:$0xff]  ;;  %v4039_v19 = vpack.c.bf16 %v4019_v22, %v4018_v26 }
 0x332   : > { %v5560_v60 = vpop.f32.mrf.mxu1  ;;  %4357 = vmatmul.mubr.bf16.gmra.mxu1 %v3943_v9  ;;  %6158 = vmatprep.mubr.bf16.mxu0 %v4036_v28  ;;  %v4040_v28 = vpack.c.bf16 %v4021_v53, %v4020_v37 }
 0x333   : > { %v3387_v14 = vpop.f32.mrf.mxu0  ;;  %4364 = vmatprep.mubr.bf16.mxu1 %v7692_v2  ;;  %v3944_v2 = vpack.c.bf16 %v3925_v54, %v3924_v31  ;;  %v3978_v54 = vld [vmem:[#allocation2 + $0x199] sm:$0xff]  ;;  %v4025_v31 = vld [vmem:[#allocation2 + $0x18a] sm:$0xff] }
 0x334   : > { %v7737_v61 = vadd.f32 %v5556_v7, %v3387_v14  ;;  %v5561_v21 = vpop.f32.mrf.mxu1  ;;  %v3927_v7 = vld [vmem:[#allocation2 + $0x170] sm:$0xff] }
 0x335   : > { %v5562_v20 = vadd.f32 %v5561_v21, %v5560_v60  ;;  %v6069_v27 = vpop.f32.mrf.mxu0  ;;  %v3945_v9 = vpack.c.bf16 %v3927_v7, %v3926_v50  ;;  %v3930_v50 = vld [vmem:[#allocation2 + $0x198] sm:$0xff] }
 0x336   : > { %v5563_v56 = vpop.f32.mrf.mxu1 }
 0x337   : > { %v7739_v43 = vadd.f32 %v6068_v15, %v5562_v20  ;;  %v3390_v25 = vpop.f32.mrf.mxu0 }
 0x338   : > { %v7741_v38 = vadd.f32 %v5559_v36, %v3390_v25  ;;  %v5564_v59 = vpop.f32.mrf.mxu1  ;;  %v3976_v36 = vld [vmem:[#allocation2 + $0x181] sm:$0xff] }
 0x339   : > { %v5565_v35 = vadd.f32 %v5564_v59, %v5563_v56  ;;  %6159 = vmatmul.mubr.bf16.gmra.mxu0 %v4037_v10  ;;  %v3994_v14 = vpack.c.bf16 %v3977_v55, %v3976_v36  ;;  %v3929_v25 = vld [vmem:[#allocation2 + $0x188] sm:$0xff] }
 0x33a   : > { %v5566_v34 = vpop.f32.mrf.mxu1  ;;  %4365 = vmatmul.mubr.bf16.gmra.mxu1 %v3944_v2  ;;  %6162 = vmatprep.mubr.bf16.mxu0 %v4038_v4  ;;  %v4024_v10 = vld [vmem:[#allocation2 + $0x182] sm:$0xff] }
 0x33b   : > { %v7743_v17 = vadd.f32 %v6069_v27, %v5565_v35  ;;  %4372 = vmatprep.mubr.bf16.mxu1 %v7704_v1  ;;  %v4023_v27 = vld [vmem:[#allocation2 + $0x172] sm:$0xff]  ;;  %v4042_v7 = vpack.c.bf16 %v4025_v31, %v4024_v10  ;;  %v4027_v55 = vld [vmem:[#allocation2 + $0x1a2] sm:$0xff] }
 0x33c   : > { %v5567_v62 = vpop.f32.mrf.mxu1  ;;  %v4041_v35 = vpack.c.bf16 %v4023_v27, %v4022_v46 }
 0x33d   : > { %v5568_v24 = vadd.f32 %v5567_v62, %v5566_v34  ;;  %v3928_v34 = vld [vmem:[#allocation2 + $0x180] sm:$0xff]  ;;  %v3995_v62 = vpack.c.bf16 %v3979_v51, %v3978_v54 }
 0x33e   : > { %v5569_v42 = vpop.f32.mrf.mxu1 }
 0x340   : > { %v5570_v49 = vpop.f32.mrf.mxu1 }
 0x341   : > { %v5571_v15 = vadd.f32 %v5570_v49, %v5569_v42  ;;  %v6072_v60 = vpop.f32.mrf.mxu0  ;;  %6163 = vmatmul.mubr.bf16.gmra.mxu0 %v4039_v19  ;;  %v4026_v42 = vld [vmem:[#allocation2 + $0x19a] sm:$0xff] }
 0x342   : > { %v5572_v1 = vpop.f32.mrf.mxu1  ;;  %4373 = vmatmul.mubr.bf16.gmra.mxu1 %v3945_v9  ;;  %6166 = vmatprep.mubr.bf16.mxu0 %v4040_v28  ;;  %v4043_v28 = vpack.c.bf16 %v4027_v55, %v4026_v42  ;;  %v3311_v42 = vadd.f32 %v7650_v29, %v7668_v23 }
 0x343   : > { %v3403_v21 = vpop.f32.mrf.mxu0  ;;  %4380 = vmatprep.mubr.bf16.mxu1 %v3994_v14 }
 0x344   : > { %v7746_v32 = vadd.f32 %v5568_v24, %v3403_v21  ;;  %v5573_v20 = vpop.f32.mrf.mxu1  ;;  %v3946_v24 = vpack.c.bf16 %v3929_v25, %v3928_v34 }
 0x345   : > { %v5574_v5 = vadd.f32 %v5573_v20, %v5572_v1  ;;  %v6073_v56 = vpop.f32.mrf.mxu0 }
 0x346   : > { %v5575_v59 = vpop.f32.mrf.mxu1 }
 0x347   : > { %v7748_v2 = vadd.f32 %v6072_v60, %v5574_v5  ;;  %v3406_v4 = vpop.f32.mrf.mxu0 }
 0x348   : > { %v7750_v26 = vadd.f32 %v5571_v15, %v3406_v4  ;;  %v5576_v22 = vpop.f32.mrf.mxu1  ;;  %v3947_v15 = vpack.c.bf16 %v7580_v8, %v3930_v50 }
 0x349   : > { %v5577_v37 = vadd.f32 %v5576_v22, %v5575_v59  ;;  %6167 = vmatmul.mubr.bf16.gmra.mxu0 %v4041_v35 }
 0x34a   : > { %v5578_v53 = vpop.f32.mrf.mxu1  ;;  %4381 = vmatmul.mubr.bf16.gmra.mxu1 %v3946_v24  ;;  %6170 = vmatprep.mubr.bf16.mxu0 %v4042_v7 }
 0x34b   : > { %v7752_v19 = vadd.f32 %v6073_v56, %v5577_v37  ;;  %4388 = vmatprep.mubr.bf16.mxu1 %v3995_v62 }
 0x34c   : > { %v5579_v49 = vpop.f32.mrf.mxu1 }
 0x34d   : > { %v5580_v9 = vadd.f32 %v5579_v49, %v5578_v53 }
 0x34e   : > { %v5581_v36 = vpop.f32.mrf.mxu1 }
 0x350   : > { %v5582_v60 = vpop.f32.mrf.mxu1 }
 0x351   : > { %v5583_v14 = vadd.f32 %v5582_v60, %v5581_v36  ;;  %v6076_v1 = vpop.f32.mrf.mxu0  ;;  %6171 = vmatmul.mubr.bf16.gmra.mxu0 %v4043_v28 }
 0x352   : > { %v5584_v21 = vpop.f32.mrf.mxu1  ;;  %4389 = vmatmul.mubr.bf16.gmra.mxu1 %v3947_v15 }
 0x353   : > { %v3419_v46 = vpop.f32.mrf.mxu0 }
 0x354   : > { %v7755_v20 = vadd.f32 %v5580_v9, %v3419_v46  ;;  %v5585_v27 = vpop.f32.mrf.mxu1 }
 0x355   : > { %v5586_v54 = vadd.f32 %v5585_v27, %v5584_v21  ;;  %v6077_v51 = vpop.f32.mrf.mxu0 }
 0x356   : > { %v5587_v5 = vpop.f32.mrf.mxu1 }
 0x357   : > { %v7757_v56 = vadd.f32 %v6076_v1, %v5586_v54  ;;  %v3422_v25 = vpop.f32.mrf.mxu0 }
 0x358   : > { %v7759_v10 = vadd.f32 %v5583_v14, %v3422_v25  ;;  %v5588_v31 = vpop.f32.mrf.mxu1 }
 0x359   : > { %v5589_v8 = vadd.f32 %v5588_v31, %v5587_v5  ;;  %v5630_v59 = vpop.f32.mrf.mxu0 }
 0x35a   : > { %v6096_v4 = vpop.f32.mrf.mxu1 }
 0x35b   : > { %v7761_v35 = vadd.f32 %v6077_v51, %v5589_v8  ;;  %v5631_v34 = vpop.f32.mrf.mxu0 }
 0x35c   : > { %v5632_v62 = vadd.f32 %v5631_v34, %v5630_v59  ;;  %v3773_v22 = vpop.f32.mrf.mxu1 }
 0x35d   : > { %v5633_v24 = vpop.f32.mrf.mxu0 }
 0x35e   : > { %v3613_v7 = vadd.f32 %v5632_v62, %v7656_v6  ;;  %v6097_v37 = vpop.f32.mrf.mxu1 }
 0x35f   : > { %v5634_v53 = vpop.f32.mrf.mxu0 }
 0x360   : > { %v7766_v55 = vadd.f32 %v3773_v22, %v3613_v7  ;;  %v5635_v50 = vadd.f32 %v5634_v53, %v5633_v24  ;;  %v3776_v49 = vpop.f32.mrf.mxu1  ;;  %v3327_v7 = vadd.f32 %v7672_v33, %v7690_v48 }
 0x361   : > { %v5636_v9 = vpop.f32.mrf.mxu0 }
 0x362   : > { %v3616_v28 = vadd.f32 %v5635_v50, %v3311_v42  ;;  %v6100_v36 = vpop.f32.mrf.mxu1 }
 0x363   : > { %v5637_v15 = vpop.f32.mrf.mxu0 }
 0x364   : > { %v7768_v60 = vadd.f32 %v3776_v49, %v3616_v28  ;;  %v5638_v14 = vadd.f32 %v5637_v15, %v5636_v9  ;;  %v3789_v1 = vpop.f32.mrf.mxu1 }
 0x365   : > { %v5639_v21 = vpop.f32.mrf.mxu0 }
 0x366   : > { %v3621_v6 = vadd.f32 %v5638_v14, %v7658_v63  ;;  %v6101_v46 = vpop.f32.mrf.mxu1 }
 0x367   : > { %v5640_v27 = vpop.f32.mrf.mxu0 }
 0x368   : > { %v5641_v54 = vadd.f32 %v5640_v27, %v5639_v21  ;;  %v3792_v51 = vpop.f32.mrf.mxu1  ;;  %v7771_v29 = vadd.f32 %v6096_v4, %v3621_v6 }
 0x369   : > { %v5642_v23 = vpop.f32.mrf.mxu0 }
 0x36a   : > { %v3624_v5 = vadd.f32 %v5641_v54, %v7665_v0  ;;  %v6104_v25 = vpop.f32.mrf.mxu1 }
 0x36b   : > { %v5643_v31 = vpop.f32.mrf.mxu0 }
 0x36c   : > { %v5644_v8 = vadd.f32 %v5643_v31, %v5642_v23  ;;  %v3805_v59 = vpop.f32.mrf.mxu1  ;;  %v7774_v34 = vadd.f32 %v6097_v37, %v3624_v5 }
 0x36d   : > { %v5645_v62 = vpop.f32.mrf.mxu0 }
 0x36e   : > { %v3629_v22 = vadd.f32 %v5644_v8, %v7678_v58  ;;  %v6105_v24 = vpop.f32.mrf.mxu1 }
 0x36f   : > { %v5646_v63 = vpop.f32.mrf.mxu0 }
 0x370   : > { %v5647_v53 = vadd.f32 %v5646_v63, %v5645_v62  ;;  %v3808_v4 = vpop.f32.mrf.mxu1  ;;  %v7779_v42 = vadd.f32 %v3789_v1, %v3629_v22 }
 0x371   : > { %v5648_v50 = vpop.f32.mrf.mxu0 }
 0x372   : > { %v3632_v0 = vadd.f32 %v5647_v53, %v3327_v7  ;;  %v7781_v49 = vpop.f32.mrf.mxu1 }
 0x373   : > { %v5649_v9 = vpop.f32.mrf.mxu0 }
 0x374   : > { %v5650_v28 = vadd.f32 %v5649_v9, %v5648_v50  ;;  %v3821_v37 = vpop.f32.mrf.mxu1  ;;  %v7783_v15 = vadd.f32 %v3792_v51, %v3632_v0 }
 0x375   : > { %v5651_v14 = vpop.f32.mrf.mxu0 }
 0x376   : > { %v3637_v58 = vadd.f32 %v5650_v28, %v7680_v47  ;;  %v7786_v21 = vpop.f32.mrf.mxu1 }
 0x377   : > { %v5652_v6 = vpop.f32.mrf.mxu0 }
 0x378   : > { %v5653_v33 = vadd.f32 %v5652_v6, %v5651_v14  ;;  %v3824_v48 = vpop.f32.mrf.mxu1  ;;  %v7788_v27 = vadd.f32 %v6100_v36, %v3637_v58  ;;  %v3343_v36 = vadd.f32 %v7694_v45, %v7711_v40 }
 0x379   : > { %v5654_v1 = vpop.f32.mrf.mxu0 }
 0x37a   : > { %v3640_v54 = vadd.f32 %v5653_v33, %v7687_v52  ;;  %v7791_v23 = vpop.f32.mrf.mxu1 }
 0x37b   : > { %v5655_v5 = vpop.f32.mrf.mxu0 }
 0x37c   : > { %v5656_v31 = vadd.f32 %v5655_v5, %v5654_v1  ;;  %v7793_v8 = vpop.f32.mrf.mxu1  ;;  %v7795_v51 = vadd.f32 %v6101_v46, %v3640_v54 }
 0x37d   : > { %v5657_v62 = vpop.f32.mrf.mxu0 }
 0x37e   : > { %v3645_v47 = vadd.f32 %v5656_v31, %v7700_v11  ;;  %v7798_v22 = vpop.f32.mrf.mxu1 }
 0x37f   : > { %v5658_v63 = vpop.f32.mrf.mxu0 }
 0x380   : > { %v5659_v7 = vadd.f32 %v5658_v63, %v5657_v62  ;;  %v7802_v53 = vpop.f32.mrf.mxu1  ;;  %v7804_v52 = vadd.f32 %v3805_v59, %v3645_v47 }
 0x381   : > { %v5660_v50 = vpop.f32.mrf.mxu0 }
 0x382   : > { %v3648_v0 = vadd.f32 %v5659_v7, %v3343_v36  ;;  %v7806_v9 = vpop.f32.mrf.mxu1 }
 0x383   : > { %v5661_v46 = vpop.f32.mrf.mxu0 }
 0x384   : > { %v5662_v28 = vadd.f32 %v5661_v46, %v5660_v50  ;;  %v7808_v14 = vpop.f32.mrf.mxu1  ;;  %v7810_v11 = vadd.f32 %v3808_v4, %v3648_v0 }
 0x385   : > { %v5663_v58 = vpop.f32.mrf.mxu0 }
 0x386   : > { %v3653_v6 = vadd.f32 %v5662_v28, %v7702_v12  ;;  %v7813_v33 = vpop.f32.mrf.mxu1 }
 0x387   : > { %v5664_v45 = vpop.f32.mrf.mxu0 }
 0x388   : > { %v5665_v40 = vadd.f32 %v5664_v45, %v5663_v58  ;;  %v7815_v1 = vpop.f32.mrf.mxu1  ;;  %v7817_v59 = vadd.f32 %v6104_v25, %v3653_v6 }
 0x389   : > { %v5666_v54 = vpop.f32.mrf.mxu0 }
 0x38a   : > { %v3656_v5 = vadd.f32 %v5665_v40, %v7708_v57  ;;  %v7820_v31 = vpop.f32.mrf.mxu1 }
 0x38b   : > { %v5667_v62 = vpop.f32.mrf.mxu0 }
 0x38c   : > { %v5668_v47 = vadd.f32 %v5667_v62, %v5666_v54  ;;  %v7822_v4 = vpop.f32.mrf.mxu1  ;;  %v7824_v63 = vadd.f32 %v6105_v24, %v3656_v5 }
 0x38d   : > { %v5669_v12 = vpop.f32.mrf.mxu0 }
 0x38e   : > { %v3661_v36 = vadd.f32 %v5668_v47, %v7716_v41  ;;  %v7827_v7 = vpop.f32.mrf.mxu1 }
 0x38f   : > { %v5670_v50 = vpop.f32.mrf.mxu0 }
 0x390   : > { %v5671_v0 = vadd.f32 %v5670_v50, %v5669_v12  ;;  %v7829_v25 = vpop.f32.mrf.mxu1  ;;  %v7831_v46 = vadd.f32 %v3821_v37, %v3661_v36 }
 0x391   : > { %v5672_v57 = vpop.f32.mrf.mxu0 }
 0x392   : > { %v3664_v28 = vadd.f32 %v5671_v0, %v7720_v16  ;;  %v7834_v58 = vpop.f32.mrf.mxu1 }
 0x393   : > { %8318 = vst [vmem:[#allocation13_spill] sm:$0xff] %v7834_v58  ;;  %v5673_v6 = vpop.f32.mrf.mxu0 }
 0x394   : > { %v5674_v45 = vadd.f32 %v5673_v6, %v5672_v57  ;;  %v7836_v24 = vpop.f32.mrf.mxu1  ;;  %v7838_v40 = vadd.f32 %v3824_v48, %v3664_v28 }
 0x395   : > { %v5675_v41 = vpop.f32.mrf.mxu0 }
 0x396   : > { %v3669_v54 = vadd.f32 %v5674_v45, %v7718_v13  ;;  %v7841_v5 = vpop.f32.mrf.mxu1 }
 0x397   : > { %8319 = vst [vmem:[#allocation14_spill] sm:$0xff] %v7841_v5  ;;  %v5676_v62 = vpop.f32.mrf.mxu0 }
 0x398   : > { %v5677_v47 = vadd.f32 %v5676_v62, %v5675_v41  ;;  %v7843_v37 = vpop.f32.mrf.mxu1  ;;  %v7846_v12 = vadd.f32 %v7781_v49, %v3669_v54 }
 0x399   : > { %v5678_v16 = vpop.f32.mrf.mxu0 }
 0x39a   : > { %v3672_v36 = vadd.f32 %v5677_v47, %v7723_v18  ;;  %v7849_v50 = vpop.f32.mrf.mxu1 }
 0x39b   : > { %v5679_v0 = vpop.f32.mrf.mxu0 }
 0x39c   : > { %v5680_v48 = vadd.f32 %v5679_v0, %v5678_v16  ;;  %v7851_v57 = vpop.f32.mrf.mxu1  ;;  %v7854_v13 = vadd.f32 %v7786_v21, %v3672_v36 }
 0x39d   : > { %v5681_v28 = vpop.f32.mrf.mxu0 }
 0x39e   : > { %v3677_v6 = vadd.f32 %v5680_v48, %v7727_v44  ;;  %v7857_v45 = vpop.f32.mrf.mxu1 }
 0x39f   : > { %v5682_v41 = vpop.f32.mrf.mxu0 }
 0x3a0   : > { %v5683_v49 = vadd.f32 %v5682_v41, %v5681_v28  ;;  %v7859_v54 = vpop.f32.mrf.mxu1  ;;  %v7862_v18 = vadd.f32 %v7793_v8, %v3677_v6 }
 0x3a1   : > { %v5684_v62 = vpop.f32.mrf.mxu0 }
 0x3a2   : > { %8320 = vst [vmem:[#allocation15_spill] sm:$0xff] %v7862_v18  ;;  %v3680_v47 = vadd.f32 %v5683_v49, %v7731_v30  ;;  %v7865_v16 = vpop.f32.mrf.mxu1 }
 0x3a3   : > { %v5685_v0 = vpop.f32.mrf.mxu0 }
 0x3a4   : > { %v5686_v21 = vadd.f32 %v5685_v0, %v5684_v62  ;;  %v7867_v36 = vpop.f32.mrf.mxu1  ;;  %v7870_v44 = vadd.f32 %v7802_v53, %v3680_v47 }
 0x3a5   : > { %v5687_v48 = vpop.f32.mrf.mxu0 }
 0x3a6   : > { %8321 = vst [vmem:[#allocation16_spill] sm:$0xff] %v7870_v44  ;;  %v3685_v28 = vadd.f32 %v5686_v21, %v7729_v3  ;;  %v7873_v41 = vpop.f32.mrf.mxu1 }
 0x3a7   : > { %v5688_v5 = vpop.f32.mrf.mxu0 }
 0x3a8   : > { %v5689_v8 = vadd.f32 %v5688_v5, %v5687_v48  ;;  %v7875_v6 = vpop.f32.mrf.mxu1  ;;  %v7878_v30 = vadd.f32 %v7791_v23, %v3685_v28 }
 0x3a9   : > { %v5690_v49 = vpop.f32.mrf.mxu0 }
 0x3aa   : > { %v3688_v62 = vadd.f32 %v5689_v8, %v7733_v39  ;;  %v7881_v0 = vpop.f32.mrf.mxu1 }
 0x3ab   : > { %v5691_v58 = vpop.f32.mrf.mxu0 }
 0x3ac   : > { %v5692_v53 = vadd.f32 %v5691_v58, %v5690_v49  ;;  %v7883_v47 = vpop.f32.mrf.mxu1  ;;  %v7886_v3 = vadd.f32 %v7798_v22, %v3688_v62 }
 0x3ad   : > { %v5693_v21 = vpop.f32.mrf.mxu0 }
 0x3ae   : > { %8322 = vst [vmem:[#allocation17_spill] sm:$0xff] %v7886_v3  ;;  %v3693_v5 = vadd.f32 %v5692_v53, %v7737_v61  ;;  %v7889_v48 = vpop.f32.mrf.mxu1 }
 0x3af   : > { %v5694_v44 = vpop.f32.mrf.mxu0 }
 0x3b0   : > { %v5695_v23 = vadd.f32 %v5694_v44, %v5693_v21  ;;  %v7891_v28 = vpop.f32.mrf.mxu1  ;;  %v7894_v39 = vadd.f32 %v7808_v14, %v3693_v5 }
 0x3b1   : > { %v5696_v8 = vpop.f32.mrf.mxu0 }
 0x3b2   : > { %8323 = vst [vmem:[#allocation18_spill] sm:$0xff] %v7894_v39  ;;  %v3696_v58 = vadd.f32 %v5695_v23, %v7741_v38  ;;  %v7897_v49 = vpop.f32.mrf.mxu1 }
 0x3b3   : > { %v5697_v18 = vpop.f32.mrf.mxu0 }
 0x3b4   : > { %v5698_v22 = vadd.f32 %v5697_v18, %v5696_v8  ;;  %v7899_v62 = vpop.f32.mrf.mxu1  ;;  %v7902_v61 = vadd.f32 %v7815_v1, %v3696_v58 }
 0x3b5   : > { %v5699_v53 = vpop.f32.mrf.mxu0 }
 0x3b6   : > { %8324 = vst [vmem:[#allocation19_spill] sm:$0xff] %v7902_v61  ;;  %v3701_v44 = vadd.f32 %v5698_v22, %v7739_v43  ;;  %v7905_v21 = vpop.f32.mrf.mxu1 }
 0x3b7   : > { %v5700_v3 = vpop.f32.mrf.mxu0 }
 0x3b8   : > { %v5701_v14 = vadd.f32 %v5700_v3, %v5699_v53  ;;  %v7907_v5 = vpop.f32.mrf.mxu1  ;;  %v7910_v38 = vadd.f32 %v7806_v9, %v3701_v44 }
 0x3b9   : > { %v5702_v23 = vpop.f32.mrf.mxu0 }
 0x3ba   : > { %8325 = vst [vmem:[#allocation20_spill] sm:$0xff] %v7910_v38  ;;  %v3704_v18 = vadd.f32 %v5701_v14, %v7743_v17  ;;  %v7913_v8 = vpop.f32.mrf.mxu1 }
 0x3bb   : > { %v5703_v39 = vpop.f32.mrf.mxu0 }
 0x3bc   : > { %v5704_v1 = vadd.f32 %v5703_v39, %v5702_v23  ;;  %v7915_v58 = vpop.f32.mrf.mxu1  ;;  %v7918_v43 = vadd.f32 %v7813_v33, %v3704_v18 }
 0x3bd   : > { %v5705_v22 = vpop.f32.mrf.mxu0 }
 0x3be   : > { %8326 = vst [vmem:[#allocation21_spill] sm:$0xff] %v7918_v43  ;;  %v3709_v3 = vadd.f32 %v5704_v1, %v7746_v32  ;;  %v7921_v53 = vpop.f32.mrf.mxu1 }
 0x3bf   : > { %v5706_v61 = vpop.f32.mrf.mxu0 }
 0x3c0   : > { %v5707_v9 = vadd.f32 %v5706_v61, %v5705_v22  ;;  %v7923_v44 = vpop.f32.mrf.mxu1  ;;  %v7926_v17 = vadd.f32 %v7822_v4, %v3709_v3 }
 0x3c1   : > { %v5708_v14 = vpop.f32.mrf.mxu0 }
 0x3c2   : > { %8327 = vst [vmem:[#allocation22_spill] sm:$0xff] %v7926_v17  ;;  %v3712_v39 = vadd.f32 %v5707_v9, %v7750_v26  ;;  %v7929_v23 = vpop.f32.mrf.mxu1 }
 0x3c3   : > { %v5709_v38 = vpop.f32.mrf.mxu0 }
 0x3c4   : > { %v5710_v33 = vadd.f32 %v5709_v38, %v5708_v14  ;;  %v7931_v18 = vpop.f32.mrf.mxu1  ;;  %v7934_v32 = vadd.f32 %v7829_v25, %v3712_v39 }
 0x3c5   : > { %v5711_v1 = vpop.f32.mrf.mxu0 }
 0x3c6   : > { %8328 = vst [vmem:[#allocation23_spill] sm:$0xff] %v7934_v32  ;;  %v3717_v61 = vadd.f32 %v5710_v33, %v7748_v2  ;;  %v7937_v22 = vpop.f32.mrf.mxu1 }
 0x3c7   : > { %v5712_v43 = vpop.f32.mrf.mxu0 }
 0x3c8   : > { %v5713_v4 = vadd.f32 %v5712_v43, %v5711_v1  ;;  %v7939_v3 = vpop.f32.mrf.mxu1  ;;  %v7942_v26 = vadd.f32 %v7820_v31, %v3717_v61 }
 0x3c9   : > { %v5714_v9 = vpop.f32.mrf.mxu0 }
 0x3ca   : > { %8329 = vst [vmem:[#allocation24_spill] sm:$0xff] %v7942_v26  ;;  %v3720_v38 = vadd.f32 %v5713_v4, %v7752_v19  ;;  %v7945_v14 = vpop.f32.mrf.mxu1 }
 0x3cb   : > { %v5715_v17 = vpop.f32.mrf.mxu0 }
 0x3cc   : > { %v5716_v25 = vadd.f32 %v5715_v17, %v5714_v9  ;;  %v7947_v39 = vpop.f32.mrf.mxu1  ;;  %v7950_v2 = vadd.f32 %v7827_v7, %v3720_v38 }
 0x3cd   : > { %v5717_v33 = vpop.f32.mrf.mxu0 }
 0x3ce   : > { %v3725_v43 = vadd.f32 %v5716_v25, %v7755_v20  ;;  %v7953_v1 = vpop.f32.mrf.mxu1 }
 0x3cf   : > { %v5718_v32 = vpop.f32.mrf.mxu0 }
 0x3d0   : > { %v5719_v31 = vadd.f32 %v5718_v32, %v5717_v33  ;;  %v7955_v61 = vpop.f32.mrf.mxu1  ;;  %v7958_v19 = vadd.f32 %v7836_v24, %v3725_v43  ;;  %v5774_v43 = vadd.f32 %v7867_v36, %v7865_v16  ;;  %v5777_v36 = vadd.f32 %v7875_v6, %v7873_v41 }
 0x3d1   : > { %v5720_v4 = vpop.f32.mrf.mxu0 }
 0x3d2   : > { %8330 = vst [vmem:[#allocation25_spill] sm:$0xff] %v7958_v19  ;;  %v3728_v17 = vadd.f32 %v5719_v31, %v7759_v10  ;;  %v7961_v9 = vpop.f32.mrf.mxu1 }
 0x3d3   : > { %v5721_v26 = vpop.f32.mrf.mxu0 }
 0x3d4   : > { %v5722_v7 = vadd.f32 %v5721_v26, %v5720_v4  ;;  %v7963_v38 = vpop.f32.mrf.mxu1  ;;  %v7966_v20 = vadd.f32 %v7843_v37, %v3728_v17  ;;  %v5768_v26 = vadd.f32 %v7851_v57, %v7849_v50  ;;  %v7987_v17 = vld [vmem:[%s8298_s5] ss:$0 sm:$0xff] }
 0x3d5   : > { %v5723_v25 = vpop.f32.mrf.mxu0 }
 0x3d6   : > { %8331 = vst [vmem:[#allocation26_spill] sm:$0xff] %v7966_v20  ;;  %v7969_v32 = vadd.f32 %v5722_v7, %v7757_v56  ;;  %v7971_v33 = vpop.f32.mrf.mxu1 }
 0x3d7   : > { %v5724_v24 = vpop.f32.mrf.mxu0 }
 0x3d8   : > { %v5725_v10 = vadd.f32 %v5724_v24, %v5723_v25  ;;  %v7975_v31 = vpop.f32.mrf.mxu1 }
 0x3d9   : > { %v6144_v19 = vpop.f32.mrf.mxu0 }
 0x3da   : > { %v7980_v37 = vadd.f32 %v5725_v10, %v7761_v35  ;;  %v4440_v4 = vadd.f32 %v6144_v19, %v5774_v43  ;;  %v7982_v56 = vpop.f32.mrf.mxu1  ;;  %v7997_v35 = vld [vmem:[%s8299_s6] ss:$0 sm:$0xff]  ;;  %v5771_v19 = vadd.f32 %v7859_v54, %v7857_v45  ;;  %v5786_v45 = vadd.f32 %v7899_v62, %v7897_v49  ;;  %v4668_v54 = vld [vmem:[%s6730_s17] sm:$0xff]  ;;  %v4671_v49 = vld [vmem:[%s6730_s17 + $0x18] sm:$0xff] }
 0x3db   : > { %v4431_v16 = vpop.f32.mrf.mxu0 }
 0x3dc   : > { %8332 = vst [vmem:[#allocation27_spill] sm:$0xff] %v7980_v37  ;;  %v4560_v7 = vadd.f32 %v4440_v4, %v7771_v29  ;;  %v4432_v25 = vadd.f32 %v5768_v26, %v4431_v16  ;;  %v7992_v50 = vpop.f32.mrf.mxu1  ;;  %v4670_v29 = vld [vmem:[%s6730_s17 + $0x10] sm:$0xff] }
 0x3dd   : > { %v6145_v57 = vpop.f32.mrf.mxu0 }
 0x3de   : > { %v4599_v24 = vmul.f32 %v7987_v17, %v4560_v7  ;;  %v4558_v43 = vadd.f32 %v4432_v25, %v7766_v55  ;;  %v4443_v41 = vadd.f32 %v6145_v57, %v5777_v36  ;;  %v8003_v6 = vpop.f32.mrf.mxu1 }
 0x3df   : > { %v4434_v10 = vpop.f32.mrf.mxu0 }
 0x3e0   : > { %v4638_v26 = vadd.f32 %v7997_v35, %v4599_v24  ;;  %v4597_v4 = vmul.f32 %v7987_v17, %v4558_v43  ;;  %v4561_v16 = vadd.f32 %v4443_v41, %v7774_v34  ;;  %v4435_v37 = vadd.f32 %v5771_v19, %v4434_v10  ;;  %v8009_v20 = vpop.f32.mrf.mxu1 }
 0x3e1   : > { %v6148_v55 = vpop.f32.mrf.mxu0  ;;  %v5780_v34 = vadd.f32 %v7883_v47, %v7881_v0  ;;  %v5789_v19 = vadd.f32 %v7907_v5, %v7905_v21 }
 0x3e2   : > { %v4702_v36 = vadd.f32 %v4670_v29, %v4638_v26  ;;  %v4636_v7 = vadd.f32 %v7997_v35, %v4597_v4  ;;  %v4600_v25 = vmul.f32 %v7987_v17, %v4561_v16  ;;  %v4559_v57 = vadd.f32 %v4435_v37, %v7768_v60  ;;  %v8017_v24 = vpop.f32.mrf.mxu1  ;;  %v4669_v37 = vld [vmem:[%s6730_s17 + $0x8] sm:$0xff] }
 0x3e3   : > { %v4456_v62 = vadd.f32 %v6148_v55, %v5786_v45  ;;  %v4447_v43 = vpop.f32.mrf.mxu0  ;;  %v5783_v60 = vadd.f32 %v7891_v28, %v7889_v48 }
 0x3e4   : > { %v4734_v41 = vmax.f32 %v4702_v36, 0.0  ;;  %v4700_v29 = vadd.f32 %v4668_v54, %v4636_v7  ;;  %v4639_v10 = vadd.f32 %v7997_v35, %v4600_v25  ;;  %v4598_v26 = vmul.f32 %v7987_v17, %v4559_v57  ;;  %v8026_v4 = vpop.f32.mrf.mxu1  ;;  %v4674_v57 = vld [vmem:[%s6730_s17 + $0x30] sm:$0xff] }
 0x3e5   : > { %v4564_v0 = vadd.f32 %v4456_v62, %v7788_v27  ;;  %v4448_v47 = vadd.f32 %v5780_v34, %v4447_v43  ;;  %v6149_v21 = vpop.f32.mrf.mxu0  ;;  %v5798_v27 = vadd.f32 %v7931_v18, %v7929_v23  ;;  %v5792_v23 = vadd.f32 %v7915_v58, %v7913_v8  ;;  %v4675_v8 = vld [vmem:[%s6730_s17 + $0x38] sm:$0xff] }
 0x3e6   : > { %4766 = vst [vmem:[%s8034_s30 + $0x10] sm:$0xff] %v4734_v41  ;;  %v4732_v5 = vmax.f32 %v4700_v29, 0.0  ;;  %v4703_v16 = vadd.f32 %v4671_v49, %v4639_v10  ;;  %v4637_v45 = vadd.f32 %v7997_v35, %v4598_v26  ;;  %v4459_v54 = vadd.f32 %v6149_v21, %v5789_v19  ;;  %v8038_v55 = vpop.f32.mrf.mxu1  ;;  %v4672_v41 = vld [vmem:[%s6730_s17 + $0x20] sm:$0xff] }
 0x3e7   : > { %v4603_v48 = vmul.f32 %v7987_v17, %v4564_v0  ;;  %v4562_v28 = vadd.f32 %v4448_v47, %v7779_v42  ;;  %v4450_v36 = vpop.f32.mrf.mxu0 }
 0x3e8   : > { %4764 = vst [vmem:[%s8034_s30] sm:$0xff] %v4732_v5  ;;  %v4735_v7 = vmax.f32 %v4703_v16, 0.0  ;;  %v4701_v25 = vadd.f32 %v4669_v37, %v4637_v45  ;;  %v4565_v34 = vadd.f32 %v4459_v54, %v7795_v51  ;;  %v4451_v19 = vadd.f32 %v5783_v60, %v4450_v36  ;;  %v8047_v49 = vpop.f32.mrf.mxu1 }
 0x3e9   : > { %v4642_v18 = vadd.f32 %v7997_v35, %v4603_v48  ;;  %v4601_v62 = vmul.f32 %v7987_v17, %v4562_v28  ;;  %v6152_v42 = vpop.f32.mrf.mxu0  ;;  %v5801_v16 = vadd.f32 %v7939_v3, %v7937_v22  ;;  %v5810_v22 = vadd.f32 %v7963_v38, %v7961_v9 }
 0x3ea   : > { %4767 = vst [vmem:[%s8034_s30 + $0x18] sm:$0xff] %v4735_v7  ;;  %v4733_v43 = vmax.f32 %v4701_v25, 0.0  ;;  %v4604_v29 = vmul.f32 %v7987_v17, %v4565_v34  ;;  %v4563_v51 = vadd.f32 %v4451_v19, %v7783_v15  ;;  %v4472_v10 = vadd.f32 %v6152_v42, %v5798_v27  ;;  %v8057_v26 = vpop.f32.mrf.mxu1  ;;  %v4673_v27 = vld [vmem:[%s6730_s17 + $0x28] sm:$0xff]  ;;  %v4678_v34 = vld [vmem:[%s6730_s17 + $0x50] sm:$0xff] }
 0x3eb   : > { %v4706_v60 = vadd.f32 %v4674_v57, %v4642_v18  ;;  %v4640_v37 = vadd.f32 %v7997_v35, %v4601_v62  ;;  %v4463_v58 = vpop.f32.mrf.mxu0  ;;  %v5795_v57 = vadd.f32 %v7923_v44, %v7921_v53  ;;  %v5804_v53 = vadd.f32 %v7947_v39, %v7945_v14  ;;  %v4676_v44 = vld [vmem:[%s6730_s17 + $0x40] sm:$0xff] }
 0x3ec   : > { %4765 = vst [vmem:[%s8034_s30 + $0x8] sm:$0xff] %v4733_v43  ;;  %v4643_v0 = vadd.f32 %v7997_v35, %v4604_v29  ;;  %v4602_v47 = vmul.f32 %v7987_v17, %v4563_v51  ;;  %v4568_v21 = vadd.f32 %v4472_v10, %v7817_v59  ;;  %v4464_v5 = vadd.f32 %v5792_v23, %v4463_v58  ;;  %v8065_v15 = vpop.f32.mrf.mxu1 }
 0x3ed   : > { %v4738_v45 = vmax.f32 %v4706_v60, 0.0  ;;  %v4704_v54 = vadd.f32 %v4672_v41, %v4640_v37  ;;  %v6153_v48 = vpop.f32.mrf.mxu0  ;;  %v5813_v14 = vadd.f32 %v7975_v31, %v7971_v33 }
 0x3ee   : > { %v4707_v28 = vadd.f32 %v4675_v8, %v4643_v0  ;;  %v4641_v36 = vadd.f32 %v7997_v35, %v4602_v47  ;;  %v4607_v7 = vmul.f32 %v7987_v17, %v4568_v21  ;;  %v4566_v25 = vadd.f32 %v4464_v5, %v7804_v52  ;;  %v8073_v59 = vpop.f32.mrf.mxu1  ;;  %v4679_v47 = vld [vmem:[%s6730_s17 + $0x58] sm:$0xff] }
 0x3ef   : > { %4770 = vst [vmem:[%s8034_s30 + $0x30] sm:$0xff] %v4738_v45  ;;  %v4736_v3 = vmax.f32 %v4704_v54, 0.0  ;;  %v4475_v19 = vadd.f32 %v6153_v48, %v5801_v16  ;;  %v4466_v23 = vpop.f32.mrf.mxu0  ;;  %v5807_v45 = vadd.f32 %v7955_v61, %v7953_v1  ;;  %v4682_v1 = vld [vmem:[%s6730_s17 + $0x70] sm:$0xff] }
 0x3f0   : > { %v4739_v18 = vmax.f32 %v4707_v28, 0.0  ;;  %v4705_v62 = vadd.f32 %v4673_v27, %v4641_v36  ;;  %v4646_v42 = vadd.f32 %v7997_v35, %v4607_v7  ;;  %v4605_v52 = vmul.f32 %v7987_v17, %v4566_v25  ;;  %v8083_v43 = vpop.f32.mrf.mxu1  ;;  %v4677_v27 = vld [vmem:[%s6730_s17 + $0x48] sm:$0xff] }
 0x3f1   : > { %4768 = vst [vmem:[%s8034_s30 + $0x20] sm:$0xff] %v4736_v3  ;;  %v4569_v9 = vadd.f32 %v4475_v19, %v7824_v63  ;;  %v4467_v38 = vadd.f32 %v5795_v57, %v4466_v23  ;;  %v6156_v41 = vpop.f32.mrf.mxu0  ;;  %v5822_v19 = vadd.f32 %v8026_v4, %v8017_v24  ;;  %v5825_v24 = vadd.f32 %v8047_v49, %v8038_v55 }
 0x3f2   : > { %4771 = vst [vmem:[%s8034_s30 + $0x38] sm:$0xff] %v4739_v18  ;;  %v4737_v29 = vmax.f32 %v4705_v62, 0.0  ;;  %v4710_v51 = vadd.f32 %v4678_v34, %v4646_v42  ;;  %v4644_v10 = vadd.f32 %v7997_v35, %v4605_v52  ;;  %v4488_v60 = vadd.f32 %v6156_v41, %v5810_v22  ;;  %v8092_v37 = vpop.f32.mrf.mxu1  ;;  %v4680_v62 = vld [vmem:[%s6730_s17 + $0x60] sm:$0xff]  ;;  %v4683_v41 = vld [vmem:[%s6730_s17 + $0x78] sm:$0xff] }
 0x3f3   : > { %v4608_v39 = vmul.f32 %v7987_v17, %v4569_v9  ;;  %v4567_v63 = vadd.f32 %v4467_v38, %v7810_v11  ;;  %v4479_v8 = vpop.f32.mrf.mxu0  ;;  %v5816_v38 = vadd.f32 %v7992_v50, %v7982_v56  ;;  %v5819_v56 = vadd.f32 %v8009_v20, %v8003_v6  ;;  %v4681_v50 = vld [vmem:[%s6730_s17 + $0x68] sm:$0xff]  ;;  %v8333_v6 = vld [vmem:[#allocation15_spill] sm:$0xff] }
 0x3f4   : > { %4769 = vst [vmem:[%s8034_s30 + $0x28] sm:$0xff] %v4737_v29  ;;  %v4742_v58 = vmax.f32 %v4710_v51, 0.0  ;;  %v4708_v0 = vadd.f32 %v4676_v44, %v4644_v10  ;;  %v4572_v21 = vadd.f32 %v4488_v60, %v7846_v12  ;;  %v4480_v5 = vadd.f32 %v5804_v53, %v4479_v8  ;;  %v5833_v16 = vpop.f32.mrf.mxu1 }
 0x3f5   : > { %v4647_v33 = vadd.f32 %v7997_v35, %v4608_v39  ;;  %v4606_v31 = vmul.f32 %v7987_v17, %v4567_v63  ;;  %v6157_v54 = vpop.f32.mrf.mxu0 }
 0x3f6   : > { %4774 = vst [vmem:[%s8034_s30 + $0x50] sm:$0xff] %v4742_v58  ;;  %v4740_v11 = vmax.f32 %v4708_v0, 0.0  ;;  %v4611_v48 = vmul.f32 %v7987_v17, %v4572_v21  ;;  %v4570_v28 = vadd.f32 %v4480_v5, %v7831_v46  ;;  %v4491_v12 = vadd.f32 %v6157_v54, %v5813_v14  ;;  %v8109_v36 = vpop.f32.mrf.mxu1  ;;  %v4686_v54 = vld [vmem:[%s6730_s17 + $0x90] sm:$0xff] }
 0x3f7   : > { %v4711_v7 = vadd.f32 %v4679_v47, %v4647_v33  ;;  %v4645_v25 = vadd.f32 %v7997_v35, %v4606_v31  ;;  %v4482_v61 = vpop.f32.mrf.mxu0  ;;  %v5834_v5 = vadd.f32 %v5833_v16, %v8092_v37  ;;  %v5828_v37 = vadd.f32 %v8065_v15, %v8057_v26 }
 0x3f8   : > { %4772 = vst [vmem:[%s8034_s30 + $0x40] sm:$0xff] %v4740_v11  ;;  %v4650_v57 = vadd.f32 %v7997_v35, %v4611_v48  ;;  %v4609_v22 = vmul.f32 %v7987_v17, %v4570_v28  ;;  %v4573_v3 = vadd.f32 %v4491_v12, %v7854_v13  ;;  %v4483_v34 = vadd.f32 %v5807_v45, %v4482_v61  ;;  %v8117_v46 = vpop.f32.mrf.mxu1  ;;  %v8334_v11 = vld [vmem:[#allocation17_spill] sm:$0xff] }
 0x3f9   : > { %v4743_v23 = vmax.f32 %v4711_v7, 0.0  ;;  %v4709_v18 = vadd.f32 %v4677_v27, %v4645_v25  ;;  %v6160_v42 = vpop.f32.mrf.mxu0 }
 0x3fa   : > { %v4714_v52 = vadd.f32 %v4682_v1, %v4650_v57  ;;  %v4648_v53 = vadd.f32 %v7997_v35, %v4609_v22  ;;  %v4612_v44 = vmul.f32 %v7987_v17, %v4573_v3  ;;  %v4571_v9 = vadd.f32 %v4483_v34, %v7838_v40  ;;  %v8125_v13 = vpop.f32.mrf.mxu1  ;;  %v4684_v1 = vld [vmem:[%s6730_s17 + $0x80] sm:$0xff]  ;;  %v8335_v57 = vld [vmem:[#allocation16_spill] sm:$0xff] }
 0x3fb   : > { %4775 = vst [vmem:[%s8034_s30 + $0x58] sm:$0xff] %v4743_v23  ;;  %v4741_v4 = vmax.f32 %v4709_v18, 0.0  ;;  %v4504_v29 = vadd.f32 %v6160_v42, %v5822_v19  ;;  %v4495_v51 = vpop.f32.mrf.mxu0  ;;  %v4687_v18 = vld [vmem:[%s6730_s17 + $0x98] sm:$0xff] }
 0x3fc   : > { %v4746_v10 = vmax.f32 %v4714_v52, 0.0  ;;  %v4712_v60 = vadd.f32 %v4680_v62, %v4648_v53  ;;  %v4651_v14 = vadd.f32 %v7997_v35, %v4612_v44  ;;  %v4610_v40 = vmul.f32 %v7987_v17, %v4571_v9  ;;  %v8135_v39 = vpop.f32.mrf.mxu1  ;;  %v8336_v42 = vld [vmem:[#allocation20_spill] sm:$0xff] }
 0x3fd   : > { %4773 = vst [vmem:[%s8034_s30 + $0x48] sm:$0xff] %v4741_v4  ;;  %v4576_v55 = vadd.f32 %v4504_v29, %v7878_v30  ;;  %v4496_v49 = vadd.f32 %v5816_v38, %v4495_v51  ;;  %v6161_v63 = vpop.f32.mrf.mxu0  ;;  %v5837_v9 = vadd.f32 %v8117_v46, %v8109_v36  ;;  %v4685_v4 = vld [vmem:[%s6730_s17 + $0x88] sm:$0xff]  ;;  %v4690_v36 = vld [vmem:[%s6730_s17 + $0xb0] sm:$0xff] }
 0x3fe   : > { %4778 = vst [vmem:[%s8034_s30 + $0x70] sm:$0xff] %v4746_v10  ;;  %v4744_v8 = vmax.f32 %v4712_v60, 0.0  ;;  %v4715_v58 = vadd.f32 %v4683_v41, %v4651_v14  ;;  %v4649_v0 = vadd.f32 %v7997_v35, %v4610_v40  ;;  %v4507_v47 = vadd.f32 %v6161_v63, %v5825_v24  ;;  %v8144_v21 = vpop.f32.mrf.mxu1  ;;  %v8337_v60 = vld [vmem:[#allocation18_spill] sm:$0xff] }
 0x3ff   : > { %v4615_v20 = vmul.f32 %v7987_v17, %v4576_v55  ;;  %v4574_v45 = vadd.f32 %v4496_v49, %v8333_v6  ;;  %v4498_v30 = vpop.f32.mrf.mxu0 }
 0x400   : > { %4776 = vst [vmem:[%s8034_s30 + $0x60] sm:$0xff] %v4744_v8  ;;  %v4747_v33 = vmax.f32 %v4715_v58, 0.0  ;;  %v4713_v31 = vadd.f32 %v4681_v50, %v4649_v0  ;;  %v4577_v27 = vadd.f32 %v4507_v47, %v8334_v11  ;;  %v4499_v48 = vadd.f32 %v5819_v56, %v4498_v30  ;;  %v8152_v28 = vpop.f32.mrf.mxu1 }
 0x401   : > { %v4654_v16 = vadd.f32 %v7997_v35, %v4615_v20  ;;  %v4613_v12 = vmul.f32 %v7987_v17, %v4574_v45  ;;  %v6164_v7 = vpop.f32.mrf.mxu0  ;;  %v5831_v56 = vadd.f32 %v8083_v43, %v8073_v59  ;;  %v4688_v59 = vld [vmem:[%s6730_s17 + $0xa0] sm:$0xff] }
 0x402   : > { %4779 = vst [vmem:[%s8034_s30 + $0x78] sm:$0xff] %v4747_v33  ;;  %v4745_v25 = vmax.f32 %v4713_v31, 0.0  ;;  %v4616_v61 = vmul.f32 %v7987_v17, %v4577_v27  ;;  %v4575_v22 = vadd.f32 %v4499_v48, %v8335_v57  ;;  %v4520_v3 = vadd.f32 %v6164_v7, %v5834_v5  ;;  %v5844_v34 = vpop.f32.mrf.mxu1  ;;  %v8338_v43 = vld [vmem:[#allocation21_spill] sm:$0xff]  ;;  %v8339_v48 = vld [vmem:[#allocation19_spill] sm:$0xff]  ;;  %v4691_v7 = vld [vmem:[%s6730_s17 + $0xb8] sm:$0xff] }
 0x403   : > { %v4718_v19 = vadd.f32 %v4686_v54, %v4654_v16  ;;  %v4652_v23 = vadd.f32 %v7997_v35, %v4613_v12  ;;  %v4511_v26 = vpop.f32.mrf.mxu0  ;;  %v5840_v5 = vadd.f32 %v8135_v39, %v8125_v13 }
 0x404   : > { %4777 = vst [vmem:[%s8034_s30 + $0x68] sm:$0xff] %v4745_v25  ;;  %v4655_v15 = vadd.f32 %v7997_v35, %v4616_v61  ;;  %v4614_v62 = vmul.f32 %v7987_v17, %v4575_v22  ;;  %v4580_v52 = vadd.f32 %v4520_v3, %v8336_v42  ;;  %v4512_v53 = vadd.f32 %v5828_v37, %v4511_v26  ;;  %v5845_v44 = vpop.f32.mrf.mxu1  ;;  %v8340_v25 = vld [vmem:[#allocation24_spill] sm:$0xff] }
 0x405   : > { %v4750_v38 = vmax.f32 %v4718_v19, 0.0  ;;  %v4716_v24 = vadd.f32 %v4684_v1, %v4652_v23  ;;  %v6165_v41 = vpop.f32.mrf.mxu0  ;;  %v5846_v46 = vadd.f32 %v5845_v44, %v5844_v34  ;;  %v5843_v22 = vadd.f32 %v8152_v28, %v8144_v21 }
 0x406   : > { %v4719_v29 = vadd.f32 %v4687_v18, %v4655_v15  ;;  %v4653_v51 = vadd.f32 %v7997_v35, %v4614_v62  ;;  %v4619_v10 = vmul.f32 %v7987_v17, %v4580_v52  ;;  %v4578_v14 = vadd.f32 %v4512_v53, %v8337_v60  ;;  %v5847_v40 = vpop.f32.mrf.mxu1  ;;  %v4689_v18 = vld [vmem:[%s6730_s17 + $0xa8] sm:$0xff] }
 0x407   : > { %4782 = vst [vmem:[%s8034_s30 + $0x90] sm:$0xff] %v4750_v38  ;;  %v4748_v50 = vmax.f32 %v4716_v24, 0.0  ;;  %v4523_v55 = vadd.f32 %v6165_v41, %v5837_v9  ;;  %v4514_v49 = vpop.f32.mrf.mxu0  ;;  %v8341_v15 = vld [vmem:[#allocation22_spill] sm:$0xff]  ;;  %v4694_v9 = vld [vmem:[%s6730_s17 + $0xd0] sm:$0xff] }
 0x408   : > { %v4751_v63 = vmax.f32 %v4719_v29, 0.0  ;;  %v4717_v8 = vadd.f32 %v4685_v4, %v4653_v51  ;;  %v4658_v58 = vadd.f32 %v7997_v35, %v4619_v10  ;;  %v4617_v0 = vmul.f32 %v7987_v17, %v4578_v14  ;;  %v5848_v47 = vpop.f32.mrf.mxu1  ;;  %v4692_v10 = vld [vmem:[%s6730_s17 + $0xc0] sm:$0xff] }
 0x409   : > { %4780 = vst [vmem:[%s8034_s30 + $0x80] sm:$0xff] %v4748_v50  ;;  %v4581_v20 = vadd.f32 %v4523_v55, %v8338_v43  ;;  %v4515_v6 = vadd.f32 %v5831_v56, %v4514_v49  ;;  %v6168_v45 = vpop.f32.mrf.mxu0  ;;  %v5849_v13 = vadd.f32 %v5848_v47, %v5847_v40  ;;  %v8342_v50 = vld [vmem:[#allocation23_spill] sm:$0xff]  ;;  %v4695_v49 = vld [vmem:[%s6730_s17 + $0xd8] sm:$0xff] }
 0x40a   : > { %4783 = vst [vmem:[%s8034_s30 + $0x98] sm:$0xff] %v4751_v63  ;;  %v4749_v30 = vmax.f32 %v4717_v8, 0.0  ;;  %v4722_v33 = vadd.f32 %v4690_v36, %v4658_v58  ;;  %v4656_v31 = vadd.f32 %v7997_v35, %v4617_v0  ;;  %v4536_v54 = vadd.f32 %v6168_v45, %v5846_v46  ;;  %v5850_v11 = vpop.f32.mrf.mxu1 }
 0x40b   : > { %v4620_v27 = vmul.f32 %v7987_v17, %v4581_v20  ;;  %v4579_v37 = vadd.f32 %v4515_v6, %v8339_v48  ;;  %v4527_v39 = vpop.f32.mrf.mxu0  ;;  %v8344_v48 = vld [vmem:[#allocation25_spill] sm:$0xff] }
 0x40c   : > { %4781 = vst [vmem:[%s8034_s30 + $0x88] sm:$0xff] %v4749_v30  ;;  %v4754_v16 = vmax.f32 %v4722_v33, 0.0  ;;  %v4720_v12 = vadd.f32 %v4688_v59, %v4656_v31  ;;  %v4584_v1 = vadd.f32 %v4536_v54, %v8340_v25  ;;  %v4528_v61 = vadd.f32 %v5840_v5, %v4527_v39  ;;  %v5851_v57 = vpop.f32.mrf.mxu1  ;;  %v4693_v59 = vld [vmem:[%s6730_s17 + $0xc8] sm:$0xff] }
 0x40d   : > { %v4659_v3 = vadd.f32 %v7997_v35, %v4620_v27  ;;  %v4618_v34 = vmul.f32 %v7987_v17, %v4579_v37  ;;  %v6169_v19 = vpop.f32.mrf.mxu0 }
 0x40e   : > { %4786 = vst [vmem:[%s8034_s30 + $0xb0] sm:$0xff] %v4754_v16  ;;  %v4752_v23 = vmax.f32 %v4720_v12, 0.0  ;;  %v4623_v26 = vmul.f32 %v7987_v17, %v4584_v1  ;;  %v4582_v62 = vadd.f32 %v4528_v61, %v8341_v15  ;;  %v4539_v42 = vadd.f32 %v6169_v19, %v5849_v13  ;;  %v5853_v52 = vpop.f32.mrf.mxu1  ;;  %v8346_v19 = vld [vmem:[#allocation27_spill] sm:$0xff] }
 0x40f   : > { %v4723_v53 = vadd.f32 %v4691_v7, %v4659_v3  ;;  %v4657_v44 = vadd.f32 %v7997_v35, %v4618_v34  ;;  %v4530_v21 = vpop.f32.mrf.mxu0  ;;  %v4696_v3 = vld [vmem:[%s6730_s17 + $0xe0] sm:$0xff] }
 0x410   : > { %4784 = vst [vmem:[%s8034_s30 + $0xa0] sm:$0xff] %v4752_v23  ;;  %v4662_v28 = vadd.f32 %v7997_v35, %v4623_v26  ;;  %v4621_v38 = vmul.f32 %v7987_v17, %v4582_v62  ;;  %v4585_v24 = vadd.f32 %v4539_v42, %v7950_v2  ;;  %v4531_v4 = vadd.f32 %v5843_v22, %v4530_v21  ;;  %v5854_v41 = vpop.f32.mrf.mxu1  ;;  %v8347_v23 = vld [vmem:[#allocation14_spill] sm:$0xff]  ;;  %v4698_v42 = vld [vmem:[%s6730_s17 + $0xf0] sm:$0xff] }
 0x411   : > { %v4755_v29 = vmax.f32 %v4723_v53, 0.0  ;;  %v4721_v51 = vadd.f32 %v4689_v18, %v4657_v44  ;;  %v6172_v60 = vpop.f32.mrf.mxu0  ;;  %v5852_v2 = vadd.f32 %v5851_v57, %v5850_v11  ;;  %v5855_v31 = vadd.f32 %v5854_v41, %v5853_v52  ;;  %v8343_v11 = vld [vmem:[#allocation13_spill] sm:$0xff] }
 0x412   : > { %v4726_v14 = vadd.f32 %v4694_v9, %v4662_v28  ;;  %v4660_v40 = vadd.f32 %v7997_v35, %v4621_v38  ;;  %v4624_v56 = vmul.f32 %v7987_v17, %v4585_v24  ;;  %v4583_v36 = vadd.f32 %v4531_v4, %v8342_v50  ;;  %v5856_v46 = vpop.f32.mrf.mxu1  ;;  %v4697_v9 = vld [vmem:[%s6730_s17 + $0xe8] sm:$0xff] }
 0x413   : > { %4787 = vst [vmem:[%s8034_s30 + $0xb8] sm:$0xff] %v4755_v29  ;;  %v4753_v55 = vmax.f32 %v4721_v51, 0.0  ;;  %v4543_v63 = vpop.f32.mrf.mxu0  ;;  %v3894_v27 = vadd.f32 %v8343_v11, %v7969_v32  ;;  %v8345_v32 = vld [vmem:[#allocation26_spill] sm:$0xff]  ;;  %v3897_v18 = vadd.f32 %v8347_v23, %v8346_v19  ;;  %v4699_v29 = vld [vmem:[%s6730_s17 + $0xf8] sm:$0xff]  ;;  %s4797_s17 = scalar_lea.sflag [#allocation5], %s6724_s15 }
 0x414   : > { %v4758_v8 = vmax.f32 %v4726_v14, 0.0  ;;  %v4724_v58 = vadd.f32 %v4692_v10, %v4660_v40  ;;  %v4663_v0 = vadd.f32 %v7997_v35, %v4624_v56  ;;  %v4622_v47 = vmul.f32 %v7987_v17, %v4583_v36  ;;  %v5857_v5 = vpop.f32.mrf.mxu1 }
 0x415   : > { %4785 = vst [vmem:[%s8034_s30 + $0xa8] sm:$0xff] %v4753_v55  ;;  %v4544_v43 = vadd.f32 %v5852_v2, %v4543_v63  ;;  %v5858_v20 = vadd.f32 %v5857_v5, %v5856_v46  ;;  %v6173_v6 = vpop.f32.mrf.mxu0 }
 0x416   : > { %4790 = vst [vmem:[%s8034_s30 + $0xd0] sm:$0xff] %v4758_v8  ;;  %v4756_v45 = vmax.f32 %v4724_v58, 0.0  ;;  %v4727_v30 = vadd.f32 %v4695_v49, %v4663_v0  ;;  %v4661_v33 = vadd.f32 %v7997_v35, %v4622_v47  ;;  %v5859_v54 = vpop.f32.mrf.mxu1 }
 0x417   : > { %v4586_v37 = vadd.f32 %v4544_v43, %v8344_v48  ;;  %v4552_v13 = vadd.f32 %v6172_v60, %v5858_v20  ;;  %v4546_v39 = vpop.f32.mrf.mxu0 }
 0x418   : > { %4788 = vst [vmem:[%s8034_s30 + $0xc0] sm:$0xff] %v4756_v45  ;;  %v4759_v16 = vmax.f32 %v4727_v30, 0.0  ;;  %v4725_v12 = vadd.f32 %v4693_v59, %v4661_v33  ;;  %v4547_v7 = vadd.f32 %v5855_v31, %v4546_v39  ;;  %v5860_v25 = vpop.f32.mrf.mxu1 }
 0x419   : > { %v4625_v1 = vmul.f32 %v7987_v17, %v4586_v37  ;;  %v4588_v61 = vadd.f32 %v4552_v13, %v3894_v27  ;;  %v5861_v57 = vadd.f32 %v5860_v25, %v5859_v54 }
 0x41a   : > { %4791 = vst [vmem:[%s8034_s30 + $0xd8] sm:$0xff] %v4759_v16  ;;  %v4757_v22 = vmax.f32 %v4725_v12, 0.0  ;;  %v4587_v34 = vadd.f32 %v4547_v7, %v8345_v32 }
 0x41b   : > { %v4664_v26 = vadd.f32 %v7997_v35, %v4625_v1  ;;  %v4627_v15 = vmul.f32 %v7987_v17, %v4588_v61  ;;  %v4555_v62 = vadd.f32 %v6173_v6, %v5861_v57 }
 0x41c   : > { %4789 = vst [vmem:[%s8034_s30 + $0xc8] sm:$0xff] %v4757_v22  ;;  %v4626_v52 = vmul.f32 %v7987_v17, %v4587_v34 }
 0x41d   : > { %v4728_v53 = vadd.f32 %v4696_v3, %v4664_v26  ;;  %v4666_v44 = vadd.f32 %v7997_v35, %v4627_v15  ;;  %v4589_v21 = vadd.f32 %v4555_v62, %v3897_v18 }
 0x41e   : > { %v4665_v28 = vadd.f32 %v7997_v35, %v4626_v52 }
 0x41f   : > { %v4760_v38 = vmax.f32 %v4728_v53, 0.0  ;;  %v4730_v24 = vadd.f32 %v4698_v42, %v4666_v44  ;;  %v4628_v4 = vmul.f32 %v7987_v17, %v4589_v21 }
 0x420   : > { %v4729_v41 = vadd.f32 %v4697_v9, %v4665_v28 }
 0x421   : > { %4792 = vst [vmem:[%s8034_s30 + $0xe0] sm:$0xff] %v4760_v38  ;;  %v4762_v51 = vmax.f32 %v4730_v24, 0.0  ;;  %v4667_v10 = vadd.f32 %v7997_v35, %v4628_v4 }
 0x422   : > { %v4761_v60 = vmax.f32 %v4729_v41, 0.0 }
 0x423   : > { %4794 = vst [vmem:[%s8034_s30 + $0xf0] sm:$0xff] %v4762_v51  ;;  %v4731_v14 = vadd.f32 %v4699_v29, %v4667_v10 }
 0x424   : > { %4793 = vst [vmem:[%s8034_s30 + $0xe8] sm:$0xff] %v4761_v60 }
 0x425   : > { %v4763_v17 = vmax.f32 %v4731_v14, 0.0 }
 0x427   : > { %4795 = vst [vmem:[%s8034_s30 + $0xf8] sm:$0xff] %v4763_v17 }
 0x428   : > { %6489 = shalt.err (!%p6486_p9)
}
 0x429   : > { %s6490_s10 = scalar_lea.hbm %s8247_s21, 4096  ;;  %s6494_s16 = scalar_lea.hbm %s8300_s7, 8192 }
 0x42a   : > { %p6491_p13 = scmp.ne.s32.totalorder %s8247_s21, %s6490_s10  ;;  %p6495_p4 = scmp.lt.s32.totalorder %s8247_s21, %s8300_s7 }
 0x42b   : > { %p6496_p8 = scmp.lt.s32.totalorder %s6494_s16, %s6490_s10 }
 0x42c   : > { %p6492_p5 = pnand %p6491_p13, %p8348_p10 }
 0x42d   : > { %p6497_p3 = por %p6496_p8, %p6495_p4 }
 0x42e   : > { %p6493_p0 = pneg %p6492_p5 }
 0x430   : > { %p6498_p11 = pnand %p6497_p3, %p6493_p0 }
 0x432   : > { %6501 = shalt.err (!%p6498_p11)
}
 0x433   : > { %s6555_s18 = smov 128   ;;  %s6556_s20 = smov 8  }
 0x434   : > { %6184 = dma.vmem_to_hbm [thread:$0]  (%p8348_p10), %s8249_s9, 4096, %s8247_s21, %s4797_s17, %s6555_s18, %s6555_s18, %s6556_s20  }
 0x435 PF: > { %s4825_s22 = sand.u32 1, %s6532_s24   ;;  %p8349_p1 = scmp.ne.s32.totalorder %s8307_s8, 0 }
 0x436   : > { %p8350_p2 = scmp.ge.s32.totalorder %s6544_s27, 2  ;;  %s4826_s28 = scalar_lea.sflag [#allocation5], %s4825_s22 }
 0x438   : > { %p6198_p6 = pnand %p8350_p2, %p8349_p1 }
 0x43a   : > { %p6199_p12 = pneg %p6198_p6 }
 0x43c   : > { %6527 = dma.done.wait (%p6199_p12), %s4826_s28, 4096  }
 0x43d   : > { %6529 = vsyncadd (%p6199_p12), %s4826_s28, 4294963200  ;;  %p21_p7 = scmp.ge.s32.totalorder %s6669_s23, 4   ;;  %s8351_s24 = smov %s6536_s25 }
 0x43e   : > { %s8352_s25 = smov %s6540_s26  ;;  %s8353_s26 = smov %s6685_s12 }
 0x43f   : > { %s8354_s27 = smov %s6669_s23  ;;  %23 = sbr.rel (!%p21_p7) target bundleno = 8 (0x8), region = 104 }
 0x444   :  { %4831 = vsyncpa [#allocation4], 1 }
 0x445   :  { %4833 = vsyncpa [#allocation4 + $0x1], 1 }
 0x446   :  { %4834 = vsyncpa [#allocation7], 1 }
 0x447   :  { %4835 = vsyncpa [#allocation5], 1 }
 0x448   :  { %4837 = vsyncpa [#allocation5 + $0x1], 1 }

</bundles_post_ra>
